<compile_context>
chip_gen: v7x
topology: tpu7x:2x2x1
jax: 0.10.0
libtpu: 0.0.40
codegen_flags: <defaults>
</compile_context>

<pallas_src>
import math
import numpy as np

import jax
import jax.numpy as jnp
from jax import lax
from jax.experimental import pallas as pl
from jax.experimental.pallas import tpu as pltpu

# ---------------- problem parameters (WENONetwork.get_params) ----------------
SIGMA = 0.3
RATE = 0.1
E_STRIKE = 50.0
T_MAT = 1.0
EPS = 1e-13
XL = -6.0
XR = 1.5
M = 80                       # m -> m+1 = 81 spatial grid points
LANES = 128                  # pad spatial axis to one vreg lane width

BATCH = 16                   # independent omega-parameter samples (sublane batch)
# Single block: NB == BATCH, grid=(1,)  (per perf review)

G = XL                       # log(Smin/E) = xl
L_R = XR                     # log(Smax/E) = xr
H = (L_R - G) / M
N_STEPS = int(math.ceil((T_MAT * SIGMA ** 2) / (0.8 * H ** 2)))   # = 13
DT = T_MAT / N_STEPS
A_DIFF = SIGMA ** 2 / 2.0            # diffusion coefficient
B_CONV = RATE - SIGMA ** 2 / 2.0     # convection coefficient (>0 -> fixed upwind)
C_REACT = RATE                       # reaction coefficient
INV_H = 1.0 / H
INV_H2 = 1.0 / (H * H)
INV_E = 1.0 / E_STRIKE
DECAY = math.exp(-RATE * DT)         # per-step boundary discount factor

# Compile-time right-boundary values for each unrolled step k = 0..N_STEPS-1:
#   u(boundary) = exp(-r * (k+1) * dt) / E    (baked literals, no scalar carry)
RIGHT_BC_VALS = tuple(float(DECAY ** (k + 1) * INV_E) for k in range(N_STEPS))

D5 = (0.1, 0.6, 0.3)                 # ideal WENO5 weights
D6 = (0.25, 0.5, 0.25)               # ideal weights for the diffusion stencils


# ------------------------------ kernel helper --------------------------------
def _shift(arr, s):
    """Value at lane (i + s) placed at lane i (cyclic; boundaries masked later)."""
    return pltpu.roll(arr, shift=(-s) % LANES, axis=1)


# --------------------------------- kernel ------------------------------------
def bs_weno_kernel(u0_ref, w5_ref, w6_ref, v_ref):
    u_init = u0_ref[...]                                     # (BATCH, LANES)
    lane = lax.broadcasted_iota(jnp.int32, u_init.shape, 1)
    right_bc = (lane >= M - 2) & (lane <= M)                 # discounted boundary
    zero_bc = (lane < 3) | (lane > M)                        # deep-OTM boundary + pad
    # (zero_bc ∪ right_bc is exactly the complement of the interior 3..M-3,
    #  so no separate "interior" select is needed.)

    def weno_weights(u, um2, um1, up1, up2):
        # WENO smoothness indicators
        b0 = 13.0 / 12.0 * (um2 - 2.0 * um1 + u) ** 2 + 0.25 * (um2 - 4.0 * um1 + 3.0 * u) ** 2
        b1 = 13.0 / 12.0 * (um1 - 2.0 * u + up1) ** 2 + 0.25 * (um1 - up1) ** 2
        b2 = 13.0 / 12.0 * (u - 2.0 * up1 + up2) ** 2 + 0.25 * (3.0 * u - 4.0 * up1 + up2) ** 2
        # shared approx reciprocals (EUP slot) feed both WENO5 and diffusion paths
        r0 = pl.reciprocal((EPS + b0) ** 2, approx=True)
        r1 = pl.reciprocal((EPS + b1) ** 2, approx=True)
        r2 = pl.reciprocal((EPS + b2) ** 2, approx=True)
        a5_0, a5_1, a5_2 = D5[0] * r0, D5[1] * r1, D5[2] * r2
        a6_0, a6_1, a6_2 = D6[0] * r0, D6[1] * r1, D6[2] * r2
        # exact normalization (2 per step, cheap) so the weights sum to 1
        n5 = pl.reciprocal(a5_0 + a5_1 + a5_2)
        n6 = pl.reciprocal(a6_0 + a6_1 + a6_2)
        return (a5_0 * n5, a5_1 * n5, a5_2 * n5), (a6_0 * n6, a6_1 * n6, a6_2 * n6)

    def learned_weights(u, um2, um1, up1, up2):
        # trainable omegas (first time step only)
        return ((w5_ref[0], w5_ref[1], w5_ref[2]),
                (w6_ref[0], w6_ref[1], w6_ref[2]))

    def substep(u, right_val, weights_fn):
        um2 = _shift(u, -2)
        um1 = _shift(u, -1)
        up1 = _shift(u, 1)
        up2 = _shift(u, 2)
        (o0, o1, o2), (q0, q1, q2) = weights_fn(u, um2, um1, up1, up2)

        # ---- WENO5 reconstruction of u_x (wind B_CONV > 0, left-biased) ----
        p0 = (2.0 * um2 - 7.0 * um1 + 11.0 * u) * (1.0 / 6.0)
        p1 = (-um1 + 5.0 * u + 2.0 * up1) * (1.0 / 6.0)
        p2 = (2.0 * u + 5.0 * up1 - up2) * (1.0 / 6.0)
        fhat = o0 * p0 + o1 * p1 + o2 * p2                   # numerical flux at i+1/2
        ux = (fhat - _shift(fhat, -1)) * INV_H               # (f_{i+1/2} - f_{i-1/2}) / h

        # ---- WENO-weighted second derivative u_xx ----
        # TODO(synk): original BS_WENO uses a 6th-order WENO6 diffusion stencil
        # (source unavailable); approximated by nonlinearly weighted 3-point
        # second differences sharing the WENO5 smoothness indicators.
        l0 = um2 - 2.0 * um1 + u
        l1 = um1 - 2.0 * u + up1
        l2 = u - 2.0 * up1 + up2
        uxx = (q0 * l0 + q1 * l1 + q2 * l2) * INV_H2

        rhs = A_DIFF * uxx + B_CONV * ux - C_REACT * u
        u_new = u + DT * rhs
        u_new = jnp.where(zero_bc, 0.0, u_new)               # left boundary + padding
        u_new = jnp.where(right_bc, jnp.float32(right_val), u_new)  # discounted payoff
        return u_new

    # Step 0: learned omegas (peeled). Steps 1..N-1: nonlinear WENO weights.
    # The time loop is a static Python loop (13 steps) -> fully unrolled, with
    # each step's boundary discount baked as a compile-time constant.
    u = substep(u_init, RIGHT_BC_VALS[0], learned_weights)
    for k in range(1, N_STEPS):
        u = substep(u, RIGHT_BC_VALS[k], weno_weights)

    v_ref[...] = E_STRIKE * u                                # back-transform V = E * u


# --------------------------------- wrapper ------------------------------------
@jax.jit
def weno_network_forward(u0_pad, omegas5, omegas6):
    """u0_pad: (BATCH, LANES); omegasX: (3, BATCH, LANES) -> V: (BATCH, m+1)."""
    v_pad = pl.pallas_call(
        bs_weno_kernel,
        out_shape=jax.ShapeDtypeStruct((BATCH, LANES), jnp.float32),
        grid=(1,),                                    # single block: no grid-step overhead
        in_specs=[
            pl.BlockSpec((BATCH, LANES), lambda i: (0, 0)),
            pl.BlockSpec((3, BATCH, LANES), lambda i: (0, 0, 0)),
            pl.BlockSpec((3, BATCH, LANES), lambda i: (0, 0, 0)),
        ],
        out_specs=pl.BlockSpec((BATCH, LANES), lambda i: (0, 0)),
        compiler_params=pltpu.CompilerParams(
            dimension_semantics=("arbitrary",)),
    )(u0_pad, omegas5, omegas6)
    # TODO(synk): original BS_WENO likely returns the full (m+1, n+1) space-time
    # solution; we return the final-time price slice V(S, t=0) per batch element.
    return v_pad[:, : M + 1]


def pre_weights(u_pad, d):
    """Plain-JAX mirror of compute_omegas5/6 on the initial condition -> (3, LANES)."""
    def sh(a, s):
        return jnp.roll(a, -s, axis=1)

    um2, um1 = sh(u_pad, -2), sh(u_pad, -1)
    up1, up2 = sh(u_pad, 1), sh(u_pad, 2)
    b0 = 13.0 / 12.0 * (um2 - 2.0 * um1 + u_pad) ** 2 + 0.25 * (um2 - 4.0 * um1 + 3.0 * u_pad) ** 2
    b1 = 13.0 / 12.0 * (um1 - 2.0 * u_pad + up1) ** 2 + 0.25 * (um1 - up1) ** 2
    b2 = 13.0 / 12.0 * (u_pad - 2.0 * up1 + up2) ** 2 + 0.25 * (3.0 * u_pad - 4.0 * up1 + up2) ** 2
    a0 = d[0] / (EPS + b0) ** 2
    a1 = d[1] / (EPS + b1) ** 2
    a2 = d[2] / (EPS + b2) ** 2
    s = a0 + a1 + a2
    return jnp.concatenate([a0 / s, a1 / s, a2 / s], axis=0)


if __name__ == "__main__":
    # -------- initial condition (WENONetwork.initial_condition) --------
    x = np.linspace(G, L_R, M + 1)
    u0 = np.where(x > 0.0, 1.0 / E_STRIKE, 0.0).astype(np.float32)
    u0_row = np.zeros((1, LANES), np.float32)
    u0_row[0, : M + 1] = u0
    u0_row = jnp.asarray(u0_row)
    u0_pad = jnp.tile(u0_row, (BATCH, 1))         # same payoff for every batch element

    # -------- deterministic "trainable" omega parameters --------
    pre_w5 = pre_weights(u0_row, D5)              # mimics compute_omegas5(u, m, 1, e)
    pre_w6 = pre_weights(u0_row, D6)              # mimics compute_omegas6(u, m, 1, e)
    key = jax.random.PRNGKey(0)
    k5, k6 = jax.random.split(key)
    noise5 = 0.01 * jax.random.normal(k5, (3, BATCH, LANES), jnp.float32)
    noise6 = 0.01 * jax.random.normal(k6, (3, BATCH, LANES), jnp.float32)
    noise5 = noise5.at[:, 0, :].set(0.0)          # batch 0 == canonical module forward
    noise6 = noise6.at[:, 0, :].set(0.0)
    omegas5 = pre_w5[:, None, :] * (1.0 + noise5)
    omegas6 = pre_w6[:, None, :] * (1.0 + noise6)
    omegas5 = omegas5 / jnp.sum(omegas5, axis=0, keepdims=True)
    omegas6 = omegas6 / jnp.sum(omegas6, axis=0, keepdims=True)

    V = weno_network_forward(u0_pad, omegas5, omegas6)
    V = jax.block_until_ready(V)

    assert V.shape == (BATCH, M + 1)
    assert bool(np.all(np.isfinite(np.asarray(V))))
    print("KERNEL_OK")
</pallas_src>

<mosaic_0001>
module attributes {stable_mosaic.version = 11 : i64} {
  func.func @bs_weno_kernel(%arg0: i32, %arg1: memref<16x128xf32, #tpu.memory_space<vmem>>, %arg2: memref<3x16x128xf32, #tpu.memory_space<vmem>>, %arg3: memref<3x16x128xf32, #tpu.memory_space<vmem>>, %arg4: memref<16x128xf32, #tpu.memory_space<vmem>>) attributes {dimension_semantics = [#tpu.dimension_semantics<arbitrary>], iteration_bounds = array<i64: 1>, scalar_prefetch = 0 : i64, scratch_operands = 0 : i64, tpu.core_type = #tpu.core_type<tc>, window_params = [{pipeline_mode = #tpu.pipeline_mode<synchronous>, transform_indices = @transform_0, window_bounds = array<i64: 16, 128>}, {pipeline_mode = #tpu.pipeline_mode<synchronous>, transform_indices = @transform_1, window_bounds = array<i64: 3, 16, 128>}, {pipeline_mode = #tpu.pipeline_mode<synchronous>, transform_indices = @transform_2, window_bounds = array<i64: 3, 16, 128>}, {pipeline_mode = #tpu.pipeline_mode<synchronous>, transform_indices = @transform_3, window_bounds = array<i64: 16, 128>}]} {
    %c0 = arith.constant 0 : index
    %c0_0 = arith.constant 0 : index
    %0 = vector.load %arg1[%c0, %c0_0] : memref<16x128xf32, #tpu.memory_space<vmem>>, vector<16x128xf32>
    %1 = tpu.iota {dimensions = array<i32: 1>} : vector<16x128xi32>
    %c78_i32 = arith.constant 78 : i32
    %2 = vector.broadcast %c78_i32 : i32 to vector<16x128xi32>
    %3 = arith.cmpi sge, %1, %2 : vector<16x128xi32>
    %c80_i32 = arith.constant 80 : i32
    %4 = vector.broadcast %c80_i32 : i32 to vector<16x128xi32>
    %5 = arith.cmpi sle, %1, %4 : vector<16x128xi32>
    %6 = arith.andi %3, %5 : vector<16x128xi1>
    %c3_i32 = arith.constant 3 : i32
    %7 = vector.broadcast %c3_i32 : i32 to vector<16x128xi32>
    %8 = arith.cmpi slt, %1, %7 : vector<16x128xi32>
    %c80_i32_1 = arith.constant 80 : i32
    %9 = vector.broadcast %c80_i32_1 : i32 to vector<16x128xi32>
    %10 = arith.cmpi sgt, %1, %9 : vector<16x128xi32>
    %11 = arith.ori %8, %10 : vector<16x128xi1>
    %c2_i32 = arith.constant 2 : i32
    %12 = tpu.dynamic_rotate %0 by %c2_i32 dim 1 : vector<16x128xf32>, i32 -> vector<16x128xf32>
    %c1_i32 = arith.constant 1 : i32
    %13 = tpu.dynamic_rotate %0 by %c1_i32 dim 1 : vector<16x128xf32>, i32 -> vector<16x128xf32>
    %c127_i32 = arith.constant 127 : i32
    %14 = tpu.dynamic_rotate %0 by %c127_i32 dim 1 : vector<16x128xf32>, i32 -> vector<16x128xf32>
    %c126_i32 = arith.constant 126 : i32
    %15 = tpu.dynamic_rotate %0 by %c126_i32 dim 1 : vector<16x128xf32>, i32 -> vector<16x128xf32>
    %c0_2 = arith.constant 0 : index
    %c0_3 = arith.constant 0 : index
    %c0_4 = arith.constant 0 : index
    %16 = vector.load %arg2[%c0_2, %c0_3, %c0_4] : memref<3x16x128xf32, #tpu.memory_space<vmem>>, vector<1x16x128xf32>
    %17 = vector.shape_cast %16 : vector<1x16x128xf32> to vector<16x128xf32>
    %c1 = arith.constant 1 : index
    %c0_5 = arith.constant 0 : index
    %c0_6 = arith.constant 0 : index
    %18 = vector.load %arg2[%c1, %c0_5, %c0_6] : memref<3x16x128xf32, #tpu.memory_space<vmem>>, vector<1x16x128xf32>
    %19 = vector.shape_cast %18 : vector<1x16x128xf32> to vector<16x128xf32>
    %c2 = arith.constant 2 : index
    %c0_7 = arith.constant 0 : index
    %c0_8 = arith.constant 0 : index
    %20 = vector.load %arg2[%c2, %c0_7, %c0_8] : memref<3x16x128xf32, #tpu.memory_space<vmem>>, vector<1x16x128xf32>
    %21 = vector.shape_cast %20 : vector<1x16x128xf32> to vector<16x128xf32>
    %c0_9 = arith.constant 0 : index
    %c0_10 = arith.constant 0 : index
    %c0_11 = arith.constant 0 : index
    %22 = vector.load %arg3[%c0_9, %c0_10, %c0_11] : memref<3x16x128xf32, #tpu.memory_space<vmem>>, vector<1x16x128xf32>
    %23 = vector.shape_cast %22 : vector<1x16x128xf32> to vector<16x128xf32>
    %c1_12 = arith.constant 1 : index
    %c0_13 = arith.constant 0 : index
    %c0_14 = arith.constant 0 : index
    %24 = vector.load %arg3[%c1_12, %c0_13, %c0_14] : memref<3x16x128xf32, #tpu.memory_space<vmem>>, vector<1x16x128xf32>
    %25 = vector.shape_cast %24 : vector<1x16x128xf32> to vector<16x128xf32>
    %c2_15 = arith.constant 2 : index
    %c0_16 = arith.constant 0 : index
    %c0_17 = arith.constant 0 : index
    %26 = vector.load %arg3[%c2_15, %c0_16, %c0_17] : memref<3x16x128xf32, #tpu.memory_space<vmem>>, vector<1x16x128xf32>
    %27 = vector.shape_cast %26 : vector<1x16x128xf32> to vector<16x128xf32>
    %cst = arith.constant 2.000000e+00 : f32
    %28 = vector.broadcast %cst : f32 to vector<16x128xf32>
    %29 = arith.mulf %28, %12 : vector<16x128xf32>
    %cst_18 = arith.constant 7.000000e+00 : f32
    %30 = vector.broadcast %cst_18 : f32 to vector<16x128xf32>
    %31 = arith.mulf %30, %13 : vector<16x128xf32>
    %32 = arith.subf %29, %31 : vector<16x128xf32>
    %cst_19 = arith.constant 1.100000e+01 : f32
    %33 = vector.broadcast %cst_19 : f32 to vector<16x128xf32>
    %34 = arith.mulf %33, %0 : vector<16x128xf32>
    %35 = arith.addf %32, %34 : vector<16x128xf32>
    %cst_20 = arith.constant 0.166666672 : f32
    %36 = vector.broadcast %cst_20 : f32 to vector<16x128xf32>
    %37 = arith.mulf %35, %36 : vector<16x128xf32>
    %cst_21 = arith.constant 0.000000e+00 : f32
    %38 = vector.broadcast %cst_21 : f32 to vector<16x128xf32>
    %39 = arith.subf %38, %13 : vector<16x128xf32>
    %cst_22 = arith.constant 5.000000e+00 : f32
    %40 = vector.broadcast %cst_22 : f32 to vector<16x128xf32>
    %41 = arith.mulf %40, %0 : vector<16x128xf32>
    %42 = arith.addf %39, %41 : vector<16x128xf32>
    %cst_23 = arith.constant 2.000000e+00 : f32
    %43 = vector.broadcast %cst_23 : f32 to vector<16x128xf32>
    %44 = arith.mulf %43, %14 : vector<16x128xf32>
    %45 = arith.addf %42, %44 : vector<16x128xf32>
    %cst_24 = arith.constant 0.166666672 : f32
    %46 = vector.broadcast %cst_24 : f32 to vector<16x128xf32>
    %47 = arith.mulf %45, %46 : vector<16x128xf32>
    %cst_25 = arith.constant 2.000000e+00 : f32
    %48 = vector.broadcast %cst_25 : f32 to vector<16x128xf32>
    %49 = arith.mulf %48, %0 : vector<16x128xf32>
    %cst_26 = arith.constant 5.000000e+00 : f32
    %50 = vector.broadcast %cst_26 : f32 to vector<16x128xf32>
    %51 = arith.mulf %50, %14 : vector<16x128xf32>
    %52 = arith.addf %49, %51 : vector<16x128xf32>
    %53 = arith.subf %52, %15 : vector<16x128xf32>
    %cst_27 = arith.constant 0.166666672 : f32
    %54 = vector.broadcast %cst_27 : f32 to vector<16x128xf32>
    %55 = arith.mulf %53, %54 : vector<16x128xf32>
    %56 = arith.mulf %17, %37 : vector<16x128xf32>
    %57 = arith.mulf %19, %47 : vector<16x128xf32>
    %58 = arith.addf %56, %57 : vector<16x128xf32>
    %59 = arith.mulf %21, %55 : vector<16x128xf32>
    %60 = arith.addf %58, %59 : vector<16x128xf32>
    %c1_i32_28 = arith.constant 1 : i32
    %61 = tpu.dynamic_rotate %60 by %c1_i32_28 dim 1 : vector<16x128xf32>, i32 -> vector<16x128xf32>
    %62 = arith.subf %60, %61 : vector<16x128xf32>
    %cst_29 = arith.constant 10.666667 : f32
    %63 = vector.broadcast %cst_29 : f32 to vector<16x128xf32>
    %64 = arith.mulf %62, %63 : vector<16x128xf32>
    %cst_30 = arith.constant 2.000000e+00 : f32
    %65 = vector.broadcast %cst_30 : f32 to vector<16x128xf32>
    %66 = arith.mulf %65, %13 : vector<16x128xf32>
    %67 = arith.subf %12, %66 : vector<16x128xf32>
    %68 = arith.addf %67, %0 : vector<16x128xf32>
    %cst_31 = arith.constant 2.000000e+00 : f32
    %69 = vector.broadcast %cst_31 : f32 to vector<16x128xf32>
    %70 = arith.mulf %69, %0 : vector<16x128xf32>
    %71 = arith.subf %13, %70 : vector<16x128xf32>
    %72 = arith.addf %71, %14 : vector<16x128xf32>
    %cst_32 = arith.constant 2.000000e+00 : f32
    %73 = vector.broadcast %cst_32 : f32 to vector<16x128xf32>
    %74 = arith.mulf %73, %14 : vector<16x128xf32>
    %75 = arith.subf %0, %74 : vector<16x128xf32>
    %76 = arith.addf %75, %15 : vector<16x128xf32>
    %77 = arith.mulf %23, %68 : vector<16x128xf32>
    %78 = arith.mulf %25, %72 : vector<16x128xf32>
    %79 = arith.addf %77, %78 : vector<16x128xf32>
    %80 = arith.mulf %27, %76 : vector<16x128xf32>
    %81 = arith.addf %79, %80 : vector<16x128xf32>
    %cst_33 = arith.constant 113.777779 : f32
    %82 = vector.broadcast %cst_33 : f32 to vector<16x128xf32>
    %83 = arith.mulf %81, %82 : vector<16x128xf32>
    %cst_34 = arith.constant 4.500000e-02 : f32
    %84 = vector.broadcast %cst_34 : f32 to vector<16x128xf32>
    %85 = arith.mulf %84, %83 : vector<16x128xf32>
    %cst_35 = arith.constant 5.500000e-02 : f32
    %86 = vector.broadcast %cst_35 : f32 to vector<16x128xf32>
    %87 = arith.mulf %86, %64 : vector<16x128xf32>
    %88 = arith.addf %85, %87 : vector<16x128xf32>
    %cst_36 = arith.constant 1.000000e-01 : f32
    %89 = vector.broadcast %cst_36 : f32 to vector<16x128xf32>
    %90 = arith.mulf %89, %0 : vector<16x128xf32>
    %91 = arith.subf %88, %90 : vector<16x128xf32>
    %cst_37 = arith.constant 0.0769230798 : f32
    %92 = vector.broadcast %cst_37 : f32 to vector<16x128xf32>
    %93 = arith.mulf %92, %91 : vector<16x128xf32>
    %94 = arith.addf %0, %93 : vector<16x128xf32>
    %cst_38 = arith.constant 0.000000e+00 : f32
    %95 = vector.broadcast %cst_38 : f32 to vector<16x128xf32>
    %96 = arith.select %11, %95, %94 : vector<16x128xi1>, vector<16x128xf32>
    %cst_39 = arith.constant 0.0198467448 : f32
    %97 = vector.broadcast %cst_39 : f32 to vector<16x128xf32>
    %98 = arith.select %6, %97, %96 : vector<16x128xi1>, vector<16x128xf32>
    %c2_i32_40 = arith.constant 2 : i32
    %99 = tpu.dynamic_rotate %98 by %c2_i32_40 dim 1 : vector<16x128xf32>, i32 -> vector<16x128xf32>
    %c1_i32_41 = arith.constant 1 : i32
    %100 = tpu.dynamic_rotate %98 by %c1_i32_41 dim 1 : vector<16x128xf32>, i32 -> vector<16x128xf32>
    %c127_i32_42 = arith.constant 127 : i32
    %101 = tpu.dynamic_rotate %98 by %c127_i32_42 dim 1 : vector<16x128xf32>, i32 -> vector<16x128xf32>
    %c126_i32_43 = arith.constant 126 : i32
    %102 = tpu.dynamic_rotate %98 by %c126_i32_43 dim 1 : vector<16x128xf32>, i32 -> vector<16x128xf32>
    %cst_44 = arith.constant 2.000000e+00 : f32
    %103 = vector.broadcast %cst_44 : f32 to vector<16x128xf32>
    %104 = arith.mulf %103, %100 : vector<16x128xf32>
    %105 = arith.subf %99, %104 : vector<16x128xf32>
    %106 = arith.addf %105, %98 : vector<16x128xf32>
    %107 = arith.mulf %106, %106 : vector<16x128xf32>
    %cst_45 = arith.constant 1.08333337 : f32
    %108 = vector.broadcast %cst_45 : f32 to vector<16x128xf32>
    %109 = arith.mulf %108, %107 : vector<16x128xf32>
    %cst_46 = arith.constant 4.000000e+00 : f32
    %110 = vector.broadcast %cst_46 : f32 to vector<16x128xf32>
    %111 = arith.mulf %110, %100 : vector<16x128xf32>
    %112 = arith.subf %99, %111 : vector<16x128xf32>
    %cst_47 = arith.constant 3.000000e+00 : f32
    %113 = vector.broadcast %cst_47 : f32 to vector<16x128xf32>
    %114 = arith.mulf %113, %98 : vector<16x128xf32>
    %115 = arith.addf %112, %114 : vector<16x128xf32>
    %116 = arith.mulf %115, %115 : vector<16x128xf32>
    %cst_48 = arith.constant 2.500000e-01 : f32
    %117 = vector.broadcast %cst_48 : f32 to vector<16x128xf32>
    %118 = arith.mulf %117, %116 : vector<16x128xf32>
    %119 = arith.addf %109, %118 : vector<16x128xf32>
    %cst_49 = arith.constant 2.000000e+00 : f32
    %120 = vector.broadcast %cst_49 : f32 to vector<16x128xf32>
    %121 = arith.mulf %120, %98 : vector<16x128xf32>
    %122 = arith.subf %100, %121 : vector<16x128xf32>
    %123 = arith.addf %122, %101 : vector<16x128xf32>
    %124 = arith.mulf %123, %123 : vector<16x128xf32>
    %cst_50 = arith.constant 1.08333337 : f32
    %125 = vector.broadcast %cst_50 : f32 to vector<16x128xf32>
    %126 = arith.mulf %125, %124 : vector<16x128xf32>
    %127 = arith.subf %100, %101 : vector<16x128xf32>
    %128 = arith.mulf %127, %127 : vector<16x128xf32>
    %cst_51 = arith.constant 2.500000e-01 : f32
    %129 = vector.broadcast %cst_51 : f32 to vector<16x128xf32>
    %130 = arith.mulf %129, %128 : vector<16x128xf32>
    %131 = arith.addf %126, %130 : vector<16x128xf32>
    %cst_52 = arith.constant 2.000000e+00 : f32
    %132 = vector.broadcast %cst_52 : f32 to vector<16x128xf32>
    %133 = arith.mulf %132, %101 : vector<16x128xf32>
    %134 = arith.subf %98, %133 : vector<16x128xf32>
    %135 = arith.addf %134, %102 : vector<16x128xf32>
    %136 = arith.mulf %135, %135 : vector<16x128xf32>
    %cst_53 = arith.constant 1.08333337 : f32
    %137 = vector.broadcast %cst_53 : f32 to vector<16x128xf32>
    %138 = arith.mulf %137, %136 : vector<16x128xf32>
    %cst_54 = arith.constant 3.000000e+00 : f32
    %139 = vector.broadcast %cst_54 : f32 to vector<16x128xf32>
    %140 = arith.mulf %139, %98 : vector<16x128xf32>
    %cst_55 = arith.constant 4.000000e+00 : f32
    %141 = vector.broadcast %cst_55 : f32 to vector<16x128xf32>
    %142 = arith.mulf %141, %101 : vector<16x128xf32>
    %143 = arith.subf %140, %142 : vector<16x128xf32>
    %144 = arith.addf %143, %102 : vector<16x128xf32>
    %145 = arith.mulf %144, %144 : vector<16x128xf32>
    %cst_56 = arith.constant 2.500000e-01 : f32
    %146 = vector.broadcast %cst_56 : f32 to vector<16x128xf32>
    %147 = arith.mulf %146, %145 : vector<16x128xf32>
    %148 = arith.addf %138, %147 : vector<16x128xf32>
    %cst_57 = arith.constant 9.99999982E-14 : f32
    %149 = vector.broadcast %cst_57 : f32 to vector<16x128xf32>
    %150 = arith.addf %149, %119 : vector<16x128xf32>
    %151 = arith.mulf %150, %150 : vector<16x128xf32>
    %152 = tpu.reciprocal %151 {approx = true} : vector<16x128xf32> -> vector<16x128xf32>
    %cst_58 = arith.constant 9.99999982E-14 : f32
    %153 = vector.broadcast %cst_58 : f32 to vector<16x128xf32>
    %154 = arith.addf %153, %131 : vector<16x128xf32>
    %155 = arith.mulf %154, %154 : vector<16x128xf32>
    %156 = tpu.reciprocal %155 {approx = true} : vector<16x128xf32> -> vector<16x128xf32>
    %cst_59 = arith.constant 9.99999982E-14 : f32
    %157 = vector.broadcast %cst_59 : f32 to vector<16x128xf32>
    %158 = arith.addf %157, %148 : vector<16x128xf32>
    %159 = arith.mulf %158, %158 : vector<16x128xf32>
    %160 = tpu.reciprocal %159 {approx = true} : vector<16x128xf32> -> vector<16x128xf32>
    %cst_60 = arith.constant 1.000000e-01 : f32
    %161 = vector.broadcast %cst_60 : f32 to vector<16x128xf32>
    %162 = arith.mulf %161, %152 : vector<16x128xf32>
    %cst_61 = arith.constant 6.000000e-01 : f32
    %163 = vector.broadcast %cst_61 : f32 to vector<16x128xf32>
    %164 = arith.mulf %163, %156 : vector<16x128xf32>
    %cst_62 = arith.constant 3.000000e-01 : f32
    %165 = vector.broadcast %cst_62 : f32 to vector<16x128xf32>
    %166 = arith.mulf %165, %160 : vector<16x128xf32>
    %cst_63 = arith.constant 2.500000e-01 : f32
    %167 = vector.broadcast %cst_63 : f32 to vector<16x128xf32>
    %168 = arith.mulf %167, %152 : vector<16x128xf32>
    %cst_64 = arith.constant 5.000000e-01 : f32
    %169 = vector.broadcast %cst_64 : f32 to vector<16x128xf32>
    %170 = arith.mulf %169, %156 : vector<16x128xf32>
    %cst_65 = arith.constant 2.500000e-01 : f32
    %171 = vector.broadcast %cst_65 : f32 to vector<16x128xf32>
    %172 = arith.mulf %171, %160 : vector<16x128xf32>
    %173 = arith.addf %162, %164 : vector<16x128xf32>
    %174 = arith.addf %173, %166 : vector<16x128xf32>
    %175 = tpu.reciprocal %174 : vector<16x128xf32> -> vector<16x128xf32>
    %176 = arith.addf %168, %170 : vector<16x128xf32>
    %177 = arith.addf %176, %172 : vector<16x128xf32>
    %178 = tpu.reciprocal %177 : vector<16x128xf32> -> vector<16x128xf32>
    %179 = arith.mulf %162, %175 : vector<16x128xf32>
    %180 = arith.mulf %164, %175 : vector<16x128xf32>
    %181 = arith.mulf %166, %175 : vector<16x128xf32>
    %182 = arith.mulf %168, %178 : vector<16x128xf32>
    %183 = arith.mulf %170, %178 : vector<16x128xf32>
    %184 = arith.mulf %172, %178 : vector<16x128xf32>
    %cst_66 = arith.constant 2.000000e+00 : f32
    %185 = vector.broadcast %cst_66 : f32 to vector<16x128xf32>
    %186 = arith.mulf %185, %99 : vector<16x128xf32>
    %cst_67 = arith.constant 7.000000e+00 : f32
    %187 = vector.broadcast %cst_67 : f32 to vector<16x128xf32>
    %188 = arith.mulf %187, %100 : vector<16x128xf32>
    %189 = arith.subf %186, %188 : vector<16x128xf32>
    %cst_68 = arith.constant 1.100000e+01 : f32
    %190 = vector.broadcast %cst_68 : f32 to vector<16x128xf32>
    %191 = arith.mulf %190, %98 : vector<16x128xf32>
    %192 = arith.addf %189, %191 : vector<16x128xf32>
    %cst_69 = arith.constant 0.166666672 : f32
    %193 = vector.broadcast %cst_69 : f32 to vector<16x128xf32>
    %194 = arith.mulf %192, %193 : vector<16x128xf32>
    %cst_70 = arith.constant 0.000000e+00 : f32
    %195 = vector.broadcast %cst_70 : f32 to vector<16x128xf32>
    %196 = arith.subf %195, %100 : vector<16x128xf32>
    %cst_71 = arith.constant 5.000000e+00 : f32
    %197 = vector.broadcast %cst_71 : f32 to vector<16x128xf32>
    %198 = arith.mulf %197, %98 : vector<16x128xf32>
    %199 = arith.addf %196, %198 : vector<16x128xf32>
    %cst_72 = arith.constant 2.000000e+00 : f32
    %200 = vector.broadcast %cst_72 : f32 to vector<16x128xf32>
    %201 = arith.mulf %200, %101 : vector<16x128xf32>
    %202 = arith.addf %199, %201 : vector<16x128xf32>
    %cst_73 = arith.constant 0.166666672 : f32
    %203 = vector.broadcast %cst_73 : f32 to vector<16x128xf32>
    %204 = arith.mulf %202, %203 : vector<16x128xf32>
    %cst_74 = arith.constant 2.000000e+00 : f32
    %205 = vector.broadcast %cst_74 : f32 to vector<16x128xf32>
    %206 = arith.mulf %205, %98 : vector<16x128xf32>
    %cst_75 = arith.constant 5.000000e+00 : f32
    %207 = vector.broadcast %cst_75 : f32 to vector<16x128xf32>
    %208 = arith.mulf %207, %101 : vector<16x128xf32>
    %209 = arith.addf %206, %208 : vector<16x128xf32>
    %210 = arith.subf %209, %102 : vector<16x128xf32>
    %cst_76 = arith.constant 0.166666672 : f32
    %211 = vector.broadcast %cst_76 : f32 to vector<16x128xf32>
    %212 = arith.mulf %210, %211 : vector<16x128xf32>
    %213 = arith.mulf %179, %194 : vector<16x128xf32>
    %214 = arith.mulf %180, %204 : vector<16x128xf32>
    %215 = arith.addf %213, %214 : vector<16x128xf32>
    %216 = arith.mulf %181, %212 : vector<16x128xf32>
    %217 = arith.addf %215, %216 : vector<16x128xf32>
    %c1_i32_77 = arith.constant 1 : i32
    %218 = tpu.dynamic_rotate %217 by %c1_i32_77 dim 1 : vector<16x128xf32>, i32 -> vector<16x128xf32>
    %219 = arith.subf %217, %218 : vector<16x128xf32>
    %cst_78 = arith.constant 10.666667 : f32
    %220 = vector.broadcast %cst_78 : f32 to vector<16x128xf32>
    %221 = arith.mulf %219, %220 : vector<16x128xf32>
    %cst_79 = arith.constant 2.000000e+00 : f32
    %222 = vector.broadcast %cst_79 : f32 to vector<16x128xf32>
    %223 = arith.mulf %222, %100 : vector<16x128xf32>
    %224 = arith.subf %99, %223 : vector<16x128xf32>
    %225 = arith.addf %224, %98 : vector<16x128xf32>
    %cst_80 = arith.constant 2.000000e+00 : f32
    %226 = vector.broadcast %cst_80 : f32 to vector<16x128xf32>
    %227 = arith.mulf %226, %98 : vector<16x128xf32>
    %228 = arith.subf %100, %227 : vector<16x128xf32>
    %229 = arith.addf %228, %101 : vector<16x128xf32>
    %cst_81 = arith.constant 2.000000e+00 : f32
    %230 = vector.broadcast %cst_81 : f32 to vector<16x128xf32>
    %231 = arith.mulf %230, %101 : vector<16x128xf32>
    %232 = arith.subf %98, %231 : vector<16x128xf32>
    %233 = arith.addf %232, %102 : vector<16x128xf32>
    %234 = arith.mulf %182, %225 : vector<16x128xf32>
    %235 = arith.mulf %183, %229 : vector<16x128xf32>
    %236 = arith.addf %234, %235 : vector<16x128xf32>
    %237 = arith.mulf %184, %233 : vector<16x128xf32>
    %238 = arith.addf %236, %237 : vector<16x128xf32>
    %cst_82 = arith.constant 113.777779 : f32
    %239 = vector.broadcast %cst_82 : f32 to vector<16x128xf32>
    %240 = arith.mulf %238, %239 : vector<16x128xf32>
    %cst_83 = arith.constant 4.500000e-02 : f32
    %241 = vector.broadcast %cst_83 : f32 to vector<16x128xf32>
    %242 = arith.mulf %241, %240 : vector<16x128xf32>
    %cst_84 = arith.constant 5.500000e-02 : f32
    %243 = vector.broadcast %cst_84 : f32 to vector<16x128xf32>
    %244 = arith.mulf %243, %221 : vector<16x128xf32>
    %245 = arith.addf %242, %244 : vector<16x128xf32>
    %cst_85 = arith.constant 1.000000e-01 : f32
    %246 = vector.broadcast %cst_85 : f32 to vector<16x128xf32>
    %247 = arith.mulf %246, %98 : vector<16x128xf32>
    %248 = arith.subf %245, %247 : vector<16x128xf32>
    %cst_86 = arith.constant 0.0769230798 : f32
    %249 = vector.broadcast %cst_86 : f32 to vector<16x128xf32>
    %250 = arith.mulf %249, %248 : vector<16x128xf32>
    %251 = arith.addf %98, %250 : vector<16x128xf32>
    %cst_87 = arith.constant 0.000000e+00 : f32
    %252 = vector.broadcast %cst_87 : f32 to vector<16x128xf32>
    %253 = arith.select %11, %252, %251 : vector<16x128xi1>, vector<16x128xf32>
    %cst_88 = arith.constant 0.0196946617 : f32
    %254 = vector.broadcast %cst_88 : f32 to vector<16x128xf32>
    %255 = arith.select %6, %254, %253 : vector<16x128xi1>, vector<16x128xf32>
    %c2_i32_89 = arith.constant 2 : i32
    %256 = tpu.dynamic_rotate %255 by %c2_i32_89 dim 1 : vector<16x128xf32>, i32 -> vector<16x128xf32>
    %c1_i32_90 = arith.constant 1 : i32
    %257 = tpu.dynamic_rotate %255 by %c1_i32_90 dim 1 : vector<16x128xf32>, i32 -> vector<16x128xf32>
    %c127_i32_91 = arith.constant 127 : i32
    %258 = tpu.dynamic_rotate %255 by %c127_i32_91 dim 1 : vector<16x128xf32>, i32 -> vector<16x128xf32>
    %c126_i32_92 = arith.constant 126 : i32
    %259 = tpu.dynamic_rotate %255 by %c126_i32_92 dim 1 : vector<16x128xf32>, i32 -> vector<16x128xf32>
    %cst_93 = arith.constant 2.000000e+00 : f32
    %260 = vector.broadcast %cst_93 : f32 to vector<16x128xf32>
    %261 = arith.mulf %260, %257 : vector<16x128xf32>
    %262 = arith.subf %256, %261 : vector<16x128xf32>
    %263 = arith.addf %262, %255 : vector<16x128xf32>
    %264 = arith.mulf %263, %263 : vector<16x128xf32>
    %cst_94 = arith.constant 1.08333337 : f32
    %265 = vector.broadcast %cst_94 : f32 to vector<16x128xf32>
    %266 = arith.mulf %265, %264 : vector<16x128xf32>
    %cst_95 = arith.constant 4.000000e+00 : f32
    %267 = vector.broadcast %cst_95 : f32 to vector<16x128xf32>
    %268 = arith.mulf %267, %257 : vector<16x128xf32>
    %269 = arith.subf %256, %268 : vector<16x128xf32>
    %cst_96 = arith.constant 3.000000e+00 : f32
    %270 = vector.broadcast %cst_96 : f32 to vector<16x128xf32>
    %271 = arith.mulf %270, %255 : vector<16x128xf32>
    %272 = arith.addf %269, %271 : vector<16x128xf32>
    %273 = arith.mulf %272, %272 : vector<16x128xf32>
    %cst_97 = arith.constant 2.500000e-01 : f32
    %274 = vector.broadcast %cst_97 : f32 to vector<16x128xf32>
    %275 = arith.mulf %274, %273 : vector<16x128xf32>
    %276 = arith.addf %266, %275 : vector<16x128xf32>
    %cst_98 = arith.constant 2.000000e+00 : f32
    %277 = vector.broadcast %cst_98 : f32 to vector<16x128xf32>
    %278 = arith.mulf %277, %255 : vector<16x128xf32>
    %279 = arith.subf %257, %278 : vector<16x128xf32>
    %280 = arith.addf %279, %258 : vector<16x128xf32>
    %281 = arith.mulf %280, %280 : vector<16x128xf32>
    %cst_99 = arith.constant 1.08333337 : f32
    %282 = vector.broadcast %cst_99 : f32 to vector<16x128xf32>
    %283 = arith.mulf %282, %281 : vector<16x128xf32>
    %284 = arith.subf %257, %258 : vector<16x128xf32>
    %285 = arith.mulf %284, %284 : vector<16x128xf32>
    %cst_100 = arith.constant 2.500000e-01 : f32
    %286 = vector.broadcast %cst_100 : f32 to vector<16x128xf32>
    %287 = arith.mulf %286, %285 : vector<16x128xf32>
    %288 = arith.addf %283, %287 : vector<16x128xf32>
    %cst_101 = arith.constant 2.000000e+00 : f32
    %289 = vector.broadcast %cst_101 : f32 to vector<16x128xf32>
    %290 = arith.mulf %289, %258 : vector<16x128xf32>
    %291 = arith.subf %255, %290 : vector<16x128xf32>
    %292 = arith.addf %291, %259 : vector<16x128xf32>
    %293 = arith.mulf %292, %292 : vector<16x128xf32>
    %cst_102 = arith.constant 1.08333337 : f32
    %294 = vector.broadcast %cst_102 : f32 to vector<16x128xf32>
    %295 = arith.mulf %294, %293 : vector<16x128xf32>
    %cst_103 = arith.constant 3.000000e+00 : f32
    %296 = vector.broadcast %cst_103 : f32 to vector<16x128xf32>
    %297 = arith.mulf %296, %255 : vector<16x128xf32>
    %cst_104 = arith.constant 4.000000e+00 : f32
    %298 = vector.broadcast %cst_104 : f32 to vector<16x128xf32>
    %299 = arith.mulf %298, %258 : vector<16x128xf32>
    %300 = arith.subf %297, %299 : vector<16x128xf32>
    %301 = arith.addf %300, %259 : vector<16x128xf32>
    %302 = arith.mulf %301, %301 : vector<16x128xf32>
    %cst_105 = arith.constant 2.500000e-01 : f32
    %303 = vector.broadcast %cst_105 : f32 to vector<16x128xf32>
    %304 = arith.mulf %303, %302 : vector<16x128xf32>
    %305 = arith.addf %295, %304 : vector<16x128xf32>
    %cst_106 = arith.constant 9.99999982E-14 : f32
    %306 = vector.broadcast %cst_106 : f32 to vector<16x128xf32>
    %307 = arith.addf %306, %276 : vector<16x128xf32>
    %308 = arith.mulf %307, %307 : vector<16x128xf32>
    %309 = tpu.reciprocal %308 {approx = true} : vector<16x128xf32> -> vector<16x128xf32>
    %cst_107 = arith.constant 9.99999982E-14 : f32
    %310 = vector.broadcast %cst_107 : f32 to vector<16x128xf32>
    %311 = arith.addf %310, %288 : vector<16x128xf32>
    %312 = arith.mulf %311, %311 : vector<16x128xf32>
    %313 = tpu.reciprocal %312 {approx = true} : vector<16x128xf32> -> vector<16x128xf32>
    %cst_108 = arith.constant 9.99999982E-14 : f32
    %314 = vector.broadcast %cst_108 : f32 to vector<16x128xf32>
    %315 = arith.addf %314, %305 : vector<16x128xf32>
    %316 = arith.mulf %315, %315 : vector<16x128xf32>
    %317 = tpu.reciprocal %316 {approx = true} : vector<16x128xf32> -> vector<16x128xf32>
    %cst_109 = arith.constant 1.000000e-01 : f32
    %318 = vector.broadcast %cst_109 : f32 to vector<16x128xf32>
    %319 = arith.mulf %318, %309 : vector<16x128xf32>
    %cst_110 = arith.constant 6.000000e-01 : f32
    %320 = vector.broadcast %cst_110 : f32 to vector<16x128xf32>
    %321 = arith.mulf %320, %313 : vector<16x128xf32>
    %cst_111 = arith.constant 3.000000e-01 : f32
    %322 = vector.broadcast %cst_111 : f32 to vector<16x128xf32>
    %323 = arith.mulf %322, %317 : vector<16x128xf32>
    %cst_112 = arith.constant 2.500000e-01 : f32
    %324 = vector.broadcast %cst_112 : f32 to vector<16x128xf32>
    %325 = arith.mulf %324, %309 : vector<16x128xf32>
    %cst_113 = arith.constant 5.000000e-01 : f32
    %326 = vector.broadcast %cst_113 : f32 to vector<16x128xf32>
    %327 = arith.mulf %326, %313 : vector<16x128xf32>
    %cst_114 = arith.constant 2.500000e-01 : f32
    %328 = vector.broadcast %cst_114 : f32 to vector<16x128xf32>
    %329 = arith.mulf %328, %317 : vector<16x128xf32>
    %330 = arith.addf %319, %321 : vector<16x128xf32>
    %331 = arith.addf %330, %323 : vector<16x128xf32>
    %332 = tpu.reciprocal %331 : vector<16x128xf32> -> vector<16x128xf32>
    %333 = arith.addf %325, %327 : vector<16x128xf32>
    %334 = arith.addf %333, %329 : vector<16x128xf32>
    %335 = tpu.reciprocal %334 : vector<16x128xf32> -> vector<16x128xf32>
    %336 = arith.mulf %319, %332 : vector<16x128xf32>
    %337 = arith.mulf %321, %332 : vector<16x128xf32>
    %338 = arith.mulf %323, %332 : vector<16x128xf32>
    %339 = arith.mulf %325, %335 : vector<16x128xf32>
    %340 = arith.mulf %327, %335 : vector<16x128xf32>
    %341 = arith.mulf %329, %335 : vector<16x128xf32>
    %cst_115 = arith.constant 2.000000e+00 : f32
    %342 = vector.broadcast %cst_115 : f32 to vector<16x128xf32>
    %343 = arith.mulf %342, %256 : vector<16x128xf32>
    %cst_116 = arith.constant 7.000000e+00 : f32
    %344 = vector.broadcast %cst_116 : f32 to vector<16x128xf32>
    %345 = arith.mulf %344, %257 : vector<16x128xf32>
    %346 = arith.subf %343, %345 : vector<16x128xf32>
    %cst_117 = arith.constant 1.100000e+01 : f32
    %347 = vector.broadcast %cst_117 : f32 to vector<16x128xf32>
    %348 = arith.mulf %347, %255 : vector<16x128xf32>
    %349 = arith.addf %346, %348 : vector<16x128xf32>
    %cst_118 = arith.constant 0.166666672 : f32
    %350 = vector.broadcast %cst_118 : f32 to vector<16x128xf32>
    %351 = arith.mulf %349, %350 : vector<16x128xf32>
    %cst_119 = arith.constant 0.000000e+00 : f32
    %352 = vector.broadcast %cst_119 : f32 to vector<16x128xf32>
    %353 = arith.subf %352, %257 : vector<16x128xf32>
    %cst_120 = arith.constant 5.000000e+00 : f32
    %354 = vector.broadcast %cst_120 : f32 to vector<16x128xf32>
    %355 = arith.mulf %354, %255 : vector<16x128xf32>
    %356 = arith.addf %353, %355 : vector<16x128xf32>
    %cst_121 = arith.constant 2.000000e+00 : f32
    %357 = vector.broadcast %cst_121 : f32 to vector<16x128xf32>
    %358 = arith.mulf %357, %258 : vector<16x128xf32>
    %359 = arith.addf %356, %358 : vector<16x128xf32>
    %cst_122 = arith.constant 0.166666672 : f32
    %360 = vector.broadcast %cst_122 : f32 to vector<16x128xf32>
    %361 = arith.mulf %359, %360 : vector<16x128xf32>
    %cst_123 = arith.constant 2.000000e+00 : f32
    %362 = vector.broadcast %cst_123 : f32 to vector<16x128xf32>
    %363 = arith.mulf %362, %255 : vector<16x128xf32>
    %cst_124 = arith.constant 5.000000e+00 : f32
    %364 = vector.broadcast %cst_124 : f32 to vector<16x128xf32>
    %365 = arith.mulf %364, %258 : vector<16x128xf32>
    %366 = arith.addf %363, %365 : vector<16x128xf32>
    %367 = arith.subf %366, %259 : vector<16x128xf32>
    %cst_125 = arith.constant 0.166666672 : f32
    %368 = vector.broadcast %cst_125 : f32 to vector<16x128xf32>
    %369 = arith.mulf %367, %368 : vector<16x128xf32>
    %370 = arith.mulf %336, %351 : vector<16x128xf32>
    %371 = arith.mulf %337, %361 : vector<16x128xf32>
    %372 = arith.addf %370, %371 : vector<16x128xf32>
    %373 = arith.mulf %338, %369 : vector<16x128xf32>
    %374 = arith.addf %372, %373 : vector<16x128xf32>
    %c1_i32_126 = arith.constant 1 : i32
    %375 = tpu.dynamic_rotate %374 by %c1_i32_126 dim 1 : vector<16x128xf32>, i32 -> vector<16x128xf32>
    %376 = arith.subf %374, %375 : vector<16x128xf32>
    %cst_127 = arith.constant 10.666667 : f32
    %377 = vector.broadcast %cst_127 : f32 to vector<16x128xf32>
    %378 = arith.mulf %376, %377 : vector<16x128xf32>
    %cst_128 = arith.constant 2.000000e+00 : f32
    %379 = vector.broadcast %cst_128 : f32 to vector<16x128xf32>
    %380 = arith.mulf %379, %257 : vector<16x128xf32>
    %381 = arith.subf %256, %380 : vector<16x128xf32>
    %382 = arith.addf %381, %255 : vector<16x128xf32>
    %cst_129 = arith.constant 2.000000e+00 : f32
    %383 = vector.broadcast %cst_129 : f32 to vector<16x128xf32>
    %384 = arith.mulf %383, %255 : vector<16x128xf32>
    %385 = arith.subf %257, %384 : vector<16x128xf32>
    %386 = arith.addf %385, %258 : vector<16x128xf32>
    %cst_130 = arith.constant 2.000000e+00 : f32
    %387 = vector.broadcast %cst_130 : f32 to vector<16x128xf32>
    %388 = arith.mulf %387, %258 : vector<16x128xf32>
    %389 = arith.subf %255, %388 : vector<16x128xf32>
    %390 = arith.addf %389, %259 : vector<16x128xf32>
    %391 = arith.mulf %339, %382 : vector<16x128xf32>
    %392 = arith.mulf %340, %386 : vector<16x128xf32>
    %393 = arith.addf %391, %392 : vector<16x128xf32>
    %394 = arith.mulf %341, %390 : vector<16x128xf32>
    %395 = arith.addf %393, %394 : vector<16x128xf32>
    %cst_131 = arith.constant 113.777779 : f32
    %396 = vector.broadcast %cst_131 : f32 to vector<16x128xf32>
    %397 = arith.mulf %395, %396 : vector<16x128xf32>
    %cst_132 = arith.constant 4.500000e-02 : f32
    %398 = vector.broadcast %cst_132 : f32 to vector<16x128xf32>
    %399 = arith.mulf %398, %397 : vector<16x128xf32>
    %cst_133 = arith.constant 5.500000e-02 : f32
    %400 = vector.broadcast %cst_133 : f32 to vector<16x128xf32>
    %401 = arith.mulf %400, %378 : vector<16x128xf32>
    %402 = arith.addf %399, %401 : vector<16x128xf32>
    %cst_134 = arith.constant 1.000000e-01 : f32
    %403 = vector.broadcast %cst_134 : f32 to vector<16x128xf32>
    %404 = arith.mulf %403, %255 : vector<16x128xf32>
    %405 = arith.subf %402, %404 : vector<16x128xf32>
    %cst_135 = arith.constant 0.0769230798 : f32
    %406 = vector.broadcast %cst_135 : f32 to vector<16x128xf32>
    %407 = arith.mulf %406, %405 : vector<16x128xf32>
    %408 = arith.addf %255, %407 : vector<16x128xf32>
    %cst_136 = arith.constant 0.000000e+00 : f32
    %409 = vector.broadcast %cst_136 : f32 to vector<16x128xf32>
    %410 = arith.select %11, %409, %408 : vector<16x128xi1>, vector<16x128xf32>
    %cst_137 = arith.constant 0.0195437465 : f32
    %411 = vector.broadcast %cst_137 : f32 to vector<16x128xf32>
    %412 = arith.select %6, %411, %410 : vector<16x128xi1>, vector<16x128xf32>
    %c2_i32_138 = arith.constant 2 : i32
    %413 = tpu.dynamic_rotate %412 by %c2_i32_138 dim 1 : vector<16x128xf32>, i32 -> vector<16x128xf32>
    %c1_i32_139 = arith.constant 1 : i32
    %414 = tpu.dynamic_rotate %412 by %c1_i32_139 dim 1 : vector<16x128xf32>, i32 -> vector<16x128xf32>
    %c127_i32_140 = arith.constant 127 : i32
    %415 = tpu.dynamic_rotate %412 by %c127_i32_140 dim 1 : vector<16x128xf32>, i32 -> vector<16x128xf32>
    %c126_i32_141 = arith.constant 126 : i32
    %416 = tpu.dynamic_rotate %412 by %c126_i32_141 dim 1 : vector<16x128xf32>, i32 -> vector<16x128xf32>
    %cst_142 = arith.constant 2.000000e+00 : f32
    %417 = vector.broadcast %cst_142 : f32 to vector<16x128xf32>
    %418 = arith.mulf %417, %414 : vector<16x128xf32>
    %419 = arith.subf %413, %418 : vector<16x128xf32>
    %420 = arith.addf %419, %412 : vector<16x128xf32>
    %421 = arith.mulf %420, %420 : vector<16x128xf32>
    %cst_143 = arith.constant 1.08333337 : f32
    %422 = vector.broadcast %cst_143 : f32 to vector<16x128xf32>
    %423 = arith.mulf %422, %421 : vector<16x128xf32>
    %cst_144 = arith.constant 4.000000e+00 : f32
    %424 = vector.broadcast %cst_144 : f32 to vector<16x128xf32>
    %425 = arith.mulf %424, %414 : vector<16x128xf32>
    %426 = arith.subf %413, %425 : vector<16x128xf32>
    %cst_145 = arith.constant 3.000000e+00 : f32
    %427 = vector.broadcast %cst_145 : f32 to vector<16x128xf32>
    %428 = arith.mulf %427, %412 : vector<16x128xf32>
    %429 = arith.addf %426, %428 : vector<16x128xf32>
    %430 = arith.mulf %429, %429 : vector<16x128xf32>
    %cst_146 = arith.constant 2.500000e-01 : f32
    %431 = vector.broadcast %cst_146 : f32 to vector<16x128xf32>
    %432 = arith.mulf %431, %430 : vector<16x128xf32>
    %433 = arith.addf %423, %432 : vector<16x128xf32>
    %cst_147 = arith.constant 2.000000e+00 : f32
    %434 = vector.broadcast %cst_147 : f32 to vector<16x128xf32>
    %435 = arith.mulf %434, %412 : vector<16x128xf32>
    %436 = arith.subf %414, %435 : vector<16x128xf32>
    %437 = arith.addf %436, %415 : vector<16x128xf32>
    %438 = arith.mulf %437, %437 : vector<16x128xf32>
    %cst_148 = arith.constant 1.08333337 : f32
    %439 = vector.broadcast %cst_148 : f32 to vector<16x128xf32>
    %440 = arith.mulf %439, %438 : vector<16x128xf32>
    %441 = arith.subf %414, %415 : vector<16x128xf32>
    %442 = arith.mulf %441, %441 : vector<16x128xf32>
    %cst_149 = arith.constant 2.500000e-01 : f32
    %443 = vector.broadcast %cst_149 : f32 to vector<16x128xf32>
    %444 = arith.mulf %443, %442 : vector<16x128xf32>
    %445 = arith.addf %440, %444 : vector<16x128xf32>
    %cst_150 = arith.constant 2.000000e+00 : f32
    %446 = vector.broadcast %cst_150 : f32 to vector<16x128xf32>
    %447 = arith.mulf %446, %415 : vector<16x128xf32>
    %448 = arith.subf %412, %447 : vector<16x128xf32>
    %449 = arith.addf %448, %416 : vector<16x128xf32>
    %450 = arith.mulf %449, %449 : vector<16x128xf32>
    %cst_151 = arith.constant 1.08333337 : f32
    %451 = vector.broadcast %cst_151 : f32 to vector<16x128xf32>
    %452 = arith.mulf %451, %450 : vector<16x128xf32>
    %cst_152 = arith.constant 3.000000e+00 : f32
    %453 = vector.broadcast %cst_152 : f32 to vector<16x128xf32>
    %454 = arith.mulf %453, %412 : vector<16x128xf32>
    %cst_153 = arith.constant 4.000000e+00 : f32
    %455 = vector.broadcast %cst_153 : f32 to vector<16x128xf32>
    %456 = arith.mulf %455, %415 : vector<16x128xf32>
    %457 = arith.subf %454, %456 : vector<16x128xf32>
    %458 = arith.addf %457, %416 : vector<16x128xf32>
    %459 = arith.mulf %458, %458 : vector<16x128xf32>
    %cst_154 = arith.constant 2.500000e-01 : f32
    %460 = vector.broadcast %cst_154 : f32 to vector<16x128xf32>
    %461 = arith.mulf %460, %459 : vector<16x128xf32>
    %462 = arith.addf %452, %461 : vector<16x128xf32>
    %cst_155 = arith.constant 9.99999982E-14 : f32
    %463 = vector.broadcast %cst_155 : f32 to vector<16x128xf32>
    %464 = arith.addf %463, %433 : vector<16x128xf32>
    %465 = arith.mulf %464, %464 : vector<16x128xf32>
    %466 = tpu.reciprocal %465 {approx = true} : vector<16x128xf32> -> vector<16x128xf32>
    %cst_156 = arith.constant 9.99999982E-14 : f32
    %467 = vector.broadcast %cst_156 : f32 to vector<16x128xf32>
    %468 = arith.addf %467, %445 : vector<16x128xf32>
    %469 = arith.mulf %468, %468 : vector<16x128xf32>
    %470 = tpu.reciprocal %469 {approx = true} : vector<16x128xf32> -> vector<16x128xf32>
    %cst_157 = arith.constant 9.99999982E-14 : f32
    %471 = vector.broadcast %cst_157 : f32 to vector<16x128xf32>
    %472 = arith.addf %471, %462 : vector<16x128xf32>
    %473 = arith.mulf %472, %472 : vector<16x128xf32>
    %474 = tpu.reciprocal %473 {approx = true} : vector<16x128xf32> -> vector<16x128xf32>
    %cst_158 = arith.constant 1.000000e-01 : f32
    %475 = vector.broadcast %cst_158 : f32 to vector<16x128xf32>
    %476 = arith.mulf %475, %466 : vector<16x128xf32>
    %cst_159 = arith.constant 6.000000e-01 : f32
    %477 = vector.broadcast %cst_159 : f32 to vector<16x128xf32>
    %478 = arith.mulf %477, %470 : vector<16x128xf32>
    %cst_160 = arith.constant 3.000000e-01 : f32
    %479 = vector.broadcast %cst_160 : f32 to vector<16x128xf32>
    %480 = arith.mulf %479, %474 : vector<16x128xf32>
    %cst_161 = arith.constant 2.500000e-01 : f32
    %481 = vector.broadcast %cst_161 : f32 to vector<16x128xf32>
    %482 = arith.mulf %481, %466 : vector<16x128xf32>
    %cst_162 = arith.constant 5.000000e-01 : f32
    %483 = vector.broadcast %cst_162 : f32 to vector<16x128xf32>
    %484 = arith.mulf %483, %470 : vector<16x128xf32>
    %cst_163 = arith.constant 2.500000e-01 : f32
    %485 = vector.broadcast %cst_163 : f32 to vector<16x128xf32>
    %486 = arith.mulf %485, %474 : vector<16x128xf32>
    %487 = arith.addf %476, %478 : vector<16x128xf32>
    %488 = arith.addf %487, %480 : vector<16x128xf32>
    %489 = tpu.reciprocal %488 : vector<16x128xf32> -> vector<16x128xf32>
    %490 = arith.addf %482, %484 : vector<16x128xf32>
    %491 = arith.addf %490, %486 : vector<16x128xf32>
    %492 = tpu.reciprocal %491 : vector<16x128xf32> -> vector<16x128xf32>
    %493 = arith.mulf %476, %489 : vector<16x128xf32>
    %494 = arith.mulf %478, %489 : vector<16x128xf32>
    %495 = arith.mulf %480, %489 : vector<16x128xf32>
    %496 = arith.mulf %482, %492 : vector<16x128xf32>
    %497 = arith.mulf %484, %492 : vector<16x128xf32>
    %498 = arith.mulf %486, %492 : vector<16x128xf32>
    %cst_164 = arith.constant 2.000000e+00 : f32
    %499 = vector.broadcast %cst_164 : f32 to vector<16x128xf32>
    %500 = arith.mulf %499, %413 : vector<16x128xf32>
    %cst_165 = arith.constant 7.000000e+00 : f32
    %501 = vector.broadcast %cst_165 : f32 to vector<16x128xf32>
    %502 = arith.mulf %501, %414 : vector<16x128xf32>
    %503 = arith.subf %500, %502 : vector<16x128xf32>
    %cst_166 = arith.constant 1.100000e+01 : f32
    %504 = vector.broadcast %cst_166 : f32 to vector<16x128xf32>
    %505 = arith.mulf %504, %412 : vector<16x128xf32>
    %506 = arith.addf %503, %505 : vector<16x128xf32>
    %cst_167 = arith.constant 0.166666672 : f32
    %507 = vector.broadcast %cst_167 : f32 to vector<16x128xf32>
    %508 = arith.mulf %506, %507 : vector<16x128xf32>
    %cst_168 = arith.constant 0.000000e+00 : f32
    %509 = vector.broadcast %cst_168 : f32 to vector<16x128xf32>
    %510 = arith.subf %509, %414 : vector<16x128xf32>
    %cst_169 = arith.constant 5.000000e+00 : f32
    %511 = vector.broadcast %cst_169 : f32 to vector<16x128xf32>
    %512 = arith.mulf %511, %412 : vector<16x128xf32>
    %513 = arith.addf %510, %512 : vector<16x128xf32>
    %cst_170 = arith.constant 2.000000e+00 : f32
    %514 = vector.broadcast %cst_170 : f32 to vector<16x128xf32>
    %515 = arith.mulf %514, %415 : vector<16x128xf32>
    %516 = arith.addf %513, %515 : vector<16x128xf32>
    %cst_171 = arith.constant 0.166666672 : f32
    %517 = vector.broadcast %cst_171 : f32 to vector<16x128xf32>
    %518 = arith.mulf %516, %517 : vector<16x128xf32>
    %cst_172 = arith.constant 2.000000e+00 : f32
    %519 = vector.broadcast %cst_172 : f32 to vector<16x128xf32>
    %520 = arith.mulf %519, %412 : vector<16x128xf32>
    %cst_173 = arith.constant 5.000000e+00 : f32
    %521 = vector.broadcast %cst_173 : f32 to vector<16x128xf32>
    %522 = arith.mulf %521, %415 : vector<16x128xf32>
    %523 = arith.addf %520, %522 : vector<16x128xf32>
    %524 = arith.subf %523, %416 : vector<16x128xf32>
    %cst_174 = arith.constant 0.166666672 : f32
    %525 = vector.broadcast %cst_174 : f32 to vector<16x128xf32>
    %526 = arith.mulf %524, %525 : vector<16x128xf32>
    %527 = arith.mulf %493, %508 : vector<16x128xf32>
    %528 = arith.mulf %494, %518 : vector<16x128xf32>
    %529 = arith.addf %527, %528 : vector<16x128xf32>
    %530 = arith.mulf %495, %526 : vector<16x128xf32>
    %531 = arith.addf %529, %530 : vector<16x128xf32>
    %c1_i32_175 = arith.constant 1 : i32
    %532 = tpu.dynamic_rotate %531 by %c1_i32_175 dim 1 : vector<16x128xf32>, i32 -> vector<16x128xf32>
    %533 = arith.subf %531, %532 : vector<16x128xf32>
    %cst_176 = arith.constant 10.666667 : f32
    %534 = vector.broadcast %cst_176 : f32 to vector<16x128xf32>
    %535 = arith.mulf %533, %534 : vector<16x128xf32>
    %cst_177 = arith.constant 2.000000e+00 : f32
    %536 = vector.broadcast %cst_177 : f32 to vector<16x128xf32>
    %537 = arith.mulf %536, %414 : vector<16x128xf32>
    %538 = arith.subf %413, %537 : vector<16x128xf32>
    %539 = arith.addf %538, %412 : vector<16x128xf32>
    %cst_178 = arith.constant 2.000000e+00 : f32
    %540 = vector.broadcast %cst_178 : f32 to vector<16x128xf32>
    %541 = arith.mulf %540, %412 : vector<16x128xf32>
    %542 = arith.subf %414, %541 : vector<16x128xf32>
    %543 = arith.addf %542, %415 : vector<16x128xf32>
    %cst_179 = arith.constant 2.000000e+00 : f32
    %544 = vector.broadcast %cst_179 : f32 to vector<16x128xf32>
    %545 = arith.mulf %544, %415 : vector<16x128xf32>
    %546 = arith.subf %412, %545 : vector<16x128xf32>
    %547 = arith.addf %546, %416 : vector<16x128xf32>
    %548 = arith.mulf %496, %539 : vector<16x128xf32>
    %549 = arith.mulf %497, %543 : vector<16x128xf32>
    %550 = arith.addf %548, %549 : vector<16x128xf32>
    %551 = arith.mulf %498, %547 : vector<16x128xf32>
    %552 = arith.addf %550, %551 : vector<16x128xf32>
    %cst_180 = arith.constant 113.777779 : f32
    %553 = vector.broadcast %cst_180 : f32 to vector<16x128xf32>
    %554 = arith.mulf %552, %553 : vector<16x128xf32>
    %cst_181 = arith.constant 4.500000e-02 : f32
    %555 = vector.broadcast %cst_181 : f32 to vector<16x128xf32>
    %556 = arith.mulf %555, %554 : vector<16x128xf32>
    %cst_182 = arith.constant 5.500000e-02 : f32
    %557 = vector.broadcast %cst_182 : f32 to vector<16x128xf32>
    %558 = arith.mulf %557, %535 : vector<16x128xf32>
    %559 = arith.addf %556, %558 : vector<16x128xf32>
    %cst_183 = arith.constant 1.000000e-01 : f32
    %560 = vector.broadcast %cst_183 : f32 to vector<16x128xf32>
    %561 = arith.mulf %560, %412 : vector<16x128xf32>
    %562 = arith.subf %559, %561 : vector<16x128xf32>
    %cst_184 = arith.constant 0.0769230798 : f32
    %563 = vector.broadcast %cst_184 : f32 to vector<16x128xf32>
    %564 = arith.mulf %563, %562 : vector<16x128xf32>
    %565 = arith.addf %412, %564 : vector<16x128xf32>
    %cst_185 = arith.constant 0.000000e+00 : f32
    %566 = vector.broadcast %cst_185 : f32 to vector<16x128xf32>
    %567 = arith.select %11, %566, %565 : vector<16x128xi1>, vector<16x128xf32>
    %cst_186 = arith.constant 0.0193939861 : f32
    %568 = vector.broadcast %cst_186 : f32 to vector<16x128xf32>
    %569 = arith.select %6, %568, %567 : vector<16x128xi1>, vector<16x128xf32>
    %c2_i32_187 = arith.constant 2 : i32
    %570 = tpu.dynamic_rotate %569 by %c2_i32_187 dim 1 : vector<16x128xf32>, i32 -> vector<16x128xf32>
    %c1_i32_188 = arith.constant 1 : i32
    %571 = tpu.dynamic_rotate %569 by %c1_i32_188 dim 1 : vector<16x128xf32>, i32 -> vector<16x128xf32>
    %c127_i32_189 = arith.constant 127 : i32
    %572 = tpu.dynamic_rotate %569 by %c127_i32_189 dim 1 : vector<16x128xf32>, i32 -> vector<16x128xf32>
    %c126_i32_190 = arith.constant 126 : i32
    %573 = tpu.dynamic_rotate %569 by %c126_i32_190 dim 1 : vector<16x128xf32>, i32 -> vector<16x128xf32>
    %cst_191 = arith.constant 2.000000e+00 : f32
    %574 = vector.broadcast %cst_191 : f32 to vector<16x128xf32>
    %575 = arith.mulf %574, %571 : vector<16x128xf32>
    %576 = arith.subf %570, %575 : vector<16x128xf32>
    %577 = arith.addf %576, %569 : vector<16x128xf32>
    %578 = arith.mulf %577, %577 : vector<16x128xf32>
    %cst_192 = arith.constant 1.08333337 : f32
    %579 = vector.broadcast %cst_192 : f32 to vector<16x128xf32>
    %580 = arith.mulf %579, %578 : vector<16x128xf32>
    %cst_193 = arith.constant 4.000000e+00 : f32
    %581 = vector.broadcast %cst_193 : f32 to vector<16x128xf32>
    %582 = arith.mulf %581, %571 : vector<16x128xf32>
    %583 = arith.subf %570, %582 : vector<16x128xf32>
    %cst_194 = arith.constant 3.000000e+00 : f32
    %584 = vector.broadcast %cst_194 : f32 to vector<16x128xf32>
    %585 = arith.mulf %584, %569 : vector<16x128xf32>
    %586 = arith.addf %583, %585 : vector<16x128xf32>
    %587 = arith.mulf %586, %586 : vector<16x128xf32>
    %cst_195 = arith.constant 2.500000e-01 : f32
    %588 = vector.broadcast %cst_195 : f32 to vector<16x128xf32>
    %589 = arith.mulf %588, %587 : vector<16x128xf32>
    %590 = arith.addf %580, %589 : vector<16x128xf32>
    %cst_196 = arith.constant 2.000000e+00 : f32
    %591 = vector.broadcast %cst_196 : f32 to vector<16x128xf32>
    %592 = arith.mulf %591, %569 : vector<16x128xf32>
    %593 = arith.subf %571, %592 : vector<16x128xf32>
    %594 = arith.addf %593, %572 : vector<16x128xf32>
    %595 = arith.mulf %594, %594 : vector<16x128xf32>
    %cst_197 = arith.constant 1.08333337 : f32
    %596 = vector.broadcast %cst_197 : f32 to vector<16x128xf32>
    %597 = arith.mulf %596, %595 : vector<16x128xf32>
    %598 = arith.subf %571, %572 : vector<16x128xf32>
    %599 = arith.mulf %598, %598 : vector<16x128xf32>
    %cst_198 = arith.constant 2.500000e-01 : f32
    %600 = vector.broadcast %cst_198 : f32 to vector<16x128xf32>
    %601 = arith.mulf %600, %599 : vector<16x128xf32>
    %602 = arith.addf %597, %601 : vector<16x128xf32>
    %cst_199 = arith.constant 2.000000e+00 : f32
    %603 = vector.broadcast %cst_199 : f32 to vector<16x128xf32>
    %604 = arith.mulf %603, %572 : vector<16x128xf32>
    %605 = arith.subf %569, %604 : vector<16x128xf32>
    %606 = arith.addf %605, %573 : vector<16x128xf32>
    %607 = arith.mulf %606, %606 : vector<16x128xf32>
    %cst_200 = arith.constant 1.08333337 : f32
    %608 = vector.broadcast %cst_200 : f32 to vector<16x128xf32>
    %609 = arith.mulf %608, %607 : vector<16x128xf32>
    %cst_201 = arith.constant 3.000000e+00 : f32
    %610 = vector.broadcast %cst_201 : f32 to vector<16x128xf32>
    %611 = arith.mulf %610, %569 : vector<16x128xf32>
    %cst_202 = arith.constant 4.000000e+00 : f32
    %612 = vector.broadcast %cst_202 : f32 to vector<16x128xf32>
    %613 = arith.mulf %612, %572 : vector<16x128xf32>
    %614 = arith.subf %611, %613 : vector<16x128xf32>
    %615 = arith.addf %614, %573 : vector<16x128xf32>
    %616 = arith.mulf %615, %615 : vector<16x128xf32>
    %cst_203 = arith.constant 2.500000e-01 : f32
    %617 = vector.broadcast %cst_203 : f32 to vector<16x128xf32>
    %618 = arith.mulf %617, %616 : vector<16x128xf32>
    %619 = arith.addf %609, %618 : vector<16x128xf32>
    %cst_204 = arith.constant 9.99999982E-14 : f32
    %620 = vector.broadcast %cst_204 : f32 to vector<16x128xf32>
    %621 = arith.addf %620, %590 : vector<16x128xf32>
    %622 = arith.mulf %621, %621 : vector<16x128xf32>
    %623 = tpu.reciprocal %622 {approx = true} : vector<16x128xf32> -> vector<16x128xf32>
    %cst_205 = arith.constant 9.99999982E-14 : f32
    %624 = vector.broadcast %cst_205 : f32 to vector<16x128xf32>
    %625 = arith.addf %624, %602 : vector<16x128xf32>
    %626 = arith.mulf %625, %625 : vector<16x128xf32>
    %627 = tpu.reciprocal %626 {approx = true} : vector<16x128xf32> -> vector<16x128xf32>
    %cst_206 = arith.constant 9.99999982E-14 : f32
    %628 = vector.broadcast %cst_206 : f32 to vector<16x128xf32>
    %629 = arith.addf %628, %619 : vector<16x128xf32>
    %630 = arith.mulf %629, %629 : vector<16x128xf32>
    %631 = tpu.reciprocal %630 {approx = true} : vector<16x128xf32> -> vector<16x128xf32>
    %cst_207 = arith.constant 1.000000e-01 : f32
    %632 = vector.broadcast %cst_207 : f32 to vector<16x128xf32>
    %633 = arith.mulf %632, %623 : vector<16x128xf32>
    %cst_208 = arith.constant 6.000000e-01 : f32
    %634 = vector.broadcast %cst_208 : f32 to vector<16x128xf32>
    %635 = arith.mulf %634, %627 : vector<16x128xf32>
    %cst_209 = arith.constant 3.000000e-01 : f32
    %636 = vector.broadcast %cst_209 : f32 to vector<16x128xf32>
    %637 = arith.mulf %636, %631 : vector<16x128xf32>
    %cst_210 = arith.constant 2.500000e-01 : f32
    %638 = vector.broadcast %cst_210 : f32 to vector<16x128xf32>
    %639 = arith.mulf %638, %623 : vector<16x128xf32>
    %cst_211 = arith.constant 5.000000e-01 : f32
    %640 = vector.broadcast %cst_211 : f32 to vector<16x128xf32>
    %641 = arith.mulf %640, %627 : vector<16x128xf32>
    %cst_212 = arith.constant 2.500000e-01 : f32
    %642 = vector.broadcast %cst_212 : f32 to vector<16x128xf32>
    %643 = arith.mulf %642, %631 : vector<16x128xf32>
    %644 = arith.addf %633, %635 : vector<16x128xf32>
    %645 = arith.addf %644, %637 : vector<16x128xf32>
    %646 = tpu.reciprocal %645 : vector<16x128xf32> -> vector<16x128xf32>
    %647 = arith.addf %639, %641 : vector<16x128xf32>
    %648 = arith.addf %647, %643 : vector<16x128xf32>
    %649 = tpu.reciprocal %648 : vector<16x128xf32> -> vector<16x128xf32>
    %650 = arith.mulf %633, %646 : vector<16x128xf32>
    %651 = arith.mulf %635, %646 : vector<16x128xf32>
    %652 = arith.mulf %637, %646 : vector<16x128xf32>
    %653 = arith.mulf %639, %649 : vector<16x128xf32>
    %654 = arith.mulf %641, %649 : vector<16x128xf32>
    %655 = arith.mulf %643, %649 : vector<16x128xf32>
    %cst_213 = arith.constant 2.000000e+00 : f32
    %656 = vector.broadcast %cst_213 : f32 to vector<16x128xf32>
    %657 = arith.mulf %656, %570 : vector<16x128xf32>
    %cst_214 = arith.constant 7.000000e+00 : f32
    %658 = vector.broadcast %cst_214 : f32 to vector<16x128xf32>
    %659 = arith.mulf %658, %571 : vector<16x128xf32>
    %660 = arith.subf %657, %659 : vector<16x128xf32>
    %cst_215 = arith.constant 1.100000e+01 : f32
    %661 = vector.broadcast %cst_215 : f32 to vector<16x128xf32>
    %662 = arith.mulf %661, %569 : vector<16x128xf32>
    %663 = arith.addf %660, %662 : vector<16x128xf32>
    %cst_216 = arith.constant 0.166666672 : f32
    %664 = vector.broadcast %cst_216 : f32 to vector<16x128xf32>
    %665 = arith.mulf %663, %664 : vector<16x128xf32>
    %cst_217 = arith.constant 0.000000e+00 : f32
    %666 = vector.broadcast %cst_217 : f32 to vector<16x128xf32>
    %667 = arith.subf %666, %571 : vector<16x128xf32>
    %cst_218 = arith.constant 5.000000e+00 : f32
    %668 = vector.broadcast %cst_218 : f32 to vector<16x128xf32>
    %669 = arith.mulf %668, %569 : vector<16x128xf32>
    %670 = arith.addf %667, %669 : vector<16x128xf32>
    %cst_219 = arith.constant 2.000000e+00 : f32
    %671 = vector.broadcast %cst_219 : f32 to vector<16x128xf32>
    %672 = arith.mulf %671, %572 : vector<16x128xf32>
    %673 = arith.addf %670, %672 : vector<16x128xf32>
    %cst_220 = arith.constant 0.166666672 : f32
    %674 = vector.broadcast %cst_220 : f32 to vector<16x128xf32>
    %675 = arith.mulf %673, %674 : vector<16x128xf32>
    %cst_221 = arith.constant 2.000000e+00 : f32
    %676 = vector.broadcast %cst_221 : f32 to vector<16x128xf32>
    %677 = arith.mulf %676, %569 : vector<16x128xf32>
    %cst_222 = arith.constant 5.000000e+00 : f32
    %678 = vector.broadcast %cst_222 : f32 to vector<16x128xf32>
    %679 = arith.mulf %678, %572 : vector<16x128xf32>
    %680 = arith.addf %677, %679 : vector<16x128xf32>
    %681 = arith.subf %680, %573 : vector<16x128xf32>
    %cst_223 = arith.constant 0.166666672 : f32
    %682 = vector.broadcast %cst_223 : f32 to vector<16x128xf32>
    %683 = arith.mulf %681, %682 : vector<16x128xf32>
    %684 = arith.mulf %650, %665 : vector<16x128xf32>
    %685 = arith.mulf %651, %675 : vector<16x128xf32>
    %686 = arith.addf %684, %685 : vector<16x128xf32>
    %687 = arith.mulf %652, %683 : vector<16x128xf32>
    %688 = arith.addf %686, %687 : vector<16x128xf32>
    %c1_i32_224 = arith.constant 1 : i32
    %689 = tpu.dynamic_rotate %688 by %c1_i32_224 dim 1 : vector<16x128xf32>, i32 -> vector<16x128xf32>
    %690 = arith.subf %688, %689 : vector<16x128xf32>
    %cst_225 = arith.constant 10.666667 : f32
    %691 = vector.broadcast %cst_225 : f32 to vector<16x128xf32>
    %692 = arith.mulf %690, %691 : vector<16x128xf32>
    %cst_226 = arith.constant 2.000000e+00 : f32
    %693 = vector.broadcast %cst_226 : f32 to vector<16x128xf32>
    %694 = arith.mulf %693, %571 : vector<16x128xf32>
    %695 = arith.subf %570, %694 : vector<16x128xf32>
    %696 = arith.addf %695, %569 : vector<16x128xf32>
    %cst_227 = arith.constant 2.000000e+00 : f32
    %697 = vector.broadcast %cst_227 : f32 to vector<16x128xf32>
    %698 = arith.mulf %697, %569 : vector<16x128xf32>
    %699 = arith.subf %571, %698 : vector<16x128xf32>
    %700 = arith.addf %699, %572 : vector<16x128xf32>
    %cst_228 = arith.constant 2.000000e+00 : f32
    %701 = vector.broadcast %cst_228 : f32 to vector<16x128xf32>
    %702 = arith.mulf %701, %572 : vector<16x128xf32>
    %703 = arith.subf %569, %702 : vector<16x128xf32>
    %704 = arith.addf %703, %573 : vector<16x128xf32>
    %705 = arith.mulf %653, %696 : vector<16x128xf32>
    %706 = arith.mulf %654, %700 : vector<16x128xf32>
    %707 = arith.addf %705, %706 : vector<16x128xf32>
    %708 = arith.mulf %655, %704 : vector<16x128xf32>
    %709 = arith.addf %707, %708 : vector<16x128xf32>
    %cst_229 = arith.constant 113.777779 : f32
    %710 = vector.broadcast %cst_229 : f32 to vector<16x128xf32>
    %711 = arith.mulf %709, %710 : vector<16x128xf32>
    %cst_230 = arith.constant 4.500000e-02 : f32
    %712 = vector.broadcast %cst_230 : f32 to vector<16x128xf32>
    %713 = arith.mulf %712, %711 : vector<16x128xf32>
    %cst_231 = arith.constant 5.500000e-02 : f32
    %714 = vector.broadcast %cst_231 : f32 to vector<16x128xf32>
    %715 = arith.mulf %714, %692 : vector<16x128xf32>
    %716 = arith.addf %713, %715 : vector<16x128xf32>
    %cst_232 = arith.constant 1.000000e-01 : f32
    %717 = vector.broadcast %cst_232 : f32 to vector<16x128xf32>
    %718 = arith.mulf %717, %569 : vector<16x128xf32>
    %719 = arith.subf %716, %718 : vector<16x128xf32>
    %cst_233 = arith.constant 0.0769230798 : f32
    %720 = vector.broadcast %cst_233 : f32 to vector<16x128xf32>
    %721 = arith.mulf %720, %719 : vector<16x128xf32>
    %722 = arith.addf %569, %721 : vector<16x128xf32>
    %cst_234 = arith.constant 0.000000e+00 : f32
    %723 = vector.broadcast %cst_234 : f32 to vector<16x128xf32>
    %724 = arith.select %11, %723, %722 : vector<16x128xi1>, vector<16x128xf32>
    %cst_235 = arith.constant 0.0192453749 : f32
    %725 = vector.broadcast %cst_235 : f32 to vector<16x128xf32>
    %726 = arith.select %6, %725, %724 : vector<16x128xi1>, vector<16x128xf32>
    %c2_i32_236 = arith.constant 2 : i32
    %727 = tpu.dynamic_rotate %726 by %c2_i32_236 dim 1 : vector<16x128xf32>, i32 -> vector<16x128xf32>
    %c1_i32_237 = arith.constant 1 : i32
    %728 = tpu.dynamic_rotate %726 by %c1_i32_237 dim 1 : vector<16x128xf32>, i32 -> vector<16x128xf32>
    %c127_i32_238 = arith.constant 127 : i32
    %729 = tpu.dynamic_rotate %726 by %c127_i32_238 dim 1 : vector<16x128xf32>, i32 -> vector<16x128xf32>
    %c126_i32_239 = arith.constant 126 : i32
    %730 = tpu.dynamic_rotate %726 by %c126_i32_239 dim 1 : vector<16x128xf32>, i32 -> vector<16x128xf32>
    %cst_240 = arith.constant 2.000000e+00 : f32
    %731 = vector.broadcast %cst_240 : f32 to vector<16x128xf32>
    %732 = arith.mulf %731, %728 : vector<16x128xf32>
    %733 = arith.subf %727, %732 : vector<16x128xf32>
    %734 = arith.addf %733, %726 : vector<16x128xf32>
    %735 = arith.mulf %734, %734 : vector<16x128xf32>
    %cst_241 = arith.constant 1.08333337 : f32
    %736 = vector.broadcast %cst_241 : f32 to vector<16x128xf32>
    %737 = arith.mulf %736, %735 : vector<16x128xf32>
    %cst_242 = arith.constant 4.000000e+00 : f32
    %738 = vector.broadcast %cst_242 : f32 to vector<16x128xf32>
    %739 = arith.mulf %738, %728 : vector<16x128xf32>
    %740 = arith.subf %727, %739 : vector<16x128xf32>
    %cst_243 = arith.constant 3.000000e+00 : f32
    %741 = vector.broadcast %cst_243 : f32 to vector<16x128xf32>
    %742 = arith.mulf %741, %726 : vector<16x128xf32>
    %743 = arith.addf %740, %742 : vector<16x128xf32>
    %744 = arith.mulf %743, %743 : vector<16x128xf32>
    %cst_244 = arith.constant 2.500000e-01 : f32
    %745 = vector.broadcast %cst_244 : f32 to vector<16x128xf32>
    %746 = arith.mulf %745, %744 : vector<16x128xf32>
    %747 = arith.addf %737, %746 : vector<16x128xf32>
    %cst_245 = arith.constant 2.000000e+00 : f32
    %748 = vector.broadcast %cst_245 : f32 to vector<16x128xf32>
    %749 = arith.mulf %748, %726 : vector<16x128xf32>
    %750 = arith.subf %728, %749 : vector<16x128xf32>
    %751 = arith.addf %750, %729 : vector<16x128xf32>
    %752 = arith.mulf %751, %751 : vector<16x128xf32>
    %cst_246 = arith.constant 1.08333337 : f32
    %753 = vector.broadcast %cst_246 : f32 to vector<16x128xf32>
    %754 = arith.mulf %753, %752 : vector<16x128xf32>
    %755 = arith.subf %728, %729 : vector<16x128xf32>
    %756 = arith.mulf %755, %755 : vector<16x128xf32>
    %cst_247 = arith.constant 2.500000e-01 : f32
    %757 = vector.broadcast %cst_247 : f32 to vector<16x128xf32>
    %758 = arith.mulf %757, %756 : vector<16x128xf32>
    %759 = arith.addf %754, %758 : vector<16x128xf32>
    %cst_248 = arith.constant 2.000000e+00 : f32
    %760 = vector.broadcast %cst_248 : f32 to vector<16x128xf32>
    %761 = arith.mulf %760, %729 : vector<16x128xf32>
    %762 = arith.subf %726, %761 : vector<16x128xf32>
    %763 = arith.addf %762, %730 : vector<16x128xf32>
    %764 = arith.mulf %763, %763 : vector<16x128xf32>
    %cst_249 = arith.constant 1.08333337 : f32
    %765 = vector.broadcast %cst_249 : f32 to vector<16x128xf32>
    %766 = arith.mulf %765, %764 : vector<16x128xf32>
    %cst_250 = arith.constant 3.000000e+00 : f32
    %767 = vector.broadcast %cst_250 : f32 to vector<16x128xf32>
    %768 = arith.mulf %767, %726 : vector<16x128xf32>
    %cst_251 = arith.constant 4.000000e+00 : f32
    %769 = vector.broadcast %cst_251 : f32 to vector<16x128xf32>
    %770 = arith.mulf %769, %729 : vector<16x128xf32>
    %771 = arith.subf %768, %770 : vector<16x128xf32>
    %772 = arith.addf %771, %730 : vector<16x128xf32>
    %773 = arith.mulf %772, %772 : vector<16x128xf32>
    %cst_252 = arith.constant 2.500000e-01 : f32
    %774 = vector.broadcast %cst_252 : f32 to vector<16x128xf32>
    %775 = arith.mulf %774, %773 : vector<16x128xf32>
    %776 = arith.addf %766, %775 : vector<16x128xf32>
    %cst_253 = arith.constant 9.99999982E-14 : f32
    %777 = vector.broadcast %cst_253 : f32 to vector<16x128xf32>
    %778 = arith.addf %777, %747 : vector<16x128xf32>
    %779 = arith.mulf %778, %778 : vector<16x128xf32>
    %780 = tpu.reciprocal %779 {approx = true} : vector<16x128xf32> -> vector<16x128xf32>
    %cst_254 = arith.constant 9.99999982E-14 : f32
    %781 = vector.broadcast %cst_254 : f32 to vector<16x128xf32>
    %782 = arith.addf %781, %759 : vector<16x128xf32>
    %783 = arith.mulf %782, %782 : vector<16x128xf32>
    %784 = tpu.reciprocal %783 {approx = true} : vector<16x128xf32> -> vector<16x128xf32>
    %cst_255 = arith.constant 9.99999982E-14 : f32
    %785 = vector.broadcast %cst_255 : f32 to vector<16x128xf32>
    %786 = arith.addf %785, %776 : vector<16x128xf32>
    %787 = arith.mulf %786, %786 : vector<16x128xf32>
    %788 = tpu.reciprocal %787 {approx = true} : vector<16x128xf32> -> vector<16x128xf32>
    %cst_256 = arith.constant 1.000000e-01 : f32
    %789 = vector.broadcast %cst_256 : f32 to vector<16x128xf32>
    %790 = arith.mulf %789, %780 : vector<16x128xf32>
    %cst_257 = arith.constant 6.000000e-01 : f32
    %791 = vector.broadcast %cst_257 : f32 to vector<16x128xf32>
    %792 = arith.mulf %791, %784 : vector<16x128xf32>
    %cst_258 = arith.constant 3.000000e-01 : f32
    %793 = vector.broadcast %cst_258 : f32 to vector<16x128xf32>
    %794 = arith.mulf %793, %788 : vector<16x128xf32>
    %cst_259 = arith.constant 2.500000e-01 : f32
    %795 = vector.broadcast %cst_259 : f32 to vector<16x128xf32>
    %796 = arith.mulf %795, %780 : vector<16x128xf32>
    %cst_260 = arith.constant 5.000000e-01 : f32
    %797 = vector.broadcast %cst_260 : f32 to vector<16x128xf32>
    %798 = arith.mulf %797, %784 : vector<16x128xf32>
    %cst_261 = arith.constant 2.500000e-01 : f32
    %799 = vector.broadcast %cst_261 : f32 to vector<16x128xf32>
    %800 = arith.mulf %799, %788 : vector<16x128xf32>
    %801 = arith.addf %790, %792 : vector<16x128xf32>
    %802 = arith.addf %801, %794 : vector<16x128xf32>
    %803 = tpu.reciprocal %802 : vector<16x128xf32> -> vector<16x128xf32>
    %804 = arith.addf %796, %798 : vector<16x128xf32>
    %805 = arith.addf %804, %800 : vector<16x128xf32>
    %806 = tpu.reciprocal %805 : vector<16x128xf32> -> vector<16x128xf32>
    %807 = arith.mulf %790, %803 : vector<16x128xf32>
    %808 = arith.mulf %792, %803 : vector<16x128xf32>
    %809 = arith.mulf %794, %803 : vector<16x128xf32>
    %810 = arith.mulf %796, %806 : vector<16x128xf32>
    %811 = arith.mulf %798, %806 : vector<16x128xf32>
    %812 = arith.mulf %800, %806 : vector<16x128xf32>
    %cst_262 = arith.constant 2.000000e+00 : f32
    %813 = vector.broadcast %cst_262 : f32 to vector<16x128xf32>
    %814 = arith.mulf %813, %727 : vector<16x128xf32>
    %cst_263 = arith.constant 7.000000e+00 : f32
    %815 = vector.broadcast %cst_263 : f32 to vector<16x128xf32>
    %816 = arith.mulf %815, %728 : vector<16x128xf32>
    %817 = arith.subf %814, %816 : vector<16x128xf32>
    %cst_264 = arith.constant 1.100000e+01 : f32
    %818 = vector.broadcast %cst_264 : f32 to vector<16x128xf32>
    %819 = arith.mulf %818, %726 : vector<16x128xf32>
    %820 = arith.addf %817, %819 : vector<16x128xf32>
    %cst_265 = arith.constant 0.166666672 : f32
    %821 = vector.broadcast %cst_265 : f32 to vector<16x128xf32>
    %822 = arith.mulf %820, %821 : vector<16x128xf32>
    %cst_266 = arith.constant 0.000000e+00 : f32
    %823 = vector.broadcast %cst_266 : f32 to vector<16x128xf32>
    %824 = arith.subf %823, %728 : vector<16x128xf32>
    %cst_267 = arith.constant 5.000000e+00 : f32
    %825 = vector.broadcast %cst_267 : f32 to vector<16x128xf32>
    %826 = arith.mulf %825, %726 : vector<16x128xf32>
    %827 = arith.addf %824, %826 : vector<16x128xf32>
    %cst_268 = arith.constant 2.000000e+00 : f32
    %828 = vector.broadcast %cst_268 : f32 to vector<16x128xf32>
    %829 = arith.mulf %828, %729 : vector<16x128xf32>
    %830 = arith.addf %827, %829 : vector<16x128xf32>
    %cst_269 = arith.constant 0.166666672 : f32
    %831 = vector.broadcast %cst_269 : f32 to vector<16x128xf32>
    %832 = arith.mulf %830, %831 : vector<16x128xf32>
    %cst_270 = arith.constant 2.000000e+00 : f32
    %833 = vector.broadcast %cst_270 : f32 to vector<16x128xf32>
    %834 = arith.mulf %833, %726 : vector<16x128xf32>
    %cst_271 = arith.constant 5.000000e+00 : f32
    %835 = vector.broadcast %cst_271 : f32 to vector<16x128xf32>
    %836 = arith.mulf %835, %729 : vector<16x128xf32>
    %837 = arith.addf %834, %836 : vector<16x128xf32>
    %838 = arith.subf %837, %730 : vector<16x128xf32>
    %cst_272 = arith.constant 0.166666672 : f32
    %839 = vector.broadcast %cst_272 : f32 to vector<16x128xf32>
    %840 = arith.mulf %838, %839 : vector<16x128xf32>
    %841 = arith.mulf %807, %822 : vector<16x128xf32>
    %842 = arith.mulf %808, %832 : vector<16x128xf32>
    %843 = arith.addf %841, %842 : vector<16x128xf32>
    %844 = arith.mulf %809, %840 : vector<16x128xf32>
    %845 = arith.addf %843, %844 : vector<16x128xf32>
    %c1_i32_273 = arith.constant 1 : i32
    %846 = tpu.dynamic_rotate %845 by %c1_i32_273 dim 1 : vector<16x128xf32>, i32 -> vector<16x128xf32>
    %847 = arith.subf %845, %846 : vector<16x128xf32>
    %cst_274 = arith.constant 10.666667 : f32
    %848 = vector.broadcast %cst_274 : f32 to vector<16x128xf32>
    %849 = arith.mulf %847, %848 : vector<16x128xf32>
    %cst_275 = arith.constant 2.000000e+00 : f32
    %850 = vector.broadcast %cst_275 : f32 to vector<16x128xf32>
    %851 = arith.mulf %850, %728 : vector<16x128xf32>
    %852 = arith.subf %727, %851 : vector<16x128xf32>
    %853 = arith.addf %852, %726 : vector<16x128xf32>
    %cst_276 = arith.constant 2.000000e+00 : f32
    %854 = vector.broadcast %cst_276 : f32 to vector<16x128xf32>
    %855 = arith.mulf %854, %726 : vector<16x128xf32>
    %856 = arith.subf %728, %855 : vector<16x128xf32>
    %857 = arith.addf %856, %729 : vector<16x128xf32>
    %cst_277 = arith.constant 2.000000e+00 : f32
    %858 = vector.broadcast %cst_277 : f32 to vector<16x128xf32>
    %859 = arith.mulf %858, %729 : vector<16x128xf32>
    %860 = arith.subf %726, %859 : vector<16x128xf32>
    %861 = arith.addf %860, %730 : vector<16x128xf32>
    %862 = arith.mulf %810, %853 : vector<16x128xf32>
    %863 = arith.mulf %811, %857 : vector<16x128xf32>
    %864 = arith.addf %862, %863 : vector<16x128xf32>
    %865 = arith.mulf %812, %861 : vector<16x128xf32>
    %866 = arith.addf %864, %865 : vector<16x128xf32>
    %cst_278 = arith.constant 113.777779 : f32
    %867 = vector.broadcast %cst_278 : f32 to vector<16x128xf32>
    %868 = arith.mulf %866, %867 : vector<16x128xf32>
    %cst_279 = arith.constant 4.500000e-02 : f32
    %869 = vector.broadcast %cst_279 : f32 to vector<16x128xf32>
    %870 = arith.mulf %869, %868 : vector<16x128xf32>
    %cst_280 = arith.constant 5.500000e-02 : f32
    %871 = vector.broadcast %cst_280 : f32 to vector<16x128xf32>
    %872 = arith.mulf %871, %849 : vector<16x128xf32>
    %873 = arith.addf %870, %872 : vector<16x128xf32>
    %cst_281 = arith.constant 1.000000e-01 : f32
    %874 = vector.broadcast %cst_281 : f32 to vector<16x128xf32>
    %875 = arith.mulf %874, %726 : vector<16x128xf32>
    %876 = arith.subf %873, %875 : vector<16x128xf32>
    %cst_282 = arith.constant 0.0769230798 : f32
    %877 = vector.broadcast %cst_282 : f32 to vector<16x128xf32>
    %878 = arith.mulf %877, %876 : vector<16x128xf32>
    %879 = arith.addf %726, %878 : vector<16x128xf32>
    %cst_283 = arith.constant 0.000000e+00 : f32
    %880 = vector.broadcast %cst_283 : f32 to vector<16x128xf32>
    %881 = arith.select %11, %880, %879 : vector<16x128xi1>, vector<16x128xf32>
    %cst_284 = arith.constant 1.909790e-02 : f32
    %882 = vector.broadcast %cst_284 : f32 to vector<16x128xf32>
    %883 = arith.select %6, %882, %881 : vector<16x128xi1>, vector<16x128xf32>
    %c2_i32_285 = arith.constant 2 : i32
    %884 = tpu.dynamic_rotate %883 by %c2_i32_285 dim 1 : vector<16x128xf32>, i32 -> vector<16x128xf32>
    %c1_i32_286 = arith.constant 1 : i32
    %885 = tpu.dynamic_rotate %883 by %c1_i32_286 dim 1 : vector<16x128xf32>, i32 -> vector<16x128xf32>
    %c127_i32_287 = arith.constant 127 : i32
    %886 = tpu.dynamic_rotate %883 by %c127_i32_287 dim 1 : vector<16x128xf32>, i32 -> vector<16x128xf32>
    %c126_i32_288 = arith.constant 126 : i32
    %887 = tpu.dynamic_rotate %883 by %c126_i32_288 dim 1 : vector<16x128xf32>, i32 -> vector<16x128xf32>
    %cst_289 = arith.constant 2.000000e+00 : f32
    %888 = vector.broadcast %cst_289 : f32 to vector<16x128xf32>
    %889 = arith.mulf %888, %885 : vector<16x128xf32>
    %890 = arith.subf %884, %889 : vector<16x128xf32>
    %891 = arith.addf %890, %883 : vector<16x128xf32>
    %892 = arith.mulf %891, %891 : vector<16x128xf32>
    %cst_290 = arith.constant 1.08333337 : f32
    %893 = vector.broadcast %cst_290 : f32 to vector<16x128xf32>
    %894 = arith.mulf %893, %892 : vector<16x128xf32>
    %cst_291 = arith.constant 4.000000e+00 : f32
    %895 = vector.broadcast %cst_291 : f32 to vector<16x128xf32>
    %896 = arith.mulf %895, %885 : vector<16x128xf32>
    %897 = arith.subf %884, %896 : vector<16x128xf32>
    %cst_292 = arith.constant 3.000000e+00 : f32
    %898 = vector.broadcast %cst_292 : f32 to vector<16x128xf32>
    %899 = arith.mulf %898, %883 : vector<16x128xf32>
    %900 = arith.addf %897, %899 : vector<16x128xf32>
    %901 = arith.mulf %900, %900 : vector<16x128xf32>
    %cst_293 = arith.constant 2.500000e-01 : f32
    %902 = vector.broadcast %cst_293 : f32 to vector<16x128xf32>
    %903 = arith.mulf %902, %901 : vector<16x128xf32>
    %904 = arith.addf %894, %903 : vector<16x128xf32>
    %cst_294 = arith.constant 2.000000e+00 : f32
    %905 = vector.broadcast %cst_294 : f32 to vector<16x128xf32>
    %906 = arith.mulf %905, %883 : vector<16x128xf32>
    %907 = arith.subf %885, %906 : vector<16x128xf32>
    %908 = arith.addf %907, %886 : vector<16x128xf32>
    %909 = arith.mulf %908, %908 : vector<16x128xf32>
    %cst_295 = arith.constant 1.08333337 : f32
    %910 = vector.broadcast %cst_295 : f32 to vector<16x128xf32>
    %911 = arith.mulf %910, %909 : vector<16x128xf32>
    %912 = arith.subf %885, %886 : vector<16x128xf32>
    %913 = arith.mulf %912, %912 : vector<16x128xf32>
    %cst_296 = arith.constant 2.500000e-01 : f32
    %914 = vector.broadcast %cst_296 : f32 to vector<16x128xf32>
    %915 = arith.mulf %914, %913 : vector<16x128xf32>
    %916 = arith.addf %911, %915 : vector<16x128xf32>
    %cst_297 = arith.constant 2.000000e+00 : f32
    %917 = vector.broadcast %cst_297 : f32 to vector<16x128xf32>
    %918 = arith.mulf %917, %886 : vector<16x128xf32>
    %919 = arith.subf %883, %918 : vector<16x128xf32>
    %920 = arith.addf %919, %887 : vector<16x128xf32>
    %921 = arith.mulf %920, %920 : vector<16x128xf32>
    %cst_298 = arith.constant 1.08333337 : f32
    %922 = vector.broadcast %cst_298 : f32 to vector<16x128xf32>
    %923 = arith.mulf %922, %921 : vector<16x128xf32>
    %cst_299 = arith.constant 3.000000e+00 : f32
    %924 = vector.broadcast %cst_299 : f32 to vector<16x128xf32>
    %925 = arith.mulf %924, %883 : vector<16x128xf32>
    %cst_300 = arith.constant 4.000000e+00 : f32
    %926 = vector.broadcast %cst_300 : f32 to vector<16x128xf32>
    %927 = arith.mulf %926, %886 : vector<16x128xf32>
    %928 = arith.subf %925, %927 : vector<16x128xf32>
    %929 = arith.addf %928, %887 : vector<16x128xf32>
    %930 = arith.mulf %929, %929 : vector<16x128xf32>
    %cst_301 = arith.constant 2.500000e-01 : f32
    %931 = vector.broadcast %cst_301 : f32 to vector<16x128xf32>
    %932 = arith.mulf %931, %930 : vector<16x128xf32>
    %933 = arith.addf %923, %932 : vector<16x128xf32>
    %cst_302 = arith.constant 9.99999982E-14 : f32
    %934 = vector.broadcast %cst_302 : f32 to vector<16x128xf32>
    %935 = arith.addf %934, %904 : vector<16x128xf32>
    %936 = arith.mulf %935, %935 : vector<16x128xf32>
    %937 = tpu.reciprocal %936 {approx = true} : vector<16x128xf32> -> vector<16x128xf32>
    %cst_303 = arith.constant 9.99999982E-14 : f32
    %938 = vector.broadcast %cst_303 : f32 to vector<16x128xf32>
    %939 = arith.addf %938, %916 : vector<16x128xf32>
    %940 = arith.mulf %939, %939 : vector<16x128xf32>
    %941 = tpu.reciprocal %940 {approx = true} : vector<16x128xf32> -> vector<16x128xf32>
    %cst_304 = arith.constant 9.99999982E-14 : f32
    %942 = vector.broadcast %cst_304 : f32 to vector<16x128xf32>
    %943 = arith.addf %942, %933 : vector<16x128xf32>
    %944 = arith.mulf %943, %943 : vector<16x128xf32>
    %945 = tpu.reciprocal %944 {approx = true} : vector<16x128xf32> -> vector<16x128xf32>
    %cst_305 = arith.constant 1.000000e-01 : f32
    %946 = vector.broadcast %cst_305 : f32 to vector<16x128xf32>
    %947 = arith.mulf %946, %937 : vector<16x128xf32>
    %cst_306 = arith.constant 6.000000e-01 : f32
    %948 = vector.broadcast %cst_306 : f32 to vector<16x128xf32>
    %949 = arith.mulf %948, %941 : vector<16x128xf32>
    %cst_307 = arith.constant 3.000000e-01 : f32
    %950 = vector.broadcast %cst_307 : f32 to vector<16x128xf32>
    %951 = arith.mulf %950, %945 : vector<16x128xf32>
    %cst_308 = arith.constant 2.500000e-01 : f32
    %952 = vector.broadcast %cst_308 : f32 to vector<16x128xf32>
    %953 = arith.mulf %952, %937 : vector<16x128xf32>
    %cst_309 = arith.constant 5.000000e-01 : f32
    %954 = vector.broadcast %cst_309 : f32 to vector<16x128xf32>
    %955 = arith.mulf %954, %941 : vector<16x128xf32>
    %cst_310 = arith.constant 2.500000e-01 : f32
    %956 = vector.broadcast %cst_310 : f32 to vector<16x128xf32>
    %957 = arith.mulf %956, %945 : vector<16x128xf32>
    %958 = arith.addf %947, %949 : vector<16x128xf32>
    %959 = arith.addf %958, %951 : vector<16x128xf32>
    %960 = tpu.reciprocal %959 : vector<16x128xf32> -> vector<16x128xf32>
    %961 = arith.addf %953, %955 : vector<16x128xf32>
    %962 = arith.addf %961, %957 : vector<16x128xf32>
    %963 = tpu.reciprocal %962 : vector<16x128xf32> -> vector<16x128xf32>
    %964 = arith.mulf %947, %960 : vector<16x128xf32>
    %965 = arith.mulf %949, %960 : vector<16x128xf32>
    %966 = arith.mulf %951, %960 : vector<16x128xf32>
    %967 = arith.mulf %953, %963 : vector<16x128xf32>
    %968 = arith.mulf %955, %963 : vector<16x128xf32>
    %969 = arith.mulf %957, %963 : vector<16x128xf32>
    %cst_311 = arith.constant 2.000000e+00 : f32
    %970 = vector.broadcast %cst_311 : f32 to vector<16x128xf32>
    %971 = arith.mulf %970, %884 : vector<16x128xf32>
    %cst_312 = arith.constant 7.000000e+00 : f32
    %972 = vector.broadcast %cst_312 : f32 to vector<16x128xf32>
    %973 = arith.mulf %972, %885 : vector<16x128xf32>
    %974 = arith.subf %971, %973 : vector<16x128xf32>
    %cst_313 = arith.constant 1.100000e+01 : f32
    %975 = vector.broadcast %cst_313 : f32 to vector<16x128xf32>
    %976 = arith.mulf %975, %883 : vector<16x128xf32>
    %977 = arith.addf %974, %976 : vector<16x128xf32>
    %cst_314 = arith.constant 0.166666672 : f32
    %978 = vector.broadcast %cst_314 : f32 to vector<16x128xf32>
    %979 = arith.mulf %977, %978 : vector<16x128xf32>
    %cst_315 = arith.constant 0.000000e+00 : f32
    %980 = vector.broadcast %cst_315 : f32 to vector<16x128xf32>
    %981 = arith.subf %980, %885 : vector<16x128xf32>
    %cst_316 = arith.constant 5.000000e+00 : f32
    %982 = vector.broadcast %cst_316 : f32 to vector<16x128xf32>
    %983 = arith.mulf %982, %883 : vector<16x128xf32>
    %984 = arith.addf %981, %983 : vector<16x128xf32>
    %cst_317 = arith.constant 2.000000e+00 : f32
    %985 = vector.broadcast %cst_317 : f32 to vector<16x128xf32>
    %986 = arith.mulf %985, %886 : vector<16x128xf32>
    %987 = arith.addf %984, %986 : vector<16x128xf32>
    %cst_318 = arith.constant 0.166666672 : f32
    %988 = vector.broadcast %cst_318 : f32 to vector<16x128xf32>
    %989 = arith.mulf %987, %988 : vector<16x128xf32>
    %cst_319 = arith.constant 2.000000e+00 : f32
    %990 = vector.broadcast %cst_319 : f32 to vector<16x128xf32>
    %991 = arith.mulf %990, %883 : vector<16x128xf32>
    %cst_320 = arith.constant 5.000000e+00 : f32
    %992 = vector.broadcast %cst_320 : f32 to vector<16x128xf32>
    %993 = arith.mulf %992, %886 : vector<16x128xf32>
    %994 = arith.addf %991, %993 : vector<16x128xf32>
    %995 = arith.subf %994, %887 : vector<16x128xf32>
    %cst_321 = arith.constant 0.166666672 : f32
    %996 = vector.broadcast %cst_321 : f32 to vector<16x128xf32>
    %997 = arith.mulf %995, %996 : vector<16x128xf32>
    %998 = arith.mulf %964, %979 : vector<16x128xf32>
    %999 = arith.mulf %965, %989 : vector<16x128xf32>
    %1000 = arith.addf %998, %999 : vector<16x128xf32>
    %1001 = arith.mulf %966, %997 : vector<16x128xf32>
    %1002 = arith.addf %1000, %1001 : vector<16x128xf32>
    %c1_i32_322 = arith.constant 1 : i32
    %1003 = tpu.dynamic_rotate %1002 by %c1_i32_322 dim 1 : vector<16x128xf32>, i32 -> vector<16x128xf32>
    %1004 = arith.subf %1002, %1003 : vector<16x128xf32>
    %cst_323 = arith.constant 10.666667 : f32
    %1005 = vector.broadcast %cst_323 : f32 to vector<16x128xf32>
    %1006 = arith.mulf %1004, %1005 : vector<16x128xf32>
    %cst_324 = arith.constant 2.000000e+00 : f32
    %1007 = vector.broadcast %cst_324 : f32 to vector<16x128xf32>
    %1008 = arith.mulf %1007, %885 : vector<16x128xf32>
    %1009 = arith.subf %884, %1008 : vector<16x128xf32>
    %1010 = arith.addf %1009, %883 : vector<16x128xf32>
    %cst_325 = arith.constant 2.000000e+00 : f32
    %1011 = vector.broadcast %cst_325 : f32 to vector<16x128xf32>
    %1012 = arith.mulf %1011, %883 : vector<16x128xf32>
    %1013 = arith.subf %885, %1012 : vector<16x128xf32>
    %1014 = arith.addf %1013, %886 : vector<16x128xf32>
    %cst_326 = arith.constant 2.000000e+00 : f32
    %1015 = vector.broadcast %cst_326 : f32 to vector<16x128xf32>
    %1016 = arith.mulf %1015, %886 : vector<16x128xf32>
    %1017 = arith.subf %883, %1016 : vector<16x128xf32>
    %1018 = arith.addf %1017, %887 : vector<16x128xf32>
    %1019 = arith.mulf %967, %1010 : vector<16x128xf32>
    %1020 = arith.mulf %968, %1014 : vector<16x128xf32>
    %1021 = arith.addf %1019, %1020 : vector<16x128xf32>
    %1022 = arith.mulf %969, %1018 : vector<16x128xf32>
    %1023 = arith.addf %1021, %1022 : vector<16x128xf32>
    %cst_327 = arith.constant 113.777779 : f32
    %1024 = vector.broadcast %cst_327 : f32 to vector<16x128xf32>
    %1025 = arith.mulf %1023, %1024 : vector<16x128xf32>
    %cst_328 = arith.constant 4.500000e-02 : f32
    %1026 = vector.broadcast %cst_328 : f32 to vector<16x128xf32>
    %1027 = arith.mulf %1026, %1025 : vector<16x128xf32>
    %cst_329 = arith.constant 5.500000e-02 : f32
    %1028 = vector.broadcast %cst_329 : f32 to vector<16x128xf32>
    %1029 = arith.mulf %1028, %1006 : vector<16x128xf32>
    %1030 = arith.addf %1027, %1029 : vector<16x128xf32>
    %cst_330 = arith.constant 1.000000e-01 : f32
    %1031 = vector.broadcast %cst_330 : f32 to vector<16x128xf32>
    %1032 = arith.mulf %1031, %883 : vector<16x128xf32>
    %1033 = arith.subf %1030, %1032 : vector<16x128xf32>
    %cst_331 = arith.constant 0.0769230798 : f32
    %1034 = vector.broadcast %cst_331 : f32 to vector<16x128xf32>
    %1035 = arith.mulf %1034, %1033 : vector<16x128xf32>
    %1036 = arith.addf %883, %1035 : vector<16x128xf32>
    %cst_332 = arith.constant 0.000000e+00 : f32
    %1037 = vector.broadcast %cst_332 : f32 to vector<16x128xf32>
    %1038 = arith.select %11, %1037, %1036 : vector<16x128xi1>, vector<16x128xf32>
    %cst_333 = arith.constant 0.0189515576 : f32
    %1039 = vector.broadcast %cst_333 : f32 to vector<16x128xf32>
    %1040 = arith.select %6, %1039, %1038 : vector<16x128xi1>, vector<16x128xf32>
    %c2_i32_334 = arith.constant 2 : i32
    %1041 = tpu.dynamic_rotate %1040 by %c2_i32_334 dim 1 : vector<16x128xf32>, i32 -> vector<16x128xf32>
    %c1_i32_335 = arith.constant 1 : i32
    %1042 = tpu.dynamic_rotate %1040 by %c1_i32_335 dim 1 : vector<16x128xf32>, i32 -> vector<16x128xf32>
    %c127_i32_336 = arith.constant 127 : i32
    %1043 = tpu.dynamic_rotate %1040 by %c127_i32_336 dim 1 : vector<16x128xf32>, i32 -> vector<16x128xf32>
    %c126_i32_337 = arith.constant 126 : i32
    %1044 = tpu.dynamic_rotate %1040 by %c126_i32_337 dim 1 : vector<16x128xf32>, i32 -> vector<16x128xf32>
    %cst_338 = arith.constant 2.000000e+00 : f32
    %1045 = vector.broadcast %cst_338 : f32 to vector<16x128xf32>
    %1046 = arith.mulf %1045, %1042 : vector<16x128xf32>
    %1047 = arith.subf %1041, %1046 : vector<16x128xf32>
    %1048 = arith.addf %1047, %1040 : vector<16x128xf32>
    %1049 = arith.mulf %1048, %1048 : vector<16x128xf32>
    %cst_339 = arith.constant 1.08333337 : f32
    %1050 = vector.broadcast %cst_339 : f32 to vector<16x128xf32>
    %1051 = arith.mulf %1050, %1049 : vector<16x128xf32>
    %cst_340 = arith.constant 4.000000e+00 : f32
    %1052 = vector.broadcast %cst_340 : f32 to vector<16x128xf32>
    %1053 = arith.mulf %1052, %1042 : vector<16x128xf32>
    %1054 = arith.subf %1041, %1053 : vector<16x128xf32>
    %cst_341 = arith.constant 3.000000e+00 : f32
    %1055 = vector.broadcast %cst_341 : f32 to vector<16x128xf32>
    %1056 = arith.mulf %1055, %1040 : vector<16x128xf32>
    %1057 = arith.addf %1054, %1056 : vector<16x128xf32>
    %1058 = arith.mulf %1057, %1057 : vector<16x128xf32>
    %cst_342 = arith.constant 2.500000e-01 : f32
    %1059 = vector.broadcast %cst_342 : f32 to vector<16x128xf32>
    %1060 = arith.mulf %1059, %1058 : vector<16x128xf32>
    %1061 = arith.addf %1051, %1060 : vector<16x128xf32>
    %cst_343 = arith.constant 2.000000e+00 : f32
    %1062 = vector.broadcast %cst_343 : f32 to vector<16x128xf32>
    %1063 = arith.mulf %1062, %1040 : vector<16x128xf32>
    %1064 = arith.subf %1042, %1063 : vector<16x128xf32>
    %1065 = arith.addf %1064, %1043 : vector<16x128xf32>
    %1066 = arith.mulf %1065, %1065 : vector<16x128xf32>
    %cst_344 = arith.constant 1.08333337 : f32
    %1067 = vector.broadcast %cst_344 : f32 to vector<16x128xf32>
    %1068 = arith.mulf %1067, %1066 : vector<16x128xf32>
    %1069 = arith.subf %1042, %1043 : vector<16x128xf32>
    %1070 = arith.mulf %1069, %1069 : vector<16x128xf32>
    %cst_345 = arith.constant 2.500000e-01 : f32
    %1071 = vector.broadcast %cst_345 : f32 to vector<16x128xf32>
    %1072 = arith.mulf %1071, %1070 : vector<16x128xf32>
    %1073 = arith.addf %1068, %1072 : vector<16x128xf32>
    %cst_346 = arith.constant 2.000000e+00 : f32
    %1074 = vector.broadcast %cst_346 : f32 to vector<16x128xf32>
    %1075 = arith.mulf %1074, %1043 : vector<16x128xf32>
    %1076 = arith.subf %1040, %1075 : vector<16x128xf32>
    %1077 = arith.addf %1076, %1044 : vector<16x128xf32>
    %1078 = arith.mulf %1077, %1077 : vector<16x128xf32>
    %cst_347 = arith.constant 1.08333337 : f32
    %1079 = vector.broadcast %cst_347 : f32 to vector<16x128xf32>
    %1080 = arith.mulf %1079, %1078 : vector<16x128xf32>
    %cst_348 = arith.constant 3.000000e+00 : f32
    %1081 = vector.broadcast %cst_348 : f32 to vector<16x128xf32>
    %1082 = arith.mulf %1081, %1040 : vector<16x128xf32>
    %cst_349 = arith.constant 4.000000e+00 : f32
    %1083 = vector.broadcast %cst_349 : f32 to vector<16x128xf32>
    %1084 = arith.mulf %1083, %1043 : vector<16x128xf32>
    %1085 = arith.subf %1082, %1084 : vector<16x128xf32>
    %1086 = arith.addf %1085, %1044 : vector<16x128xf32>
    %1087 = arith.mulf %1086, %1086 : vector<16x128xf32>
    %cst_350 = arith.constant 2.500000e-01 : f32
    %1088 = vector.broadcast %cst_350 : f32 to vector<16x128xf32>
    %1089 = arith.mulf %1088, %1087 : vector<16x128xf32>
    %1090 = arith.addf %1080, %1089 : vector<16x128xf32>
    %cst_351 = arith.constant 9.99999982E-14 : f32
    %1091 = vector.broadcast %cst_351 : f32 to vector<16x128xf32>
    %1092 = arith.addf %1091, %1061 : vector<16x128xf32>
    %1093 = arith.mulf %1092, %1092 : vector<16x128xf32>
    %1094 = tpu.reciprocal %1093 {approx = true} : vector<16x128xf32> -> vector<16x128xf32>
    %cst_352 = arith.constant 9.99999982E-14 : f32
    %1095 = vector.broadcast %cst_352 : f32 to vector<16x128xf32>
    %1096 = arith.addf %1095, %1073 : vector<16x128xf32>
    %1097 = arith.mulf %1096, %1096 : vector<16x128xf32>
    %1098 = tpu.reciprocal %1097 {approx = true} : vector<16x128xf32> -> vector<16x128xf32>
    %cst_353 = arith.constant 9.99999982E-14 : f32
    %1099 = vector.broadcast %cst_353 : f32 to vector<16x128xf32>
    %1100 = arith.addf %1099, %1090 : vector<16x128xf32>
    %1101 = arith.mulf %1100, %1100 : vector<16x128xf32>
    %1102 = tpu.reciprocal %1101 {approx = true} : vector<16x128xf32> -> vector<16x128xf32>
    %cst_354 = arith.constant 1.000000e-01 : f32
    %1103 = vector.broadcast %cst_354 : f32 to vector<16x128xf32>
    %1104 = arith.mulf %1103, %1094 : vector<16x128xf32>
    %cst_355 = arith.constant 6.000000e-01 : f32
    %1105 = vector.broadcast %cst_355 : f32 to vector<16x128xf32>
    %1106 = arith.mulf %1105, %1098 : vector<16x128xf32>
    %cst_356 = arith.constant 3.000000e-01 : f32
    %1107 = vector.broadcast %cst_356 : f32 to vector<16x128xf32>
    %1108 = arith.mulf %1107, %1102 : vector<16x128xf32>
    %cst_357 = arith.constant 2.500000e-01 : f32
    %1109 = vector.broadcast %cst_357 : f32 to vector<16x128xf32>
    %1110 = arith.mulf %1109, %1094 : vector<16x128xf32>
    %cst_358 = arith.constant 5.000000e-01 : f32
    %1111 = vector.broadcast %cst_358 : f32 to vector<16x128xf32>
    %1112 = arith.mulf %1111, %1098 : vector<16x128xf32>
    %cst_359 = arith.constant 2.500000e-01 : f32
    %1113 = vector.broadcast %cst_359 : f32 to vector<16x128xf32>
    %1114 = arith.mulf %1113, %1102 : vector<16x128xf32>
    %1115 = arith.addf %1104, %1106 : vector<16x128xf32>
    %1116 = arith.addf %1115, %1108 : vector<16x128xf32>
    %1117 = tpu.reciprocal %1116 : vector<16x128xf32> -> vector<16x128xf32>
    %1118 = arith.addf %1110, %1112 : vector<16x128xf32>
    %1119 = arith.addf %1118, %1114 : vector<16x128xf32>
    %1120 = tpu.reciprocal %1119 : vector<16x128xf32> -> vector<16x128xf32>
    %1121 = arith.mulf %1104, %1117 : vector<16x128xf32>
    %1122 = arith.mulf %1106, %1117 : vector<16x128xf32>
    %1123 = arith.mulf %1108, %1117 : vector<16x128xf32>
    %1124 = arith.mulf %1110, %1120 : vector<16x128xf32>
    %1125 = arith.mulf %1112, %1120 : vector<16x128xf32>
    %1126 = arith.mulf %1114, %1120 : vector<16x128xf32>
    %cst_360 = arith.constant 2.000000e+00 : f32
    %1127 = vector.broadcast %cst_360 : f32 to vector<16x128xf32>
    %1128 = arith.mulf %1127, %1041 : vector<16x128xf32>
    %cst_361 = arith.constant 7.000000e+00 : f32
    %1129 = vector.broadcast %cst_361 : f32 to vector<16x128xf32>
    %1130 = arith.mulf %1129, %1042 : vector<16x128xf32>
    %1131 = arith.subf %1128, %1130 : vector<16x128xf32>
    %cst_362 = arith.constant 1.100000e+01 : f32
    %1132 = vector.broadcast %cst_362 : f32 to vector<16x128xf32>
    %1133 = arith.mulf %1132, %1040 : vector<16x128xf32>
    %1134 = arith.addf %1131, %1133 : vector<16x128xf32>
    %cst_363 = arith.constant 0.166666672 : f32
    %1135 = vector.broadcast %cst_363 : f32 to vector<16x128xf32>
    %1136 = arith.mulf %1134, %1135 : vector<16x128xf32>
    %cst_364 = arith.constant 0.000000e+00 : f32
    %1137 = vector.broadcast %cst_364 : f32 to vector<16x128xf32>
    %1138 = arith.subf %1137, %1042 : vector<16x128xf32>
    %cst_365 = arith.constant 5.000000e+00 : f32
    %1139 = vector.broadcast %cst_365 : f32 to vector<16x128xf32>
    %1140 = arith.mulf %1139, %1040 : vector<16x128xf32>
    %1141 = arith.addf %1138, %1140 : vector<16x128xf32>
    %cst_366 = arith.constant 2.000000e+00 : f32
    %1142 = vector.broadcast %cst_366 : f32 to vector<16x128xf32>
    %1143 = arith.mulf %1142, %1043 : vector<16x128xf32>
    %1144 = arith.addf %1141, %1143 : vector<16x128xf32>
    %cst_367 = arith.constant 0.166666672 : f32
    %1145 = vector.broadcast %cst_367 : f32 to vector<16x128xf32>
    %1146 = arith.mulf %1144, %1145 : vector<16x128xf32>
    %cst_368 = arith.constant 2.000000e+00 : f32
    %1147 = vector.broadcast %cst_368 : f32 to vector<16x128xf32>
    %1148 = arith.mulf %1147, %1040 : vector<16x128xf32>
    %cst_369 = arith.constant 5.000000e+00 : f32
    %1149 = vector.broadcast %cst_369 : f32 to vector<16x128xf32>
    %1150 = arith.mulf %1149, %1043 : vector<16x128xf32>
    %1151 = arith.addf %1148, %1150 : vector<16x128xf32>
    %1152 = arith.subf %1151, %1044 : vector<16x128xf32>
    %cst_370 = arith.constant 0.166666672 : f32
    %1153 = vector.broadcast %cst_370 : f32 to vector<16x128xf32>
    %1154 = arith.mulf %1152, %1153 : vector<16x128xf32>
    %1155 = arith.mulf %1121, %1136 : vector<16x128xf32>
    %1156 = arith.mulf %1122, %1146 : vector<16x128xf32>
    %1157 = arith.addf %1155, %1156 : vector<16x128xf32>
    %1158 = arith.mulf %1123, %1154 : vector<16x128xf32>
    %1159 = arith.addf %1157, %1158 : vector<16x128xf32>
    %c1_i32_371 = arith.constant 1 : i32
    %1160 = tpu.dynamic_rotate %1159 by %c1_i32_371 dim 1 : vector<16x128xf32>, i32 -> vector<16x128xf32>
    %1161 = arith.subf %1159, %1160 : vector<16x128xf32>
    %cst_372 = arith.constant 10.666667 : f32
    %1162 = vector.broadcast %cst_372 : f32 to vector<16x128xf32>
    %1163 = arith.mulf %1161, %1162 : vector<16x128xf32>
    %cst_373 = arith.constant 2.000000e+00 : f32
    %1164 = vector.broadcast %cst_373 : f32 to vector<16x128xf32>
    %1165 = arith.mulf %1164, %1042 : vector<16x128xf32>
    %1166 = arith.subf %1041, %1165 : vector<16x128xf32>
    %1167 = arith.addf %1166, %1040 : vector<16x128xf32>
    %cst_374 = arith.constant 2.000000e+00 : f32
    %1168 = vector.broadcast %cst_374 : f32 to vector<16x128xf32>
    %1169 = arith.mulf %1168, %1040 : vector<16x128xf32>
    %1170 = arith.subf %1042, %1169 : vector<16x128xf32>
    %1171 = arith.addf %1170, %1043 : vector<16x128xf32>
    %cst_375 = arith.constant 2.000000e+00 : f32
    %1172 = vector.broadcast %cst_375 : f32 to vector<16x128xf32>
    %1173 = arith.mulf %1172, %1043 : vector<16x128xf32>
    %1174 = arith.subf %1040, %1173 : vector<16x128xf32>
    %1175 = arith.addf %1174, %1044 : vector<16x128xf32>
    %1176 = arith.mulf %1124, %1167 : vector<16x128xf32>
    %1177 = arith.mulf %1125, %1171 : vector<16x128xf32>
    %1178 = arith.addf %1176, %1177 : vector<16x128xf32>
    %1179 = arith.mulf %1126, %1175 : vector<16x128xf32>
    %1180 = arith.addf %1178, %1179 : vector<16x128xf32>
    %cst_376 = arith.constant 113.777779 : f32
    %1181 = vector.broadcast %cst_376 : f32 to vector<16x128xf32>
    %1182 = arith.mulf %1180, %1181 : vector<16x128xf32>
    %cst_377 = arith.constant 4.500000e-02 : f32
    %1183 = vector.broadcast %cst_377 : f32 to vector<16x128xf32>
    %1184 = arith.mulf %1183, %1182 : vector<16x128xf32>
    %cst_378 = arith.constant 5.500000e-02 : f32
    %1185 = vector.broadcast %cst_378 : f32 to vector<16x128xf32>
    %1186 = arith.mulf %1185, %1163 : vector<16x128xf32>
    %1187 = arith.addf %1184, %1186 : vector<16x128xf32>
    %cst_379 = arith.constant 1.000000e-01 : f32
    %1188 = vector.broadcast %cst_379 : f32 to vector<16x128xf32>
    %1189 = arith.mulf %1188, %1040 : vector<16x128xf32>
    %1190 = arith.subf %1187, %1189 : vector<16x128xf32>
    %cst_380 = arith.constant 0.0769230798 : f32
    %1191 = vector.broadcast %cst_380 : f32 to vector<16x128xf32>
    %1192 = arith.mulf %1191, %1190 : vector<16x128xf32>
    %1193 = arith.addf %1040, %1192 : vector<16x128xf32>
    %cst_381 = arith.constant 0.000000e+00 : f32
    %1194 = vector.broadcast %cst_381 : f32 to vector<16x128xf32>
    %1195 = arith.select %11, %1194, %1193 : vector<16x128xi1>, vector<16x128xf32>
    %cst_382 = arith.constant 0.0188063364 : f32
    %1196 = vector.broadcast %cst_382 : f32 to vector<16x128xf32>
    %1197 = arith.select %6, %1196, %1195 : vector<16x128xi1>, vector<16x128xf32>
    %c2_i32_383 = arith.constant 2 : i32
    %1198 = tpu.dynamic_rotate %1197 by %c2_i32_383 dim 1 : vector<16x128xf32>, i32 -> vector<16x128xf32>
    %c1_i32_384 = arith.constant 1 : i32
    %1199 = tpu.dynamic_rotate %1197 by %c1_i32_384 dim 1 : vector<16x128xf32>, i32 -> vector<16x128xf32>
    %c127_i32_385 = arith.constant 127 : i32
    %1200 = tpu.dynamic_rotate %1197 by %c127_i32_385 dim 1 : vector<16x128xf32>, i32 -> vector<16x128xf32>
    %c126_i32_386 = arith.constant 126 : i32
    %1201 = tpu.dynamic_rotate %1197 by %c126_i32_386 dim 1 : vector<16x128xf32>, i32 -> vector<16x128xf32>
    %cst_387 = arith.constant 2.000000e+00 : f32
    %1202 = vector.broadcast %cst_387 : f32 to vector<16x128xf32>
    %1203 = arith.mulf %1202, %1199 : vector<16x128xf32>
    %1204 = arith.subf %1198, %1203 : vector<16x128xf32>
    %1205 = arith.addf %1204, %1197 : vector<16x128xf32>
    %1206 = arith.mulf %1205, %1205 : vector<16x128xf32>
    %cst_388 = arith.constant 1.08333337 : f32
    %1207 = vector.broadcast %cst_388 : f32 to vector<16x128xf32>
    %1208 = arith.mulf %1207, %1206 : vector<16x128xf32>
    %cst_389 = arith.constant 4.000000e+00 : f32
    %1209 = vector.broadcast %cst_389 : f32 to vector<16x128xf32>
    %1210 = arith.mulf %1209, %1199 : vector<16x128xf32>
    %1211 = arith.subf %1198, %1210 : vector<16x128xf32>
    %cst_390 = arith.constant 3.000000e+00 : f32
    %1212 = vector.broadcast %cst_390 : f32 to vector<16x128xf32>
    %1213 = arith.mulf %1212, %1197 : vector<16x128xf32>
    %1214 = arith.addf %1211, %1213 : vector<16x128xf32>
    %1215 = arith.mulf %1214, %1214 : vector<16x128xf32>
    %cst_391 = arith.constant 2.500000e-01 : f32
    %1216 = vector.broadcast %cst_391 : f32 to vector<16x128xf32>
    %1217 = arith.mulf %1216, %1215 : vector<16x128xf32>
    %1218 = arith.addf %1208, %1217 : vector<16x128xf32>
    %cst_392 = arith.constant 2.000000e+00 : f32
    %1219 = vector.broadcast %cst_392 : f32 to vector<16x128xf32>
    %1220 = arith.mulf %1219, %1197 : vector<16x128xf32>
    %1221 = arith.subf %1199, %1220 : vector<16x128xf32>
    %1222 = arith.addf %1221, %1200 : vector<16x128xf32>
    %1223 = arith.mulf %1222, %1222 : vector<16x128xf32>
    %cst_393 = arith.constant 1.08333337 : f32
    %1224 = vector.broadcast %cst_393 : f32 to vector<16x128xf32>
    %1225 = arith.mulf %1224, %1223 : vector<16x128xf32>
    %1226 = arith.subf %1199, %1200 : vector<16x128xf32>
    %1227 = arith.mulf %1226, %1226 : vector<16x128xf32>
    %cst_394 = arith.constant 2.500000e-01 : f32
    %1228 = vector.broadcast %cst_394 : f32 to vector<16x128xf32>
    %1229 = arith.mulf %1228, %1227 : vector<16x128xf32>
    %1230 = arith.addf %1225, %1229 : vector<16x128xf32>
    %cst_395 = arith.constant 2.000000e+00 : f32
    %1231 = vector.broadcast %cst_395 : f32 to vector<16x128xf32>
    %1232 = arith.mulf %1231, %1200 : vector<16x128xf32>
    %1233 = arith.subf %1197, %1232 : vector<16x128xf32>
    %1234 = arith.addf %1233, %1201 : vector<16x128xf32>
    %1235 = arith.mulf %1234, %1234 : vector<16x128xf32>
    %cst_396 = arith.constant 1.08333337 : f32
    %1236 = vector.broadcast %cst_396 : f32 to vector<16x128xf32>
    %1237 = arith.mulf %1236, %1235 : vector<16x128xf32>
    %cst_397 = arith.constant 3.000000e+00 : f32
    %1238 = vector.broadcast %cst_397 : f32 to vector<16x128xf32>
    %1239 = arith.mulf %1238, %1197 : vector<16x128xf32>
    %cst_398 = arith.constant 4.000000e+00 : f32
    %1240 = vector.broadcast %cst_398 : f32 to vector<16x128xf32>
    %1241 = arith.mulf %1240, %1200 : vector<16x128xf32>
    %1242 = arith.subf %1239, %1241 : vector<16x128xf32>
    %1243 = arith.addf %1242, %1201 : vector<16x128xf32>
    %1244 = arith.mulf %1243, %1243 : vector<16x128xf32>
    %cst_399 = arith.constant 2.500000e-01 : f32
    %1245 = vector.broadcast %cst_399 : f32 to vector<16x128xf32>
    %1246 = arith.mulf %1245, %1244 : vector<16x128xf32>
    %1247 = arith.addf %1237, %1246 : vector<16x128xf32>
    %cst_400 = arith.constant 9.99999982E-14 : f32
    %1248 = vector.broadcast %cst_400 : f32 to vector<16x128xf32>
    %1249 = arith.addf %1248, %1218 : vector<16x128xf32>
    %1250 = arith.mulf %1249, %1249 : vector<16x128xf32>
    %1251 = tpu.reciprocal %1250 {approx = true} : vector<16x128xf32> -> vector<16x128xf32>
    %cst_401 = arith.constant 9.99999982E-14 : f32
    %1252 = vector.broadcast %cst_401 : f32 to vector<16x128xf32>
    %1253 = arith.addf %1252, %1230 : vector<16x128xf32>
    %1254 = arith.mulf %1253, %1253 : vector<16x128xf32>
    %1255 = tpu.reciprocal %1254 {approx = true} : vector<16x128xf32> -> vector<16x128xf32>
    %cst_402 = arith.constant 9.99999982E-14 : f32
    %1256 = vector.broadcast %cst_402 : f32 to vector<16x128xf32>
    %1257 = arith.addf %1256, %1247 : vector<16x128xf32>
    %1258 = arith.mulf %1257, %1257 : vector<16x128xf32>
    %1259 = tpu.reciprocal %1258 {approx = true} : vector<16x128xf32> -> vector<16x128xf32>
    %cst_403 = arith.constant 1.000000e-01 : f32
    %1260 = vector.broadcast %cst_403 : f32 to vector<16x128xf32>
    %1261 = arith.mulf %1260, %1251 : vector<16x128xf32>
    %cst_404 = arith.constant 6.000000e-01 : f32
    %1262 = vector.broadcast %cst_404 : f32 to vector<16x128xf32>
    %1263 = arith.mulf %1262, %1255 : vector<16x128xf32>
    %cst_405 = arith.constant 3.000000e-01 : f32
    %1264 = vector.broadcast %cst_405 : f32 to vector<16x128xf32>
    %1265 = arith.mulf %1264, %1259 : vector<16x128xf32>
    %cst_406 = arith.constant 2.500000e-01 : f32
    %1266 = vector.broadcast %cst_406 : f32 to vector<16x128xf32>
    %1267 = arith.mulf %1266, %1251 : vector<16x128xf32>
    %cst_407 = arith.constant 5.000000e-01 : f32
    %1268 = vector.broadcast %cst_407 : f32 to vector<16x128xf32>
    %1269 = arith.mulf %1268, %1255 : vector<16x128xf32>
    %cst_408 = arith.constant 2.500000e-01 : f32
    %1270 = vector.broadcast %cst_408 : f32 to vector<16x128xf32>
    %1271 = arith.mulf %1270, %1259 : vector<16x128xf32>
    %1272 = arith.addf %1261, %1263 : vector<16x128xf32>
    %1273 = arith.addf %1272, %1265 : vector<16x128xf32>
    %1274 = tpu.reciprocal %1273 : vector<16x128xf32> -> vector<16x128xf32>
    %1275 = arith.addf %1267, %1269 : vector<16x128xf32>
    %1276 = arith.addf %1275, %1271 : vector<16x128xf32>
    %1277 = tpu.reciprocal %1276 : vector<16x128xf32> -> vector<16x128xf32>
    %1278 = arith.mulf %1261, %1274 : vector<16x128xf32>
    %1279 = arith.mulf %1263, %1274 : vector<16x128xf32>
    %1280 = arith.mulf %1265, %1274 : vector<16x128xf32>
    %1281 = arith.mulf %1267, %1277 : vector<16x128xf32>
    %1282 = arith.mulf %1269, %1277 : vector<16x128xf32>
    %1283 = arith.mulf %1271, %1277 : vector<16x128xf32>
    %cst_409 = arith.constant 2.000000e+00 : f32
    %1284 = vector.broadcast %cst_409 : f32 to vector<16x128xf32>
    %1285 = arith.mulf %1284, %1198 : vector<16x128xf32>
    %cst_410 = arith.constant 7.000000e+00 : f32
    %1286 = vector.broadcast %cst_410 : f32 to vector<16x128xf32>
    %1287 = arith.mulf %1286, %1199 : vector<16x128xf32>
    %1288 = arith.subf %1285, %1287 : vector<16x128xf32>
    %cst_411 = arith.constant 1.100000e+01 : f32
    %1289 = vector.broadcast %cst_411 : f32 to vector<16x128xf32>
    %1290 = arith.mulf %1289, %1197 : vector<16x128xf32>
    %1291 = arith.addf %1288, %1290 : vector<16x128xf32>
    %cst_412 = arith.constant 0.166666672 : f32
    %1292 = vector.broadcast %cst_412 : f32 to vector<16x128xf32>
    %1293 = arith.mulf %1291, %1292 : vector<16x128xf32>
    %cst_413 = arith.constant 0.000000e+00 : f32
    %1294 = vector.broadcast %cst_413 : f32 to vector<16x128xf32>
    %1295 = arith.subf %1294, %1199 : vector<16x128xf32>
    %cst_414 = arith.constant 5.000000e+00 : f32
    %1296 = vector.broadcast %cst_414 : f32 to vector<16x128xf32>
    %1297 = arith.mulf %1296, %1197 : vector<16x128xf32>
    %1298 = arith.addf %1295, %1297 : vector<16x128xf32>
    %cst_415 = arith.constant 2.000000e+00 : f32
    %1299 = vector.broadcast %cst_415 : f32 to vector<16x128xf32>
    %1300 = arith.mulf %1299, %1200 : vector<16x128xf32>
    %1301 = arith.addf %1298, %1300 : vector<16x128xf32>
    %cst_416 = arith.constant 0.166666672 : f32
    %1302 = vector.broadcast %cst_416 : f32 to vector<16x128xf32>
    %1303 = arith.mulf %1301, %1302 : vector<16x128xf32>
    %cst_417 = arith.constant 2.000000e+00 : f32
    %1304 = vector.broadcast %cst_417 : f32 to vector<16x128xf32>
    %1305 = arith.mulf %1304, %1197 : vector<16x128xf32>
    %cst_418 = arith.constant 5.000000e+00 : f32
    %1306 = vector.broadcast %cst_418 : f32 to vector<16x128xf32>
    %1307 = arith.mulf %1306, %1200 : vector<16x128xf32>
    %1308 = arith.addf %1305, %1307 : vector<16x128xf32>
    %1309 = arith.subf %1308, %1201 : vector<16x128xf32>
    %cst_419 = arith.constant 0.166666672 : f32
    %1310 = vector.broadcast %cst_419 : f32 to vector<16x128xf32>
    %1311 = arith.mulf %1309, %1310 : vector<16x128xf32>
    %1312 = arith.mulf %1278, %1293 : vector<16x128xf32>
    %1313 = arith.mulf %1279, %1303 : vector<16x128xf32>
    %1314 = arith.addf %1312, %1313 : vector<16x128xf32>
    %1315 = arith.mulf %1280, %1311 : vector<16x128xf32>
    %1316 = arith.addf %1314, %1315 : vector<16x128xf32>
    %c1_i32_420 = arith.constant 1 : i32
    %1317 = tpu.dynamic_rotate %1316 by %c1_i32_420 dim 1 : vector<16x128xf32>, i32 -> vector<16x128xf32>
    %1318 = arith.subf %1316, %1317 : vector<16x128xf32>
    %cst_421 = arith.constant 10.666667 : f32
    %1319 = vector.broadcast %cst_421 : f32 to vector<16x128xf32>
    %1320 = arith.mulf %1318, %1319 : vector<16x128xf32>
    %cst_422 = arith.constant 2.000000e+00 : f32
    %1321 = vector.broadcast %cst_422 : f32 to vector<16x128xf32>
    %1322 = arith.mulf %1321, %1199 : vector<16x128xf32>
    %1323 = arith.subf %1198, %1322 : vector<16x128xf32>
    %1324 = arith.addf %1323, %1197 : vector<16x128xf32>
    %cst_423 = arith.constant 2.000000e+00 : f32
    %1325 = vector.broadcast %cst_423 : f32 to vector<16x128xf32>
    %1326 = arith.mulf %1325, %1197 : vector<16x128xf32>
    %1327 = arith.subf %1199, %1326 : vector<16x128xf32>
    %1328 = arith.addf %1327, %1200 : vector<16x128xf32>
    %cst_424 = arith.constant 2.000000e+00 : f32
    %1329 = vector.broadcast %cst_424 : f32 to vector<16x128xf32>
    %1330 = arith.mulf %1329, %1200 : vector<16x128xf32>
    %1331 = arith.subf %1197, %1330 : vector<16x128xf32>
    %1332 = arith.addf %1331, %1201 : vector<16x128xf32>
    %1333 = arith.mulf %1281, %1324 : vector<16x128xf32>
    %1334 = arith.mulf %1282, %1328 : vector<16x128xf32>
    %1335 = arith.addf %1333, %1334 : vector<16x128xf32>
    %1336 = arith.mulf %1283, %1332 : vector<16x128xf32>
    %1337 = arith.addf %1335, %1336 : vector<16x128xf32>
    %cst_425 = arith.constant 113.777779 : f32
    %1338 = vector.broadcast %cst_425 : f32 to vector<16x128xf32>
    %1339 = arith.mulf %1337, %1338 : vector<16x128xf32>
    %cst_426 = arith.constant 4.500000e-02 : f32
    %1340 = vector.broadcast %cst_426 : f32 to vector<16x128xf32>
    %1341 = arith.mulf %1340, %1339 : vector<16x128xf32>
    %cst_427 = arith.constant 5.500000e-02 : f32
    %1342 = vector.broadcast %cst_427 : f32 to vector<16x128xf32>
    %1343 = arith.mulf %1342, %1320 : vector<16x128xf32>
    %1344 = arith.addf %1341, %1343 : vector<16x128xf32>
    %cst_428 = arith.constant 1.000000e-01 : f32
    %1345 = vector.broadcast %cst_428 : f32 to vector<16x128xf32>
    %1346 = arith.mulf %1345, %1197 : vector<16x128xf32>
    %1347 = arith.subf %1344, %1346 : vector<16x128xf32>
    %cst_429 = arith.constant 0.0769230798 : f32
    %1348 = vector.broadcast %cst_429 : f32 to vector<16x128xf32>
    %1349 = arith.mulf %1348, %1347 : vector<16x128xf32>
    %1350 = arith.addf %1197, %1349 : vector<16x128xf32>
    %cst_430 = arith.constant 0.000000e+00 : f32
    %1351 = vector.broadcast %cst_430 : f32 to vector<16x128xf32>
    %1352 = arith.select %11, %1351, %1350 : vector<16x128xi1>, vector<16x128xf32>
    %cst_431 = arith.constant 0.0186622273 : f32
    %1353 = vector.broadcast %cst_431 : f32 to vector<16x128xf32>
    %1354 = arith.select %6, %1353, %1352 : vector<16x128xi1>, vector<16x128xf32>
    %c2_i32_432 = arith.constant 2 : i32
    %1355 = tpu.dynamic_rotate %1354 by %c2_i32_432 dim 1 : vector<16x128xf32>, i32 -> vector<16x128xf32>
    %c1_i32_433 = arith.constant 1 : i32
    %1356 = tpu.dynamic_rotate %1354 by %c1_i32_433 dim 1 : vector<16x128xf32>, i32 -> vector<16x128xf32>
    %c127_i32_434 = arith.constant 127 : i32
    %1357 = tpu.dynamic_rotate %1354 by %c127_i32_434 dim 1 : vector<16x128xf32>, i32 -> vector<16x128xf32>
    %c126_i32_435 = arith.constant 126 : i32
    %1358 = tpu.dynamic_rotate %1354 by %c126_i32_435 dim 1 : vector<16x128xf32>, i32 -> vector<16x128xf32>
    %cst_436 = arith.constant 2.000000e+00 : f32
    %1359 = vector.broadcast %cst_436 : f32 to vector<16x128xf32>
    %1360 = arith.mulf %1359, %1356 : vector<16x128xf32>
    %1361 = arith.subf %1355, %1360 : vector<16x128xf32>
    %1362 = arith.addf %1361, %1354 : vector<16x128xf32>
    %1363 = arith.mulf %1362, %1362 : vector<16x128xf32>
    %cst_437 = arith.constant 1.08333337 : f32
    %1364 = vector.broadcast %cst_437 : f32 to vector<16x128xf32>
    %1365 = arith.mulf %1364, %1363 : vector<16x128xf32>
    %cst_438 = arith.constant 4.000000e+00 : f32
    %1366 = vector.broadcast %cst_438 : f32 to vector<16x128xf32>
    %1367 = arith.mulf %1366, %1356 : vector<16x128xf32>
    %1368 = arith.subf %1355, %1367 : vector<16x128xf32>
    %cst_439 = arith.constant 3.000000e+00 : f32
    %1369 = vector.broadcast %cst_439 : f32 to vector<16x128xf32>
    %1370 = arith.mulf %1369, %1354 : vector<16x128xf32>
    %1371 = arith.addf %1368, %1370 : vector<16x128xf32>
    %1372 = arith.mulf %1371, %1371 : vector<16x128xf32>
    %cst_440 = arith.constant 2.500000e-01 : f32
    %1373 = vector.broadcast %cst_440 : f32 to vector<16x128xf32>
    %1374 = arith.mulf %1373, %1372 : vector<16x128xf32>
    %1375 = arith.addf %1365, %1374 : vector<16x128xf32>
    %cst_441 = arith.constant 2.000000e+00 : f32
    %1376 = vector.broadcast %cst_441 : f32 to vector<16x128xf32>
    %1377 = arith.mulf %1376, %1354 : vector<16x128xf32>
    %1378 = arith.subf %1356, %1377 : vector<16x128xf32>
    %1379 = arith.addf %1378, %1357 : vector<16x128xf32>
    %1380 = arith.mulf %1379, %1379 : vector<16x128xf32>
    %cst_442 = arith.constant 1.08333337 : f32
    %1381 = vector.broadcast %cst_442 : f32 to vector<16x128xf32>
    %1382 = arith.mulf %1381, %1380 : vector<16x128xf32>
    %1383 = arith.subf %1356, %1357 : vector<16x128xf32>
    %1384 = arith.mulf %1383, %1383 : vector<16x128xf32>
    %cst_443 = arith.constant 2.500000e-01 : f32
    %1385 = vector.broadcast %cst_443 : f32 to vector<16x128xf32>
    %1386 = arith.mulf %1385, %1384 : vector<16x128xf32>
    %1387 = arith.addf %1382, %1386 : vector<16x128xf32>
    %cst_444 = arith.constant 2.000000e+00 : f32
    %1388 = vector.broadcast %cst_444 : f32 to vector<16x128xf32>
    %1389 = arith.mulf %1388, %1357 : vector<16x128xf32>
    %1390 = arith.subf %1354, %1389 : vector<16x128xf32>
    %1391 = arith.addf %1390, %1358 : vector<16x128xf32>
    %1392 = arith.mulf %1391, %1391 : vector<16x128xf32>
    %cst_445 = arith.constant 1.08333337 : f32
    %1393 = vector.broadcast %cst_445 : f32 to vector<16x128xf32>
    %1394 = arith.mulf %1393, %1392 : vector<16x128xf32>
    %cst_446 = arith.constant 3.000000e+00 : f32
    %1395 = vector.broadcast %cst_446 : f32 to vector<16x128xf32>
    %1396 = arith.mulf %1395, %1354 : vector<16x128xf32>
    %cst_447 = arith.constant 4.000000e+00 : f32
    %1397 = vector.broadcast %cst_447 : f32 to vector<16x128xf32>
    %1398 = arith.mulf %1397, %1357 : vector<16x128xf32>
    %1399 = arith.subf %1396, %1398 : vector<16x128xf32>
    %1400 = arith.addf %1399, %1358 : vector<16x128xf32>
    %1401 = arith.mulf %1400, %1400 : vector<16x128xf32>
    %cst_448 = arith.constant 2.500000e-01 : f32
    %1402 = vector.broadcast %cst_448 : f32 to vector<16x128xf32>
    %1403 = arith.mulf %1402, %1401 : vector<16x128xf32>
    %1404 = arith.addf %1394, %1403 : vector<16x128xf32>
    %cst_449 = arith.constant 9.99999982E-14 : f32
    %1405 = vector.broadcast %cst_449 : f32 to vector<16x128xf32>
    %1406 = arith.addf %1405, %1375 : vector<16x128xf32>
    %1407 = arith.mulf %1406, %1406 : vector<16x128xf32>
    %1408 = tpu.reciprocal %1407 {approx = true} : vector<16x128xf32> -> vector<16x128xf32>
    %cst_450 = arith.constant 9.99999982E-14 : f32
    %1409 = vector.broadcast %cst_450 : f32 to vector<16x128xf32>
    %1410 = arith.addf %1409, %1387 : vector<16x128xf32>
    %1411 = arith.mulf %1410, %1410 : vector<16x128xf32>
    %1412 = tpu.reciprocal %1411 {approx = true} : vector<16x128xf32> -> vector<16x128xf32>
    %cst_451 = arith.constant 9.99999982E-14 : f32
    %1413 = vector.broadcast %cst_451 : f32 to vector<16x128xf32>
    %1414 = arith.addf %1413, %1404 : vector<16x128xf32>
    %1415 = arith.mulf %1414, %1414 : vector<16x128xf32>
    %1416 = tpu.reciprocal %1415 {approx = true} : vector<16x128xf32> -> vector<16x128xf32>
    %cst_452 = arith.constant 1.000000e-01 : f32
    %1417 = vector.broadcast %cst_452 : f32 to vector<16x128xf32>
    %1418 = arith.mulf %1417, %1408 : vector<16x128xf32>
    %cst_453 = arith.constant 6.000000e-01 : f32
    %1419 = vector.broadcast %cst_453 : f32 to vector<16x128xf32>
    %1420 = arith.mulf %1419, %1412 : vector<16x128xf32>
    %cst_454 = arith.constant 3.000000e-01 : f32
    %1421 = vector.broadcast %cst_454 : f32 to vector<16x128xf32>
    %1422 = arith.mulf %1421, %1416 : vector<16x128xf32>
    %cst_455 = arith.constant 2.500000e-01 : f32
    %1423 = vector.broadcast %cst_455 : f32 to vector<16x128xf32>
    %1424 = arith.mulf %1423, %1408 : vector<16x128xf32>
    %cst_456 = arith.constant 5.000000e-01 : f32
    %1425 = vector.broadcast %cst_456 : f32 to vector<16x128xf32>
    %1426 = arith.mulf %1425, %1412 : vector<16x128xf32>
    %cst_457 = arith.constant 2.500000e-01 : f32
    %1427 = vector.broadcast %cst_457 : f32 to vector<16x128xf32>
    %1428 = arith.mulf %1427, %1416 : vector<16x128xf32>
    %1429 = arith.addf %1418, %1420 : vector<16x128xf32>
    %1430 = arith.addf %1429, %1422 : vector<16x128xf32>
    %1431 = tpu.reciprocal %1430 : vector<16x128xf32> -> vector<16x128xf32>
    %1432 = arith.addf %1424, %1426 : vector<16x128xf32>
    %1433 = arith.addf %1432, %1428 : vector<16x128xf32>
    %1434 = tpu.reciprocal %1433 : vector<16x128xf32> -> vector<16x128xf32>
    %1435 = arith.mulf %1418, %1431 : vector<16x128xf32>
    %1436 = arith.mulf %1420, %1431 : vector<16x128xf32>
    %1437 = arith.mulf %1422, %1431 : vector<16x128xf32>
    %1438 = arith.mulf %1424, %1434 : vector<16x128xf32>
    %1439 = arith.mulf %1426, %1434 : vector<16x128xf32>
    %1440 = arith.mulf %1428, %1434 : vector<16x128xf32>
    %cst_458 = arith.constant 2.000000e+00 : f32
    %1441 = vector.broadcast %cst_458 : f32 to vector<16x128xf32>
    %1442 = arith.mulf %1441, %1355 : vector<16x128xf32>
    %cst_459 = arith.constant 7.000000e+00 : f32
    %1443 = vector.broadcast %cst_459 : f32 to vector<16x128xf32>
    %1444 = arith.mulf %1443, %1356 : vector<16x128xf32>
    %1445 = arith.subf %1442, %1444 : vector<16x128xf32>
    %cst_460 = arith.constant 1.100000e+01 : f32
    %1446 = vector.broadcast %cst_460 : f32 to vector<16x128xf32>
    %1447 = arith.mulf %1446, %1354 : vector<16x128xf32>
    %1448 = arith.addf %1445, %1447 : vector<16x128xf32>
    %cst_461 = arith.constant 0.166666672 : f32
    %1449 = vector.broadcast %cst_461 : f32 to vector<16x128xf32>
    %1450 = arith.mulf %1448, %1449 : vector<16x128xf32>
    %cst_462 = arith.constant 0.000000e+00 : f32
    %1451 = vector.broadcast %cst_462 : f32 to vector<16x128xf32>
    %1452 = arith.subf %1451, %1356 : vector<16x128xf32>
    %cst_463 = arith.constant 5.000000e+00 : f32
    %1453 = vector.broadcast %cst_463 : f32 to vector<16x128xf32>
    %1454 = arith.mulf %1453, %1354 : vector<16x128xf32>
    %1455 = arith.addf %1452, %1454 : vector<16x128xf32>
    %cst_464 = arith.constant 2.000000e+00 : f32
    %1456 = vector.broadcast %cst_464 : f32 to vector<16x128xf32>
    %1457 = arith.mulf %1456, %1357 : vector<16x128xf32>
    %1458 = arith.addf %1455, %1457 : vector<16x128xf32>
    %cst_465 = arith.constant 0.166666672 : f32
    %1459 = vector.broadcast %cst_465 : f32 to vector<16x128xf32>
    %1460 = arith.mulf %1458, %1459 : vector<16x128xf32>
    %cst_466 = arith.constant 2.000000e+00 : f32
    %1461 = vector.broadcast %cst_466 : f32 to vector<16x128xf32>
    %1462 = arith.mulf %1461, %1354 : vector<16x128xf32>
    %cst_467 = arith.constant 5.000000e+00 : f32
    %1463 = vector.broadcast %cst_467 : f32 to vector<16x128xf32>
    %1464 = arith.mulf %1463, %1357 : vector<16x128xf32>
    %1465 = arith.addf %1462, %1464 : vector<16x128xf32>
    %1466 = arith.subf %1465, %1358 : vector<16x128xf32>
    %cst_468 = arith.constant 0.166666672 : f32
    %1467 = vector.broadcast %cst_468 : f32 to vector<16x128xf32>
    %1468 = arith.mulf %1466, %1467 : vector<16x128xf32>
    %1469 = arith.mulf %1435, %1450 : vector<16x128xf32>
    %1470 = arith.mulf %1436, %1460 : vector<16x128xf32>
    %1471 = arith.addf %1469, %1470 : vector<16x128xf32>
    %1472 = arith.mulf %1437, %1468 : vector<16x128xf32>
    %1473 = arith.addf %1471, %1472 : vector<16x128xf32>
    %c1_i32_469 = arith.constant 1 : i32
    %1474 = tpu.dynamic_rotate %1473 by %c1_i32_469 dim 1 : vector<16x128xf32>, i32 -> vector<16x128xf32>
    %1475 = arith.subf %1473, %1474 : vector<16x128xf32>
    %cst_470 = arith.constant 10.666667 : f32
    %1476 = vector.broadcast %cst_470 : f32 to vector<16x128xf32>
    %1477 = arith.mulf %1475, %1476 : vector<16x128xf32>
    %cst_471 = arith.constant 2.000000e+00 : f32
    %1478 = vector.broadcast %cst_471 : f32 to vector<16x128xf32>
    %1479 = arith.mulf %1478, %1356 : vector<16x128xf32>
    %1480 = arith.subf %1355, %1479 : vector<16x128xf32>
    %1481 = arith.addf %1480, %1354 : vector<16x128xf32>
    %cst_472 = arith.constant 2.000000e+00 : f32
    %1482 = vector.broadcast %cst_472 : f32 to vector<16x128xf32>
    %1483 = arith.mulf %1482, %1354 : vector<16x128xf32>
    %1484 = arith.subf %1356, %1483 : vector<16x128xf32>
    %1485 = arith.addf %1484, %1357 : vector<16x128xf32>
    %cst_473 = arith.constant 2.000000e+00 : f32
    %1486 = vector.broadcast %cst_473 : f32 to vector<16x128xf32>
    %1487 = arith.mulf %1486, %1357 : vector<16x128xf32>
    %1488 = arith.subf %1354, %1487 : vector<16x128xf32>
    %1489 = arith.addf %1488, %1358 : vector<16x128xf32>
    %1490 = arith.mulf %1438, %1481 : vector<16x128xf32>
    %1491 = arith.mulf %1439, %1485 : vector<16x128xf32>
    %1492 = arith.addf %1490, %1491 : vector<16x128xf32>
    %1493 = arith.mulf %1440, %1489 : vector<16x128xf32>
    %1494 = arith.addf %1492, %1493 : vector<16x128xf32>
    %cst_474 = arith.constant 113.777779 : f32
    %1495 = vector.broadcast %cst_474 : f32 to vector<16x128xf32>
    %1496 = arith.mulf %1494, %1495 : vector<16x128xf32>
    %cst_475 = arith.constant 4.500000e-02 : f32
    %1497 = vector.broadcast %cst_475 : f32 to vector<16x128xf32>
    %1498 = arith.mulf %1497, %1496 : vector<16x128xf32>
    %cst_476 = arith.constant 5.500000e-02 : f32
    %1499 = vector.broadcast %cst_476 : f32 to vector<16x128xf32>
    %1500 = arith.mulf %1499, %1477 : vector<16x128xf32>
    %1501 = arith.addf %1498, %1500 : vector<16x128xf32>
    %cst_477 = arith.constant 1.000000e-01 : f32
    %1502 = vector.broadcast %cst_477 : f32 to vector<16x128xf32>
    %1503 = arith.mulf %1502, %1354 : vector<16x128xf32>
    %1504 = arith.subf %1501, %1503 : vector<16x128xf32>
    %cst_478 = arith.constant 0.0769230798 : f32
    %1505 = vector.broadcast %cst_478 : f32 to vector<16x128xf32>
    %1506 = arith.mulf %1505, %1504 : vector<16x128xf32>
    %1507 = arith.addf %1354, %1506 : vector<16x128xf32>
    %cst_479 = arith.constant 0.000000e+00 : f32
    %1508 = vector.broadcast %cst_479 : f32 to vector<16x128xf32>
    %1509 = arith.select %11, %1508, %1507 : vector<16x128xi1>, vector<16x128xf32>
    %cst_480 = arith.constant 0.0185192209 : f32
    %1510 = vector.broadcast %cst_480 : f32 to vector<16x128xf32>
    %1511 = arith.select %6, %1510, %1509 : vector<16x128xi1>, vector<16x128xf32>
    %c2_i32_481 = arith.constant 2 : i32
    %1512 = tpu.dynamic_rotate %1511 by %c2_i32_481 dim 1 : vector<16x128xf32>, i32 -> vector<16x128xf32>
    %c1_i32_482 = arith.constant 1 : i32
    %1513 = tpu.dynamic_rotate %1511 by %c1_i32_482 dim 1 : vector<16x128xf32>, i32 -> vector<16x128xf32>
    %c127_i32_483 = arith.constant 127 : i32
    %1514 = tpu.dynamic_rotate %1511 by %c127_i32_483 dim 1 : vector<16x128xf32>, i32 -> vector<16x128xf32>
    %c126_i32_484 = arith.constant 126 : i32
    %1515 = tpu.dynamic_rotate %1511 by %c126_i32_484 dim 1 : vector<16x128xf32>, i32 -> vector<16x128xf32>
    %cst_485 = arith.constant 2.000000e+00 : f32
    %1516 = vector.broadcast %cst_485 : f32 to vector<16x128xf32>
    %1517 = arith.mulf %1516, %1513 : vector<16x128xf32>
    %1518 = arith.subf %1512, %1517 : vector<16x128xf32>
    %1519 = arith.addf %1518, %1511 : vector<16x128xf32>
    %1520 = arith.mulf %1519, %1519 : vector<16x128xf32>
    %cst_486 = arith.constant 1.08333337 : f32
    %1521 = vector.broadcast %cst_486 : f32 to vector<16x128xf32>
    %1522 = arith.mulf %1521, %1520 : vector<16x128xf32>
    %cst_487 = arith.constant 4.000000e+00 : f32
    %1523 = vector.broadcast %cst_487 : f32 to vector<16x128xf32>
    %1524 = arith.mulf %1523, %1513 : vector<16x128xf32>
    %1525 = arith.subf %1512, %1524 : vector<16x128xf32>
    %cst_488 = arith.constant 3.000000e+00 : f32
    %1526 = vector.broadcast %cst_488 : f32 to vector<16x128xf32>
    %1527 = arith.mulf %1526, %1511 : vector<16x128xf32>
    %1528 = arith.addf %1525, %1527 : vector<16x128xf32>
    %1529 = arith.mulf %1528, %1528 : vector<16x128xf32>
    %cst_489 = arith.constant 2.500000e-01 : f32
    %1530 = vector.broadcast %cst_489 : f32 to vector<16x128xf32>
    %1531 = arith.mulf %1530, %1529 : vector<16x128xf32>
    %1532 = arith.addf %1522, %1531 : vector<16x128xf32>
    %cst_490 = arith.constant 2.000000e+00 : f32
    %1533 = vector.broadcast %cst_490 : f32 to vector<16x128xf32>
    %1534 = arith.mulf %1533, %1511 : vector<16x128xf32>
    %1535 = arith.subf %1513, %1534 : vector<16x128xf32>
    %1536 = arith.addf %1535, %1514 : vector<16x128xf32>
    %1537 = arith.mulf %1536, %1536 : vector<16x128xf32>
    %cst_491 = arith.constant 1.08333337 : f32
    %1538 = vector.broadcast %cst_491 : f32 to vector<16x128xf32>
    %1539 = arith.mulf %1538, %1537 : vector<16x128xf32>
    %1540 = arith.subf %1513, %1514 : vector<16x128xf32>
    %1541 = arith.mulf %1540, %1540 : vector<16x128xf32>
    %cst_492 = arith.constant 2.500000e-01 : f32
    %1542 = vector.broadcast %cst_492 : f32 to vector<16x128xf32>
    %1543 = arith.mulf %1542, %1541 : vector<16x128xf32>
    %1544 = arith.addf %1539, %1543 : vector<16x128xf32>
    %cst_493 = arith.constant 2.000000e+00 : f32
    %1545 = vector.broadcast %cst_493 : f32 to vector<16x128xf32>
    %1546 = arith.mulf %1545, %1514 : vector<16x128xf32>
    %1547 = arith.subf %1511, %1546 : vector<16x128xf32>
    %1548 = arith.addf %1547, %1515 : vector<16x128xf32>
    %1549 = arith.mulf %1548, %1548 : vector<16x128xf32>
    %cst_494 = arith.constant 1.08333337 : f32
    %1550 = vector.broadcast %cst_494 : f32 to vector<16x128xf32>
    %1551 = arith.mulf %1550, %1549 : vector<16x128xf32>
    %cst_495 = arith.constant 3.000000e+00 : f32
    %1552 = vector.broadcast %cst_495 : f32 to vector<16x128xf32>
    %1553 = arith.mulf %1552, %1511 : vector<16x128xf32>
    %cst_496 = arith.constant 4.000000e+00 : f32
    %1554 = vector.broadcast %cst_496 : f32 to vector<16x128xf32>
    %1555 = arith.mulf %1554, %1514 : vector<16x128xf32>
    %1556 = arith.subf %1553, %1555 : vector<16x128xf32>
    %1557 = arith.addf %1556, %1515 : vector<16x128xf32>
    %1558 = arith.mulf %1557, %1557 : vector<16x128xf32>
    %cst_497 = arith.constant 2.500000e-01 : f32
    %1559 = vector.broadcast %cst_497 : f32 to vector<16x128xf32>
    %1560 = arith.mulf %1559, %1558 : vector<16x128xf32>
    %1561 = arith.addf %1551, %1560 : vector<16x128xf32>
    %cst_498 = arith.constant 9.99999982E-14 : f32
    %1562 = vector.broadcast %cst_498 : f32 to vector<16x128xf32>
    %1563 = arith.addf %1562, %1532 : vector<16x128xf32>
    %1564 = arith.mulf %1563, %1563 : vector<16x128xf32>
    %1565 = tpu.reciprocal %1564 {approx = true} : vector<16x128xf32> -> vector<16x128xf32>
    %cst_499 = arith.constant 9.99999982E-14 : f32
    %1566 = vector.broadcast %cst_499 : f32 to vector<16x128xf32>
    %1567 = arith.addf %1566, %1544 : vector<16x128xf32>
    %1568 = arith.mulf %1567, %1567 : vector<16x128xf32>
    %1569 = tpu.reciprocal %1568 {approx = true} : vector<16x128xf32> -> vector<16x128xf32>
    %cst_500 = arith.constant 9.99999982E-14 : f32
    %1570 = vector.broadcast %cst_500 : f32 to vector<16x128xf32>
    %1571 = arith.addf %1570, %1561 : vector<16x128xf32>
    %1572 = arith.mulf %1571, %1571 : vector<16x128xf32>
    %1573 = tpu.reciprocal %1572 {approx = true} : vector<16x128xf32> -> vector<16x128xf32>
    %cst_501 = arith.constant 1.000000e-01 : f32
    %1574 = vector.broadcast %cst_501 : f32 to vector<16x128xf32>
    %1575 = arith.mulf %1574, %1565 : vector<16x128xf32>
    %cst_502 = arith.constant 6.000000e-01 : f32
    %1576 = vector.broadcast %cst_502 : f32 to vector<16x128xf32>
    %1577 = arith.mulf %1576, %1569 : vector<16x128xf32>
    %cst_503 = arith.constant 3.000000e-01 : f32
    %1578 = vector.broadcast %cst_503 : f32 to vector<16x128xf32>
    %1579 = arith.mulf %1578, %1573 : vector<16x128xf32>
    %cst_504 = arith.constant 2.500000e-01 : f32
    %1580 = vector.broadcast %cst_504 : f32 to vector<16x128xf32>
    %1581 = arith.mulf %1580, %1565 : vector<16x128xf32>
    %cst_505 = arith.constant 5.000000e-01 : f32
    %1582 = vector.broadcast %cst_505 : f32 to vector<16x128xf32>
    %1583 = arith.mulf %1582, %1569 : vector<16x128xf32>
    %cst_506 = arith.constant 2.500000e-01 : f32
    %1584 = vector.broadcast %cst_506 : f32 to vector<16x128xf32>
    %1585 = arith.mulf %1584, %1573 : vector<16x128xf32>
    %1586 = arith.addf %1575, %1577 : vector<16x128xf32>
    %1587 = arith.addf %1586, %1579 : vector<16x128xf32>
    %1588 = tpu.reciprocal %1587 : vector<16x128xf32> -> vector<16x128xf32>
    %1589 = arith.addf %1581, %1583 : vector<16x128xf32>
    %1590 = arith.addf %1589, %1585 : vector<16x128xf32>
    %1591 = tpu.reciprocal %1590 : vector<16x128xf32> -> vector<16x128xf32>
    %1592 = arith.mulf %1575, %1588 : vector<16x128xf32>
    %1593 = arith.mulf %1577, %1588 : vector<16x128xf32>
    %1594 = arith.mulf %1579, %1588 : vector<16x128xf32>
    %1595 = arith.mulf %1581, %1591 : vector<16x128xf32>
    %1596 = arith.mulf %1583, %1591 : vector<16x128xf32>
    %1597 = arith.mulf %1585, %1591 : vector<16x128xf32>
    %cst_507 = arith.constant 2.000000e+00 : f32
    %1598 = vector.broadcast %cst_507 : f32 to vector<16x128xf32>
    %1599 = arith.mulf %1598, %1512 : vector<16x128xf32>
    %cst_508 = arith.constant 7.000000e+00 : f32
    %1600 = vector.broadcast %cst_508 : f32 to vector<16x128xf32>
    %1601 = arith.mulf %1600, %1513 : vector<16x128xf32>
    %1602 = arith.subf %1599, %1601 : vector<16x128xf32>
    %cst_509 = arith.constant 1.100000e+01 : f32
    %1603 = vector.broadcast %cst_509 : f32 to vector<16x128xf32>
    %1604 = arith.mulf %1603, %1511 : vector<16x128xf32>
    %1605 = arith.addf %1602, %1604 : vector<16x128xf32>
    %cst_510 = arith.constant 0.166666672 : f32
    %1606 = vector.broadcast %cst_510 : f32 to vector<16x128xf32>
    %1607 = arith.mulf %1605, %1606 : vector<16x128xf32>
    %cst_511 = arith.constant 0.000000e+00 : f32
    %1608 = vector.broadcast %cst_511 : f32 to vector<16x128xf32>
    %1609 = arith.subf %1608, %1513 : vector<16x128xf32>
    %cst_512 = arith.constant 5.000000e+00 : f32
    %1610 = vector.broadcast %cst_512 : f32 to vector<16x128xf32>
    %1611 = arith.mulf %1610, %1511 : vector<16x128xf32>
    %1612 = arith.addf %1609, %1611 : vector<16x128xf32>
    %cst_513 = arith.constant 2.000000e+00 : f32
    %1613 = vector.broadcast %cst_513 : f32 to vector<16x128xf32>
    %1614 = arith.mulf %1613, %1514 : vector<16x128xf32>
    %1615 = arith.addf %1612, %1614 : vector<16x128xf32>
    %cst_514 = arith.constant 0.166666672 : f32
    %1616 = vector.broadcast %cst_514 : f32 to vector<16x128xf32>
    %1617 = arith.mulf %1615, %1616 : vector<16x128xf32>
    %cst_515 = arith.constant 2.000000e+00 : f32
    %1618 = vector.broadcast %cst_515 : f32 to vector<16x128xf32>
    %1619 = arith.mulf %1618, %1511 : vector<16x128xf32>
    %cst_516 = arith.constant 5.000000e+00 : f32
    %1620 = vector.broadcast %cst_516 : f32 to vector<16x128xf32>
    %1621 = arith.mulf %1620, %1514 : vector<16x128xf32>
    %1622 = arith.addf %1619, %1621 : vector<16x128xf32>
    %1623 = arith.subf %1622, %1515 : vector<16x128xf32>
    %cst_517 = arith.constant 0.166666672 : f32
    %1624 = vector.broadcast %cst_517 : f32 to vector<16x128xf32>
    %1625 = arith.mulf %1623, %1624 : vector<16x128xf32>
    %1626 = arith.mulf %1592, %1607 : vector<16x128xf32>
    %1627 = arith.mulf %1593, %1617 : vector<16x128xf32>
    %1628 = arith.addf %1626, %1627 : vector<16x128xf32>
    %1629 = arith.mulf %1594, %1625 : vector<16x128xf32>
    %1630 = arith.addf %1628, %1629 : vector<16x128xf32>
    %c1_i32_518 = arith.constant 1 : i32
    %1631 = tpu.dynamic_rotate %1630 by %c1_i32_518 dim 1 : vector<16x128xf32>, i32 -> vector<16x128xf32>
    %1632 = arith.subf %1630, %1631 : vector<16x128xf32>
    %cst_519 = arith.constant 10.666667 : f32
    %1633 = vector.broadcast %cst_519 : f32 to vector<16x128xf32>
    %1634 = arith.mulf %1632, %1633 : vector<16x128xf32>
    %cst_520 = arith.constant 2.000000e+00 : f32
    %1635 = vector.broadcast %cst_520 : f32 to vector<16x128xf32>
    %1636 = arith.mulf %1635, %1513 : vector<16x128xf32>
    %1637 = arith.subf %1512, %1636 : vector<16x128xf32>
    %1638 = arith.addf %1637, %1511 : vector<16x128xf32>
    %cst_521 = arith.constant 2.000000e+00 : f32
    %1639 = vector.broadcast %cst_521 : f32 to vector<16x128xf32>
    %1640 = arith.mulf %1639, %1511 : vector<16x128xf32>
    %1641 = arith.subf %1513, %1640 : vector<16x128xf32>
    %1642 = arith.addf %1641, %1514 : vector<16x128xf32>
    %cst_522 = arith.constant 2.000000e+00 : f32
    %1643 = vector.broadcast %cst_522 : f32 to vector<16x128xf32>
    %1644 = arith.mulf %1643, %1514 : vector<16x128xf32>
    %1645 = arith.subf %1511, %1644 : vector<16x128xf32>
    %1646 = arith.addf %1645, %1515 : vector<16x128xf32>
    %1647 = arith.mulf %1595, %1638 : vector<16x128xf32>
    %1648 = arith.mulf %1596, %1642 : vector<16x128xf32>
    %1649 = arith.addf %1647, %1648 : vector<16x128xf32>
    %1650 = arith.mulf %1597, %1646 : vector<16x128xf32>
    %1651 = arith.addf %1649, %1650 : vector<16x128xf32>
    %cst_523 = arith.constant 113.777779 : f32
    %1652 = vector.broadcast %cst_523 : f32 to vector<16x128xf32>
    %1653 = arith.mulf %1651, %1652 : vector<16x128xf32>
    %cst_524 = arith.constant 4.500000e-02 : f32
    %1654 = vector.broadcast %cst_524 : f32 to vector<16x128xf32>
    %1655 = arith.mulf %1654, %1653 : vector<16x128xf32>
    %cst_525 = arith.constant 5.500000e-02 : f32
    %1656 = vector.broadcast %cst_525 : f32 to vector<16x128xf32>
    %1657 = arith.mulf %1656, %1634 : vector<16x128xf32>
    %1658 = arith.addf %1655, %1657 : vector<16x128xf32>
    %cst_526 = arith.constant 1.000000e-01 : f32
    %1659 = vector.broadcast %cst_526 : f32 to vector<16x128xf32>
    %1660 = arith.mulf %1659, %1511 : vector<16x128xf32>
    %1661 = arith.subf %1658, %1660 : vector<16x128xf32>
    %cst_527 = arith.constant 0.0769230798 : f32
    %1662 = vector.broadcast %cst_527 : f32 to vector<16x128xf32>
    %1663 = arith.mulf %1662, %1661 : vector<16x128xf32>
    %1664 = arith.addf %1511, %1663 : vector<16x128xf32>
    %cst_528 = arith.constant 0.000000e+00 : f32
    %1665 = vector.broadcast %cst_528 : f32 to vector<16x128xf32>
    %1666 = arith.select %11, %1665, %1664 : vector<16x128xi1>, vector<16x128xf32>
    %cst_529 = arith.constant 0.0183773134 : f32
    %1667 = vector.broadcast %cst_529 : f32 to vector<16x128xf32>
    %1668 = arith.select %6, %1667, %1666 : vector<16x128xi1>, vector<16x128xf32>
    %c2_i32_530 = arith.constant 2 : i32
    %1669 = tpu.dynamic_rotate %1668 by %c2_i32_530 dim 1 : vector<16x128xf32>, i32 -> vector<16x128xf32>
    %c1_i32_531 = arith.constant 1 : i32
    %1670 = tpu.dynamic_rotate %1668 by %c1_i32_531 dim 1 : vector<16x128xf32>, i32 -> vector<16x128xf32>
    %c127_i32_532 = arith.constant 127 : i32
    %1671 = tpu.dynamic_rotate %1668 by %c127_i32_532 dim 1 : vector<16x128xf32>, i32 -> vector<16x128xf32>
    %c126_i32_533 = arith.constant 126 : i32
    %1672 = tpu.dynamic_rotate %1668 by %c126_i32_533 dim 1 : vector<16x128xf32>, i32 -> vector<16x128xf32>
    %cst_534 = arith.constant 2.000000e+00 : f32
    %1673 = vector.broadcast %cst_534 : f32 to vector<16x128xf32>
    %1674 = arith.mulf %1673, %1670 : vector<16x128xf32>
    %1675 = arith.subf %1669, %1674 : vector<16x128xf32>
    %1676 = arith.addf %1675, %1668 : vector<16x128xf32>
    %1677 = arith.mulf %1676, %1676 : vector<16x128xf32>
    %cst_535 = arith.constant 1.08333337 : f32
    %1678 = vector.broadcast %cst_535 : f32 to vector<16x128xf32>
    %1679 = arith.mulf %1678, %1677 : vector<16x128xf32>
    %cst_536 = arith.constant 4.000000e+00 : f32
    %1680 = vector.broadcast %cst_536 : f32 to vector<16x128xf32>
    %1681 = arith.mulf %1680, %1670 : vector<16x128xf32>
    %1682 = arith.subf %1669, %1681 : vector<16x128xf32>
    %cst_537 = arith.constant 3.000000e+00 : f32
    %1683 = vector.broadcast %cst_537 : f32 to vector<16x128xf32>
    %1684 = arith.mulf %1683, %1668 : vector<16x128xf32>
    %1685 = arith.addf %1682, %1684 : vector<16x128xf32>
    %1686 = arith.mulf %1685, %1685 : vector<16x128xf32>
    %cst_538 = arith.constant 2.500000e-01 : f32
    %1687 = vector.broadcast %cst_538 : f32 to vector<16x128xf32>
    %1688 = arith.mulf %1687, %1686 : vector<16x128xf32>
    %1689 = arith.addf %1679, %1688 : vector<16x128xf32>
    %cst_539 = arith.constant 2.000000e+00 : f32
    %1690 = vector.broadcast %cst_539 : f32 to vector<16x128xf32>
    %1691 = arith.mulf %1690, %1668 : vector<16x128xf32>
    %1692 = arith.subf %1670, %1691 : vector<16x128xf32>
    %1693 = arith.addf %1692, %1671 : vector<16x128xf32>
    %1694 = arith.mulf %1693, %1693 : vector<16x128xf32>
    %cst_540 = arith.constant 1.08333337 : f32
    %1695 = vector.broadcast %cst_540 : f32 to vector<16x128xf32>
    %1696 = arith.mulf %1695, %1694 : vector<16x128xf32>
    %1697 = arith.subf %1670, %1671 : vector<16x128xf32>
    %1698 = arith.mulf %1697, %1697 : vector<16x128xf32>
    %cst_541 = arith.constant 2.500000e-01 : f32
    %1699 = vector.broadcast %cst_541 : f32 to vector<16x128xf32>
    %1700 = arith.mulf %1699, %1698 : vector<16x128xf32>
    %1701 = arith.addf %1696, %1700 : vector<16x128xf32>
    %cst_542 = arith.constant 2.000000e+00 : f32
    %1702 = vector.broadcast %cst_542 : f32 to vector<16x128xf32>
    %1703 = arith.mulf %1702, %1671 : vector<16x128xf32>
    %1704 = arith.subf %1668, %1703 : vector<16x128xf32>
    %1705 = arith.addf %1704, %1672 : vector<16x128xf32>
    %1706 = arith.mulf %1705, %1705 : vector<16x128xf32>
    %cst_543 = arith.constant 1.08333337 : f32
    %1707 = vector.broadcast %cst_543 : f32 to vector<16x128xf32>
    %1708 = arith.mulf %1707, %1706 : vector<16x128xf32>
    %cst_544 = arith.constant 3.000000e+00 : f32
    %1709 = vector.broadcast %cst_544 : f32 to vector<16x128xf32>
    %1710 = arith.mulf %1709, %1668 : vector<16x128xf32>
    %cst_545 = arith.constant 4.000000e+00 : f32
    %1711 = vector.broadcast %cst_545 : f32 to vector<16x128xf32>
    %1712 = arith.mulf %1711, %1671 : vector<16x128xf32>
    %1713 = arith.subf %1710, %1712 : vector<16x128xf32>
    %1714 = arith.addf %1713, %1672 : vector<16x128xf32>
    %1715 = arith.mulf %1714, %1714 : vector<16x128xf32>
    %cst_546 = arith.constant 2.500000e-01 : f32
    %1716 = vector.broadcast %cst_546 : f32 to vector<16x128xf32>
    %1717 = arith.mulf %1716, %1715 : vector<16x128xf32>
    %1718 = arith.addf %1708, %1717 : vector<16x128xf32>
    %cst_547 = arith.constant 9.99999982E-14 : f32
    %1719 = vector.broadcast %cst_547 : f32 to vector<16x128xf32>
    %1720 = arith.addf %1719, %1689 : vector<16x128xf32>
    %1721 = arith.mulf %1720, %1720 : vector<16x128xf32>
    %1722 = tpu.reciprocal %1721 {approx = true} : vector<16x128xf32> -> vector<16x128xf32>
    %cst_548 = arith.constant 9.99999982E-14 : f32
    %1723 = vector.broadcast %cst_548 : f32 to vector<16x128xf32>
    %1724 = arith.addf %1723, %1701 : vector<16x128xf32>
    %1725 = arith.mulf %1724, %1724 : vector<16x128xf32>
    %1726 = tpu.reciprocal %1725 {approx = true} : vector<16x128xf32> -> vector<16x128xf32>
    %cst_549 = arith.constant 9.99999982E-14 : f32
    %1727 = vector.broadcast %cst_549 : f32 to vector<16x128xf32>
    %1728 = arith.addf %1727, %1718 : vector<16x128xf32>
    %1729 = arith.mulf %1728, %1728 : vector<16x128xf32>
    %1730 = tpu.reciprocal %1729 {approx = true} : vector<16x128xf32> -> vector<16x128xf32>
    %cst_550 = arith.constant 1.000000e-01 : f32
    %1731 = vector.broadcast %cst_550 : f32 to vector<16x128xf32>
    %1732 = arith.mulf %1731, %1722 : vector<16x128xf32>
    %cst_551 = arith.constant 6.000000e-01 : f32
    %1733 = vector.broadcast %cst_551 : f32 to vector<16x128xf32>
    %1734 = arith.mulf %1733, %1726 : vector<16x128xf32>
    %cst_552 = arith.constant 3.000000e-01 : f32
    %1735 = vector.broadcast %cst_552 : f32 to vector<16x128xf32>
    %1736 = arith.mulf %1735, %1730 : vector<16x128xf32>
    %cst_553 = arith.constant 2.500000e-01 : f32
    %1737 = vector.broadcast %cst_553 : f32 to vector<16x128xf32>
    %1738 = arith.mulf %1737, %1722 : vector<16x128xf32>
    %cst_554 = arith.constant 5.000000e-01 : f32
    %1739 = vector.broadcast %cst_554 : f32 to vector<16x128xf32>
    %1740 = arith.mulf %1739, %1726 : vector<16x128xf32>
    %cst_555 = arith.constant 2.500000e-01 : f32
    %1741 = vector.broadcast %cst_555 : f32 to vector<16x128xf32>
    %1742 = arith.mulf %1741, %1730 : vector<16x128xf32>
    %1743 = arith.addf %1732, %1734 : vector<16x128xf32>
    %1744 = arith.addf %1743, %1736 : vector<16x128xf32>
    %1745 = tpu.reciprocal %1744 : vector<16x128xf32> -> vector<16x128xf32>
    %1746 = arith.addf %1738, %1740 : vector<16x128xf32>
    %1747 = arith.addf %1746, %1742 : vector<16x128xf32>
    %1748 = tpu.reciprocal %1747 : vector<16x128xf32> -> vector<16x128xf32>
    %1749 = arith.mulf %1732, %1745 : vector<16x128xf32>
    %1750 = arith.mulf %1734, %1745 : vector<16x128xf32>
    %1751 = arith.mulf %1736, %1745 : vector<16x128xf32>
    %1752 = arith.mulf %1738, %1748 : vector<16x128xf32>
    %1753 = arith.mulf %1740, %1748 : vector<16x128xf32>
    %1754 = arith.mulf %1742, %1748 : vector<16x128xf32>
    %cst_556 = arith.constant 2.000000e+00 : f32
    %1755 = vector.broadcast %cst_556 : f32 to vector<16x128xf32>
    %1756 = arith.mulf %1755, %1669 : vector<16x128xf32>
    %cst_557 = arith.constant 7.000000e+00 : f32
    %1757 = vector.broadcast %cst_557 : f32 to vector<16x128xf32>
    %1758 = arith.mulf %1757, %1670 : vector<16x128xf32>
    %1759 = arith.subf %1756, %1758 : vector<16x128xf32>
    %cst_558 = arith.constant 1.100000e+01 : f32
    %1760 = vector.broadcast %cst_558 : f32 to vector<16x128xf32>
    %1761 = arith.mulf %1760, %1668 : vector<16x128xf32>
    %1762 = arith.addf %1759, %1761 : vector<16x128xf32>
    %cst_559 = arith.constant 0.166666672 : f32
    %1763 = vector.broadcast %cst_559 : f32 to vector<16x128xf32>
    %1764 = arith.mulf %1762, %1763 : vector<16x128xf32>
    %cst_560 = arith.constant 0.000000e+00 : f32
    %1765 = vector.broadcast %cst_560 : f32 to vector<16x128xf32>
    %1766 = arith.subf %1765, %1670 : vector<16x128xf32>
    %cst_561 = arith.constant 5.000000e+00 : f32
    %1767 = vector.broadcast %cst_561 : f32 to vector<16x128xf32>
    %1768 = arith.mulf %1767, %1668 : vector<16x128xf32>
    %1769 = arith.addf %1766, %1768 : vector<16x128xf32>
    %cst_562 = arith.constant 2.000000e+00 : f32
    %1770 = vector.broadcast %cst_562 : f32 to vector<16x128xf32>
    %1771 = arith.mulf %1770, %1671 : vector<16x128xf32>
    %1772 = arith.addf %1769, %1771 : vector<16x128xf32>
    %cst_563 = arith.constant 0.166666672 : f32
    %1773 = vector.broadcast %cst_563 : f32 to vector<16x128xf32>
    %1774 = arith.mulf %1772, %1773 : vector<16x128xf32>
    %cst_564 = arith.constant 2.000000e+00 : f32
    %1775 = vector.broadcast %cst_564 : f32 to vector<16x128xf32>
    %1776 = arith.mulf %1775, %1668 : vector<16x128xf32>
    %cst_565 = arith.constant 5.000000e+00 : f32
    %1777 = vector.broadcast %cst_565 : f32 to vector<16x128xf32>
    %1778 = arith.mulf %1777, %1671 : vector<16x128xf32>
    %1779 = arith.addf %1776, %1778 : vector<16x128xf32>
    %1780 = arith.subf %1779, %1672 : vector<16x128xf32>
    %cst_566 = arith.constant 0.166666672 : f32
    %1781 = vector.broadcast %cst_566 : f32 to vector<16x128xf32>
    %1782 = arith.mulf %1780, %1781 : vector<16x128xf32>
    %1783 = arith.mulf %1749, %1764 : vector<16x128xf32>
    %1784 = arith.mulf %1750, %1774 : vector<16x128xf32>
    %1785 = arith.addf %1783, %1784 : vector<16x128xf32>
    %1786 = arith.mulf %1751, %1782 : vector<16x128xf32>
    %1787 = arith.addf %1785, %1786 : vector<16x128xf32>
    %c1_i32_567 = arith.constant 1 : i32
    %1788 = tpu.dynamic_rotate %1787 by %c1_i32_567 dim 1 : vector<16x128xf32>, i32 -> vector<16x128xf32>
    %1789 = arith.subf %1787, %1788 : vector<16x128xf32>
    %cst_568 = arith.constant 10.666667 : f32
    %1790 = vector.broadcast %cst_568 : f32 to vector<16x128xf32>
    %1791 = arith.mulf %1789, %1790 : vector<16x128xf32>
    %cst_569 = arith.constant 2.000000e+00 : f32
    %1792 = vector.broadcast %cst_569 : f32 to vector<16x128xf32>
    %1793 = arith.mulf %1792, %1670 : vector<16x128xf32>
    %1794 = arith.subf %1669, %1793 : vector<16x128xf32>
    %1795 = arith.addf %1794, %1668 : vector<16x128xf32>
    %cst_570 = arith.constant 2.000000e+00 : f32
    %1796 = vector.broadcast %cst_570 : f32 to vector<16x128xf32>
    %1797 = arith.mulf %1796, %1668 : vector<16x128xf32>
    %1798 = arith.subf %1670, %1797 : vector<16x128xf32>
    %1799 = arith.addf %1798, %1671 : vector<16x128xf32>
    %cst_571 = arith.constant 2.000000e+00 : f32
    %1800 = vector.broadcast %cst_571 : f32 to vector<16x128xf32>
    %1801 = arith.mulf %1800, %1671 : vector<16x128xf32>
    %1802 = arith.subf %1668, %1801 : vector<16x128xf32>
    %1803 = arith.addf %1802, %1672 : vector<16x128xf32>
    %1804 = arith.mulf %1752, %1795 : vector<16x128xf32>
    %1805 = arith.mulf %1753, %1799 : vector<16x128xf32>
    %1806 = arith.addf %1804, %1805 : vector<16x128xf32>
    %1807 = arith.mulf %1754, %1803 : vector<16x128xf32>
    %1808 = arith.addf %1806, %1807 : vector<16x128xf32>
    %cst_572 = arith.constant 113.777779 : f32
    %1809 = vector.broadcast %cst_572 : f32 to vector<16x128xf32>
    %1810 = arith.mulf %1808, %1809 : vector<16x128xf32>
    %cst_573 = arith.constant 4.500000e-02 : f32
    %1811 = vector.broadcast %cst_573 : f32 to vector<16x128xf32>
    %1812 = arith.mulf %1811, %1810 : vector<16x128xf32>
    %cst_574 = arith.constant 5.500000e-02 : f32
    %1813 = vector.broadcast %cst_574 : f32 to vector<16x128xf32>
    %1814 = arith.mulf %1813, %1791 : vector<16x128xf32>
    %1815 = arith.addf %1812, %1814 : vector<16x128xf32>
    %cst_575 = arith.constant 1.000000e-01 : f32
    %1816 = vector.broadcast %cst_575 : f32 to vector<16x128xf32>
    %1817 = arith.mulf %1816, %1668 : vector<16x128xf32>
    %1818 = arith.subf %1815, %1817 : vector<16x128xf32>
    %cst_576 = arith.constant 0.0769230798 : f32
    %1819 = vector.broadcast %cst_576 : f32 to vector<16x128xf32>
    %1820 = arith.mulf %1819, %1818 : vector<16x128xf32>
    %1821 = arith.addf %1668, %1820 : vector<16x128xf32>
    %cst_577 = arith.constant 0.000000e+00 : f32
    %1822 = vector.broadcast %cst_577 : f32 to vector<16x128xf32>
    %1823 = arith.select %11, %1822, %1821 : vector<16x128xi1>, vector<16x128xf32>
    %cst_578 = arith.constant 0.0182364918 : f32
    %1824 = vector.broadcast %cst_578 : f32 to vector<16x128xf32>
    %1825 = arith.select %6, %1824, %1823 : vector<16x128xi1>, vector<16x128xf32>
    %c2_i32_579 = arith.constant 2 : i32
    %1826 = tpu.dynamic_rotate %1825 by %c2_i32_579 dim 1 : vector<16x128xf32>, i32 -> vector<16x128xf32>
    %c1_i32_580 = arith.constant 1 : i32
    %1827 = tpu.dynamic_rotate %1825 by %c1_i32_580 dim 1 : vector<16x128xf32>, i32 -> vector<16x128xf32>
    %c127_i32_581 = arith.constant 127 : i32
    %1828 = tpu.dynamic_rotate %1825 by %c127_i32_581 dim 1 : vector<16x128xf32>, i32 -> vector<16x128xf32>
    %c126_i32_582 = arith.constant 126 : i32
    %1829 = tpu.dynamic_rotate %1825 by %c126_i32_582 dim 1 : vector<16x128xf32>, i32 -> vector<16x128xf32>
    %cst_583 = arith.constant 2.000000e+00 : f32
    %1830 = vector.broadcast %cst_583 : f32 to vector<16x128xf32>
    %1831 = arith.mulf %1830, %1827 : vector<16x128xf32>
    %1832 = arith.subf %1826, %1831 : vector<16x128xf32>
    %1833 = arith.addf %1832, %1825 : vector<16x128xf32>
    %1834 = arith.mulf %1833, %1833 : vector<16x128xf32>
    %cst_584 = arith.constant 1.08333337 : f32
    %1835 = vector.broadcast %cst_584 : f32 to vector<16x128xf32>
    %1836 = arith.mulf %1835, %1834 : vector<16x128xf32>
    %cst_585 = arith.constant 4.000000e+00 : f32
    %1837 = vector.broadcast %cst_585 : f32 to vector<16x128xf32>
    %1838 = arith.mulf %1837, %1827 : vector<16x128xf32>
    %1839 = arith.subf %1826, %1838 : vector<16x128xf32>
    %cst_586 = arith.constant 3.000000e+00 : f32
    %1840 = vector.broadcast %cst_586 : f32 to vector<16x128xf32>
    %1841 = arith.mulf %1840, %1825 : vector<16x128xf32>
    %1842 = arith.addf %1839, %1841 : vector<16x128xf32>
    %1843 = arith.mulf %1842, %1842 : vector<16x128xf32>
    %cst_587 = arith.constant 2.500000e-01 : f32
    %1844 = vector.broadcast %cst_587 : f32 to vector<16x128xf32>
    %1845 = arith.mulf %1844, %1843 : vector<16x128xf32>
    %1846 = arith.addf %1836, %1845 : vector<16x128xf32>
    %cst_588 = arith.constant 2.000000e+00 : f32
    %1847 = vector.broadcast %cst_588 : f32 to vector<16x128xf32>
    %1848 = arith.mulf %1847, %1825 : vector<16x128xf32>
    %1849 = arith.subf %1827, %1848 : vector<16x128xf32>
    %1850 = arith.addf %1849, %1828 : vector<16x128xf32>
    %1851 = arith.mulf %1850, %1850 : vector<16x128xf32>
    %cst_589 = arith.constant 1.08333337 : f32
    %1852 = vector.broadcast %cst_589 : f32 to vector<16x128xf32>
    %1853 = arith.mulf %1852, %1851 : vector<16x128xf32>
    %1854 = arith.subf %1827, %1828 : vector<16x128xf32>
    %1855 = arith.mulf %1854, %1854 : vector<16x128xf32>
    %cst_590 = arith.constant 2.500000e-01 : f32
    %1856 = vector.broadcast %cst_590 : f32 to vector<16x128xf32>
    %1857 = arith.mulf %1856, %1855 : vector<16x128xf32>
    %1858 = arith.addf %1853, %1857 : vector<16x128xf32>
    %cst_591 = arith.constant 2.000000e+00 : f32
    %1859 = vector.broadcast %cst_591 : f32 to vector<16x128xf32>
    %1860 = arith.mulf %1859, %1828 : vector<16x128xf32>
    %1861 = arith.subf %1825, %1860 : vector<16x128xf32>
    %1862 = arith.addf %1861, %1829 : vector<16x128xf32>
    %1863 = arith.mulf %1862, %1862 : vector<16x128xf32>
    %cst_592 = arith.constant 1.08333337 : f32
    %1864 = vector.broadcast %cst_592 : f32 to vector<16x128xf32>
    %1865 = arith.mulf %1864, %1863 : vector<16x128xf32>
    %cst_593 = arith.constant 3.000000e+00 : f32
    %1866 = vector.broadcast %cst_593 : f32 to vector<16x128xf32>
    %1867 = arith.mulf %1866, %1825 : vector<16x128xf32>
    %cst_594 = arith.constant 4.000000e+00 : f32
    %1868 = vector.broadcast %cst_594 : f32 to vector<16x128xf32>
    %1869 = arith.mulf %1868, %1828 : vector<16x128xf32>
    %1870 = arith.subf %1867, %1869 : vector<16x128xf32>
    %1871 = arith.addf %1870, %1829 : vector<16x128xf32>
    %1872 = arith.mulf %1871, %1871 : vector<16x128xf32>
    %cst_595 = arith.constant 2.500000e-01 : f32
    %1873 = vector.broadcast %cst_595 : f32 to vector<16x128xf32>
    %1874 = arith.mulf %1873, %1872 : vector<16x128xf32>
    %1875 = arith.addf %1865, %1874 : vector<16x128xf32>
    %cst_596 = arith.constant 9.99999982E-14 : f32
    %1876 = vector.broadcast %cst_596 : f32 to vector<16x128xf32>
    %1877 = arith.addf %1876, %1846 : vector<16x128xf32>
    %1878 = arith.mulf %1877, %1877 : vector<16x128xf32>
    %1879 = tpu.reciprocal %1878 {approx = true} : vector<16x128xf32> -> vector<16x128xf32>
    %cst_597 = arith.constant 9.99999982E-14 : f32
    %1880 = vector.broadcast %cst_597 : f32 to vector<16x128xf32>
    %1881 = arith.addf %1880, %1858 : vector<16x128xf32>
    %1882 = arith.mulf %1881, %1881 : vector<16x128xf32>
    %1883 = tpu.reciprocal %1882 {approx = true} : vector<16x128xf32> -> vector<16x128xf32>
    %cst_598 = arith.constant 9.99999982E-14 : f32
    %1884 = vector.broadcast %cst_598 : f32 to vector<16x128xf32>
    %1885 = arith.addf %1884, %1875 : vector<16x128xf32>
    %1886 = arith.mulf %1885, %1885 : vector<16x128xf32>
    %1887 = tpu.reciprocal %1886 {approx = true} : vector<16x128xf32> -> vector<16x128xf32>
    %cst_599 = arith.constant 1.000000e-01 : f32
    %1888 = vector.broadcast %cst_599 : f32 to vector<16x128xf32>
    %1889 = arith.mulf %1888, %1879 : vector<16x128xf32>
    %cst_600 = arith.constant 6.000000e-01 : f32
    %1890 = vector.broadcast %cst_600 : f32 to vector<16x128xf32>
    %1891 = arith.mulf %1890, %1883 : vector<16x128xf32>
    %cst_601 = arith.constant 3.000000e-01 : f32
    %1892 = vector.broadcast %cst_601 : f32 to vector<16x128xf32>
    %1893 = arith.mulf %1892, %1887 : vector<16x128xf32>
    %cst_602 = arith.constant 2.500000e-01 : f32
    %1894 = vector.broadcast %cst_602 : f32 to vector<16x128xf32>
    %1895 = arith.mulf %1894, %1879 : vector<16x128xf32>
    %cst_603 = arith.constant 5.000000e-01 : f32
    %1896 = vector.broadcast %cst_603 : f32 to vector<16x128xf32>
    %1897 = arith.mulf %1896, %1883 : vector<16x128xf32>
    %cst_604 = arith.constant 2.500000e-01 : f32
    %1898 = vector.broadcast %cst_604 : f32 to vector<16x128xf32>
    %1899 = arith.mulf %1898, %1887 : vector<16x128xf32>
    %1900 = arith.addf %1889, %1891 : vector<16x128xf32>
    %1901 = arith.addf %1900, %1893 : vector<16x128xf32>
    %1902 = tpu.reciprocal %1901 : vector<16x128xf32> -> vector<16x128xf32>
    %1903 = arith.addf %1895, %1897 : vector<16x128xf32>
    %1904 = arith.addf %1903, %1899 : vector<16x128xf32>
    %1905 = tpu.reciprocal %1904 : vector<16x128xf32> -> vector<16x128xf32>
    %1906 = arith.mulf %1889, %1902 : vector<16x128xf32>
    %1907 = arith.mulf %1891, %1902 : vector<16x128xf32>
    %1908 = arith.mulf %1893, %1902 : vector<16x128xf32>
    %1909 = arith.mulf %1895, %1905 : vector<16x128xf32>
    %1910 = arith.mulf %1897, %1905 : vector<16x128xf32>
    %1911 = arith.mulf %1899, %1905 : vector<16x128xf32>
    %cst_605 = arith.constant 2.000000e+00 : f32
    %1912 = vector.broadcast %cst_605 : f32 to vector<16x128xf32>
    %1913 = arith.mulf %1912, %1826 : vector<16x128xf32>
    %cst_606 = arith.constant 7.000000e+00 : f32
    %1914 = vector.broadcast %cst_606 : f32 to vector<16x128xf32>
    %1915 = arith.mulf %1914, %1827 : vector<16x128xf32>
    %1916 = arith.subf %1913, %1915 : vector<16x128xf32>
    %cst_607 = arith.constant 1.100000e+01 : f32
    %1917 = vector.broadcast %cst_607 : f32 to vector<16x128xf32>
    %1918 = arith.mulf %1917, %1825 : vector<16x128xf32>
    %1919 = arith.addf %1916, %1918 : vector<16x128xf32>
    %cst_608 = arith.constant 0.166666672 : f32
    %1920 = vector.broadcast %cst_608 : f32 to vector<16x128xf32>
    %1921 = arith.mulf %1919, %1920 : vector<16x128xf32>
    %cst_609 = arith.constant 0.000000e+00 : f32
    %1922 = vector.broadcast %cst_609 : f32 to vector<16x128xf32>
    %1923 = arith.subf %1922, %1827 : vector<16x128xf32>
    %cst_610 = arith.constant 5.000000e+00 : f32
    %1924 = vector.broadcast %cst_610 : f32 to vector<16x128xf32>
    %1925 = arith.mulf %1924, %1825 : vector<16x128xf32>
    %1926 = arith.addf %1923, %1925 : vector<16x128xf32>
    %cst_611 = arith.constant 2.000000e+00 : f32
    %1927 = vector.broadcast %cst_611 : f32 to vector<16x128xf32>
    %1928 = arith.mulf %1927, %1828 : vector<16x128xf32>
    %1929 = arith.addf %1926, %1928 : vector<16x128xf32>
    %cst_612 = arith.constant 0.166666672 : f32
    %1930 = vector.broadcast %cst_612 : f32 to vector<16x128xf32>
    %1931 = arith.mulf %1929, %1930 : vector<16x128xf32>
    %cst_613 = arith.constant 2.000000e+00 : f32
    %1932 = vector.broadcast %cst_613 : f32 to vector<16x128xf32>
    %1933 = arith.mulf %1932, %1825 : vector<16x128xf32>
    %cst_614 = arith.constant 5.000000e+00 : f32
    %1934 = vector.broadcast %cst_614 : f32 to vector<16x128xf32>
    %1935 = arith.mulf %1934, %1828 : vector<16x128xf32>
    %1936 = arith.addf %1933, %1935 : vector<16x128xf32>
    %1937 = arith.subf %1936, %1829 : vector<16x128xf32>
    %cst_615 = arith.constant 0.166666672 : f32
    %1938 = vector.broadcast %cst_615 : f32 to vector<16x128xf32>
    %1939 = arith.mulf %1937, %1938 : vector<16x128xf32>
    %1940 = arith.mulf %1906, %1921 : vector<16x128xf32>
    %1941 = arith.mulf %1907, %1931 : vector<16x128xf32>
    %1942 = arith.addf %1940, %1941 : vector<16x128xf32>
    %1943 = arith.mulf %1908, %1939 : vector<16x128xf32>
    %1944 = arith.addf %1942, %1943 : vector<16x128xf32>
    %c1_i32_616 = arith.constant 1 : i32
    %1945 = tpu.dynamic_rotate %1944 by %c1_i32_616 dim 1 : vector<16x128xf32>, i32 -> vector<16x128xf32>
    %1946 = arith.subf %1944, %1945 : vector<16x128xf32>
    %cst_617 = arith.constant 10.666667 : f32
    %1947 = vector.broadcast %cst_617 : f32 to vector<16x128xf32>
    %1948 = arith.mulf %1946, %1947 : vector<16x128xf32>
    %cst_618 = arith.constant 2.000000e+00 : f32
    %1949 = vector.broadcast %cst_618 : f32 to vector<16x128xf32>
    %1950 = arith.mulf %1949, %1827 : vector<16x128xf32>
    %1951 = arith.subf %1826, %1950 : vector<16x128xf32>
    %1952 = arith.addf %1951, %1825 : vector<16x128xf32>
    %cst_619 = arith.constant 2.000000e+00 : f32
    %1953 = vector.broadcast %cst_619 : f32 to vector<16x128xf32>
    %1954 = arith.mulf %1953, %1825 : vector<16x128xf32>
    %1955 = arith.subf %1827, %1954 : vector<16x128xf32>
    %1956 = arith.addf %1955, %1828 : vector<16x128xf32>
    %cst_620 = arith.constant 2.000000e+00 : f32
    %1957 = vector.broadcast %cst_620 : f32 to vector<16x128xf32>
    %1958 = arith.mulf %1957, %1828 : vector<16x128xf32>
    %1959 = arith.subf %1825, %1958 : vector<16x128xf32>
    %1960 = arith.addf %1959, %1829 : vector<16x128xf32>
    %1961 = arith.mulf %1909, %1952 : vector<16x128xf32>
    %1962 = arith.mulf %1910, %1956 : vector<16x128xf32>
    %1963 = arith.addf %1961, %1962 : vector<16x128xf32>
    %1964 = arith.mulf %1911, %1960 : vector<16x128xf32>
    %1965 = arith.addf %1963, %1964 : vector<16x128xf32>
    %cst_621 = arith.constant 113.777779 : f32
    %1966 = vector.broadcast %cst_621 : f32 to vector<16x128xf32>
    %1967 = arith.mulf %1965, %1966 : vector<16x128xf32>
    %cst_622 = arith.constant 4.500000e-02 : f32
    %1968 = vector.broadcast %cst_622 : f32 to vector<16x128xf32>
    %1969 = arith.mulf %1968, %1967 : vector<16x128xf32>
    %cst_623 = arith.constant 5.500000e-02 : f32
    %1970 = vector.broadcast %cst_623 : f32 to vector<16x128xf32>
    %1971 = arith.mulf %1970, %1948 : vector<16x128xf32>
    %1972 = arith.addf %1969, %1971 : vector<16x128xf32>
    %cst_624 = arith.constant 1.000000e-01 : f32
    %1973 = vector.broadcast %cst_624 : f32 to vector<16x128xf32>
    %1974 = arith.mulf %1973, %1825 : vector<16x128xf32>
    %1975 = arith.subf %1972, %1974 : vector<16x128xf32>
    %cst_625 = arith.constant 0.0769230798 : f32
    %1976 = vector.broadcast %cst_625 : f32 to vector<16x128xf32>
    %1977 = arith.mulf %1976, %1975 : vector<16x128xf32>
    %1978 = arith.addf %1825, %1977 : vector<16x128xf32>
    %cst_626 = arith.constant 0.000000e+00 : f32
    %1979 = vector.broadcast %cst_626 : f32 to vector<16x128xf32>
    %1980 = arith.select %11, %1979, %1978 : vector<16x128xi1>, vector<16x128xf32>
    %cst_627 = arith.constant 0.0180967487 : f32
    %1981 = vector.broadcast %cst_627 : f32 to vector<16x128xf32>
    %1982 = arith.select %6, %1981, %1980 : vector<16x128xi1>, vector<16x128xf32>
    %cst_628 = arith.constant 5.000000e+01 : f32
    %1983 = vector.broadcast %cst_628 : f32 to vector<16x128xf32>
    %1984 = arith.mulf %1983, %1982 : vector<16x128xf32>
    %c0_629 = arith.constant 0 : index
    %c0_630 = arith.constant 0 : index
    %1985 = vector.load %arg4[%c0_629, %c0_630] : memref<16x128xf32, #tpu.memory_space<vmem>>, vector<16x128xf32>
    tpu.vector_store %arg4[%c0_629, %c0_630], %1984 {strides = array<i32>} : memref<16x128xf32, #tpu.memory_space<vmem>>, vector<16x128xf32>,
    return
  }
  func.func @transform_0(%arg0: i32) -> (i32, i32) {
    %c0_i32 = arith.constant 0 : i32
    %c0_i32_0 = arith.constant 0 : i32
    %c0_i32_1 = arith.constant 0 : i32
    return %c0_i32, %c0_i32_0 : i32, i32
  }
  func.func @transform_1(%arg0: i32) -> (i32, i32, i32) {
    %c0_i32 = arith.constant 0 : i32
    %c0_i32_0 = arith.constant 0 : i32
    %c0_i32_1 = arith.constant 0 : i32
    %c0_i32_2 = arith.constant 0 : i32
    return %c0_i32, %c0_i32_0, %c0_i32_1 : i32, i32, i32
  }
  func.func @transform_2(%arg0: i32) -> (i32, i32, i32) {
    %c0_i32 = arith.constant 0 : i32
    %c0_i32_0 = arith.constant 0 : i32
    %c0_i32_1 = arith.constant 0 : i32
    %c0_i32_2 = arith.constant 0 : i32
    return %c0_i32, %c0_i32_0, %c0_i32_1 : i32, i32, i32
  }
  func.func @transform_3(%arg0: i32) -> (i32, i32) {
    %c0_i32 = arith.constant 0 : i32
    %c0_i32_0 = arith.constant 0 : i32
    %c0_i32_1 = arith.constant 0 : i32
    return %c0_i32, %c0_i32_0 : i32, i32
  }
}

</mosaic_0001>

<bundles_post_ra>
// kernel: weno_network_forward.1
= control target key start
LH: loop header
LB: loop body
LE: loop exit
PB: predicated region body
PF: predicated region fallthrough
CT: control target
= control target key end

     0   :  { %8 = vsyncpa [#allocation3], 0  ;;  %s4961_s0 = inlined_call_operand.hbm [shape: f32[16,128], index: 0, kind: input, shape index: {}]   ;;  %s4962_s1 = inlined_call_operand.hbm [shape: f32[3,16,128], index: 1, kind: input, shape index: {}]   ;;  %s4963_s2 = inlined_call_operand.hbm [shape: f32[3,16,128], index: 2, kind: input, shape index: {}]   ;;  %s4964_s3 = inlined_call_operand.hbm [shape: f32[16,128], index: 3, kind: output, shape index: {}]  }
   0x1   :  { %9 = vsyncpa [#allocation6], 0 }
   0x2   :  { %10 = vsyncpa [#allocation4], 0  ;;  %s3104_s12 = smov [#allocation5]   ;;  %s3105_s14 = smov [#allocation2]  }
   0x3   :  { %s28_s13 = sshll.u32 %s3104_s12, 4  ;;  %s16_s15 = sshll.u32 %s3105_s14, 4  ;;  %s29_s13 = int_to_ptr.vmem [resolvable:$true] %s28_s13  ;;  %s3134_s15 = int_to_ptr.vmem [resolvable:$true] %s16_s15 }
   0x4   :  { %s3010_s18 = scalar_lea.hbm %s4962_s1, 768 }
   0x5   :  { %p3011_p0 = scmp.ne.s32.totalorder %s4962_s1, %s3010_s18  ;;  %p3014_p1 = scmp.lt.u32.totalorder %s3010_s18, %s4962_s1 }
   0x7   :  { %p3016_p2 = pnand %p3014_p1, %p3011_p0 }
   0x9   :  { %3019 = shalt.err (!%p3016_p2)
}
   0xa   :  { %s3020_s23 = scalar_lea.vmem %s29_s13, 768  ;;  %p3025_p4 = scmp.lt.s32.totalorder %s29_s13, %s29_s13 }
   0xb   :  { %p3021_p3 = scmp.ne.s32.totalorder %s29_s13, %s3020_s23  ;;  %p3026_p5 = scmp.lt.s32.totalorder %s3020_s23, %s3020_s23 }
   0xd   :  { %p3027_p6 = por %p3026_p5, %p3025_p4 }
   0xf   :  { %p3028_p7 = pnand %p3027_p6, %p3021_p3 }
  0x11   :  { %3031 = shalt.err (!%p3028_p7)
}
  0x12   :  { %s3106_s24 = smov 128   ;;  %s3107_s25 = smov 8  }
  0x13   :  { %34 = dma.hbm_to_vmem [thread:$0]  %s4962_s1, 768, %s29_s13, [#allocation6], %s3106_s24, %s3106_s24, %s3107_s25  }
  0x14   :  { %s3032_s30 = scalar_lea.hbm %s4961_s0, 256 }
  0x15   :  { %p3033_p8 = scmp.ne.s32.totalorder %s4961_s0, %s3032_s30  ;;  %p3036_p9 = scmp.lt.u32.totalorder %s3032_s30, %s4961_s0 }
  0x17   :  { %p3038_p10 = pnand %p3036_p9, %p3033_p8 }
  0x19   :  { %3041 = shalt.err (!%p3038_p10)
}
  0x1a   :  { %s3042_s8 = scalar_lea.vmem %s3134_s15, 256  ;;  %p3047_p12 = scmp.lt.s32.totalorder %s3134_s15, %s3134_s15 }
  0x1b   :  { %p3043_p11 = scmp.ne.s32.totalorder %s3134_s15, %s3042_s8  ;;  %p3048_p13 = scmp.lt.s32.totalorder %s3042_s8, %s3042_s8 }
  0x1d   :  { %p3049_p0 = por %p3048_p13, %p3047_p12 }
  0x1f   :  { %p3050_p1 = pnand %p3049_p0, %p3043_p11 }
  0x21   :  { %3053 = shalt.err (!%p3050_p1)
}
  0x22   :  { %22 = dma.hbm_to_vmem [thread:$0]  %s4961_s0, 256, %s3134_s15, [#allocation3], %s3106_s24, %s3106_s24, %s3107_s25  }
  0x23   :  { %s3108_s10 = smov [#allocation7]   ;;  %s3054_s14 = scalar_lea.hbm %s4963_s2, 768 }
  0x24   :  { %s40_s11 = sshll.u32 %s3108_s10, 4  ;;  %p3055_p2 = scmp.ne.s32.totalorder %s4963_s2, %s3054_s14  ;;  %s41_s11 = int_to_ptr.vmem [resolvable:$true] %s40_s11 }
  0x25   :  { %p3058_p3 = scmp.lt.u32.totalorder %s3054_s14, %s4963_s2 }
  0x27   :  { %p3060_p4 = pnand %p3058_p3, %p3055_p2 }
  0x29   :  { %3063 = shalt.err (!%p3060_p4)
}
  0x2a   :  { %s3064_s20 = scalar_lea.vmem %s41_s11, 768  ;;  %p3069_p6 = scmp.lt.s32.totalorder %s41_s11, %s41_s11 }
  0x2b   :  { %p3065_p5 = scmp.ne.s32.totalorder %s41_s11, %s3064_s20  ;;  %p3070_p7 = scmp.lt.s32.totalorder %s3064_s20, %s3064_s20 }
  0x2d   :  { %p3071_p8 = por %p3070_p7, %p3069_p6 }
  0x2f   :  { %p3072_p9 = pnand %p3071_p8, %p3065_p5 }
  0x31   :  { %3075 = shalt.err (!%p3072_p9)
}
  0x32   :  { %46 = dma.hbm_to_vmem [thread:$0]  %s4963_s2, 768, %s41_s11, [#allocation6], %s3106_s24, %s3106_s24, %s3107_s25  }
  0x33   :  { %3098 = dma.done.wait [#allocation3], 256  }
  0x34   :  { %3099 = vsyncadd [#allocation3], 4294967040 }
  0x35   :  { %3100 = dma.done.wait [#allocation6], 1536  }
  0x36   :  { %3101 = vsyncadd [#allocation6], 4294965760  ;;  %v3186_v0 = vld [vmem:[#allocation2] sm:$0xff]  ;;  %s3109_s21 = smov 1   ;;  %s3110_s22 = smov 2   ;;  %v3192_v1 = vld [vmem:[#allocation2 + $0x8] sm:$0xff] }
  0x37   :  { %70 = vrot.lane.b32.xlu1 %v3186_v0, %s3109_s21  ;;  %66 = vrot.lane.b32.xlu0 %v3186_v0, %s3110_s22  ;;  %s3111_s2 = smov 127   ;;  %s3112_s23 = smov 126   ;;  %v104_v7 = vmul.f32 11.0, %v3186_v0  ;;  %v123_v8 = vmul.f32 2.0, %v3192_v1  ;;  %v112_v9 = vmul.f32 5.0, %v3186_v0  ;;  %v122_v13 = vmul.f32 2.0, %v3186_v0 }
  0x38   :  { %v113_v16 = vmul.f32 5.0, %v3192_v1  ;;  %v105_v20 = vmul.f32 11.0, %v3192_v1  ;;  %v94_v30 = vld [vmem:[#allocation7 + $0x18] sm:$0xff]  ;;  %v91_v34 = vld [vmem:[#allocation7 + $0x8] sm:$0xff]  ;;  %v93_v38 = vld [vmem:[#allocation7 + $0x10] sm:$0xff]  ;;  %s3113_s26 = smov [#allocation8]  }
  0x39   :  { %v90_v44 = vld [vmem:[#allocation7] sm:$0xff]  ;;  %v97_v52 = vld [vmem:[#allocation7 + $0x28] sm:$0xff]  ;;  %v83_v56 = vld [vmem:[#allocation5 + $0x8] sm:$0xff]  ;;  %s2747_s27 = sshll.u32 %s3113_s26, 4  ;;  %s2748_s27 = int_to_ptr.vmem [resolvable:$true] %s2747_s27 }
  0x3a   :  { %v86_v57 = vld [vmem:[#allocation5 + $0x18] sm:$0xff]  ;;  %v82_v62 = vld [vmem:[#allocation5] sm:$0xff]  ;;  %v85_v63 = vld [vmem:[#allocation5 + $0x10] sm:$0xff]  ;;  %s3076_s28 = scalar_lea.vmem %s2748_s27, 256  ;;  %p3081_p11 = scmp.lt.s32.totalorder %s2748_s27, %s2748_s27 }
  0x3b   :  { %72 = vrot.lane.b32.xlu1 %v3192_v1, %s3109_s21  ;;  %68 = vrot.lane.b32.xlu0 %v3192_v1, %s3110_s22  ;;  %p3077_p10 = scmp.ne.s32.totalorder %s2748_s27, %s3076_s28  ;;  %p3082_p12 = scmp.lt.s32.totalorder %s3076_s28, %s3076_s28 }
  0x3d   :  { %p3083_p13 = por %p3082_p12, %p3081_p11 }
  0x3f   :  { %76 = vrot.lane.b32.xlu1 %v3192_v1, %s3111_s2  ;;  %74 = vrot.lane.b32.xlu0 %v3186_v0, %s3111_s2  ;;  %p3084_p0 = pnand %p3083_p13, %p3077_p10 }
  0x43   :  { %80 = vrot.lane.b32.xlu1 %v3192_v1, %s3112_s23  ;;  %78 = vrot.lane.b32.xlu0 %v3186_v0, %s3112_s23 }
  0xa9   :  { %v71_v2 = vpop.permute.xlu1 %70  ;;  %v67_v3 = vpop.permute.xlu0 %66 }
  0xaa   :  { %v100_v4 = vmul.f32 7.0, %v71_v2  ;;  %v150_v5 = vmul.f32 2.0, %v71_v2  ;;  %v98_v6 = vmul.f32 2.0, %v67_v3  ;;  %v110_v10 = vsub.f32 0.0, %v71_v2 }
  0xab   :  { %v156_v26 = vsub.f32 %v71_v2, %v122_v13 }
  0xac   :  { %v102_v11 = vsub.f32 %v98_v6, %v100_v4  ;;  %v152_v12 = vsub.f32 %v67_v3, %v150_v5  ;;  %v114_v25 = vadd.f32 %v112_v9, %v110_v10  ;;  %v96_v5 = vld [vmem:[#allocation7 + $0x20] sm:$0xff] }
  0xad   :  { %v73_v14 = vpop.permute.xlu1 %72  ;;  %v69_v15 = vpop.permute.xlu0 %68 }
  0xae   :  { %v106_v17 = vadd.f32 %v104_v7, %v102_v11  ;;  %v111_v18 = vsub.f32 0.0, %v73_v14  ;;  %v101_v19 = vmul.f32 7.0, %v73_v14  ;;  %v151_v21 = vmul.f32 2.0, %v73_v14  ;;  %v89_v7 = vld [vmem:[#allocation5 + $0x28] sm:$0xff] }
  0xaf   :  { %v99_v22 = vmul.f32 2.0, %v69_v15  ;;  %v154_v23 = vadd.f32 %v152_v12, %v3186_v0  ;;  %v157_v24 = vsub.f32 %v73_v14, %v123_v8 }
  0xb0   :  { %v108_v27 = vmul.f32 0.16666667, %v106_v17  ;;  %v153_v29 = vsub.f32 %v69_v15, %v151_v21  ;;  %v115_v31 = vadd.f32 %v113_v16, %v111_v18  ;;  %v88_v21 = vld [vmem:[#allocation5 + $0x20] sm:$0xff] }
  0xb1   :  { %v103_v28 = vsub.f32 %v99_v22, %v101_v19  ;;  %v77_v32 = vpop.permute.xlu1 %76  ;;  %v75_v33 = vpop.permute.xlu0 %74  ;;  %v164_v2 = vmul.f32 %v154_v23, %v90_v44 }
  0xb2   :  { %v117_v35 = vmul.f32 2.0, %v77_v32  ;;  %v125_v36 = vmul.f32 5.0, %v77_v32  ;;  %v159_v37 = vadd.f32 %v157_v24, %v77_v32  ;;  %v116_v39 = vmul.f32 2.0, %v75_v33 }
  0xb3   :  { %v107_v40 = vadd.f32 %v105_v20, %v103_v28  ;;  %v155_v41 = vadd.f32 %v153_v29, %v3192_v1  ;;  %v124_v42 = vmul.f32 5.0, %v75_v33  ;;  %v158_v43 = vadd.f32 %v156_v26, %v75_v33 }
  0xb4   :  { %v119_v45 = vadd.f32 %v117_v35, %v115_v31  ;;  %v167_v46 = vmul.f32 %v159_v37, %v94_v30  ;;  %v118_v47 = vadd.f32 %v116_v39, %v114_v25  ;;  %v127_v48 = vadd.f32 %v125_v36, %v123_v8 }
  0xb5   :  { %v109_v49 = vmul.f32 0.16666667, %v107_v40  ;;  %v165_v50 = vmul.f32 %v155_v41, %v91_v34  ;;  %v166_v51 = vmul.f32 %v158_v43, %v93_v38  ;;  %v161_v53 = vsub.f32 %v3192_v1, %v117_v35  ;;  %v81_v54 = vpop.permute.xlu1 %80  ;;  %v79_v55 = vpop.permute.xlu0 %78 }
  0xb6   :  { %v121_v58 = vmul.f32 0.16666667, %v119_v45  ;;  %v120_v59 = vmul.f32 0.16666667, %v118_v47  ;;  %v129_v60 = vsub.f32 %v127_v48, %v81_v54  ;;  %v160_v61 = vsub.f32 %v3186_v0, %v116_v39 }
  0xb7   :  { %v163_v3 = vadd.f32 %v161_v53, %v81_v54  ;;  %v169_v4 = vadd.f32 %v167_v46, %v165_v50  ;;  %v126_v6 = vadd.f32 %v124_v42, %v122_v13  ;;  %v133_v10 = vmul.f32 %v109_v49, %v83_v56 }
  0xb8   :  { %v131_v8 = vmul.f32 0.16666667, %v129_v60  ;;  %v162_v9 = vadd.f32 %v160_v61, %v79_v55  ;;  %v135_v11 = vmul.f32 %v121_v58, %v86_v57  ;;  %v132_v15 = vmul.f32 %v108_v27, %v82_v62 }
  0xb9   :  { %v171_v12 = vmul.f32 %v163_v3, %v97_v52  ;;  %v128_v14 = vsub.f32 %v126_v6, %v79_v55  ;;  %v134_v16 = vmul.f32 %v120_v59, %v85_v63  ;;  %v168_v17 = vadd.f32 %v166_v51, %v164_v2 }
  0xba   :  { %v170_v18 = vmul.f32 %v162_v9, %v96_v5  ;;  %v137_v19 = vadd.f32 %v135_v11, %v133_v10  ;;  %v139_v20 = vmul.f32 %v131_v8, %v89_v7  ;;  %v58_v30 = vlaneseq }
  0xbb   :  { %v173_v22 = vadd.f32 %v171_v12, %v169_v4  ;;  %v130_v23 = vmul.f32 0.16666667, %v128_v14  ;;  %v136_v24 = vadd.f32 %v134_v16, %v132_v15  ;;  %v183_v34 = vmul.f32 0.1, %v3192_v1 }
  0xbc   :  { %v172_v25 = vadd.f32 %v170_v18, %v168_v17  ;;  %v141_v26 = vadd.f32 %v139_v20, %v137_v19  ;;  %v59_v37 = vand.u32 127, %v58_v30  ;;  %v182_v43 = vmul.f32 0.1, %v3186_v0 }
  0xbd   :  { %v138_v13 = vmul.f32 %v130_v23, %v88_v21  ;;  %v175_v31 = vmul.f32 113.77778, %v173_v22 }
  0xbe   :  { %144 = vrot.lane.b32.xlu1 %v141_v26, %s3109_s21  ;;  %v174_v35 = vmul.f32 113.77778, %v172_v25  ;;  %vm63_vm0 = vcmp.lt.s32.totalorder %v59_v37, 3  ;;  %vm64_vm1 = vcmp.gt.s32.totalorder %v59_v37, 80  ;;  %vm60_vm2 = vcmp.ge.s32.totalorder %v59_v37, 78 }
  0xbf   :  { %v140_v28 = vadd.f32 %v138_v13, %v136_v24  ;;  %v177_v38 = vmul.f32 0.045, %v175_v31  ;;  %vm61_vm3 = vcmp.le.s32.totalorder %v59_v37, 80  ;;  %vm3220_vm4 = vmor %vm63_vm0, %vm64_vm1 }
  0xc0   :  { %v176_v42 = vmul.f32 0.045, %v174_v35  ;;  %vm3224_vm5 = vmand %vm60_vm2, %vm61_vm3 }
  0xc1   :  { %142 = vrot.lane.b32.xlu0 %v140_v28, %s3109_s21 }
 0x130   :  { %v145_v29 = vpop.permute.xlu1 %144 }
 0x131   :  { %v147_v27 = vsub.f32 %v141_v26, %v145_v29 }
 0x133   :  { %v149_v32 = vmul.f32 10.666667, %v147_v27  ;;  %v143_v33 = vpop.permute.xlu0 %142 }
 0x134   :  { %v146_v36 = vsub.f32 %v140_v28, %v143_v33 }
 0x135   :  { %v179_v39 = vmul.f32 0.055, %v149_v32 }
 0x136   :  { %v148_v40 = vmul.f32 10.666667, %v146_v36 }
 0x137   :  { %v181_v41 = vadd.f32 %v179_v39, %v177_v38 }
 0x138   :  { %v178_v44 = vmul.f32 0.055, %v148_v40 }
 0x139   :  { %v185_v45 = vsub.f32 %v181_v41, %v183_v34 }
 0x13a   :  { %v180_v46 = vadd.f32 %v178_v44, %v176_v42 }
 0x13b   :  { %v187_v47 = vmul.f32 0.07692308, %v185_v45 }
 0x13c   :  { %v184_v49 = vsub.f32 %v180_v46, %v182_v43 }
 0x13d   :  { %v189_v51 = vadd.f32 %v187_v47, %v3192_v1 }
 0x13e   :  { %v186_v52 = vmul.f32 0.07692308, %v184_v49 }
 0x13f   :  { %v191_v53 = vsel %vm3220_vm4, 0.0, %v189_v51 }
 0x140   :  { %v3233_v54 = vsel %vm3224_vm5, 0.019846745, %v191_v53  ;;  %v188_v55 = vadd.f32 %v186_v52, %v3186_v0 }
 0x141   :  { %200 = vrot.lane.b32.xlu1 %v3233_v54, %s3109_s21  ;;  %v225_v63 = vmul.f32 3.0, %v3233_v54  ;;  %v3292_v18 = vmul.f32 2.0, %v3233_v54 }
 0x142   :  { %v190_v56 = vsel %vm3220_vm4, 0.0, %v188_v55 }
 0x143   :  { %v3242_v57 = vsel %vm3224_vm5, 0.019846745, %v190_v56 }
 0x144   :  { %198 = vrot.lane.b32.xlu0 %v3242_v57, %s3109_s21  ;;  %v224_v9 = vmul.f32 3.0, %v3242_v57  ;;  %v3314_v35 = vmul.f32 2.0, %v3242_v57 }
 0x145   :  { %196 = vrot.lane.b32.xlu1 %v3233_v54, %s3110_s22 }
 0x148   :  { %194 = vrot.lane.b32.xlu0 %v3242_v57, %s3110_s22 }
 0x149   :  { %204 = vrot.lane.b32.xlu1 %v3233_v54, %s3111_s2 }
 0x14c   :  { %202 = vrot.lane.b32.xlu0 %v3242_v57, %s3111_s2 }
 0x14d   :  { %208 = vrot.lane.b32.xlu1 %v3233_v54, %s3112_s23 }
 0x150   :  { %206 = vrot.lane.b32.xlu0 %v3242_v57, %s3112_s23 }
 0x1b3   :  { %v3258_v0 = vpop.permute.xlu1 %200 }
 0x1b4   :  { %v211_v58 = vmul.f32 2.0, %v3258_v0  ;;  %v221_v59 = vmul.f32 4.0, %v3258_v0  ;;  %v237_v13 = vsub.f32 %v3258_v0, %v3292_v18 }
 0x1b6   :  { %v3260_v1 = vpop.permute.xlu0 %198 }
 0x1b7   :  { %v3264_v60 = vpop.permute.xlu1 %196  ;;  %v210_v2 = vmul.f32 2.0, %v3260_v1  ;;  %v220_v3 = vmul.f32 4.0, %v3260_v1  ;;  %v236_v43 = vsub.f32 %v3260_v1, %v3314_v35 }
 0x1b8   :  { %v213_v61 = vsub.f32 %v3264_v60, %v211_v58  ;;  %v223_v62 = vsub.f32 %v3264_v60, %v221_v59 }
 0x1ba   :  { %v3272_v4 = vadd.f32 %v213_v61, %v3233_v54  ;;  %v227_v5 = vadd.f32 %v225_v63, %v223_v62  ;;  %v3274_v6 = vpop.permute.xlu0 %194 }
 0x1bb   :  { %v212_v7 = vsub.f32 %v3274_v6, %v210_v2  ;;  %v222_v8 = vsub.f32 %v3274_v6, %v220_v3  ;;  %v3279_v10 = vpop.permute.xlu1 %204 }
 0x1bc   :  { %v217_v11 = vmul.f32 %v3272_v4, %v3272_v4  ;;  %v229_v12 = vmul.f32 %v227_v5, %v227_v5  ;;  %v245_v14 = vsub.f32 %v3258_v0, %v3279_v10  ;;  %v3289_v17 = vmul.f32 2.0, %v3279_v10 }
 0x1bd   :  { %v3286_v15 = vadd.f32 %v212_v7, %v3242_v57  ;;  %v226_v16 = vadd.f32 %v224_v9, %v222_v8  ;;  %v263_v22 = vmul.f32 4.0, %v3279_v10  ;;  %v3308_v32 = vadd.f32 %v237_v13, %v3279_v10 }
 0x1be   :  { %v219_v19 = vmul.f32 1.0833334, %v217_v11  ;;  %v231_v20 = vmul.f32 0.25, %v229_v12  ;;  %v3294_v21 = vpop.permute.xlu0 %202  ;;  %v247_v25 = vmul.f32 %v245_v14, %v245_v14  ;;  %v255_v30 = vsub.f32 %v3233_v54, %v3289_v17 }
 0x1bf   :  { %v216_v23 = vmul.f32 %v3286_v15, %v3286_v15  ;;  %v228_v24 = vmul.f32 %v226_v16, %v226_v16  ;;  %v3299_v26 = vpop.permute.xlu1 %208  ;;  %v244_v29 = vsub.f32 %v3260_v1, %v3294_v21  ;;  %v265_v34 = vsub.f32 %v225_v63, %v263_v22 }
 0x1c0   :  { %v233_v28 = vadd.f32 %v231_v20, %v219_v19  ;;  %v3311_v33 = vadd.f32 %v255_v30, %v3299_v26  ;;  %v249_v37 = vmul.f32 0.25, %v247_v25  ;;  %v241_v38 = vmul.f32 %v3308_v32, %v3308_v32 }
 0x1c1   :  { %v218_v27 = vmul.f32 1.0833334, %v216_v23  ;;  %v230_v31 = vmul.f32 0.25, %v228_v24  ;;  %v3319_v39 = vmul.f32 2.0, %v3294_v21  ;;  %v246_v40 = vmul.f32 %v244_v29, %v244_v29 }
 0x1c2   :  { %v275_v36 = vadd.f32 1e-13, %v233_v28  ;;  %v259_v41 = vmul.f32 %v3311_v33, %v3311_v33  ;;  %v267_v42 = vadd.f32 %v265_v34, %v3299_v26  ;;  %v243_v45 = vmul.f32 1.0833334, %v241_v38  ;;  %v3329_v49 = vpop.permute.xlu0 %206 }
 0x1c3   :  { %v232_v44 = vadd.f32 %v230_v31, %v218_v27  ;;  %v254_v46 = vsub.f32 %v3242_v57, %v3319_v39  ;;  %v262_v47 = vmul.f32 4.0, %v3294_v21  ;;  %v3332_v56 = vadd.f32 %v236_v43, %v3294_v21 }
 0x1c4   :  { %v261_v51 = vmul.f32 1.0833334, %v259_v41  ;;  %v269_v52 = vmul.f32 %v267_v42, %v267_v42  ;;  %v277_v53 = vmul.f32 %v275_v36, %v275_v36  ;;  %v251_v55 = vadd.f32 %v249_v37, %v243_v45 }
 0x1c5   :  { %v3335_v59 = vadd.f32 %v254_v46, %v3329_v49  ;;  %v264_v61 = vsub.f32 %v224_v9, %v262_v47  ;;  %v274_v62 = vadd.f32 1e-13, %v232_v44  ;;  %v248_v63 = vmul.f32 0.25, %v246_v40 }
 0x1c6   :  { %v271_v58 = vmul.f32 0.25, %v269_v52  ;;  %v281_v2 = vadd.f32 1e-13, %v251_v55  ;;  %v240_v3 = vmul.f32 %v3332_v56, %v3332_v56  ;;  %2770 = vrcp.f32 %v277_v53 }
 0x1c7   :  { %v258_v7 = vmul.f32 %v3335_v59, %v3335_v59  ;;  %v266_v8 = vadd.f32 %v264_v61, %v3329_v49  ;;  %v276_v20 = vmul.f32 %v274_v62, %v274_v62  ;;  %v329_v45 = vmul.f32 2.0, %v3264_v60 }
 0x1c8   :  { %v273_v5 = vadd.f32 %v271_v58, %v261_v51  ;;  %v283_v11 = vmul.f32 %v281_v2, %v281_v2  ;;  %v242_v12 = vmul.f32 1.0833334, %v240_v3  ;;  %v331_v52 = vmul.f32 7.0, %v3258_v0 }
 0x1c9   :  { %v260_v16 = vmul.f32 1.0833334, %v258_v7  ;;  %v268_v19 = vmul.f32 %v266_v8, %v266_v8  ;;  %v341_v61 = vsub.f32 0.0, %v3258_v0  ;;  %v328_v3 = vmul.f32 2.0, %v3274_v6 }
 0x1ca   :  { %v287_v14 = vadd.f32 1e-13, %v273_v5  ;;  %2772 = vrcp.f32 %v283_v11  ;;  %v250_v9 = vadd.f32 %v248_v63, %v242_v12  ;;  %v333_v2 = vsub.f32 %v329_v45, %v331_v52 }
 0x1cb   :  { %v270_v23 = vmul.f32 0.25, %v268_v19  ;;  %v351_v60 = vmul.f32 5.0, %v3279_v10  ;;  %v335_v12 = vmul.f32 11.0, %v3233_v54  ;;  %v340_v6 = vsub.f32 0.0, %v3260_v1 }
 0x1cc   :  { %v289_v22 = vmul.f32 %v287_v14, %v287_v14  ;;  %v280_v24 = vadd.f32 1e-13, %v250_v9  ;;  %v343_v14 = vmul.f32 5.0, %v3233_v54  ;;  %v350_v10 = vmul.f32 5.0, %v3294_v21 }
 0x1cd   :  { %v272_v25 = vadd.f32 %v270_v23, %v260_v16  ;;  %v330_v16 = vmul.f32 7.0, %v3260_v1  ;;  %v353_v23 = vadd.f32 %v351_v60, %v3292_v18 }
 0x1ce   :  { %2774 = vrcp.f32 %v289_v22  ;;  %v282_v13 = vmul.f32 %v280_v24, %v280_v24  ;;  %v345_v9 = vadd.f32 %v343_v14, %v341_v61  ;;  %v352_v1 = vadd.f32 %v350_v10, %v3314_v35 }
 0x1cf   :  { %2776 = vrcp.f32 %v276_v20  ;;  %v286_v28 = vadd.f32 1e-13, %v272_v25  ;;  %v337_v20 = vadd.f32 %v335_v12, %v333_v2  ;;  %v332_v22 = vsub.f32 %v328_v3, %v330_v16 }
 0x1d0   :  { %2778 = vrcp.f32 %v282_v13  ;;  %v2771_v30 = vpop.eup %2770  ;;  %v347_v24 = vadd.f32 %v345_v9, %v3289_v17  ;;  %v342_v25 = vmul.f32 5.0, %v3242_v57  ;;  %v334_v13 = vmul.f32 11.0, %v3242_v57 }
 0x1d1   :  { %v288_v29 = vmul.f32 %v286_v28, %v286_v28  ;;  %v299_v31 = vmul.f32 0.25, %v2771_v30  ;;  %v293_v37 = vmul.f32 0.1, %v2771_v30  ;;  %v354_v2 = vsub.f32 %v352_v1, %v3329_v49 }
 0x1d2   :  { %v344_v28 = vadd.f32 %v342_v25, %v340_v6  ;;  %v336_v30 = vadd.f32 %v334_v13, %v332_v22 }
 0x1d3   :  { %2780 = vrcp.f32 %v288_v29 }
 0x1d4   :  { %v2773_v27 = vpop.eup %2772 }
 0x1d5   :  { %v301_v34 = vmul.f32 0.5, %v2773_v27  ;;  %v295_v36 = vmul.f32 0.6, %v2773_v27  ;;  %v355_v27 = vsub.f32 %v353_v23, %v3299_v26 }
 0x1d7   :  { %v311_v40 = vadd.f32 %v301_v34, %v299_v31  ;;  %v305_v44 = vadd.f32 %v295_v36, %v293_v37  ;;  %v357_v26 = vmul.f32 0.16666667, %v355_v27 }
 0x1d8   :  { %v2775_v38 = vpop.eup %2774 }
 0x1d9   :  { %v2777_v41 = vpop.eup %2776  ;;  %v303_v42 = vmul.f32 0.25, %v2775_v38  ;;  %v297_v43 = vmul.f32 0.3, %v2775_v38  ;;  %v339_v38 = vmul.f32 0.16666667, %v337_v20 }
 0x1da   :  { %v2779_v46 = vpop.eup %2778  ;;  %v298_v53 = vmul.f32 0.25, %v2777_v41  ;;  %v292_v62 = vmul.f32 0.1, %v2777_v41  ;;  %v349_v41 = vmul.f32 0.16666667, %v347_v24 }
 0x1db   :  { %v313_v47 = vadd.f32 %v311_v40, %v303_v42  ;;  %v307_v51 = vadd.f32 %v305_v44, %v297_v43  ;;  %v300_v55 = vmul.f32 0.5, %v2779_v46  ;;  %v3344_v58 = vmul.f32 0.6, %v2779_v46 }
 0x1dd   :  { %2782 = vrcp.f32 %v313_v47  ;;  %v2781_v63 = vpop.eup %2780  ;;  %v310_v5 = vadd.f32 %v300_v55, %v298_v53  ;;  %v304_v11 = vadd.f32 %v3344_v58, %v292_v62  ;;  %v346_v47 = vadd.f32 %v344_v28, %v3319_v39 }
 0x1de   :  { %2784 = vrcp.f32 %v307_v51  ;;  %v302_v7 = vmul.f32 0.25, %v2781_v63  ;;  %v296_v8 = vmul.f32 0.3, %v2781_v63 }
 0x1e0   :  { %v312_v0 = vadd.f32 %v310_v5, %v302_v7  ;;  %v306_v19 = vadd.f32 %v304_v11, %v296_v8 }
 0x1e2   :  { %2786 = vrcp.f32 %v312_v0  ;;  %v356_v0 = vmul.f32 0.16666667, %v354_v2 }
 0x1e3   :  { %2788 = vrcp.f32 %v306_v19 }
 0x1e7   :  { %v2783_v29 = vpop.eup %2782 }
 0x1e8   :  { %v2785_v40 = vpop.eup %2784  ;;  %v327_v18 = vmul.f32 %v2783_v29, %v303_v42  ;;  %v323_v21 = vmul.f32 %v2783_v29, %v299_v31  ;;  %v325_v44 = vmul.f32 %v2783_v29, %v301_v34 }
 0x1e9   :  { %v317_v45 = vmul.f32 %v2785_v40, %v293_v37  ;;  %v319_v17 = vmul.f32 %v2785_v40, %v295_v36  ;;  %v321_v46 = vmul.f32 %v2785_v40, %v297_v43  ;;  %v338_v37 = vmul.f32 0.16666667, %v336_v30 }
 0x1ea   :  { %v383_v51 = vmul.f32 %v327_v18, %v3311_v33  ;;  %v377_v52 = vmul.f32 %v323_v21, %v3272_v4  ;;  %v379_v61 = vmul.f32 %v325_v44, %v3308_v32  ;;  %v348_v36 = vmul.f32 0.16666667, %v346_v47 }
 0x1eb   :  { %v359_v63 = vmul.f32 %v339_v38, %v317_v45  ;;  %v361_v35 = vmul.f32 %v349_v41, %v319_v17  ;;  %v365_v34 = vmul.f32 %v357_v26, %v321_v46  ;;  %v394_v38 = vmul.f32 0.1, %v3242_v57 }
 0x1ec   :  { %v381_v42 = vadd.f32 %v379_v61, %v377_v52  ;;  %v2787_v3 = vpop.eup %2786 }
 0x1ed   :  { %v363_v31 = vadd.f32 %v361_v35, %v359_v63  ;;  %v2789_v43 = vpop.eup %2788  ;;  %v326_v5 = vmul.f32 %v2787_v3, %v302_v7  ;;  %v322_v60 = vmul.f32 %v2787_v3, %v298_v53  ;;  %v324_v33 = vmul.f32 %v2787_v3, %v300_v55 }
 0x1ee   :  { %v385_v39 = vadd.f32 %v383_v51, %v381_v42  ;;  %v316_v4 = vmul.f32 %v2789_v43, %v292_v62  ;;  %v318_v32 = vmul.f32 %v2789_v43, %v3344_v58  ;;  %v320_v12 = vmul.f32 %v2789_v43, %v296_v8 }
 0x1ef   :  { %v367_v11 = vadd.f32 %v365_v34, %v363_v31  ;;  %v382_v14 = vmul.f32 %v326_v5, %v3335_v59  ;;  %v376_v49 = vmul.f32 %v322_v60, %v3286_v15  ;;  %v378_v16 = vmul.f32 %v324_v33, %v3332_v56 }
 0x1f0   :  { %v358_v19 = vmul.f32 %v338_v37, %v316_v4  ;;  %v360_v20 = vmul.f32 %v348_v36, %v318_v32  ;;  %v364_v53 = vmul.f32 %v356_v0, %v320_v12  ;;  %v387_v62 = vmul.f32 113.77778, %v385_v39 }
 0x1f1   :  { %370 = vrot.lane.b32.xlu1 %v367_v11, %s3109_s21  ;;  %v380_v7 = vadd.f32 %v378_v16, %v376_v49  ;;  %v395_v56 = vmul.f32 0.1, %v3233_v54 }
 0x1f2   :  { %v362_v9 = vadd.f32 %v360_v20, %v358_v19  ;;  %v389_v22 = vmul.f32 0.045, %v387_v62 }
 0x1f3   :  { %v384_v55 = vadd.f32 %v382_v14, %v380_v7 }
 0x1f4   :  { %v366_v6 = vadd.f32 %v364_v53, %v362_v9 }
 0x1f5   :  { %v386_v24 = vmul.f32 113.77778, %v384_v55 }
 0x1f6   :  { %368 = vrot.lane.b32.xlu0 %v366_v6, %s3109_s21 }
 0x1f7   :  { %v388_v30 = vmul.f32 0.045, %v386_v24 }
 0x263   :  { %v371_v58 = vpop.permute.xlu1 %370 }
 0x264   :  { %v373_v8 = vsub.f32 %v367_v11, %v371_v58 }
 0x266   :  { %v375_v59 = vmul.f32 10.666667, %v373_v8 }
 0x268   :  { %v391_v15 = vmul.f32 0.055, %v375_v59  ;;  %v369_v23 = vpop.permute.xlu0 %368 }
 0x269   :  { %v372_v25 = vsub.f32 %v366_v6, %v369_v23 }
 0x26a   :  { %v393_v10 = vadd.f32 %v391_v15, %v389_v22 }
 0x26b   :  { %v374_v28 = vmul.f32 10.666667, %v372_v25 }
 0x26c   :  { %v397_v13 = vsub.f32 %v393_v10, %v395_v56 }
 0x26d   :  { %v390_v27 = vmul.f32 0.055, %v374_v28 }
 0x26e   :  { %v399_v29 = vmul.f32 0.07692308, %v397_v13 }
 0x26f   :  { %v392_v40 = vadd.f32 %v390_v27, %v388_v30 }
 0x270   :  { %v401_v1 = vadd.f32 %v399_v29, %v3233_v54 }
 0x271   :  { %v396_v41 = vsub.f32 %v392_v40, %v394_v38 }
 0x272   :  { %v403_v18 = vsel %vm3220_vm4, 0.0, %v401_v1 }
 0x273   :  { %v3379_v21 = vsel %vm3224_vm5, 0.019694662, %v403_v18  ;;  %v398_v44 = vmul.f32 0.07692308, %v396_v41 }
 0x274   :  { %412 = vrot.lane.b32.xlu1 %v3379_v21, %s3109_s21  ;;  %v437_v26 = vmul.f32 3.0, %v3379_v21  ;;  %v3416_v35 = vmul.f32 2.0, %v3379_v21 }
 0x275   :  { %v400_v45 = vadd.f32 %v398_v44, %v3242_v57 }
 0x277   :  { %v402_v54 = vsel %vm3220_vm4, 0.0, %v400_v45 }
 0x278   :  { %408 = vrot.lane.b32.xlu1 %v3379_v21, %s3110_s22  ;;  %v3390_v17 = vsel %vm3224_vm5, 0.019694662, %v402_v54 }
 0x279   :  { %410 = vrot.lane.b32.xlu0 %v3390_v17, %s3109_s21  ;;  %v436_v60 = vmul.f32 3.0, %v3390_v17  ;;  %v3465_v29 = vmul.f32 2.0, %v3390_v17 }
 0x27c   :  { %416 = vrot.lane.b32.xlu1 %v3379_v21, %s3111_s2 }
 0x27d   :  { %406 = vrot.lane.b32.xlu0 %v3390_v17, %s3110_s22 }
 0x280   :  { %420 = vrot.lane.b32.xlu1 %v3379_v21, %s3112_s23 }
 0x281   :  { %414 = vrot.lane.b32.xlu0 %v3390_v17, %s3111_s2 }
 0x285   :  { %418 = vrot.lane.b32.xlu0 %v3390_v17, %s3112_s23 }
 0x2e6   :  { %v3404_v57 = vpop.permute.xlu1 %412 }
 0x2e7   :  { %v423_v46 = vmul.f32 2.0, %v3404_v57  ;;  %v433_v47 = vmul.f32 4.0, %v3404_v57  ;;  %v449_v34 = vsub.f32 %v3404_v57, %v3416_v35 }
 0x2ea   :  { %v3408_v51 = vpop.permute.xlu1 %408 }
 0x2eb   :  { %v425_v52 = vsub.f32 %v3408_v51, %v423_v46  ;;  %v435_v61 = vsub.f32 %v3408_v51, %v433_v47  ;;  %v3413_v63 = vpop.permute.xlu0 %410 }
 0x2ec   :  { %v422_v3 = vmul.f32 2.0, %v3413_v63  ;;  %v432_v43 = vmul.f32 4.0, %v3413_v63  ;;  %v448_v41 = vsub.f32 %v3413_v63, %v3465_v29 }
 0x2ed   :  { %v3419_v2 = vadd.f32 %v425_v52, %v3379_v21  ;;  %v439_v42 = vadd.f32 %v437_v26, %v435_v61 }
 0x2ee   :  { %v3422_v31 = vpop.permute.xlu1 %416 }
 0x2ef   :  { %v429_v37 = vmul.f32 %v3419_v2, %v3419_v2  ;;  %v441_v36 = vmul.f32 %v439_v42, %v439_v42  ;;  %v457_v5 = vsub.f32 %v3404_v57, %v3422_v31  ;;  %v3431_v39 = vpop.permute.xlu0 %406  ;;  %v3435_v33 = vmul.f32 2.0, %v3422_v31 }
 0x2f0   :  { %v475_v11 = vmul.f32 4.0, %v3422_v31  ;;  %v3439_v4 = vadd.f32 %v449_v34, %v3422_v31  ;;  %v424_v14 = vsub.f32 %v3431_v39, %v422_v3  ;;  %v434_v49 = vsub.f32 %v3431_v39, %v432_v43 }
 0x2f1   :  { %v431_v32 = vmul.f32 1.0833334, %v429_v37  ;;  %v443_v12 = vmul.f32 0.25, %v441_v36  ;;  %v459_v16 = vmul.f32 %v457_v5, %v457_v5  ;;  %v467_v0 = vsub.f32 %v3379_v21, %v3435_v33 }
 0x2f2   :  { %v3445_v19 = vpop.permute.xlu1 %420  ;;  %v453_v20 = vmul.f32 %v3439_v4, %v3439_v4  ;;  %v3450_v9 = vadd.f32 %v424_v14, %v3390_v17  ;;  %v438_v53 = vadd.f32 %v436_v60, %v434_v49  ;;  %v477_v55 = vsub.f32 %v437_v26, %v475_v11 }
 0x2f3   :  { %v445_v7 = vadd.f32 %v443_v12, %v431_v32  ;;  %v461_v6 = vmul.f32 0.25, %v459_v16  ;;  %v3452_v58 = vpop.permute.xlu0 %414  ;;  %v3455_v8 = vadd.f32 %v467_v0, %v3445_v19 }
 0x2f4   :  { %v455_v62 = vmul.f32 1.0833334, %v453_v20  ;;  %v428_v22 = vmul.f32 %v3450_v9, %v3450_v9  ;;  %v440_v15 = vmul.f32 %v438_v53, %v438_v53  ;;  %v456_v23 = vsub.f32 %v3413_v63, %v3452_v58 }
 0x2f5   :  { %v487_v59 = vadd.f32 1e-13, %v445_v7  ;;  %v471_v10 = vmul.f32 %v3455_v8, %v3455_v8  ;;  %v479_v24 = vadd.f32 %v477_v55, %v3445_v19  ;;  %v3468_v18 = vmul.f32 2.0, %v3452_v58 }
 0x2f6   :  { %v463_v56 = vadd.f32 %v461_v6, %v455_v62  ;;  %v430_v13 = vmul.f32 1.0833334, %v428_v22  ;;  %v442_v28 = vmul.f32 0.25, %v440_v15  ;;  %v458_v40 = vmul.f32 %v456_v23, %v456_v23 }
 0x2f7   :  { %v489_v25 = vmul.f32 %v487_v59, %v487_v59  ;;  %v473_v30 = vmul.f32 1.0833334, %v471_v10  ;;  %v481_v27 = vmul.f32 %v479_v24, %v479_v24  ;;  %v474_v54 = vmul.f32 4.0, %v3452_v58  ;;  %v3473_v46 = vpop.permute.xlu0 %418 }
 0x2f8   :  { %v493_v1 = vadd.f32 1e-13, %v463_v56  ;;  %v444_v38 = vadd.f32 %v442_v28, %v430_v13  ;;  %v466_v47 = vsub.f32 %v3390_v17, %v3468_v18  ;;  %v3478_v52 = vadd.f32 %v448_v41, %v3452_v58 }
 0x2f9   :  { %2790 = vrcp.f32 %v489_v25  ;;  %v483_v44 = vmul.f32 0.25, %v481_v27  ;;  %v476_v26 = vsub.f32 %v436_v60, %v474_v54  ;;  %v460_v3 = vmul.f32 0.25, %v458_v40 }
 0x2fa   :  { %v495_v45 = vmul.f32 %v493_v1, %v493_v1  ;;  %v486_v42 = vadd.f32 1e-13, %v444_v38  ;;  %v452_v34 = vmul.f32 %v3478_v52, %v3478_v52  ;;  %v3483_v37 = vadd.f32 %v466_v47, %v3473_v46 }
 0x2fb   :  { %v485_v61 = vadd.f32 %v483_v44, %v473_v30  ;;  %v478_v43 = vadd.f32 %v476_v26, %v3473_v46  ;;  %v541_v1 = vmul.f32 2.0, %v3408_v51  ;;  %v543_v40 = vmul.f32 7.0, %v3404_v57 }
 0x2fc   :  { %2792 = vrcp.f32 %v495_v45  ;;  %v454_v5 = vmul.f32 1.0833334, %v452_v34  ;;  %v470_v11 = vmul.f32 %v3483_v37, %v3483_v37  ;;  %v488_v14 = vmul.f32 %v486_v42, %v486_v42 }
 0x2fd   :  { %v499_v36 = vadd.f32 1e-13, %v485_v61  ;;  %v480_v12 = vmul.f32 %v478_v43, %v478_v43  ;;  %v563_v41 = vmul.f32 5.0, %v3422_v31  ;;  %v553_v47 = vsub.f32 0.0, %v3404_v57 }
 0x2fe   :  { %v462_v49 = vadd.f32 %v460_v3, %v454_v5  ;;  %v472_v60 = vmul.f32 1.0833334, %v470_v11  ;;  %v545_v42 = vsub.f32 %v541_v1, %v543_v40  ;;  %v547_v5 = vmul.f32 11.0, %v3379_v21 }
 0x2ff   :  { %v501_v32 = vmul.f32 %v499_v36, %v499_v36  ;;  %v482_v16 = vmul.f32 0.25, %v480_v12  ;;  %v555_v36 = vmul.f32 5.0, %v3379_v21  ;;  %v565_v31 = vadd.f32 %v563_v41, %v3416_v35 }
 0x300   :  { %v492_v0 = vadd.f32 1e-13, %v462_v49  ;;  %v540_v11 = vmul.f32 2.0, %v3431_v39  ;;  %v549_v49 = vadd.f32 %v547_v5, %v545_v42  ;;  %v542_v57 = vmul.f32 7.0, %v3413_v63 }
 0x301   :  { %2794 = vrcp.f32 %v501_v32  ;;  %v484_v7 = vadd.f32 %v482_v16, %v472_v60  ;;  %v557_v12 = vadd.f32 %v555_v36, %v553_v47  ;;  %v546_v16 = vmul.f32 11.0, %v3390_v17 }
 0x302   :  { %2796 = vrcp.f32 %v488_v14  ;;  %v494_v53 = vmul.f32 %v492_v0, %v492_v0  ;;  %v567_v0 = vsub.f32 %v565_v31, %v3445_v19  ;;  %v562_v35 = vmul.f32 5.0, %v3452_v58 }
 0x303   :  { %v2791_v20 = vpop.eup %2790  ;;  %v498_v6 = vadd.f32 1e-13, %v484_v7  ;;  %v559_v60 = vadd.f32 %v557_v12, %v3435_v33  ;;  %v544_v7 = vsub.f32 %v540_v11, %v542_v57  ;;  %v552_v39 = vsub.f32 0.0, %v3413_v63 }
 0x304   :  { %v511_v62 = vmul.f32 0.25, %v2791_v20  ;;  %2798 = vrcp.f32 %v494_v53  ;;  %v505_v56 = vmul.f32 0.1, %v2791_v20  ;;  %v554_v53 = vmul.f32 5.0, %v3390_v17 }
 0x305   :  { %v500_v22 = vmul.f32 %v498_v6, %v498_v6  ;;  %v564_v63 = vadd.f32 %v562_v35, %v3465_v29 }
 0x306   :  { %v2793_v55 = vpop.eup %2792  ;;  %v556_v41 = vadd.f32 %v554_v53, %v552_v39 }
 0x307   :  { %v513_v59 = vmul.f32 0.5, %v2793_v55  ;;  %v507_v23 = vmul.f32 0.6, %v2793_v55  ;;  %2800 = vrcp.f32 %v500_v22  ;;  %v551_v22 = vmul.f32 0.16666667, %v549_v49 }
 0x309   :  { %v523_v15 = vadd.f32 %v513_v59, %v511_v62  ;;  %v517_v13 = vadd.f32 %v507_v23, %v505_v56 }
 0x30b   :  { %v2795_v10 = vpop.eup %2794 }
 0x30c   :  { %v515_v24 = vmul.f32 0.25, %v2795_v10  ;;  %v509_v25 = vmul.f32 0.3, %v2795_v10  ;;  %v2797_v28 = vpop.eup %2796 }
 0x30d   :  { %v510_v44 = vmul.f32 0.25, %v2797_v28  ;;  %v504_v61 = vmul.f32 0.1, %v2797_v28 }
 0x30e   :  { %v525_v30 = vadd.f32 %v523_v15, %v515_v24  ;;  %v519_v27 = vadd.f32 %v517_v13, %v509_v25  ;;  %v2799_v38 = vpop.eup %2798 }
 0x30f   :  { %v512_v45 = vmul.f32 0.5, %v2799_v38  ;;  %v506_v54 = vmul.f32 0.6, %v2799_v38 }
 0x310   :  { %2802 = vrcp.f32 %v525_v30  ;;  %v561_v30 = vmul.f32 0.16666667, %v559_v60 }
 0x311   :  { %2804 = vrcp.f32 %v519_v27  ;;  %v2801_v26 = vpop.eup %2800  ;;  %v522_v3 = vadd.f32 %v512_v45, %v510_v44  ;;  %v516_v43 = vadd.f32 %v506_v54, %v504_v61  ;;  %v569_v27 = vmul.f32 0.16666667, %v567_v0 }
 0x312   :  { %v514_v34 = vmul.f32 0.25, %v2801_v26  ;;  %v508_v51 = vmul.f32 0.3, %v2801_v26  ;;  %v566_v26 = vsub.f32 %v564_v63, %v3473_v46 }
 0x314   :  { %v524_v32 = vadd.f32 %v522_v3, %v514_v34  ;;  %v518_v14 = vadd.f32 %v516_v43, %v508_v51  ;;  %v568_v12 = vmul.f32 0.16666667, %v566_v26 }
 0x316   :  { %2806 = vrcp.f32 %v524_v32 }
 0x317   :  { %2808 = vrcp.f32 %v518_v14 }
 0x31a   :  { %v2803_v20 = vpop.eup %2802 }
 0x31b   :  { %v2805_v55 = vpop.eup %2804  ;;  %v539_v6 = vmul.f32 %v2803_v20, %v515_v24  ;;  %v535_v15 = vmul.f32 %v2803_v20, %v511_v62  ;;  %v537_v10 = vmul.f32 %v2803_v20, %v513_v59  ;;  %v548_v24 = vadd.f32 %v546_v16, %v544_v7 }
 0x31c   :  { %v529_v13 = vmul.f32 %v2805_v55, %v505_v56  ;;  %v531_v33 = vmul.f32 %v2805_v55, %v507_v23  ;;  %v533_v28 = vmul.f32 %v2805_v55, %v509_v25  ;;  %v558_v23 = vadd.f32 %v556_v41, %v3468_v18 }
 0x31d   :  { %v595_v19 = vmul.f32 %v539_v6, %v3455_v8  ;;  %v589_v1 = vmul.f32 %v535_v15, %v3419_v2  ;;  %v591_v58 = vmul.f32 %v537_v10, %v3439_v4  ;;  %v550_v3 = vmul.f32 0.16666667, %v548_v24 }
 0x31e   :  { %v571_v38 = vmul.f32 %v551_v22, %v529_v13  ;;  %v573_v40 = vmul.f32 %v561_v30, %v531_v33  ;;  %v577_v59 = vmul.f32 %v569_v27, %v533_v28  ;;  %v560_v31 = vmul.f32 0.16666667, %v558_v23 }
 0x31f   :  { %v593_v47 = vadd.f32 %v591_v58, %v589_v1  ;;  %v606_v10 = vmul.f32 0.1, %v3390_v17 }
 0x320   :  { %v575_v62 = vadd.f32 %v573_v40, %v571_v38  ;;  %v2807_v25 = vpop.eup %2806 }
 0x321   :  { %v597_v56 = vadd.f32 %v595_v19, %v593_v47  ;;  %v2809_v42 = vpop.eup %2808  ;;  %v538_v2 = vmul.f32 %v2807_v25, %v514_v34  ;;  %v534_v4 = vmul.f32 %v2807_v25, %v510_v44  ;;  %v536_v36 = vmul.f32 %v2807_v25, %v512_v45 }
 0x322   :  { %v579_v8 = vadd.f32 %v577_v59, %v575_v62  ;;  %v528_v29 = vmul.f32 %v2809_v42, %v504_v61  ;;  %v530_v43 = vmul.f32 %v2809_v42, %v506_v54  ;;  %v532_v5 = vmul.f32 %v2809_v42, %v508_v51 }
 0x323   :  { %v594_v11 = vmul.f32 %v538_v2, %v3483_v37  ;;  %v588_v18 = vmul.f32 %v534_v4, %v3450_v9  ;;  %v590_v32 = vmul.f32 %v536_v36, %v3478_v52  ;;  %v599_v54 = vmul.f32 113.77778, %v597_v56 }
 0x324   :  { %582 = vrot.lane.b32.xlu1 %v579_v8, %s3109_s21  ;;  %v570_v46 = vmul.f32 %v550_v3, %v528_v29  ;;  %v572_v14 = vmul.f32 %v560_v31, %v530_v43  ;;  %v576_v57 = vmul.f32 %v568_v12, %v532_v5  ;;  %v607_v9 = vmul.f32 0.1, %v3379_v21 }
 0x325   :  { %v592_v49 = vadd.f32 %v590_v32, %v588_v18  ;;  %v601_v16 = vmul.f32 0.045, %v599_v54 }
 0x326   :  { %v574_v34 = vadd.f32 %v572_v14, %v570_v46 }
 0x327   :  { %v596_v44 = vadd.f32 %v594_v11, %v592_v49 }
 0x328   :  { %v578_v45 = vadd.f32 %v576_v57, %v574_v34 }
 0x329   :  { %v598_v7 = vmul.f32 113.77778, %v596_v44 }
 0x32a   :  { %580 = vrot.lane.b32.xlu0 %v578_v45, %s3109_s21 }
 0x32b   :  { %v600_v6 = vmul.f32 0.045, %v598_v7 }
 0x396   :  { %v583_v61 = vpop.permute.xlu1 %582 }
 0x397   :  { %v585_v51 = vsub.f32 %v579_v8, %v583_v61 }
 0x399   :  { %v587_v60 = vmul.f32 10.666667, %v585_v51 }
 0x39b   :  { %v603_v37 = vmul.f32 0.055, %v587_v60 }
 0x39c   :  { %v581_v52 = vpop.permute.xlu0 %580 }
 0x39d   :  { %v605_v0 = vadd.f32 %v603_v37, %v601_v16  ;;  %v584_v35 = vsub.f32 %v578_v45, %v581_v52 }
 0x39f   :  { %v609_v20 = vsub.f32 %v605_v0, %v607_v9  ;;  %v586_v53 = vmul.f32 10.666667, %v584_v35 }
 0x3a1   :  { %v611_v39 = vmul.f32 0.07692308, %v609_v20  ;;  %v602_v22 = vmul.f32 0.055, %v586_v53 }
 0x3a3   :  { %v613_v55 = vadd.f32 %v611_v39, %v3379_v21  ;;  %v604_v13 = vadd.f32 %v602_v22, %v600_v6 }
 0x3a5   :  { %v615_v15 = vsel %vm3220_vm4, 0.0, %v613_v55  ;;  %v608_v28 = vsub.f32 %v604_v13, %v606_v10 }
 0x3a6   :  { %v3521_v33 = vsel %vm3224_vm5, 0.019543746, %v615_v15 }
 0x3a7   :  { %624 = vrot.lane.b32.xlu1 %v3521_v33, %s3109_s21  ;;  %v610_v30 = vmul.f32 0.07692308, %v608_v28  ;;  %v649_v41 = vmul.f32 3.0, %v3521_v33  ;;  %v3563_v23 = vmul.f32 2.0, %v3521_v33 }
 0x3a9   :  { %v612_v27 = vadd.f32 %v610_v30, %v3390_v17 }
 0x3ab   :  { %620 = vrot.lane.b32.xlu1 %v3521_v33, %s3110_s22  ;;  %v614_v21 = vsel %vm3220_vm4, 0.0, %v612_v27 }
 0x3ac   :  { %v3532_v19 = vsel %vm3224_vm5, 0.019543746, %v614_v21 }
 0x3ad   :  { %622 = vrot.lane.b32.xlu0 %v3532_v19, %s3109_s21  ;;  %v648_v14 = vmul.f32 3.0, %v3532_v19  ;;  %v3611_v13 = vmul.f32 2.0, %v3532_v19 }
 0x3af   :  { %628 = vrot.lane.b32.xlu1 %v3521_v33, %s3111_s2 }
 0x3b1   :  { %618 = vrot.lane.b32.xlu0 %v3532_v19, %s3110_s22 }
 0x3b3   :  { %632 = vrot.lane.b32.xlu1 %v3521_v33, %s3112_s23 }
 0x3b5   :  { %626 = vrot.lane.b32.xlu0 %v3532_v19, %s3111_s2 }
 0x3b9   :  { %630 = vrot.lane.b32.xlu0 %v3532_v19, %s3112_s23 }
 0x419   :  { %v3546_v17 = vpop.permute.xlu1 %624 }
 0x41a   :  { %v635_v1 = vmul.f32 2.0, %v3546_v17  ;;  %v645_v58 = vmul.f32 4.0, %v3546_v17  ;;  %v661_v2 = vsub.f32 %v3546_v17, %v3563_v23 }
 0x41d   :  { %v3550_v63 = vpop.permute.xlu1 %620 }
 0x41e   :  { %v637_v38 = vsub.f32 %v3550_v63, %v635_v1  ;;  %v647_v40 = vsub.f32 %v3550_v63, %v645_v58 }
 0x41f   :  { %v3558_v62 = vpop.permute.xlu0 %622 }
 0x420   :  { %v3556_v24 = vadd.f32 %v637_v38, %v3521_v33  ;;  %v651_v47 = vadd.f32 %v649_v41, %v647_v40  ;;  %v634_v26 = vmul.f32 2.0, %v3558_v62  ;;  %v644_v36 = vmul.f32 4.0, %v3558_v62 }
 0x421   :  { %v3560_v59 = vpop.permute.xlu1 %628  ;;  %v660_v38 = vsub.f32 %v3558_v62, %v3611_v13 }
 0x422   :  { %v641_v56 = vmul.f32 %v3556_v24, %v3556_v24  ;;  %v653_v25 = vmul.f32 %v651_v47, %v651_v47  ;;  %v669_v8 = vsub.f32 %v3546_v17, %v3560_v59  ;;  %v3571_v42 = vmul.f32 2.0, %v3560_v59 }
 0x423   :  { %v687_v29 = vmul.f32 4.0, %v3560_v59  ;;  %v3577_v43 = vpop.permute.xlu0 %618  ;;  %v3584_v18 = vadd.f32 %v661_v2, %v3560_v59 }
 0x424   :  { %v643_v3 = vmul.f32 1.0833334, %v641_v56  ;;  %v655_v4 = vmul.f32 0.25, %v653_v25  ;;  %v671_v5 = vmul.f32 %v669_v8, %v669_v8  ;;  %v679_v31 = vsub.f32 %v3521_v33, %v3571_v42 }
 0x425   :  { %v3581_v11 = vpop.permute.xlu1 %632  ;;  %v636_v12 = vsub.f32 %v3577_v43, %v634_v26  ;;  %v646_v46 = vsub.f32 %v3577_v43, %v644_v36  ;;  %v665_v34 = vmul.f32 %v3584_v18, %v3584_v18  ;;  %v689_v44 = vsub.f32 %v649_v41, %v687_v29 }
 0x426   :  { %v657_v32 = vadd.f32 %v655_v4, %v643_v3  ;;  %v673_v49 = vmul.f32 0.25, %v671_v5  ;;  %v3592_v57 = vadd.f32 %v679_v31, %v3581_v11 }
 0x427   :  { %v3595_v61 = vadd.f32 %v636_v12, %v3532_v19  ;;  %v650_v54 = vadd.f32 %v648_v14, %v646_v46  ;;  %v3597_v51 = vpop.permute.xlu0 %626  ;;  %v667_v60 = vmul.f32 1.0833334, %v665_v34  ;;  %v691_v37 = vadd.f32 %v689_v44, %v3581_v11 }
 0x428   :  { %v699_v45 = vadd.f32 1e-13, %v657_v32  ;;  %v683_v16 = vmul.f32 %v3592_v57, %v3592_v57  ;;  %v668_v55 = vsub.f32 %v3558_v62, %v3597_v51  ;;  %v3607_v15 = vmul.f32 2.0, %v3597_v51 }
 0x429   :  { %v640_v9 = vmul.f32 %v3595_v61, %v3595_v61  ;;  %v652_v0 = vmul.f32 %v650_v54, %v650_v54  ;;  %v675_v20 = vadd.f32 %v673_v49, %v667_v60  ;;  %v693_v35 = vmul.f32 %v691_v37, %v691_v37 }
 0x42a   :  { %v701_v52 = vmul.f32 %v699_v45, %v699_v45  ;;  %v685_v7 = vmul.f32 1.0833334, %v683_v16  ;;  %v686_v10 = vmul.f32 4.0, %v3597_v51  ;;  %v670_v1 = vmul.f32 %v668_v55, %v668_v55 }
 0x42b   :  { %v642_v39 = vmul.f32 1.0833334, %v640_v9  ;;  %v654_v53 = vmul.f32 0.25, %v652_v0  ;;  %v695_v6 = vmul.f32 0.25, %v693_v35  ;;  %v705_v22 = vadd.f32 1e-13, %v675_v20  ;;  %v3613_v21 = vpop.permute.xlu0 %630 }
 0x42c   :  { %2810 = vrcp.f32 %v701_v52  ;;  %v678_v58 = vsub.f32 %v3532_v19, %v3607_v15  ;;  %v688_v41 = vsub.f32 %v648_v14, %v686_v10  ;;  %v3620_v47 = vadd.f32 %v660_v38, %v3597_v51 }
 0x42d   :  { %v656_v28 = vadd.f32 %v654_v53, %v642_v39  ;;  %v697_v30 = vadd.f32 %v695_v6, %v685_v7  ;;  %v707_v27 = vmul.f32 %v705_v22, %v705_v22  ;;  %v672_v2 = vmul.f32 0.25, %v670_v1 }
 0x42e   :  { %v3623_v56 = vadd.f32 %v678_v58, %v3613_v21  ;;  %v690_v8 = vadd.f32 %v688_v41, %v3613_v21  ;;  %v664_v3 = vmul.f32 %v3620_v47, %v3620_v47  ;;  %v753_v20 = vmul.f32 2.0, %v3550_v63 }
 0x42f   :  { %2812 = vrcp.f32 %v707_v27  ;;  %v711_v40 = vadd.f32 1e-13, %v697_v30  ;;  %v698_v25 = vadd.f32 1e-13, %v656_v28  ;;  %v755_v53 = vmul.f32 7.0, %v3546_v17 }
 0x430   :  { %v682_v4 = vmul.f32 %v3623_v56, %v3623_v56  ;;  %v692_v36 = vmul.f32 %v690_v8, %v690_v8  ;;  %v666_v29 = vmul.f32 1.0833334, %v664_v3  ;;  %v765_v10 = vsub.f32 0.0, %v3546_v17 }
 0x431   :  { %v713_v26 = vmul.f32 %v711_v40, %v711_v40  ;;  %v700_v31 = vmul.f32 %v698_v25, %v698_v25  ;;  %v757_v22 = vsub.f32 %v753_v20, %v755_v53  ;;  %v759_v30 = vmul.f32 11.0, %v3521_v33 }
 0x432   :  { %v684_v5 = vmul.f32 1.0833334, %v682_v4  ;;  %v694_v32 = vmul.f32 0.25, %v692_v36  ;;  %v674_v12 = vadd.f32 %v672_v2, %v666_v29  ;;  %v775_v27 = vmul.f32 5.0, %v3560_v59 }
 0x433   :  { %2814 = vrcp.f32 %v713_v26  ;;  %v767_v1 = vmul.f32 5.0, %v3521_v33  ;;  %v761_v58 = vadd.f32 %v759_v30, %v757_v22  ;;  %v754_v59 = vmul.f32 7.0, %v3558_v62 }
 0x434   :  { %v696_v14 = vadd.f32 %v694_v32, %v684_v5  ;;  %v704_v49 = vadd.f32 1e-13, %v674_v12  ;;  %2816 = vrcp.f32 %v700_v31  ;;  %v777_v17 = vadd.f32 %v775_v27, %v3563_v23 }
 0x435   :  { %v769_v38 = vadd.f32 %v767_v1, %v765_v10  ;;  %v763_v5 = vmul.f32 0.16666667, %v761_v58 }
 0x436   :  { %v2811_v46 = vpop.eup %2810  ;;  %v710_v44 = vadd.f32 1e-13, %v696_v14  ;;  %v706_v60 = vmul.f32 %v704_v49, %v704_v49  ;;  %v779_v14 = vsub.f32 %v777_v17, %v3581_v11  ;;  %v764_v49 = vsub.f32 0.0, %v3558_v62 }
 0x437   :  { %v723_v45 = vmul.f32 0.25, %v2811_v46  ;;  %v717_v0 = vmul.f32 0.1, %v2811_v46  ;;  %v771_v2 = vadd.f32 %v769_v38, %v3571_v42  ;;  %v752_v46 = vmul.f32 2.0, %v3577_v43 }
 0x438   :  { %v712_v37 = vmul.f32 %v710_v44, %v710_v44  ;;  %2818 = vrcp.f32 %v706_v60  ;;  %v781_v62 = vmul.f32 0.16666667, %v779_v14 }
 0x439   :  { %v2813_v34 = vpop.eup %2812  ;;  %v756_v53 = vsub.f32 %v752_v46, %v754_v59 }
 0x43a   :  { %v725_v54 = vmul.f32 0.5, %v2813_v34  ;;  %v719_v16 = vmul.f32 0.6, %v2813_v34  ;;  %2820 = vrcp.f32 %v712_v37  ;;  %v773_v34 = vmul.f32 0.16666667, %v771_v2 }
 0x43c   :  { %v735_v9 = vadd.f32 %v725_v54, %v723_v45  ;;  %v729_v39 = vadd.f32 %v719_v16, %v717_v0 }
 0x43d   :  { %v2815_v52 = vpop.eup %2814 }
 0x43e   :  { %v727_v7 = vmul.f32 0.25, %v2815_v52  ;;  %v721_v35 = vmul.f32 0.3, %v2815_v52  ;;  %v2817_v28 = vpop.eup %2816 }
 0x43f   :  { %v722_v41 = vmul.f32 0.25, %v2817_v28  ;;  %v716_v26 = vmul.f32 0.1, %v2817_v28 }
 0x440   :  { %v737_v55 = vadd.f32 %v735_v9, %v727_v7  ;;  %v731_v6 = vadd.f32 %v729_v39, %v721_v35  ;;  %v774_v39 = vmul.f32 5.0, %v3597_v51 }
 0x442   :  { %2822 = vrcp.f32 %v737_v55  ;;  %v2819_v63 = vpop.eup %2818 }
 0x443   :  { %2824 = vrcp.f32 %v731_v6  ;;  %v724_v25 = vmul.f32 0.5, %v2819_v63  ;;  %v718_v8 = vmul.f32 0.6, %v2819_v63 }
 0x444   :  { %v2821_v40 = vpop.eup %2820 }
 0x445   :  { %v726_v3 = vmul.f32 0.25, %v2821_v40  ;;  %v720_v4 = vmul.f32 0.3, %v2821_v40  ;;  %v734_v36 = vadd.f32 %v724_v25, %v722_v41  ;;  %v728_v29 = vadd.f32 %v718_v8, %v716_v26 }
 0x447   :  { %v736_v31 = vadd.f32 %v734_v36, %v726_v3  ;;  %v730_v32 = vadd.f32 %v728_v29, %v720_v4 }
 0x449   :  { %2826 = vrcp.f32 %v736_v31 }
 0x44a   :  { %2828 = vrcp.f32 %v730_v32 }
 0x44c   :  { %v2823_v12 = vpop.eup %2822 }
 0x44d   :  { %v2825_v42 = vpop.eup %2824  ;;  %v751_v44 = vmul.f32 %v2823_v12, %v727_v7  ;;  %v747_v23 = vmul.f32 %v2823_v12, %v723_v45  ;;  %v749_v60 = vmul.f32 %v2823_v12, %v725_v54  ;;  %v766_v7 = vmul.f32 5.0, %v3532_v19 }
 0x44e   :  { %v741_v37 = vmul.f32 %v2825_v42, %v717_v0  ;;  %v743_v9 = vmul.f32 %v2825_v42, %v719_v16  ;;  %v745_v52 = vmul.f32 %v2825_v42, %v721_v35  ;;  %v758_v54 = vmul.f32 11.0, %v3532_v19 }
 0x44f   :  { %v807_v20 = vmul.f32 %v751_v44, %v3592_v57  ;;  %v801_v43 = vmul.f32 %v747_v23, %v3556_v24  ;;  %v803_v11 = vmul.f32 %v749_v60, %v3584_v18  ;;  %v768_v35 = vadd.f32 %v766_v7, %v764_v49 }
 0x450   :  { %v783_v55 = vmul.f32 %v763_v5, %v741_v37  ;;  %v785_v6 = vmul.f32 %v773_v34, %v743_v9  ;;  %v789_v0 = vmul.f32 %v781_v62, %v745_v52  ;;  %v776_v57 = vadd.f32 %v774_v39, %v3611_v13 }
 0x451   :  { %v805_v45 = vadd.f32 %v803_v11, %v801_v43  ;;  %v760_v51 = vadd.f32 %v758_v54, %v756_v53  ;;  %v770_v24 = vadd.f32 %v768_v35, %v3607_v15 }
 0x452   :  { %v787_v16 = vadd.f32 %v785_v6, %v783_v55  ;;  %v778_v28 = vsub.f32 %v776_v57, %v3613_v21 }
 0x453   :  { %v809_v22 = vadd.f32 %v807_v20, %v805_v45  ;;  %v2827_v18 = vpop.eup %2826  ;;  %v762_v27 = vmul.f32 0.16666667, %v760_v51  ;;  %v772_v17 = vmul.f32 0.16666667, %v770_v24  ;;  %v818_v20 = vmul.f32 0.1, %v3532_v19 }
 0x454   :  { %v791_v10 = vadd.f32 %v789_v0, %v787_v16  ;;  %v2829_v30 = vpop.eup %2828  ;;  %v750_v1 = vmul.f32 %v2827_v18, %v726_v3  ;;  %v746_v63 = vmul.f32 %v2827_v18, %v722_v41  ;;  %v748_v58 = vmul.f32 %v2827_v18, %v724_v25 }
 0x455   :  { %v740_v38 = vmul.f32 %v2829_v30, %v716_v26  ;;  %v742_v40 = vmul.f32 %v2829_v30, %v718_v8  ;;  %v744_v2 = vmul.f32 %v2829_v30, %v720_v4  ;;  %v780_v29 = vmul.f32 0.16666667, %v778_v28 }
 0x456   :  { %794 = vrot.lane.b32.xlu1 %v791_v10, %s3109_s21  ;;  %v806_v13 = vmul.f32 %v750_v1, %v3623_v56  ;;  %v800_v36 = vmul.f32 %v746_v63, %v3595_v61  ;;  %v802_v15 = vmul.f32 %v748_v58, %v3620_v47  ;;  %v811_v25 = vmul.f32 113.77778, %v809_v22 }
 0x457   :  { %v782_v5 = vmul.f32 %v762_v27, %v740_v38  ;;  %v784_v59 = vmul.f32 %v772_v17, %v742_v40  ;;  %v788_v32 = vmul.f32 %v780_v29, %v744_v2  ;;  %v819_v61 = vmul.f32 0.1, %v3521_v33 }
 0x458   :  { %v804_v31 = vadd.f32 %v802_v15, %v800_v36  ;;  %v813_v4 = vmul.f32 0.045, %v811_v25 }
 0x459   :  { %v786_v21 = vadd.f32 %v784_v59, %v782_v5 }
 0x45a   :  { %v808_v12 = vadd.f32 %v806_v13, %v804_v31 }
 0x45b   :  { %v790_v3 = vadd.f32 %v788_v32, %v786_v21 }
 0x45c   :  { %v810_v34 = vmul.f32 113.77778, %v808_v12 }
 0x45d   :  { %792 = vrot.lane.b32.xlu0 %v790_v3, %s3109_s21 }
 0x45e   :  { %v812_v9 = vmul.f32 0.045, %v810_v34 }
 0x4c8   :  { %v795_v41 = vpop.permute.xlu1 %794 }
 0x4c9   :  { %v797_v26 = vsub.f32 %v791_v10, %v795_v41 }
 0x4cb   :  { %v799_v8 = vmul.f32 10.666667, %v797_v26 }
 0x4cd   :  { %v815_v56 = vmul.f32 0.055, %v799_v8 }
 0x4cf   :  { %v817_v46 = vadd.f32 %v815_v56, %v813_v4  ;;  %v793_v49 = vpop.permute.xlu0 %792 }
 0x4d0   :  { %v796_v42 = vsub.f32 %v790_v3, %v793_v49 }
 0x4d1   :  { %v821_v47 = vsub.f32 %v817_v46, %v819_v61 }
 0x4d2   :  { %v798_v23 = vmul.f32 10.666667, %v796_v42 }
 0x4d3   :  { %v823_v14 = vmul.f32 0.07692308, %v821_v47 }
 0x4d4   :  { %v814_v52 = vmul.f32 0.055, %v798_v23 }
 0x4d5   :  { %v825_v44 = vadd.f32 %v823_v14, %v3521_v33 }
 0x4d6   :  { %v816_v39 = vadd.f32 %v814_v52, %v812_v9 }
 0x4d7   :  { %v827_v60 = vsel %vm3220_vm4, 0.0, %v825_v44 }
 0x4d8   :  { %v3662_v37 = vsel %vm3224_vm5, 0.019393986, %v827_v60  ;;  %v820_v43 = vsub.f32 %v816_v39, %v818_v20 }
 0x4d9   :  { %836 = vrot.lane.b32.xlu1 %v3662_v37, %s3109_s21  ;;  %v861_v16 = vmul.f32 3.0, %v3662_v37  ;;  %v3698_v0 = vmul.f32 2.0, %v3662_v37 }
 0x4da   :  { %v822_v33 = vmul.f32 0.07692308, %v820_v43 }
 0x4dc   :  { %v824_v11 = vadd.f32 %v822_v33, %v3532_v19 }
 0x4dd   :  { %832 = vrot.lane.b32.xlu1 %v3662_v37, %s3110_s22 }
 0x4de   :  { %v826_v53 = vsel %vm3220_vm4, 0.0, %v824_v11 }
 0x4df   :  { %v3676_v62 = vsel %vm3224_vm5, 0.019393986, %v826_v53 }
 0x4e0   :  { %834 = vrot.lane.b32.xlu0 %v3676_v62, %s3109_s21  ;;  %v860_v41 = vmul.f32 3.0, %v3676_v62  ;;  %v3745_v34 = vmul.f32 2.0, %v3676_v62 }
 0x4e1   :  { %840 = vrot.lane.b32.xlu1 %v3662_v37, %s3111_s2 }
 0x4e4   :  { %830 = vrot.lane.b32.xlu0 %v3676_v62, %s3110_s22 }
 0x4e5   :  { %844 = vrot.lane.b32.xlu1 %v3662_v37, %s3112_s23 }
 0x4e8   :  { %838 = vrot.lane.b32.xlu0 %v3676_v62, %s3111_s2 }
 0x4ec   :  { %842 = vrot.lane.b32.xlu0 %v3676_v62, %s3112_s23 }
 0x54b   :  { %v3688_v19 = vpop.permute.xlu1 %836 }
 0x54c   :  { %v847_v55 = vmul.f32 2.0, %v3688_v19  ;;  %v857_v6 = vmul.f32 4.0, %v3688_v19  ;;  %v873_v51 = vsub.f32 %v3688_v19, %v3698_v0 }
 0x54f   :  { %v3692_v7 = vpop.permute.xlu1 %832 }
 0x550   :  { %v849_v45 = vsub.f32 %v3692_v7, %v847_v55  ;;  %v859_v54 = vsub.f32 %v3692_v7, %v857_v6 }
 0x552   :  { %v3701_v35 = vadd.f32 %v849_v45, %v3662_v37  ;;  %v863_v57 = vadd.f32 %v861_v16, %v859_v54  ;;  %v3718_v1 = vpop.permute.xlu0 %834 }
 0x553   :  { %v3703_v22 = vpop.permute.xlu1 %840  ;;  %v846_v15 = vmul.f32 2.0, %v3718_v1  ;;  %v856_v29 = vmul.f32 4.0, %v3718_v1  ;;  %v872_v11 = vsub.f32 %v3718_v1, %v3745_v34 }
 0x554   :  { %v853_v10 = vmul.f32 %v3701_v35, %v3701_v35  ;;  %v865_v24 = vmul.f32 %v863_v57, %v863_v57  ;;  %v881_v18 = vsub.f32 %v3688_v19, %v3703_v22  ;;  %v3712_v28 = vmul.f32 2.0, %v3703_v22 }
 0x555   :  { %v899_v30 = vmul.f32 4.0, %v3703_v22  ;;  %v3716_v27 = vadd.f32 %v873_v51, %v3703_v22 }
 0x556   :  { %v855_v63 = vmul.f32 1.0833334, %v853_v10  ;;  %v867_v58 = vmul.f32 0.25, %v865_v24  ;;  %v883_v38 = vmul.f32 %v881_v18, %v881_v18  ;;  %v891_v13 = vsub.f32 %v3662_v37, %v3712_v28  ;;  %v3728_v31 = vpop.permute.xlu0 %830 }
 0x557   :  { %v3720_v40 = vpop.permute.xlu1 %844  ;;  %v877_v36 = vmul.f32 %v3716_v27, %v3716_v27  ;;  %v901_v5 = vsub.f32 %v861_v16, %v899_v30  ;;  %v848_v12 = vsub.f32 %v3728_v31, %v846_v15  ;;  %v858_v3 = vsub.f32 %v3728_v31, %v856_v29 }
 0x558   :  { %v869_v2 = vadd.f32 %v867_v58, %v855_v63  ;;  %v885_v17 = vmul.f32 0.25, %v883_v38  ;;  %v3731_v32 = vadd.f32 %v891_v13, %v3720_v40 }
 0x559   :  { %v879_v21 = vmul.f32 1.0833334, %v877_v36  ;;  %v903_v25 = vadd.f32 %v901_v5, %v3720_v40  ;;  %v3740_v56 = vadd.f32 %v848_v12, %v3676_v62  ;;  %v862_v61 = vadd.f32 %v860_v41, %v858_v3 }
 0x55a   :  { %v911_v59 = vadd.f32 1e-13, %v869_v2  ;;  %v895_v4 = vmul.f32 %v3731_v32, %v3731_v32  ;;  %v3742_v47 = vpop.permute.xlu0 %838 }
 0x55b   :  { %v887_v8 = vadd.f32 %v885_v17, %v879_v21  ;;  %v905_v46 = vmul.f32 %v903_v25, %v903_v25  ;;  %v852_v42 = vmul.f32 %v3740_v56, %v3740_v56  ;;  %v864_v44 = vmul.f32 %v862_v61, %v862_v61 }
 0x55c   :  { %v913_v26 = vmul.f32 %v911_v59, %v911_v59  ;;  %v897_v14 = vmul.f32 1.0833334, %v895_v4  ;;  %v880_v23 = vsub.f32 %v3718_v1, %v3742_v47  ;;  %v3752_v52 = vmul.f32 2.0, %v3742_v47 }
 0x55d   :  { %v917_v49 = vadd.f32 1e-13, %v887_v8  ;;  %v907_v60 = vmul.f32 0.25, %v905_v46  ;;  %v898_v20 = vmul.f32 4.0, %v3742_v47  ;;  %v854_v39 = vmul.f32 1.0833334, %v852_v42 }
 0x55e   :  { %2830 = vrcp.f32 %v913_v26  ;;  %v866_v43 = vmul.f32 0.25, %v864_v44  ;;  %v882_v33 = vmul.f32 %v880_v23, %v880_v23  ;;  %v890_v55 = vsub.f32 %v3676_v62, %v3752_v52  ;;  %v3759_v6 = vpop.permute.xlu0 %842 }
 0x55f   :  { %v919_v9 = vmul.f32 %v917_v49, %v917_v49  ;;  %v909_v53 = vadd.f32 %v907_v60, %v897_v14  ;;  %v3762_v54 = vadd.f32 %v872_v11, %v3742_v47  ;;  %v900_v16 = vsub.f32 %v860_v41, %v898_v20 }
 0x560   :  { %v868_v45 = vadd.f32 %v866_v43, %v854_v39  ;;  %v3765_v51 = vadd.f32 %v890_v55, %v3759_v6  ;;  %v884_v24 = vmul.f32 0.25, %v882_v33  ;;  %v965_v14 = vmul.f32 2.0, %v3692_v7 }
 0x561   :  { %2832 = vrcp.f32 %v919_v9  ;;  %v923_v57 = vadd.f32 1e-13, %v909_v53  ;;  %v876_v18 = vmul.f32 %v3762_v54, %v3762_v54  ;;  %v902_v30 = vadd.f32 %v900_v16, %v3759_v6 }
 0x562   :  { %v910_v10 = vadd.f32 1e-13, %v868_v45  ;;  %v894_v58 = vmul.f32 %v3765_v51, %v3765_v51  ;;  %v967_v23 = vmul.f32 7.0, %v3688_v19  ;;  %v977_v33 = vsub.f32 0.0, %v3688_v19 }
 0x563   :  { %v925_v63 = vmul.f32 %v923_v57, %v923_v57  ;;  %v878_v38 = vmul.f32 1.0833334, %v876_v18  ;;  %v904_v2 = vmul.f32 %v902_v30, %v902_v30  ;;  %v971_v11 = vmul.f32 11.0, %v3662_v37 }
 0x564   :  { %v912_v17 = vmul.f32 %v910_v10, %v910_v10  ;;  %v896_v13 = vmul.f32 1.0833334, %v894_v58  ;;  %v969_v39 = vsub.f32 %v965_v14, %v967_v23  ;;  %v987_v53 = vmul.f32 5.0, %v3703_v22 }
 0x565   :  { %2834 = vrcp.f32 %v925_v63  ;;  %v886_v15 = vadd.f32 %v884_v24, %v878_v38  ;;  %v906_v29 = vmul.f32 0.25, %v904_v2  ;;  %v979_v24 = vmul.f32 5.0, %v3662_v37 }
 0x566   :  { %2836 = vrcp.f32 %v912_v17  ;;  %v973_v10 = vadd.f32 %v971_v11, %v969_v39  ;;  %v964_v38 = vmul.f32 2.0, %v3728_v31  ;;  %v989_v19 = vadd.f32 %v987_v53, %v3698_v0 }
 0x567   :  { %v908_v5 = vadd.f32 %v906_v29, %v896_v13  ;;  %v916_v59 = vadd.f32 1e-13, %v886_v15  ;;  %v981_v2 = vadd.f32 %v979_v24, %v977_v33  ;;  %v966_v22 = vmul.f32 7.0, %v3718_v1 }
 0x568   :  { %v2831_v36 = vpop.eup %2830  ;;  %v975_v15 = vmul.f32 0.16666667, %v973_v10  ;;  %v978_v23 = vmul.f32 5.0, %v3676_v62 }
 0x569   :  { %v935_v12 = vmul.f32 0.25, %v2831_v36  ;;  %v918_v41 = vmul.f32 %v916_v59, %v916_v59  ;;  %v922_v25 = vadd.f32 1e-13, %v908_v5  ;;  %v929_v61 = vmul.f32 0.1, %v2831_v36 }
 0x56a   :  { %v983_v36 = vadd.f32 %v981_v2, %v3712_v28  ;;  %v976_v5 = vsub.f32 0.0, %v3718_v1  ;;  %v968_v59 = vsub.f32 %v964_v38, %v966_v22 }
 0x56b   :  { %v2833_v21 = vpop.eup %2832  ;;  %2838 = vrcp.f32 %v918_v41  ;;  %v924_v8 = vmul.f32 %v922_v25, %v922_v25  ;;  %v986_v25 = vmul.f32 5.0, %v3742_v47 }
 0x56c   :  { %v937_v3 = vmul.f32 0.5, %v2833_v21  ;;  %v931_v4 = vmul.f32 0.6, %v2833_v21  ;;  %v991_v21 = vsub.f32 %v989_v19, %v3720_v40  ;;  %v970_v40 = vmul.f32 11.0, %v3676_v62 }
 0x56d   :  { %2840 = vrcp.f32 %v924_v8  ;;  %v980_v47 = vadd.f32 %v978_v23, %v976_v5 }
 0x56e   :  { %v947_v26 = vadd.f32 %v937_v3, %v935_v12  ;;  %v941_v44 = vadd.f32 %v931_v4, %v929_v61 }
 0x56f   :  { %v2835_v46 = vpop.eup %2834 }
 0x570   :  { %v939_v49 = vmul.f32 0.25, %v2835_v46  ;;  %v933_v42 = vmul.f32 0.3, %v2835_v46  ;;  %v2837_v20 = vpop.eup %2836 }
 0x571   :  { %v934_v55 = vmul.f32 0.25, %v2837_v20  ;;  %v928_v45 = vmul.f32 0.1, %v2837_v20 }
 0x572   :  { %v949_v60 = vadd.f32 %v947_v26, %v939_v49  ;;  %v943_v9 = vadd.f32 %v941_v44, %v933_v42  ;;  %v985_v44 = vmul.f32 0.16666667, %v983_v36 }
 0x574   :  { %2842 = vrcp.f32 %v949_v60 }
 0x575   :  { %2844 = vrcp.f32 %v943_v9  ;;  %v2839_v43 = vpop.eup %2838  ;;  %v993_v9 = vmul.f32 0.16666667, %v991_v21 }
 0x576   :  { %v936_v7 = vmul.f32 0.5, %v2839_v43  ;;  %v930_v16 = vmul.f32 0.6, %v2839_v43 }
 0x577   :  { %v2841_v57 = vpop.eup %2840 }
 0x578   :  { %v938_v18 = vmul.f32 0.25, %v2841_v57  ;;  %v946_v30 = vadd.f32 %v936_v7, %v934_v55  ;;  %v932_v63 = vmul.f32 0.3, %v2841_v57  ;;  %v940_v58 = vadd.f32 %v930_v16, %v928_v45 }
 0x57a   :  { %v948_v17 = vadd.f32 %v946_v30, %v938_v18  ;;  %v942_v13 = vadd.f32 %v940_v58, %v932_v63 }
 0x57c   :  { %2846 = vrcp.f32 %v948_v17 }
 0x57d   :  { %2848 = vrcp.f32 %v942_v13 }
 0x57e   :  { %v2843_v29 = vpop.eup %2842 }
 0x57f   :  { %v2845_v41 = vpop.eup %2844  ;;  %v963_v31 = vmul.f32 %v2843_v29, %v939_v49  ;;  %v959_v0 = vmul.f32 %v2843_v29, %v935_v12  ;;  %v961_v26 = vmul.f32 %v2843_v29, %v937_v3  ;;  %v988_v12 = vadd.f32 %v986_v25, %v3745_v34 }
 0x580   :  { %v953_v8 = vmul.f32 %v2845_v41, %v929_v61  ;;  %v955_v46 = vmul.f32 %v2845_v41, %v931_v4  ;;  %v957_v14 = vmul.f32 %v2845_v41, %v933_v42  ;;  %v972_v4 = vadd.f32 %v970_v40, %v968_v59 }
 0x581   :  { %v1019_v28 = vmul.f32 %v963_v31, %v3731_v32  ;;  %v1013_v1 = vmul.f32 %v959_v0, %v3701_v35  ;;  %v1015_v60 = vmul.f32 %v961_v26, %v3716_v27  ;;  %v982_v32 = vadd.f32 %v980_v47, %v3752_v52 }
 0x582   :  { %v995_v49 = vmul.f32 %v975_v15, %v953_v8  ;;  %v997_v20 = vmul.f32 %v985_v44, %v955_v46  ;;  %v1001_v42 = vmul.f32 %v993_v9, %v957_v14  ;;  %v990_v35 = vsub.f32 %v988_v12, %v3759_v6 }
 0x583   :  { %v1017_v3 = vadd.f32 %v1015_v60, %v1013_v1  ;;  %v974_v11 = vmul.f32 0.16666667, %v972_v4  ;;  %v984_v58 = vmul.f32 0.16666667, %v982_v32  ;;  %v1030_v14 = vmul.f32 0.1, %v3676_v62 }
 0x584   :  { %v999_v61 = vadd.f32 %v997_v20, %v995_v49  ;;  %v992_v19 = vmul.f32 0.16666667, %v990_v35 }
 0x585   :  { %v1021_v39 = vadd.f32 %v1019_v28, %v1017_v3 }
 0x586   :  { %v1003_v43 = vadd.f32 %v1001_v42, %v999_v61  ;;  %v2847_v33 = vpop.eup %2846 }
 0x587   :  { %v2849_v27 = vpop.eup %2848  ;;  %v962_v53 = vmul.f32 %v2847_v33, %v938_v18  ;;  %v958_v57 = vmul.f32 %v2847_v33, %v934_v55  ;;  %v960_v10 = vmul.f32 %v2847_v33, %v936_v7  ;;  %v1023_v7 = vmul.f32 113.77778, %v1021_v39 }
 0x588   :  { %1006 = vrot.lane.b32.xlu1 %v1003_v43, %s3109_s21  ;;  %v952_v24 = vmul.f32 %v2849_v27, %v928_v45  ;;  %v954_v34 = vmul.f32 %v2849_v27, %v930_v16  ;;  %v956_v30 = vmul.f32 %v2849_v27, %v932_v63 }
 0x589   :  { %v1018_v38 = vmul.f32 %v962_v53, %v3765_v51  ;;  %v1012_v52 = vmul.f32 %v958_v57, %v3740_v56  ;;  %v1014_v2 = vmul.f32 %v960_v10, %v3762_v54  ;;  %v1025_v63 = vmul.f32 0.045, %v1023_v7 }
 0x58a   :  { %v994_v17 = vmul.f32 %v974_v11, %v952_v24  ;;  %v996_v6 = vmul.f32 %v984_v58, %v954_v34  ;;  %v1000_v18 = vmul.f32 %v992_v19, %v956_v30  ;;  %v1031_v56 = vmul.f32 0.1, %v3662_v37 }
 0x58b   :  { %v1016_v13 = vadd.f32 %v1014_v2, %v1012_v52 }
 0x58c   :  { %v998_v22 = vadd.f32 %v996_v6, %v994_v17 }
 0x58d   :  { %v1020_v36 = vadd.f32 %v1018_v38, %v1016_v13 }
 0x58e   :  { %v1002_v15 = vadd.f32 %v1000_v18, %v998_v22 }
 0x58f   :  { %v1022_v59 = vmul.f32 113.77778, %v1020_v36 }
 0x590   :  { %1004 = vrot.lane.b32.xlu0 %v1002_v15, %s3109_s21 }
 0x591   :  { %v1024_v0 = vmul.f32 0.045, %v1022_v59 }
 0x5fa   :  { %v1007_v55 = vpop.permute.xlu1 %1006 }
 0x5fb   :  { %v1009_v45 = vsub.f32 %v1003_v43, %v1007_v55 }
 0x5fd   :  { %v1011_v16 = vmul.f32 10.666667, %v1009_v45 }
 0x5ff   :  { %v1027_v51 = vmul.f32 0.055, %v1011_v16 }
 0x601   :  { %v1029_v29 = vadd.f32 %v1027_v51, %v1025_v63 }
 0x602   :  { %v1005_v5 = vpop.permute.xlu0 %1004 }
 0x603   :  { %v1033_v54 = vsub.f32 %v1029_v29, %v1031_v56  ;;  %v1008_v21 = vsub.f32 %v1002_v15, %v1005_v5 }
 0x605   :  { %v1035_v41 = vmul.f32 0.07692308, %v1033_v54  ;;  %v1010_v31 = vmul.f32 10.666667, %v1008_v21 }
 0x607   :  { %v1037_v25 = vadd.f32 %v1035_v41, %v3662_v37  ;;  %v1026_v26 = vmul.f32 0.055, %v1010_v31 }
 0x609   :  { %v1039_v8 = vsel %vm3220_vm4, 0.0, %v1037_v25  ;;  %v1028_v44 = vadd.f32 %v1026_v26, %v1024_v0 }
 0x60a   :  { %v3804_v46 = vsel %vm3224_vm5, 0.019245375, %v1039_v8 }
 0x60b   :  { %1048 = vrot.lane.b32.xlu1 %v3804_v46, %s3109_s21  ;;  %v1032_v28 = vsub.f32 %v1028_v44, %v1030_v14  ;;  %v1073_v12 = vmul.f32 3.0, %v3804_v46  ;;  %v3845_v42 = vmul.f32 2.0, %v3804_v46 }
 0x60d   :  { %v1034_v23 = vmul.f32 0.07692308, %v1032_v28 }
 0x60f   :  { %1044 = vrot.lane.b32.xlu1 %v3804_v46, %s3110_s22  ;;  %v1036_v37 = vadd.f32 %v1034_v23, %v3676_v62 }
 0x611   :  { %v1038_v1 = vsel %vm3220_vm4, 0.0, %v1036_v37 }
 0x612   :  { %v3816_v60 = vsel %vm3224_vm5, 0.019245375, %v1038_v1 }
 0x613   :  { %1052 = vrot.lane.b32.xlu1 %v3804_v46, %s3111_s2  ;;  %1046 = vrot.lane.b32.xlu0 %v3816_v60, %s3109_s21  ;;  %v1072_v17 = vmul.f32 3.0, %v3816_v60  ;;  %v3885_v51 = vmul.f32 2.0, %v3816_v60 }
 0x617   :  { %1056 = vrot.lane.b32.xlu1 %v3804_v46, %s3112_s23  ;;  %1042 = vrot.lane.b32.xlu0 %v3816_v60, %s3110_s22 }
 0x61b   :  { %1050 = vrot.lane.b32.xlu0 %v3816_v60, %s3111_s2 }
 0x61f   :  { %1054 = vrot.lane.b32.xlu0 %v3816_v60, %s3112_s23 }
 0x67d   :  { %v3830_v62 = vpop.permute.xlu1 %1048 }
 0x67e   :  { %v1059_v40 = vmul.f32 2.0, %v3830_v62  ;;  %v1069_v9 = vmul.f32 4.0, %v3830_v62  ;;  %v1085_v35 = vsub.f32 %v3830_v62, %v3845_v42 }
 0x681   :  { %v3834_v49 = vpop.permute.xlu1 %1044 }
 0x682   :  { %v1061_v20 = vsub.f32 %v3834_v49, %v1059_v40  ;;  %v1071_v47 = vsub.f32 %v3834_v49, %v1069_v9 }
 0x684   :  { %v3840_v3 = vadd.f32 %v1061_v20, %v3804_v46  ;;  %v1075_v4 = vadd.f32 %v1073_v12, %v1071_v47 }
 0x685   :  { %v3842_v61 = vpop.permute.xlu1 %1052  ;;  %v3847_v32 = vpop.permute.xlu0 %1046 }
 0x686   :  { %v1065_v39 = vmul.f32 %v3840_v3, %v3840_v3  ;;  %v1077_v43 = vmul.f32 %v1075_v4, %v1075_v4  ;;  %v1093_v33 = vsub.f32 %v3830_v62, %v3842_v61  ;;  %v1058_v53 = vmul.f32 2.0, %v3847_v32 }
 0x687   :  { %v1068_v10 = vmul.f32 4.0, %v3847_v32  ;;  %v3858_v24 = vmul.f32 2.0, %v3842_v61  ;;  %v1111_v34 = vmul.f32 4.0, %v3842_v61  ;;  %v3862_v30 = vadd.f32 %v1085_v35, %v3842_v61 }
 0x688   :  { %v1067_v27 = vmul.f32 1.0833334, %v1065_v39  ;;  %v1079_v11 = vmul.f32 0.25, %v1077_v43  ;;  %v1095_v57 = vmul.f32 %v1093_v33, %v1093_v33  ;;  %v1084_v0 = vsub.f32 %v3847_v32, %v3885_v51 }
 0x689   :  { %v3864_v38 = vpop.permute.xlu0 %1042  ;;  %v3866_v52 = vpop.permute.xlu1 %1056  ;;  %v1103_v6 = vsub.f32 %v3804_v46, %v3858_v24  ;;  %v1089_v18 = vmul.f32 %v3862_v30, %v3862_v30  ;;  %v1113_v36 = vsub.f32 %v1073_v12, %v1111_v34 }
 0x68a   :  { %v1081_v58 = vadd.f32 %v1079_v11, %v1067_v27  ;;  %v1060_v2 = vsub.f32 %v3864_v38, %v1058_v53  ;;  %v1070_v19 = vsub.f32 %v3864_v38, %v1068_v10  ;;  %v1097_v22 = vmul.f32 0.25, %v1095_v57 }
 0x68b   :  { %v3879_v7 = vadd.f32 %v1103_v6, %v3866_v52  ;;  %v1091_v16 = vmul.f32 1.0833334, %v1089_v18  ;;  %v1115_v63 = vadd.f32 %v1113_v36, %v3866_v52 }
 0x68c   :  { %v1123_v13 = vadd.f32 1e-13, %v1081_v58  ;;  %v3876_v15 = vadd.f32 %v1060_v2, %v3816_v60  ;;  %v1074_v55 = vadd.f32 %v1072_v17, %v1070_v19 }
 0x68d   :  { %v3881_v45 = vpop.permute.xlu0 %1050  ;;  %v1099_v59 = vadd.f32 %v1097_v22, %v1091_v16  ;;  %v1107_v21 = vmul.f32 %v3879_v7, %v3879_v7  ;;  %v1117_v41 = vmul.f32 %v1115_v63, %v1115_v63 }
 0x68e   :  { %v1125_v56 = vmul.f32 %v1123_v13, %v1123_v13  ;;  %v1064_v29 = vmul.f32 %v3876_v15, %v3876_v15  ;;  %v1076_v54 = vmul.f32 %v1074_v55, %v1074_v55  ;;  %v1092_v5 = vsub.f32 %v3847_v32, %v3881_v45 }
 0x68f   :  { %v1109_v8 = vmul.f32 1.0833334, %v1107_v21  ;;  %v1119_v14 = vmul.f32 0.25, %v1117_v41  ;;  %v1129_v44 = vadd.f32 1e-13, %v1099_v59  ;;  %v3896_v23 = vmul.f32 2.0, %v3881_v45 }
 0x690   :  { %v1066_v31 = vmul.f32 1.0833334, %v1064_v29  ;;  %v1078_v25 = vmul.f32 0.25, %v1076_v54  ;;  %v1094_v26 = vmul.f32 %v1092_v5, %v1092_v5  ;;  %2850 = vrcp.f32 %v1125_v56 }
 0x691   :  { %v1110_v37 = vmul.f32 4.0, %v3881_v45  ;;  %v1121_v1 = vadd.f32 %v1119_v14, %v1109_v8  ;;  %v1131_v40 = vmul.f32 %v1129_v44, %v1129_v44  ;;  %v3899_v9 = vpop.permute.xlu0 %1054  ;;  %v1102_v20 = vsub.f32 %v3816_v60, %v3896_v23 }
 0x692   :  { %v1080_v28 = vadd.f32 %v1078_v25, %v1066_v31  ;;  %v3904_v47 = vadd.f32 %v1084_v0, %v3881_v45  ;;  %v1096_v4 = vmul.f32 0.25, %v1094_v26  ;;  %v1177_v31 = vmul.f32 2.0, %v3834_v49 }
 0x693   :  { %v1112_v12 = vsub.f32 %v1072_v17, %v1110_v37  ;;  %2852 = vrcp.f32 %v1131_v40  ;;  %v1135_v39 = vadd.f32 1e-13, %v1121_v1  ;;  %v3909_v35 = vadd.f32 %v1102_v20, %v3899_v9 }
 0x694   :  { %v1122_v43 = vadd.f32 1e-13, %v1080_v28  ;;  %v1088_v33 = vmul.f32 %v3904_v47, %v3904_v47  ;;  %v1179_v8 = vmul.f32 7.0, %v3830_v62  ;;  %v1189_v44 = vsub.f32 0.0, %v3830_v62 }
 0x695   :  { %v1114_v27 = vadd.f32 %v1112_v12, %v3899_v9  ;;  %v1137_v11 = vmul.f32 %v1135_v39, %v1135_v39  ;;  %v1106_v57 = vmul.f32 %v3909_v35, %v3909_v35  ;;  %v1199_v37 = vmul.f32 5.0, %v3842_v61 }
 0x696   :  { %v1090_v53 = vmul.f32 1.0833334, %v1088_v33  ;;  %v1124_v34 = vmul.f32 %v1122_v43, %v1122_v43  ;;  %v1181_v28 = vsub.f32 %v1177_v31, %v1179_v8  ;;  %v1183_v49 = vmul.f32 11.0, %v3804_v46 }
 0x697   :  { %v1116_v10 = vmul.f32 %v1114_v27, %v1114_v27  ;;  %2854 = vrcp.f32 %v1137_v11  ;;  %v1108_v2 = vmul.f32 1.0833334, %v1106_v57  ;;  %v1191_v39 = vmul.f32 5.0, %v3804_v46 }
 0x698   :  { %v1098_v58 = vadd.f32 %v1096_v4, %v1090_v53  ;;  %2856 = vrcp.f32 %v1124_v34  ;;  %v1185_v53 = vadd.f32 %v1183_v49, %v1181_v28  ;;  %v1176_v57 = vmul.f32 2.0, %v3864_v38 }
 0x699   :  { %v1118_v19 = vmul.f32 0.25, %v1116_v10  ;;  %v1193_v62 = vadd.f32 %v1191_v39, %v1189_v44  ;;  %v1201_v10 = vadd.f32 %v1199_v37, %v3845_v42 }
 0x69a   :  { %v2851_v17 = vpop.eup %2850  ;;  %v1128_v13 = vadd.f32 1e-13, %v1098_v58  ;;  %v1178_v58 = vmul.f32 7.0, %v3847_v32 }
 0x69b   :  { %v1120_v6 = vadd.f32 %v1118_v19, %v1108_v2  ;;  %v1147_v55 = vmul.f32 0.25, %v2851_v17  ;;  %v1141_v54 = vmul.f32 0.1, %v2851_v17  ;;  %v1195_v2 = vadd.f32 %v1193_v62, %v3858_v24 }
 0x69c   :  { %v1130_v22 = vmul.f32 %v1128_v13, %v1128_v13  ;;  %v1188_v19 = vsub.f32 0.0, %v3847_v32  ;;  %v1180_v13 = vsub.f32 %v1176_v57, %v1178_v58  ;;  %v1190_v32 = vmul.f32 5.0, %v3816_v60 }
 0x69d   :  { %v1134_v18 = vadd.f32 1e-13, %v1120_v6  ;;  %v2853_v36 = vpop.eup %2852  ;;  %v1187_v6 = vmul.f32 0.16666667, %v1185_v53  ;;  %v1197_v31 = vmul.f32 0.16666667, %v1195_v2 }
 0x69e   :  { %v1149_v16 = vmul.f32 0.5, %v2853_v36  ;;  %2858 = vrcp.f32 %v1130_v22  ;;  %v1143_v56 = vmul.f32 0.6, %v2853_v36  ;;  %v1203_v22 = vsub.f32 %v1201_v10, %v3866_v52 }
 0x69f   :  { %v1136_v63 = vmul.f32 %v1134_v18, %v1134_v18  ;;  %v1198_v36 = vmul.f32 5.0, %v3881_v45  ;;  %v1182_v52 = vmul.f32 11.0, %v3816_v60  ;;  %v1192_v45 = vadd.f32 %v1190_v32, %v1188_v19 }
 0x6a0   :  { %v1159_v29 = vadd.f32 %v1149_v16, %v1147_v55  ;;  %v1153_v41 = vadd.f32 %v1143_v56, %v1141_v54 }
 0x6a1   :  { %2860 = vrcp.f32 %v1136_v63  ;;  %v2855_v5 = vpop.eup %2854 }
 0x6a2   :  { %v1151_v59 = vmul.f32 0.25, %v2855_v5  ;;  %v1145_v21 = vmul.f32 0.3, %v2855_v5  ;;  %v2857_v26 = vpop.eup %2856 }
 0x6a3   :  { %v1146_v1 = vmul.f32 0.25, %v2857_v26  ;;  %v1140_v20 = vmul.f32 0.1, %v2857_v26  ;;  %v1205_v26 = vmul.f32 0.16666667, %v1203_v22 }
 0x6a4   :  { %v1161_v25 = vadd.f32 %v1159_v29, %v1151_v59  ;;  %v1155_v0 = vadd.f32 %v1153_v41, %v1145_v21 }
 0x6a6   :  { %2862 = vrcp.f32 %v1161_v25 }
 0x6a7   :  { %2864 = vrcp.f32 %v1155_v0 }
 0x6a8   :  { %v2859_v14 = vpop.eup %2858 }
 0x6a9   :  { %v1148_v40 = vmul.f32 0.5, %v2859_v14  ;;  %v1142_v12 = vmul.f32 0.6, %v2859_v14 }
 0x6ab   :  { %v2861_v4 = vpop.eup %2860  ;;  %v1158_v33 = vadd.f32 %v1148_v40, %v1146_v1  ;;  %v1152_v11 = vadd.f32 %v1142_v12, %v1140_v20 }
 0x6ac   :  { %v1150_v43 = vmul.f32 0.25, %v2861_v4  ;;  %v1144_v27 = vmul.f32 0.3, %v2861_v4 }
 0x6ae   :  { %v1160_v61 = vadd.f32 %v1158_v33, %v1150_v43  ;;  %v1154_v34 = vadd.f32 %v1152_v11, %v1144_v27 }
 0x6b0   :  { %2866 = vrcp.f32 %v1160_v61  ;;  %v2863_v17 = vpop.eup %2862 }
 0x6b1   :  { %2868 = vrcp.f32 %v1154_v34  ;;  %v2865_v18 = vpop.eup %2864  ;;  %v1175_v38 = vmul.f32 %v2863_v17, %v1151_v59  ;;  %v1171_v42 = vmul.f32 %v2863_v17, %v1147_v55  ;;  %v1173_v63 = vmul.f32 %v2863_v17, %v1149_v16 }
 0x6b2   :  { %v1165_v29 = vmul.f32 %v2865_v18, %v1141_v54  ;;  %v1167_v5 = vmul.f32 %v2865_v18, %v1143_v56  ;;  %v1169_v41 = vmul.f32 %v2865_v18, %v1145_v21  ;;  %v1200_v55 = vadd.f32 %v1198_v36, %v3885_v51 }
 0x6b3   :  { %v1231_v24 = vmul.f32 %v1175_v38, %v3879_v7  ;;  %v1225_v25 = vmul.f32 %v1171_v42, %v3840_v3  ;;  %v1227_v0 = vmul.f32 %v1173_v63, %v3862_v30  ;;  %v1184_v56 = vadd.f32 %v1182_v52, %v1180_v13 }
 0x6b4   :  { %v1207_v59 = vmul.f32 %v1187_v6, %v1165_v29  ;;  %v1209_v8 = vmul.f32 %v1197_v31, %v1167_v5  ;;  %v1213_v21 = vmul.f32 %v1205_v26, %v1169_v41  ;;  %v1194_v7 = vadd.f32 %v1192_v45, %v3896_v23 }
 0x6b5   :  { %v1229_v16 = vadd.f32 %v1227_v0, %v1225_v25  ;;  %v1202_v3 = vsub.f32 %v1200_v55, %v3899_v9  ;;  %v1186_v37 = vmul.f32 0.16666667, %v1184_v56  ;;  %v1242_v41 = vmul.f32 0.1, %v3816_v60 }
 0x6b6   :  { %v1211_v54 = vadd.f32 %v1209_v8, %v1207_v59  ;;  %v1196_v53 = vmul.f32 0.16666667, %v1194_v7 }
 0x6b7   :  { %v1233_v14 = vadd.f32 %v1231_v24, %v1229_v16  ;;  %v1204_v10 = vmul.f32 0.16666667, %v1202_v3 }
 0x6b8   :  { %v1215_v44 = vadd.f32 %v1213_v21, %v1211_v54 }
 0x6ba   :  { %v2867_v28 = vpop.eup %2866  ;;  %1218 = vrot.lane.b32.xlu1 %v1215_v44, %s3109_s21 }
 0x6bb   :  { %v2869_v30 = vpop.eup %2868  ;;  %v1174_v4 = vmul.f32 %v2867_v28, %v1150_v43  ;;  %v1170_v49 = vmul.f32 %v2867_v28, %v1146_v1  ;;  %v1172_v39 = vmul.f32 %v2867_v28, %v1148_v40  ;;  %v1235_v40 = vmul.f32 113.77778, %v1233_v14 }
 0x6bc   :  { %v1164_v33 = vmul.f32 %v2869_v30, %v1140_v20  ;;  %v1166_v51 = vmul.f32 %v2869_v30, %v1142_v12  ;;  %v1168_v11 = vmul.f32 %v2869_v30, %v1144_v27 }
 0x6bd   :  { %v1230_v57 = vmul.f32 %v1174_v4, %v3909_v35  ;;  %v1224_v23 = vmul.f32 %v1170_v49, %v3876_v15  ;;  %v1226_v62 = vmul.f32 %v1172_v39, %v3904_v47  ;;  %v1237_v27 = vmul.f32 0.045, %v1235_v40 }
 0x6be   :  { %v1206_v61 = vmul.f32 %v1186_v37, %v1164_v33  ;;  %v1208_v9 = vmul.f32 %v1196_v53, %v1166_v51  ;;  %v1212_v43 = vmul.f32 %v1204_v10, %v1168_v11  ;;  %v1243_v15 = vmul.f32 0.1, %v3804_v46 }
 0x6bf   :  { %v1228_v34 = vadd.f32 %v1226_v62, %v1224_v23 }
 0x6c0   :  { %v1210_v58 = vadd.f32 %v1208_v9, %v1206_v61 }
 0x6c1   :  { %v1232_v2 = vadd.f32 %v1230_v57, %v1228_v34 }
 0x6c2   :  { %v1214_v19 = vadd.f32 %v1212_v43, %v1210_v58 }
 0x6c3   :  { %v1234_v13 = vmul.f32 113.77778, %v1232_v2 }
 0x6c4   :  { %1216 = vrot.lane.b32.xlu0 %v1214_v19, %s3109_s21 }
 0x6c5   :  { %v1236_v42 = vmul.f32 0.045, %v1234_v13 }
 0x72c   :  { %v1219_v1 = vpop.permute.xlu1 %1218 }
 0x72d   :  { %v1221_v20 = vsub.f32 %v1215_v44, %v1219_v1 }
 0x72f   :  { %v1223_v12 = vmul.f32 10.666667, %v1221_v20 }
 0x731   :  { %v1239_v35 = vmul.f32 0.055, %v1223_v12 }
 0x733   :  { %v1241_v17 = vadd.f32 %v1239_v35, %v1237_v27 }
 0x735   :  { %v1245_v47 = vsub.f32 %v1241_v17, %v1243_v15 }
 0x736   :  { %v1217_v6 = vpop.permute.xlu0 %1216 }
 0x737   :  { %v1220_v22 = vsub.f32 %v1214_v19, %v1217_v6  ;;  %v1247_v18 = vmul.f32 0.07692308, %v1245_v47 }
 0x739   :  { %v1222_v38 = vmul.f32 10.666667, %v1220_v22  ;;  %v1249_v36 = vadd.f32 %v1247_v18, %v3804_v46 }
 0x73b   :  { %v1238_v63 = vmul.f32 0.055, %v1222_v38  ;;  %v1251_v29 = vsel %vm3220_vm4, 0.0, %v1249_v36 }
 0x73c   :  { %v3946_v5 = vsel %vm3224_vm5, 0.0190979, %v1251_v29 }
 0x73d   :  { %v1240_v31 = vadd.f32 %v1238_v63, %v1236_v42  ;;  %1260 = vrot.lane.b32.xlu1 %v3946_v5, %s3109_s21  ;;  %v1285_v55 = vmul.f32 3.0, %v3946_v5  ;;  %v3987_v21 = vmul.f32 2.0, %v3946_v5 }
 0x73f   :  { %v1244_v24 = vsub.f32 %v1240_v31, %v1242_v41 }
 0x741   :  { %v1246_v32 = vmul.f32 0.07692308, %v1244_v24  ;;  %1256 = vrot.lane.b32.xlu1 %v3946_v5, %s3110_s22 }
 0x743   :  { %v1248_v46 = vadd.f32 %v1246_v32, %v3816_v60 }
 0x745   :  { %v1250_v25 = vsel %vm3220_vm4, 0.0, %v1248_v46  ;;  %1264 = vrot.lane.b32.xlu1 %v3946_v5, %s3111_s2 }
 0x746   :  { %v3958_v0 = vsel %vm3224_vm5, 0.0190979, %v1250_v25 }
 0x747   :  { %1258 = vrot.lane.b32.xlu0 %v3958_v0, %s3109_s21  ;;  %v1284_v61 = vmul.f32 3.0, %v3958_v0  ;;  %v4027_v35 = vmul.f32 2.0, %v3958_v0 }
 0x749   :  { %1268 = vrot.lane.b32.xlu1 %v3946_v5, %s3112_s23 }
 0x74b   :  { %1254 = vrot.lane.b32.xlu0 %v3958_v0, %s3110_s22 }
 0x74f   :  { %1262 = vrot.lane.b32.xlu0 %v3958_v0, %s3111_s2 }
 0x753   :  { %1266 = vrot.lane.b32.xlu0 %v3958_v0, %s3112_s23 }
 0x7af   :  { %v3972_v60 = vpop.permute.xlu1 %1260 }
 0x7b0   :  { %v1271_v52 = vmul.f32 2.0, %v3972_v60  ;;  %v1281_v26 = vmul.f32 4.0, %v3972_v60  ;;  %v1297_v3 = vsub.f32 %v3972_v60, %v3987_v21 }
 0x7b3   :  { %v3976_v59 = vpop.permute.xlu1 %1256 }
 0x7b4   :  { %v1273_v8 = vsub.f32 %v3976_v59, %v1271_v52  ;;  %v1283_v45 = vsub.f32 %v3976_v59, %v1281_v26 }
 0x7b6   :  { %v3982_v16 = vadd.f32 %v1273_v8, %v3946_v5  ;;  %v1287_v56 = vadd.f32 %v1285_v55, %v1283_v45 }
 0x7b7   :  { %v3984_v54 = vpop.permute.xlu1 %1264 }
 0x7b8   :  { %v1277_v14 = vmul.f32 %v3982_v16, %v3982_v16  ;;  %v1289_v44 = vmul.f32 %v1287_v56, %v1287_v56  ;;  %v1305_v28 = vsub.f32 %v3972_v60, %v3984_v54  ;;  %v4000_v33 = vmul.f32 2.0, %v3984_v54 }
 0x7b9   :  { %v3989_v7 = vpop.permute.xlu0 %1258  ;;  %v1323_v51 = vmul.f32 4.0, %v3984_v54  ;;  %v4004_v11 = vadd.f32 %v1297_v3, %v3984_v54 }
 0x7ba   :  { %v1279_v30 = vmul.f32 1.0833334, %v1277_v14  ;;  %v1291_v37 = vmul.f32 0.25, %v1289_v44  ;;  %v1270_v4 = vmul.f32 2.0, %v3989_v7  ;;  %v1307_v49 = vmul.f32 %v1305_v28, %v1305_v28 }
 0x7bb   :  { %v1280_v39 = vmul.f32 4.0, %v3989_v7  ;;  %v4008_v23 = vpop.permute.xlu1 %1268  ;;  %v1315_v9 = vsub.f32 %v3946_v5, %v4000_v33  ;;  %v1301_v43 = vmul.f32 %v4004_v11, %v4004_v11  ;;  %v1325_v2 = vsub.f32 %v1285_v55, %v1323_v51 }
 0x7bc   :  { %v1293_v53 = vadd.f32 %v1291_v37, %v1279_v30  ;;  %v1309_v58 = vmul.f32 0.25, %v1307_v49  ;;  %v1296_v42 = vsub.f32 %v3989_v7, %v4027_v35 }
 0x7bd   :  { %v4006_v57 = vpop.permute.xlu0 %1254  ;;  %v4021_v40 = vadd.f32 %v1315_v9, %v4008_v23  ;;  %v1303_v12 = vmul.f32 1.0833334, %v1301_v43  ;;  %v1327_v27 = vadd.f32 %v1325_v2, %v4008_v23 }
 0x7be   :  { %v1272_v62 = vsub.f32 %v4006_v57, %v1270_v4  ;;  %v1282_v10 = vsub.f32 %v4006_v57, %v1280_v39  ;;  %v1335_v34 = vadd.f32 1e-13, %v1293_v53 }
 0x7bf   :  { %v1311_v13 = vadd.f32 %v1309_v58, %v1303_v12  ;;  %v1319_v22 = vmul.f32 %v4021_v40, %v4021_v40  ;;  %v1329_v18 = vmul.f32 %v1327_v27, %v1327_v27 }
 0x7c0   :  { %v4018_v19 = vadd.f32 %v1272_v62, %v3958_v0  ;;  %v1286_v1 = vadd.f32 %v1284_v61, %v1282_v10  ;;  %v1337_v15 = vmul.f32 %v1335_v34, %v1335_v34 }
 0x7c1   :  { %v4023_v20 = vpop.permute.xlu0 %1262  ;;  %v1321_v29 = vmul.f32 1.0833334, %v1319_v22  ;;  %v1331_v41 = vmul.f32 0.25, %v1329_v18  ;;  %v1341_v31 = vadd.f32 1e-13, %v1311_v13 }
 0x7c2   :  { %v1276_v17 = vmul.f32 %v4018_v19, %v4018_v19  ;;  %v1288_v47 = vmul.f32 %v1286_v1, %v1286_v1  ;;  %v1304_v6 = vsub.f32 %v3989_v7, %v4023_v20  ;;  %2870 = vrcp.f32 %v1337_v15 }
 0x7c3   :  { %v4038_v32 = vmul.f32 2.0, %v4023_v20  ;;  %v1322_v46 = vmul.f32 4.0, %v4023_v20  ;;  %v1333_v25 = vadd.f32 %v1331_v41, %v1321_v29  ;;  %v1343_v52 = vmul.f32 %v1341_v31, %v1341_v31 }
 0x7c4   :  { %v1278_v38 = vmul.f32 1.0833334, %v1276_v17  ;;  %v1290_v36 = vmul.f32 0.25, %v1288_v47  ;;  %v1306_v63 = vmul.f32 %v1304_v6, %v1304_v6  ;;  %v4046_v45 = vadd.f32 %v1296_v42, %v4023_v20 }
 0x7c5   :  { %v4041_v26 = vpop.permute.xlu0 %1266  ;;  %v1314_v8 = vsub.f32 %v3958_v0, %v4038_v32  ;;  %v1324_v55 = vsub.f32 %v1284_v61, %v1322_v46  ;;  %2872 = vrcp.f32 %v1343_v52  ;;  %v1347_v14 = vadd.f32 1e-13, %v1333_v25 }
 0x7c6   :  { %v1292_v24 = vadd.f32 %v1290_v36, %v1278_v38  ;;  %v1308_v56 = vmul.f32 0.25, %v1306_v63  ;;  %v1300_v28 = vmul.f32 %v4046_v45, %v4046_v45  ;;  %v1389_v38 = vmul.f32 2.0, %v3976_v59 }
 0x7c7   :  { %v4051_v3 = vadd.f32 %v1314_v8, %v4041_v26  ;;  %v1326_v30 = vadd.f32 %v1324_v55, %v4041_v26  ;;  %v1349_v37 = vmul.f32 %v1347_v14, %v1347_v14  ;;  %v1391_v29 = vmul.f32 7.0, %v3972_v60 }
 0x7c8   :  { %v1334_v44 = vadd.f32 1e-13, %v1292_v24  ;;  %v1302_v4 = vmul.f32 1.0833334, %v1300_v28  ;;  %v1401_v31 = vsub.f32 0.0, %v3972_v60  ;;  %v1411_v46 = vmul.f32 5.0, %v3984_v54 }
 0x7c9   :  { %v1318_v49 = vmul.f32 %v4051_v3, %v4051_v3  ;;  %v1328_v39 = vmul.f32 %v1326_v30, %v1326_v30  ;;  %2874 = vrcp.f32 %v1349_v37  ;;  %v1393_v24 = vsub.f32 %v1389_v38, %v1391_v29 }
 0x7ca   :  { %v1336_v51 = vmul.f32 %v1334_v44, %v1334_v44  ;;  %v1310_v53 = vadd.f32 %v1308_v56, %v1302_v4  ;;  %v1395_v59 = vmul.f32 11.0, %v3946_v5  ;;  %v1403_v14 = vmul.f32 5.0, %v3946_v5 }
 0x7cb   :  { %v1320_v62 = vmul.f32 1.0833334, %v1318_v49  ;;  %v1330_v10 = vmul.f32 0.25, %v1328_v39  ;;  %v1388_v49 = vmul.f32 2.0, %v4006_v57  ;;  %v1413_v39 = vadd.f32 %v1411_v46, %v3987_v21 }
 0x7cc   :  { %v2871_v61 = vpop.eup %2870  ;;  %v1340_v34 = vadd.f32 1e-13, %v1310_v53  ;;  %2876 = vrcp.f32 %v1336_v51  ;;  %v1397_v4 = vadd.f32 %v1395_v59, %v1393_v24  ;;  %v1405_v60 = vadd.f32 %v1403_v14, %v1401_v31 }
 0x7cd   :  { %v1332_v9 = vadd.f32 %v1330_v10, %v1320_v62  ;;  %v1359_v1 = vmul.f32 0.25, %v2871_v61  ;;  %v1353_v47 = vmul.f32 0.1, %v2871_v61  ;;  %v1390_v53 = vmul.f32 7.0, %v3989_v7 }
 0x7ce   :  { %v1342_v58 = vmul.f32 %v1340_v34, %v1340_v34  ;;  %v1407_v62 = vadd.f32 %v1405_v60, %v4000_v33  ;;  %v1400_v10 = vsub.f32 0.0, %v3989_v7  ;;  %v1402_v7 = vmul.f32 5.0, %v3958_v0 }
 0x7cf   :  { %v1346_v43 = vadd.f32 1e-13, %v1332_v9  ;;  %v2873_v2 = vpop.eup %2872  ;;  %v1399_v9 = vmul.f32 0.16666667, %v1397_v4  ;;  %v1392_v34 = vsub.f32 %v1388_v49, %v1390_v53 }
 0x7d0   :  { %v1361_v12 = vmul.f32 0.5, %v2873_v2  ;;  %2878 = vrcp.f32 %v1342_v58  ;;  %v1355_v15 = vmul.f32 0.6, %v2873_v2  ;;  %v1415_v58 = vsub.f32 %v1413_v39, %v4008_v23 }
 0x7d1   :  { %v1348_v27 = vmul.f32 %v1346_v43, %v1346_v43  ;;  %v1410_v2 = vmul.f32 5.0, %v4023_v20  ;;  %v1409_v38 = vmul.f32 0.16666667, %v1407_v62  ;;  %v1394_v23 = vmul.f32 11.0, %v3958_v0 }
 0x7d2   :  { %v1371_v17 = vadd.f32 %v1361_v12, %v1359_v1  ;;  %v1365_v18 = vadd.f32 %v1355_v15, %v1353_v47  ;;  %v1404_v20 = vadd.f32 %v1402_v7, %v1400_v10 }
 0x7d3   :  { %2880 = vrcp.f32 %v1348_v27  ;;  %v2875_v6 = vpop.eup %2874 }
 0x7d4   :  { %v1363_v13 = vmul.f32 0.25, %v2875_v6  ;;  %v1357_v22 = vmul.f32 0.3, %v2875_v6 }
 0x7d6   :  { %v1373_v36 = vadd.f32 %v1371_v17, %v1363_v13  ;;  %v1367_v42 = vadd.f32 %v1365_v18, %v1357_v22  ;;  %v2877_v63 = vpop.eup %2876 }
 0x7d7   :  { %v1358_v25 = vmul.f32 0.25, %v2877_v63  ;;  %v1352_v8 = vmul.f32 0.1, %v2877_v63  ;;  %v1417_v63 = vmul.f32 0.16666667, %v1415_v58 }
 0x7d8   :  { %2882 = vrcp.f32 %v1373_v36 }
 0x7d9   :  { %2884 = vrcp.f32 %v1367_v42 }
 0x7da   :  { %v2879_v41 = vpop.eup %2878 }
 0x7db   :  { %v1360_v52 = vmul.f32 0.5, %v2879_v41  ;;  %v1354_v55 = vmul.f32 0.6, %v2879_v41 }
 0x7dd   :  { %v2881_v56 = vpop.eup %2880  ;;  %v1370_v28 = vadd.f32 %v1360_v52, %v1358_v25  ;;  %v1364_v37 = vadd.f32 %v1354_v55, %v1352_v8 }
 0x7de   :  { %v1362_v44 = vmul.f32 0.25, %v2881_v56  ;;  %v1356_v30 = vmul.f32 0.3, %v2881_v56 }
 0x7e0   :  { %v1372_v54 = vadd.f32 %v1370_v28, %v1362_v44  ;;  %v1366_v51 = vadd.f32 %v1364_v37, %v1356_v30 }
 0x7e2   :  { %2886 = vrcp.f32 %v1372_v54  ;;  %v2883_v61 = vpop.eup %2882 }
 0x7e3   :  { %2888 = vrcp.f32 %v1366_v51  ;;  %v2885_v43 = vpop.eup %2884  ;;  %v1387_v57 = vmul.f32 %v2883_v61, %v1363_v13  ;;  %v1383_v21 = vmul.f32 %v2883_v61, %v1359_v1  ;;  %v1385_v27 = vmul.f32 %v2883_v61, %v1361_v12 }
 0x7e4   :  { %v1377_v17 = vmul.f32 %v2885_v43, %v1353_v47  ;;  %v1379_v6 = vmul.f32 %v2885_v43, %v1355_v15  ;;  %v1381_v18 = vmul.f32 %v2885_v43, %v1357_v22  ;;  %v1412_v1 = vadd.f32 %v1410_v2, %v4027_v35 }
 0x7e5   :  { %v1443_v33 = vmul.f32 %v1387_v57, %v4021_v40  ;;  %v1437_v36 = vmul.f32 %v1383_v21, %v3982_v16  ;;  %v1439_v42 = vmul.f32 %v1385_v27, %v4004_v11  ;;  %v1396_v15 = vadd.f32 %v1394_v23, %v1392_v34 }
 0x7e6   :  { %v1419_v13 = vmul.f32 %v1399_v9, %v1377_v17  ;;  %v1421_v29 = vmul.f32 %v1409_v38, %v1379_v6  ;;  %v1425_v22 = vmul.f32 %v1417_v63, %v1381_v18  ;;  %v1406_v40 = vadd.f32 %v1404_v20, %v4038_v32 }
 0x7e7   :  { %v1441_v12 = vadd.f32 %v1439_v42, %v1437_v36  ;;  %v1414_v16 = vsub.f32 %v1412_v1, %v4041_v26  ;;  %v1398_v46 = vmul.f32 0.16666667, %v1396_v15  ;;  %v1454_v18 = vmul.f32 0.1, %v3958_v0 }
 0x7e8   :  { %v1423_v47 = vadd.f32 %v1421_v29, %v1419_v13  ;;  %v1408_v4 = vmul.f32 0.16666667, %v1406_v40 }
 0x7e9   :  { %v1445_v41 = vadd.f32 %v1443_v33, %v1441_v12  ;;  %v1416_v39 = vmul.f32 0.16666667, %v1414_v16 }
 0x7ea   :  { %v1427_v31 = vadd.f32 %v1425_v22, %v1423_v47 }
 0x7ec   :  { %v2887_v24 = vpop.eup %2886  ;;  %1430 = vrot.lane.b32.xlu1 %v1427_v31, %s3109_s21 }
 0x7ed   :  { %v2889_v11 = vpop.eup %2888  ;;  %v1386_v56 = vmul.f32 %v2887_v24, %v1362_v44  ;;  %v1382_v59 = vmul.f32 %v2887_v24, %v1358_v25  ;;  %v1384_v14 = vmul.f32 %v2887_v24, %v1360_v52  ;;  %v1447_v52 = vmul.f32 113.77778, %v1445_v41 }
 0x7ee   :  { %v1376_v28 = vmul.f32 %v2889_v11, %v1352_v8  ;;  %v1378_v35 = vmul.f32 %v2889_v11, %v1354_v55  ;;  %v1380_v37 = vmul.f32 %v2889_v11, %v1356_v30 }
 0x7ef   :  { %v1442_v49 = vmul.f32 %v1386_v56, %v4051_v3  ;;  %v1436_v32 = vmul.f32 %v1382_v59, %v4018_v19  ;;  %v1438_v60 = vmul.f32 %v1384_v14, %v4046_v45  ;;  %v1449_v30 = vmul.f32 0.045, %v1447_v52 }
 0x7f0   :  { %v1418_v54 = vmul.f32 %v1398_v46, %v1376_v28  ;;  %v1420_v26 = vmul.f32 %v1408_v4, %v1378_v35  ;;  %v1424_v44 = vmul.f32 %v1416_v39, %v1380_v37  ;;  %v1455_v19 = vmul.f32 0.1, %v3946_v5 }
 0x7f1   :  { %v1440_v51 = vadd.f32 %v1438_v60, %v1436_v32 }
 0x7f2   :  { %v1422_v53 = vadd.f32 %v1420_v26, %v1418_v54 }
 0x7f3   :  { %v1444_v62 = vadd.f32 %v1442_v49, %v1440_v51 }
 0x7f4   :  { %v1426_v10 = vadd.f32 %v1424_v44, %v1422_v53 }
 0x7f5   :  { %v1446_v34 = vmul.f32 113.77778, %v1444_v62 }
 0x7f6   :  { %1428 = vrot.lane.b32.xlu0 %v1426_v10, %s3109_s21 }
 0x7f7   :  { %v1448_v21 = vmul.f32 0.045, %v1446_v34 }
 0x85e   :  { %v1431_v25 = vpop.permute.xlu1 %1430 }
 0x85f   :  { %v1433_v8 = vsub.f32 %v1427_v31, %v1431_v25 }
 0x861   :  { %v1435_v55 = vmul.f32 10.666667, %v1433_v8 }
 0x863   :  { %v1451_v3 = vmul.f32 0.055, %v1435_v55 }
 0x865   :  { %v1453_v61 = vadd.f32 %v1451_v3, %v1449_v30 }
 0x867   :  { %v1457_v45 = vsub.f32 %v1453_v61, %v1455_v19 }
 0x868   :  { %v1429_v9 = vpop.permute.xlu0 %1428 }
 0x869   :  { %v1432_v58 = vsub.f32 %v1426_v10, %v1429_v9  ;;  %v1459_v43 = vmul.f32 0.07692308, %v1457_v45 }
 0x86b   :  { %v1434_v57 = vmul.f32 10.666667, %v1432_v58  ;;  %v1461_v2 = vadd.f32 %v1459_v43, %v3946_v5 }
 0x86d   :  { %v1450_v27 = vmul.f32 0.055, %v1434_v57  ;;  %v1463_v17 = vsel %vm3220_vm4, 0.0, %v1461_v2 }
 0x86e   :  { %v4088_v6 = vsel %vm3224_vm5, 0.018951558, %v1463_v17 }
 0x86f   :  { %v1452_v38 = vadd.f32 %v1450_v27, %v1448_v21  ;;  %1472 = vrot.lane.b32.xlu1 %v4088_v6, %s3109_s21  ;;  %v1497_v1 = vmul.f32 3.0, %v4088_v6  ;;  %v4129_v22 = vmul.f32 2.0, %v4088_v6 }
 0x871   :  { %v1456_v33 = vsub.f32 %v1452_v38, %v1454_v18 }
 0x873   :  { %v1458_v7 = vmul.f32 0.07692308, %v1456_v33  ;;  %1468 = vrot.lane.b32.xlu1 %v4088_v6, %s3110_s22 }
 0x875   :  { %v1460_v5 = vadd.f32 %v1458_v7, %v3958_v0 }
 0x877   :  { %v1462_v36 = vsel %vm3220_vm4, 0.0, %v1460_v5  ;;  %1476 = vrot.lane.b32.xlu1 %v4088_v6, %s3111_s2 }
 0x878   :  { %v4100_v42 = vsel %vm3224_vm5, 0.018951558, %v1462_v36 }
 0x879   :  { %1470 = vrot.lane.b32.xlu0 %v4100_v42, %s3109_s21  ;;  %v1496_v54 = vmul.f32 3.0, %v4100_v42  ;;  %v4169_v3 = vmul.f32 2.0, %v4100_v42 }
 0x87b   :  { %1480 = vrot.lane.b32.xlu1 %v4088_v6, %s3112_s23 }
 0x87d   :  { %1466 = vrot.lane.b32.xlu0 %v4100_v42, %s3110_s22 }
 0x881   :  { %1474 = vrot.lane.b32.xlu0 %v4100_v42, %s3111_s2 }
 0x885   :  { %1478 = vrot.lane.b32.xlu0 %v4100_v42, %s3112_s23 }
 0x8e1   :  { %v4114_v0 = vpop.permute.xlu1 %1472 }
 0x8e2   :  { %v1483_v23 = vmul.f32 2.0, %v4114_v0  ;;  %v1493_v63 = vmul.f32 4.0, %v4114_v0  ;;  %v1509_v16 = vsub.f32 %v4114_v0, %v4129_v22 }
 0x8e5   :  { %v4118_v13 = vpop.permute.xlu1 %1468 }
 0x8e6   :  { %v1485_v29 = vsub.f32 %v4118_v13, %v1483_v23  ;;  %v1495_v20 = vsub.f32 %v4118_v13, %v1493_v63 }
 0x8e8   :  { %v4124_v12 = vadd.f32 %v1485_v29, %v4088_v6  ;;  %v1499_v15 = vadd.f32 %v1497_v1, %v1495_v20 }
 0x8e9   :  { %v4126_v47 = vpop.permute.xlu1 %1476 }
 0x8ea   :  { %v1489_v41 = vmul.f32 %v4124_v12, %v4124_v12  ;;  %v1501_v31 = vmul.f32 %v1499_v15, %v1499_v15  ;;  %v1517_v24 = vsub.f32 %v4114_v0, %v4126_v47  ;;  %v4142_v28 = vmul.f32 2.0, %v4126_v47 }
 0x8eb   :  { %v4131_v40 = vpop.permute.xlu0 %1470  ;;  %v1535_v35 = vmul.f32 4.0, %v4126_v47  ;;  %v4146_v37 = vadd.f32 %v1509_v16, %v4126_v47 }
 0x8ec   :  { %v1491_v11 = vmul.f32 1.0833334, %v1489_v41  ;;  %v1503_v46 = vmul.f32 0.25, %v1501_v31  ;;  %v1482_v56 = vmul.f32 2.0, %v4131_v40  ;;  %v1519_v59 = vmul.f32 %v1517_v24, %v1517_v24 }
 0x8ed   :  { %v1492_v14 = vmul.f32 4.0, %v4131_v40  ;;  %v4150_v32 = vpop.permute.xlu1 %1480  ;;  %v1527_v26 = vsub.f32 %v4088_v6, %v4142_v28  ;;  %v1513_v44 = vmul.f32 %v4146_v37, %v4146_v37  ;;  %v1537_v62 = vsub.f32 %v1497_v1, %v1535_v35 }
 0x8ee   :  { %v1505_v4 = vadd.f32 %v1503_v46, %v1491_v11  ;;  %v1521_v53 = vmul.f32 0.25, %v1519_v59  ;;  %v1508_v21 = vsub.f32 %v4131_v40, %v4169_v3 }
 0x8ef   :  { %v4148_v49 = vpop.permute.xlu0 %1466  ;;  %v4163_v52 = vadd.f32 %v1527_v26, %v4150_v32  ;;  %v1515_v55 = vmul.f32 1.0833334, %v1513_v44  ;;  %v1539_v30 = vadd.f32 %v1537_v62, %v4150_v32 }
 0x8f0   :  { %v1484_v60 = vsub.f32 %v4148_v49, %v1482_v56  ;;  %v1494_v39 = vsub.f32 %v4148_v49, %v1492_v14  ;;  %v1547_v51 = vadd.f32 1e-13, %v1505_v4 }
 0x8f1   :  { %v1523_v34 = vadd.f32 %v1521_v53, %v1515_v55  ;;  %v1531_v58 = vmul.f32 %v4163_v52, %v4163_v52  ;;  %v1541_v43 = vmul.f32 %v1539_v30, %v1539_v30 }
 0x8f2   :  { %v4160_v10 = vadd.f32 %v1484_v60, %v4100_v42  ;;  %v1498_v25 = vadd.f32 %v1496_v54, %v1494_v39  ;;  %v1549_v19 = vmul.f32 %v1547_v51, %v1547_v51 }
 0x8f3   :  { %v4165_v8 = vpop.permute.xlu0 %1474  ;;  %v1533_v17 = vmul.f32 1.0833334, %v1531_v58  ;;  %v1543_v18 = vmul.f32 0.25, %v1541_v43  ;;  %v1553_v38 = vadd.f32 1e-13, %v1523_v34 }
 0x8f4   :  { %v1488_v61 = vmul.f32 %v4160_v10, %v4160_v10  ;;  %v1500_v45 = vmul.f32 %v1498_v25, %v1498_v25  ;;  %v1516_v9 = vsub.f32 %v4131_v40, %v4165_v8  ;;  %2890 = vrcp.f32 %v1549_v19 }
 0x8f5   :  { %v4180_v7 = vmul.f32 2.0, %v4165_v8  ;;  %v1534_v5 = vmul.f32 4.0, %v4165_v8  ;;  %v1545_v36 = vadd.f32 %v1543_v18, %v1533_v17  ;;  %v1555_v23 = vmul.f32 %v1553_v38, %v1553_v38 }
 0x8f6   :  { %v1490_v57 = vmul.f32 1.0833334, %v1488_v61  ;;  %v1502_v2 = vmul.f32 0.25, %v1500_v45  ;;  %v1518_v27 = vmul.f32 %v1516_v9, %v1516_v9  ;;  %v4188_v20 = vadd.f32 %v1508_v21, %v4165_v8 }
 0x8f7   :  { %v4183_v63 = vpop.permute.xlu0 %1478  ;;  %v1526_v29 = vsub.f32 %v4100_v42, %v4180_v7  ;;  %v1536_v1 = vsub.f32 %v1496_v54, %v1534_v5  ;;  %2892 = vrcp.f32 %v1555_v23  ;;  %v1559_v41 = vadd.f32 1e-13, %v1545_v36 }
 0x8f8   :  { %v1504_v33 = vadd.f32 %v1502_v2, %v1490_v57  ;;  %v1520_v15 = vmul.f32 0.25, %v1518_v27  ;;  %v1512_v24 = vmul.f32 %v4188_v20, %v4188_v20  ;;  %v1601_v57 = vmul.f32 2.0, %v4118_v13 }
 0x8f9   :  { %v4193_v16 = vadd.f32 %v1526_v29, %v4183_v63  ;;  %v1538_v11 = vadd.f32 %v1536_v1, %v4183_v63  ;;  %v1561_v46 = vmul.f32 %v1559_v41, %v1559_v41  ;;  %v1603_v17 = vmul.f32 7.0, %v4114_v0 }
 0x8fa   :  { %v1546_v31 = vadd.f32 1e-13, %v1504_v33  ;;  %v1514_v56 = vmul.f32 1.0833334, %v1512_v24  ;;  %v1613_v38 = vsub.f32 0.0, %v4114_v0  ;;  %v1623_v5 = vmul.f32 5.0, %v4126_v47 }
 0x8fb   :  { %v1530_v59 = vmul.f32 %v4193_v16, %v4193_v16  ;;  %v1540_v14 = vmul.f32 %v1538_v11, %v1538_v11  ;;  %2894 = vrcp.f32 %v1561_v46  ;;  %v1605_v33 = vsub.f32 %v1601_v57, %v1603_v17 }
 0x8fc   :  { %v1548_v35 = vmul.f32 %v1546_v31, %v1546_v31  ;;  %v1522_v4 = vadd.f32 %v1520_v15, %v1514_v56  ;;  %v1607_v13 = vmul.f32 11.0, %v4088_v6  ;;  %v1615_v41 = vmul.f32 5.0, %v4088_v6 }
 0x8fd   :  { %v1532_v60 = vmul.f32 1.0833334, %v1530_v59  ;;  %v1542_v39 = vmul.f32 0.25, %v1540_v14  ;;  %v1600_v59 = vmul.f32 2.0, %v4148_v49  ;;  %v1625_v14 = vadd.f32 %v1623_v5, %v4129_v22 }
 0x8fe   :  { %v2891_v54 = vpop.eup %2890  ;;  %v1552_v51 = vadd.f32 1e-13, %v1522_v4  ;;  %2896 = vrcp.f32 %v1548_v35  ;;  %v1609_v56 = vadd.f32 %v1607_v13, %v1605_v33  ;;  %v1617_v0 = vadd.f32 %v1615_v41, %v1613_v38 }
 0x8ff   :  { %v1544_v26 = vadd.f32 %v1542_v39, %v1532_v60  ;;  %v1571_v25 = vmul.f32 0.25, %v2891_v54  ;;  %v1565_v45 = vmul.f32 0.1, %v2891_v54  ;;  %v1602_v4 = vmul.f32 7.0, %v4131_v40 }
 0x900   :  { %v1554_v53 = vmul.f32 %v1552_v51, %v1552_v51  ;;  %v1619_v60 = vadd.f32 %v1617_v0, %v4142_v28  ;;  %v1612_v39 = vsub.f32 0.0, %v4131_v40  ;;  %v1614_v40 = vmul.f32 5.0, %v4100_v42 }
 0x901   :  { %v1558_v44 = vadd.f32 1e-13, %v1544_v26  ;;  %v2893_v62 = vpop.eup %2892  ;;  %v1611_v26 = vmul.f32 0.16666667, %v1609_v56  ;;  %v1604_v51 = vsub.f32 %v1600_v59, %v1602_v4 }
 0x902   :  { %v1573_v55 = vmul.f32 0.5, %v2893_v62  ;;  %2898 = vrcp.f32 %v1554_v53  ;;  %v1567_v19 = vmul.f32 0.6, %v2893_v62  ;;  %v1627_v53 = vsub.f32 %v1625_v14, %v4150_v32 }
 0x903   :  { %v1560_v30 = vmul.f32 %v1558_v44, %v1558_v44  ;;  %v1622_v62 = vmul.f32 5.0, %v4165_v8  ;;  %v1621_v57 = vmul.f32 0.16666667, %v1619_v60  ;;  %v1606_v32 = vmul.f32 11.0, %v4100_v42 }
 0x904   :  { %v1583_v61 = vadd.f32 %v1573_v55, %v1571_v25  ;;  %v1577_v43 = vadd.f32 %v1567_v19, %v1565_v45  ;;  %v1616_v8 = vadd.f32 %v1614_v40, %v1612_v39 }
 0x905   :  { %2900 = vrcp.f32 %v1560_v30  ;;  %v2895_v9 = vpop.eup %2894 }
 0x906   :  { %v1575_v34 = vmul.f32 0.25, %v2895_v9  ;;  %v1569_v58 = vmul.f32 0.3, %v2895_v9 }
 0x908   :  { %v1585_v2 = vadd.f32 %v1583_v61, %v1575_v34  ;;  %v1579_v21 = vadd.f32 %v1577_v43, %v1569_v58  ;;  %v2897_v27 = vpop.eup %2896 }
 0x909   :  { %v1570_v36 = vmul.f32 0.25, %v2897_v27  ;;  %v1564_v29 = vmul.f32 0.1, %v2897_v27  ;;  %v1629_v27 = vmul.f32 0.16666667, %v1627_v53 }
 0x90a   :  { %2902 = vrcp.f32 %v1585_v2 }
 0x90b   :  { %2904 = vrcp.f32 %v1579_v21 }
 0x90c   :  { %v2899_v18 = vpop.eup %2898 }
 0x90d   :  { %v1572_v23 = vmul.f32 0.5, %v2899_v18  ;;  %v1566_v1 = vmul.f32 0.6, %v2899_v18 }
 0x90f   :  { %v2901_v15 = vpop.eup %2900  ;;  %v1582_v24 = vadd.f32 %v1572_v23, %v1570_v36  ;;  %v1576_v46 = vadd.f32 %v1566_v1, %v1564_v29 }
 0x910   :  { %v1574_v31 = vmul.f32 0.25, %v2901_v15  ;;  %v1568_v11 = vmul.f32 0.3, %v2901_v15 }
 0x912   :  { %v1584_v47 = vadd.f32 %v1582_v24, %v1574_v31  ;;  %v1578_v35 = vadd.f32 %v1576_v46, %v1568_v11 }
 0x914   :  { %2906 = vrcp.f32 %v1584_v47  ;;  %v2903_v54 = vpop.eup %2902 }
 0x915   :  { %2908 = vrcp.f32 %v1578_v35  ;;  %v2905_v44 = vpop.eup %2904  ;;  %v1599_v49 = vmul.f32 %v2903_v54, %v1575_v34  ;;  %v1595_v22 = vmul.f32 %v2903_v54, %v1571_v25  ;;  %v1597_v30 = vmul.f32 %v2903_v54, %v1573_v55 }
 0x916   :  { %v1589_v61 = vmul.f32 %v2905_v44, %v1565_v45  ;;  %v1591_v9 = vmul.f32 %v2905_v44, %v1567_v19  ;;  %v1593_v43 = vmul.f32 %v2905_v44, %v1569_v58  ;;  %v1624_v25 = vadd.f32 %v1622_v62, %v4169_v3 }
 0x917   :  { %v1655_v28 = vmul.f32 %v1599_v49, %v4163_v52  ;;  %v1649_v2 = vmul.f32 %v1595_v22, %v4124_v12  ;;  %v1651_v21 = vmul.f32 %v1597_v30, %v4146_v37  ;;  %v1608_v19 = vadd.f32 %v1606_v32, %v1604_v51 }
 0x918   :  { %v1631_v34 = vmul.f32 %v1611_v26, %v1589_v61  ;;  %v1633_v17 = vmul.f32 %v1621_v57, %v1591_v9  ;;  %v1637_v58 = vmul.f32 %v1629_v27, %v1593_v43  ;;  %v1618_v52 = vadd.f32 %v1616_v8, %v4180_v7 }
 0x919   :  { %v1653_v55 = vadd.f32 %v1651_v21, %v1649_v2  ;;  %v1626_v12 = vsub.f32 %v1624_v25, %v4183_v63  ;;  %v1610_v5 = vmul.f32 0.16666667, %v1608_v19  ;;  %v1666_v43 = vmul.f32 0.1, %v4100_v42 }
 0x91a   :  { %v1635_v45 = vadd.f32 %v1633_v17, %v1631_v34  ;;  %v1620_v56 = vmul.f32 0.16666667, %v1618_v52 }
 0x91b   :  { %v1657_v18 = vadd.f32 %v1655_v28, %v1653_v55  ;;  %v1628_v14 = vmul.f32 0.16666667, %v1626_v12 }
 0x91c   :  { %v1639_v38 = vadd.f32 %v1637_v58, %v1635_v45 }
 0x91e   :  { %v2907_v33 = vpop.eup %2906  ;;  %1642 = vrot.lane.b32.xlu1 %v1639_v38, %s3109_s21 }
 0x91f   :  { %v2909_v37 = vpop.eup %2908  ;;  %v1598_v15 = vmul.f32 %v2907_v33, %v1574_v31  ;;  %v1594_v13 = vmul.f32 %v2907_v33, %v1570_v36  ;;  %v1596_v41 = vmul.f32 %v2907_v33, %v1572_v23  ;;  %v1659_v23 = vmul.f32 113.77778, %v1657_v18 }
 0x920   :  { %v1588_v24 = vmul.f32 %v2909_v37, %v1564_v29  ;;  %v1590_v3 = vmul.f32 %v2909_v37, %v1566_v1  ;;  %v1592_v46 = vmul.f32 %v2909_v37, %v1568_v11 }
 0x921   :  { %v1654_v59 = vmul.f32 %v1598_v15, %v4193_v16  ;;  %v1648_v7 = vmul.f32 %v1594_v13, %v4160_v10  ;;  %v1650_v0 = vmul.f32 %v1596_v41, %v4188_v20  ;;  %v1661_v11 = vmul.f32 0.045, %v1659_v23 }
 0x922   :  { %v1630_v47 = vmul.f32 %v1610_v5, %v1588_v24  ;;  %v1632_v63 = vmul.f32 %v1620_v56, %v1590_v3  ;;  %v1636_v31 = vmul.f32 %v1628_v14, %v1592_v46  ;;  %v1667_v10 = vmul.f32 0.1, %v4088_v6 }
 0x923   :  { %v1652_v35 = vadd.f32 %v1650_v0, %v1648_v7 }
 0x924   :  { %v1634_v4 = vadd.f32 %v1632_v63, %v1630_v47 }
 0x925   :  { %v1656_v60 = vadd.f32 %v1654_v59, %v1652_v35 }
 0x926   :  { %v1638_v39 = vadd.f32 %v1636_v31, %v1634_v4 }
 0x927   :  { %v1658_v51 = vmul.f32 113.77778, %v1656_v60 }
 0x928   :  { %1640 = vrot.lane.b32.xlu0 %v1638_v39, %s3109_s21 }
 0x929   :  { %v1660_v22 = vmul.f32 0.045, %v1658_v51 }
 0x990   :  { %v1643_v36 = vpop.permute.xlu1 %1642 }
 0x991   :  { %v1645_v29 = vsub.f32 %v1639_v38, %v1643_v36 }
 0x993   :  { %v1647_v1 = vmul.f32 10.666667, %v1645_v29 }
 0x995   :  { %v1663_v16 = vmul.f32 0.055, %v1647_v1 }
 0x997   :  { %v1665_v54 = vadd.f32 %v1663_v16, %v1661_v11 }
 0x999   :  { %v1669_v20 = vsub.f32 %v1665_v54, %v1667_v10 }
 0x99a   :  { %v1641_v26 = vpop.permute.xlu0 %1640 }
 0x99b   :  { %v1644_v53 = vsub.f32 %v1638_v39, %v1641_v26  ;;  %v1671_v44 = vmul.f32 0.07692308, %v1669_v20 }
 0x99d   :  { %v1646_v49 = vmul.f32 10.666667, %v1644_v53  ;;  %v1673_v62 = vadd.f32 %v1671_v44, %v4088_v6 }
 0x99f   :  { %v1662_v30 = vmul.f32 0.055, %v1646_v49  ;;  %v1675_v61 = vsel %vm3220_vm4, 0.0, %v1673_v62 }
 0x9a0   :  { %v4230_v9 = vsel %vm3224_vm5, 0.018806336, %v1675_v61 }
 0x9a1   :  { %v1664_v57 = vadd.f32 %v1662_v30, %v1660_v22  ;;  %1684 = vrot.lane.b32.xlu1 %v4230_v9, %s3109_s21  ;;  %v1709_v25 = vmul.f32 3.0, %v4230_v9  ;;  %v4271_v58 = vmul.f32 2.0, %v4230_v9 }
 0x9a3   :  { %v1668_v28 = vsub.f32 %v1664_v57, %v1666_v43 }
 0x9a5   :  { %v1670_v40 = vmul.f32 0.07692308, %v1668_v28  ;;  %1680 = vrot.lane.b32.xlu1 %v4230_v9, %s3110_s22 }
 0x9a7   :  { %v1672_v6 = vadd.f32 %v1670_v40, %v4100_v42 }
 0x9a9   :  { %v1674_v2 = vsel %vm3220_vm4, 0.0, %v1672_v6  ;;  %1688 = vrot.lane.b32.xlu1 %v4230_v9, %s3111_s2 }
 0x9aa   :  { %v4242_v21 = vsel %vm3224_vm5, 0.018806336, %v1674_v2 }
 0x9ab   :  { %1682 = vrot.lane.b32.xlu0 %v4242_v21, %s3109_s21  ;;  %v1708_v47 = vmul.f32 3.0, %v4242_v21  ;;  %v4311_v16 = vmul.f32 2.0, %v4242_v21 }
 0x9ad   :  { %1692 = vrot.lane.b32.xlu1 %v4230_v9, %s3112_s23 }
 0x9af   :  { %1678 = vrot.lane.b32.xlu0 %v4242_v21, %s3110_s22 }
 0x9b3   :  { %1686 = vrot.lane.b32.xlu0 %v4242_v21, %s3111_s2 }
 0x9b7   :  { %1690 = vrot.lane.b32.xlu0 %v4242_v21, %s3112_s23 }
 0xa13   :  { %v4256_v42 = vpop.permute.xlu1 %1684 }
 0xa14   :  { %v1695_v32 = vmul.f32 2.0, %v4256_v42  ;;  %v1705_v27 = vmul.f32 4.0, %v4256_v42  ;;  %v1721_v12 = vsub.f32 %v4256_v42, %v4271_v58 }
 0xa17   :  { %v4260_v34 = vpop.permute.xlu1 %1680 }
 0xa18   :  { %v1697_v17 = vsub.f32 %v4260_v34, %v1695_v32  ;;  %v1707_v8 = vsub.f32 %v4260_v34, %v1705_v27 }
 0xa1a   :  { %v4266_v55 = vadd.f32 %v1697_v17, %v4230_v9  ;;  %v1711_v19 = vadd.f32 %v1709_v25, %v1707_v8 }
 0xa1b   :  { %v4268_v45 = vpop.permute.xlu1 %1688 }
 0xa1c   :  { %v1701_v18 = vmul.f32 %v4266_v55, %v4266_v55  ;;  %v1713_v38 = vmul.f32 %v1711_v19, %v1711_v19  ;;  %v1729_v33 = vsub.f32 %v4256_v42, %v4268_v45  ;;  %v4284_v24 = vmul.f32 2.0, %v4268_v45 }
 0xa1d   :  { %v4273_v52 = vpop.permute.xlu0 %1682  ;;  %v1747_v3 = vmul.f32 4.0, %v4268_v45  ;;  %v4288_v46 = vadd.f32 %v1721_v12, %v4268_v45 }
 0xa1e   :  { %v1703_v37 = vmul.f32 1.0833334, %v1701_v18  ;;  %v1715_v5 = vmul.f32 0.25, %v1713_v38  ;;  %v1694_v15 = vmul.f32 2.0, %v4273_v52  ;;  %v1731_v13 = vmul.f32 %v1729_v33, %v1729_v33 }
 0xa1f   :  { %v1704_v41 = vmul.f32 4.0, %v4273_v52  ;;  %v4292_v7 = vpop.permute.xlu1 %1692  ;;  %v1739_v63 = vsub.f32 %v4230_v9, %v4284_v24  ;;  %v1725_v31 = vmul.f32 %v4288_v46, %v4288_v46  ;;  %v1749_v60 = vsub.f32 %v1709_v25, %v1747_v3 }
 0xa20   :  { %v1717_v56 = vadd.f32 %v1715_v5, %v1703_v37  ;;  %v1733_v4 = vmul.f32 0.25, %v1731_v13  ;;  %v1720_v22 = vsub.f32 %v4273_v52, %v4311_v16 }
 0xa21   :  { %v4290_v59 = vpop.permute.xlu0 %1678  ;;  %v4305_v23 = vadd.f32 %v1739_v63, %v4292_v7  ;;  %v1727_v1 = vmul.f32 1.0833334, %v1725_v31  ;;  %v1751_v11 = vadd.f32 %v1749_v60, %v4292_v7 }
 0xa22   :  { %v1696_v0 = vsub.f32 %v4290_v59, %v1694_v15  ;;  %v1706_v14 = vsub.f32 %v4290_v59, %v1704_v41  ;;  %v1759_v35 = vadd.f32 1e-13, %v1717_v56 }
 0xa23   :  { %v1735_v51 = vadd.f32 %v1733_v4, %v1727_v1  ;;  %v1743_v53 = vmul.f32 %v4305_v23, %v4305_v23  ;;  %v1753_v44 = vmul.f32 %v1751_v11, %v1751_v11 }
 0xa24   :  { %v4302_v39 = vadd.f32 %v1696_v0, %v4242_v21  ;;  %v1710_v36 = vadd.f32 %v1708_v47, %v1706_v14  ;;  %v1761_v10 = vmul.f32 %v1759_v35, %v1759_v35 }
 0xa25   :  { %v4307_v29 = vpop.permute.xlu0 %1686  ;;  %v1745_v61 = vmul.f32 1.0833334, %v1743_v53  ;;  %v1755_v43 = vmul.f32 0.25, %v1753_v44  ;;  %v1765_v57 = vadd.f32 1e-13, %v1735_v51 }
 0xa26   :  { %v1700_v54 = vmul.f32 %v4302_v39, %v4302_v39  ;;  %v1712_v20 = vmul.f32 %v1710_v36, %v1710_v36  ;;  %v1728_v26 = vsub.f32 %v4273_v52, %v4307_v29  ;;  %2910 = vrcp.f32 %v1761_v10 }
 0xa27   :  { %v4322_v40 = vmul.f32 2.0, %v4307_v29  ;;  %v1746_v6 = vmul.f32 4.0, %v4307_v29  ;;  %v1757_v2 = vadd.f32 %v1755_v43, %v1745_v61  ;;  %v1767_v32 = vmul.f32 %v1765_v57, %v1765_v57 }
 0xa28   :  { %v1702_v49 = vmul.f32 1.0833334, %v1700_v54  ;;  %v1714_v62 = vmul.f32 0.25, %v1712_v20  ;;  %v1730_v30 = vmul.f32 %v1728_v26, %v1728_v26  ;;  %v4330_v8 = vadd.f32 %v1720_v22, %v4307_v29 }
 0xa29   :  { %v4325_v27 = vpop.permute.xlu0 %1690  ;;  %v1738_v17 = vsub.f32 %v4242_v21, %v4322_v40  ;;  %v1748_v25 = vsub.f32 %v1708_v47, %v1746_v6  ;;  %2912 = vrcp.f32 %v1767_v32  ;;  %v1771_v18 = vadd.f32 1e-13, %v1757_v2 }
 0xa2a   :  { %v1716_v28 = vadd.f32 %v1714_v62, %v1702_v49  ;;  %v1732_v19 = vmul.f32 0.25, %v1730_v30  ;;  %v1724_v33 = vmul.f32 %v4330_v8, %v4330_v8  ;;  %v1813_v49 = vmul.f32 2.0, %v4260_v34 }
 0xa2b   :  { %v4335_v12 = vadd.f32 %v1738_v17, %v4325_v27  ;;  %v1750_v37 = vadd.f32 %v1748_v25, %v4325_v27  ;;  %v1773_v5 = vmul.f32 %v1771_v18, %v1771_v18  ;;  %v1815_v61 = vmul.f32 7.0, %v4256_v42 }
 0xa2c   :  { %v1758_v38 = vadd.f32 1e-13, %v1716_v28  ;;  %v1726_v15 = vmul.f32 1.0833334, %v1724_v33  ;;  %v1825_v57 = vsub.f32 0.0, %v4256_v42  ;;  %v1835_v6 = vmul.f32 5.0, %v4268_v45 }
 0xa2d   :  { %v1742_v13 = vmul.f32 %v4335_v12, %v4335_v12  ;;  %v1752_v41 = vmul.f32 %v1750_v37, %v1750_v37  ;;  %2914 = vrcp.f32 %v1773_v5  ;;  %v1817_v28 = vsub.f32 %v1813_v49, %v1815_v61 }
 0xa2e   :  { %v1760_v3 = vmul.f32 %v1758_v38, %v1758_v38  ;;  %v1734_v56 = vadd.f32 %v1732_v19, %v1726_v15  ;;  %v1819_v34 = vmul.f32 11.0, %v4230_v9  ;;  %v1827_v18 = vmul.f32 5.0, %v4230_v9 }
 0xa2f   :  { %v1744_v0 = vmul.f32 1.0833334, %v1742_v13  ;;  %v1754_v14 = vmul.f32 0.25, %v1752_v41  ;;  %v1812_v13 = vmul.f32 2.0, %v4290_v59  ;;  %v1837_v41 = vadd.f32 %v1835_v6, %v4271_v58 }
 0xa30   :  { %v2911_v47 = vpop.eup %2910  ;;  %v1764_v35 = vadd.f32 1e-13, %v1734_v56  ;;  %2916 = vrcp.f32 %v1760_v3  ;;  %v1821_v15 = vadd.f32 %v1819_v34, %v1817_v28  ;;  %v1829_v42 = vadd.f32 %v1827_v18, %v1825_v57 }
 0xa31   :  { %v1756_v63 = vadd.f32 %v1754_v14, %v1744_v0  ;;  %v1783_v36 = vmul.f32 0.25, %v2911_v47  ;;  %v1777_v20 = vmul.f32 0.1, %v2911_v47  ;;  %v1814_v56 = vmul.f32 7.0, %v4273_v52 }
 0xa32   :  { %v1766_v4 = vmul.f32 %v1764_v35, %v1764_v35  ;;  %v1831_v0 = vadd.f32 %v1829_v42, %v4284_v24  ;;  %v1824_v14 = vsub.f32 0.0, %v4273_v52  ;;  %v1826_v52 = vmul.f32 5.0, %v4242_v21 }
 0xa33   :  { %v1770_v31 = vadd.f32 1e-13, %v1756_v63  ;;  %v2913_v60 = vpop.eup %2912  ;;  %v1823_v63 = vmul.f32 0.16666667, %v1821_v15  ;;  %v1816_v35 = vsub.f32 %v1812_v13, %v1814_v56 }
 0xa34   :  { %v1785_v1 = vmul.f32 0.5, %v2913_v60  ;;  %2918 = vrcp.f32 %v1766_v4  ;;  %v1779_v10 = vmul.f32 0.6, %v2913_v60  ;;  %v1839_v4 = vsub.f32 %v1837_v41, %v4292_v7 }
 0xa35   :  { %v1772_v11 = vmul.f32 %v1770_v31, %v1770_v31  ;;  %v1834_v60 = vmul.f32 5.0, %v4307_v29  ;;  %v1833_v49 = vmul.f32 0.16666667, %v1831_v0  ;;  %v1818_v7 = vmul.f32 11.0, %v4242_v21 }
 0xa36   :  { %v1795_v54 = vadd.f32 %v1785_v1, %v1783_v36  ;;  %v1789_v44 = vadd.f32 %v1779_v10, %v1777_v20  ;;  %v1828_v29 = vadd.f32 %v1826_v52, %v1824_v14 }
 0xa37   :  { %2920 = vrcp.f32 %v1772_v11  ;;  %v2915_v26 = vpop.eup %2914 }
 0xa38   :  { %v1787_v51 = vmul.f32 0.25, %v2915_v26  ;;  %v1781_v53 = vmul.f32 0.3, %v2915_v26 }
 0xa3a   :  { %v1797_v62 = vadd.f32 %v1795_v54, %v1787_v51  ;;  %v1791_v22 = vadd.f32 %v1789_v44, %v1781_v53  ;;  %v2917_v30 = vpop.eup %2916 }
 0xa3b   :  { %v1782_v2 = vmul.f32 0.25, %v2917_v30  ;;  %v1776_v17 = vmul.f32 0.1, %v2917_v30  ;;  %v1841_v30 = vmul.f32 0.16666667, %v1839_v4 }
 0xa3c   :  { %2922 = vrcp.f32 %v1797_v62 }
 0xa3d   :  { %2924 = vrcp.f32 %v1791_v22 }
 0xa3e   :  { %v2919_v43 = vpop.eup %2918 }
 0xa3f   :  { %v1784_v32 = vmul.f32 0.5, %v2919_v43  ;;  %v1778_v25 = vmul.f32 0.6, %v2919_v43 }
 0xa41   :  { %v2921_v19 = vpop.eup %2920  ;;  %v1794_v33 = vadd.f32 %v1784_v32, %v1782_v2  ;;  %v1788_v5 = vadd.f32 %v1778_v25, %v1776_v17 }
 0xa42   :  { %v1786_v38 = vmul.f32 0.25, %v2921_v19  ;;  %v1780_v37 = vmul.f32 0.3, %v2921_v19 }
 0xa44   :  { %v1796_v45 = vadd.f32 %v1794_v33, %v1786_v38  ;;  %v1790_v3 = vadd.f32 %v1788_v5, %v1780_v37 }
 0xa46   :  { %2926 = vrcp.f32 %v1796_v45  ;;  %v2923_v47 = vpop.eup %2922 }
 0xa47   :  { %2928 = vrcp.f32 %v1790_v3  ;;  %v2925_v31 = vpop.eup %2924  ;;  %v1811_v59 = vmul.f32 %v2923_v47, %v1787_v51  ;;  %v1807_v58 = vmul.f32 %v2923_v47, %v1783_v36  ;;  %v1809_v11 = vmul.f32 %v2923_v47, %v1785_v1 }
 0xa48   :  { %v1801_v54 = vmul.f32 %v2925_v31, %v1777_v20  ;;  %v1803_v26 = vmul.f32 %v2925_v31, %v1779_v10  ;;  %v1805_v44 = vmul.f32 %v2925_v31, %v1781_v53  ;;  %v1836_v36 = vadd.f32 %v1834_v60, %v4311_v16 }
 0xa49   :  { %v1867_v24 = vmul.f32 %v1811_v59, %v4305_v23  ;;  %v1861_v62 = vmul.f32 %v1807_v58, %v4266_v55  ;;  %v1863_v22 = vmul.f32 %v1809_v11, %v4288_v46  ;;  %v1820_v10 = vadd.f32 %v1818_v7, %v1816_v35 }
 0xa4a   :  { %v1843_v51 = vmul.f32 %v1823_v63, %v1801_v54  ;;  %v1845_v61 = vmul.f32 %v1833_v49, %v1803_v26  ;;  %v1849_v53 = vmul.f32 %v1841_v30, %v1805_v44  ;;  %v1830_v23 = vadd.f32 %v1828_v29, %v4322_v40 }
 0xa4b   :  { %v1865_v1 = vadd.f32 %v1863_v22, %v1861_v62  ;;  %v1838_v55 = vsub.f32 %v1836_v36, %v4325_v27  ;;  %v1822_v6 = vmul.f32 0.16666667, %v1820_v10  ;;  %v1878_v44 = vmul.f32 0.1, %v4242_v21 }
 0xa4c   :  { %v1847_v20 = vadd.f32 %v1845_v61, %v1843_v51  ;;  %v1832_v15 = vmul.f32 0.16666667, %v1830_v23 }
 0xa4d   :  { %v1869_v43 = vadd.f32 %v1867_v24, %v1865_v1  ;;  %v1840_v41 = vmul.f32 0.16666667, %v1838_v55 }
 0xa4e   :  { %v1851_v57 = vadd.f32 %v1849_v53, %v1847_v20 }
 0xa50   :  { %v2927_v28 = vpop.eup %2926  ;;  %1854 = vrot.lane.b32.xlu1 %v1851_v57, %s3109_s21 }
 0xa51   :  { %v2929_v46 = vpop.eup %2928  ;;  %v1810_v19 = vmul.f32 %v2927_v28, %v1786_v38  ;;  %v1806_v34 = vmul.f32 %v2927_v28, %v1782_v2  ;;  %v1808_v18 = vmul.f32 %v2927_v28, %v1784_v32  ;;  %v1871_v32 = vmul.f32 113.77778, %v1869_v43 }
 0xa52   :  { %v1800_v33 = vmul.f32 %v2929_v46, %v1776_v17  ;;  %v1802_v16 = vmul.f32 %v2929_v46, %v1778_v25  ;;  %v1804_v5 = vmul.f32 %v2929_v46, %v1780_v37 }
 0xa53   :  { %v1866_v13 = vmul.f32 %v1810_v19, %v4335_v12  ;;  %v1860_v40 = vmul.f32 %v1806_v34, %v4302_v39  ;;  %v1862_v42 = vmul.f32 %v1808_v18, %v4330_v8  ;;  %v1873_v37 = vmul.f32 0.045, %v1871_v32 }
 0xa54   :  { %v1842_v45 = vmul.f32 %v1822_v6, %v1800_v33  ;;  %v1844_v27 = vmul.f32 %v1832_v15, %v1802_v16  ;;  %v1848_v38 = vmul.f32 %v1840_v41, %v1804_v5  ;;  %v1879_v39 = vmul.f32 0.1, %v4230_v9 }
 0xa55   :  { %v1864_v3 = vadd.f32 %v1862_v42, %v1860_v40 }
 0xa56   :  { %v1846_v56 = vadd.f32 %v1844_v27, %v1842_v45 }
 0xa57   :  { %v1868_v0 = vadd.f32 %v1866_v13, %v1864_v3 }
 0xa58   :  { %v1850_v14 = vadd.f32 %v1848_v38, %v1846_v56 }
 0xa59   :  { %v1870_v35 = vmul.f32 113.77778, %v1868_v0 }
 0xa5a   :  { %1852 = vrot.lane.b32.xlu0 %v1850_v14, %s3109_s21 }
 0xa5b   :  { %v1872_v58 = vmul.f32 0.045, %v1870_v35 }
 0xac2   :  { %v1855_v2 = vpop.permute.xlu1 %1854 }
 0xac3   :  { %v1857_v17 = vsub.f32 %v1851_v57, %v1855_v2 }
 0xac5   :  { %v1859_v25 = vmul.f32 10.666667, %v1857_v17 }
 0xac7   :  { %v1875_v12 = vmul.f32 0.055, %v1859_v25 }
 0xac9   :  { %v1877_v47 = vadd.f32 %v1875_v12, %v1873_v37 }
 0xacb   :  { %v1881_v8 = vsub.f32 %v1877_v47, %v1879_v39 }
 0xacc   :  { %v1853_v63 = vpop.permute.xlu0 %1852 }
 0xacd   :  { %v1856_v4 = vsub.f32 %v1850_v14, %v1853_v63  ;;  %v1883_v31 = vmul.f32 0.07692308, %v1881_v8 }
 0xacf   :  { %v1858_v59 = vmul.f32 10.666667, %v1856_v4  ;;  %v1885_v60 = vadd.f32 %v1883_v31, %v4230_v9 }
 0xad1   :  { %v1874_v11 = vmul.f32 0.055, %v1858_v59  ;;  %v1887_v54 = vsel %vm3220_vm4, 0.0, %v1885_v60 }
 0xad2   :  { %v4372_v26 = vsel %vm3224_vm5, 0.018662227, %v1887_v54 }
 0xad3   :  { %v1876_v49 = vadd.f32 %v1874_v11, %v1872_v58  ;;  %1896 = vrot.lane.b32.xlu1 %v4372_v26, %s3109_s21  ;;  %v1921_v36 = vmul.f32 3.0, %v4372_v26  ;;  %v4413_v53 = vmul.f32 2.0, %v4372_v26 }
 0xad5   :  { %v1880_v24 = vsub.f32 %v1876_v49, %v1878_v44 }
 0xad7   :  { %v1882_v52 = vmul.f32 0.07692308, %v1880_v24  ;;  %1892 = vrot.lane.b32.xlu1 %v4372_v26, %s3110_s22 }
 0xad9   :  { %v1884_v9 = vadd.f32 %v1882_v52, %v4242_v21 }
 0xadb   :  { %v1886_v62 = vsel %vm3220_vm4, 0.0, %v1884_v9  ;;  %1900 = vrot.lane.b32.xlu1 %v4372_v26, %s3111_s2 }
 0xadc   :  { %v4384_v22 = vsel %vm3224_vm5, 0.018662227, %v1886_v62 }
 0xadd   :  { %1894 = vrot.lane.b32.xlu0 %v4384_v22, %s3109_s21  ;;  %v1920_v45 = vmul.f32 3.0, %v4384_v22  ;;  %v4459_v60 = vmul.f32 2.0, %v4384_v22 }
 0xadf   :  { %1904 = vrot.lane.b32.xlu1 %v4372_v26, %s3112_s23 }
 0xae1   :  { %1890 = vrot.lane.b32.xlu0 %v4384_v22, %s3110_s22 }
 0xae5   :  { %1898 = vrot.lane.b32.xlu0 %v4384_v22, %s3111_s2 }
 0xae9   :  { %1902 = vrot.lane.b32.xlu0 %v4384_v22, %s3112_s23 }
 0xb45   :  { %v4398_v21 = vpop.permute.xlu1 %1896 }
 0xb46   :  { %v1907_v7 = vmul.f32 2.0, %v4398_v21  ;;  %v1917_v30 = vmul.f32 4.0, %v4398_v21  ;;  %v1933_v55 = vsub.f32 %v4398_v21, %v4413_v53 }
 0xb49   :  { %v4402_v51 = vpop.permute.xlu1 %1892 }
 0xb4a   :  { %v1909_v61 = vsub.f32 %v4402_v51, %v1907_v7  ;;  %v1919_v29 = vsub.f32 %v4402_v51, %v1917_v30 }
 0xb4c   :  { %v4408_v1 = vadd.f32 %v1909_v61, %v4372_v26  ;;  %v1923_v10 = vadd.f32 %v1921_v36, %v1919_v29 }
 0xb4d   :  { %v4410_v20 = vpop.permute.xlu1 %1900 }
 0xb4e   :  { %v1913_v43 = vmul.f32 %v4408_v1, %v4408_v1  ;;  %v1925_v57 = vmul.f32 %v1923_v10, %v1923_v10  ;;  %v1941_v28 = vsub.f32 %v4398_v21, %v4410_v20  ;;  %v4426_v33 = vmul.f32 2.0, %v4410_v20 }
 0xb4f   :  { %v4415_v23 = vpop.permute.xlu0 %1894  ;;  %v1959_v16 = vmul.f32 4.0, %v4410_v20  ;;  %v4430_v5 = vadd.f32 %v1933_v55, %v4410_v20 }
 0xb50   :  { %v1915_v46 = vmul.f32 1.0833334, %v1913_v43  ;;  %v1927_v6 = vmul.f32 0.25, %v1925_v57  ;;  %v1906_v19 = vmul.f32 2.0, %v4415_v23  ;;  %v1943_v34 = vmul.f32 %v1941_v28, %v1941_v28 }
 0xb51   :  { %v1916_v18 = vmul.f32 4.0, %v4415_v23  ;;  %v4434_v40 = vpop.permute.xlu1 %1904  ;;  %v1951_v27 = vsub.f32 %v4372_v26, %v4426_v33  ;;  %v1937_v38 = vmul.f32 %v4430_v5, %v4430_v5  ;;  %v1961_v0 = vsub.f32 %v1921_v36, %v1959_v16 }
 0xb52   :  { %v1929_v15 = vadd.f32 %v1927_v6, %v1915_v46  ;;  %v1945_v56 = vmul.f32 0.25, %v1943_v34  ;;  %v1932_v9 = vsub.f32 %v4415_v23, %v4459_v60 }
 0xb53   :  { %v4432_v13 = vpop.permute.xlu0 %1890  ;;  %v4447_v32 = vadd.f32 %v1951_v27, %v4434_v40  ;;  %v1939_v25 = vmul.f32 1.0833334, %v1937_v38  ;;  %v1963_v37 = vadd.f32 %v1961_v0, %v4434_v40 }
 0xb54   :  { %v1908_v42 = vsub.f32 %v4432_v13, %v1906_v19  ;;  %v1918_v41 = vsub.f32 %v4432_v13, %v1916_v18  ;;  %v1971_v3 = vadd.f32 1e-13, %v1929_v15 }
 0xb55   :  { %v1947_v63 = vadd.f32 %v1945_v56, %v1939_v25  ;;  %v1955_v35 = vmul.f32 %v4447_v32, %v4447_v32  ;;  %v1965_v4 = vmul.f32 %v1963_v37, %v1963_v37 }
 0xb56   :  { %v4444_v14 = vadd.f32 %v1908_v42, %v4384_v22  ;;  %v1922_v2 = vadd.f32 %v1920_v45, %v1918_v41  ;;  %v1973_v8 = vmul.f32 %v1971_v3, %v1971_v3 }
 0xb57   :  { %v4449_v17 = vpop.permute.xlu0 %1898  ;;  %v1957_v11 = vmul.f32 1.0833334, %v1955_v35  ;;  %v1967_v54 = vmul.f32 0.25, %v1965_v4  ;;  %v1977_v44 = vadd.f32 1e-13, %v1947_v63 }
 0xb58   :  { %v1912_v12 = vmul.f32 %v4444_v14, %v4444_v14  ;;  %v1924_v39 = vmul.f32 %v1922_v2, %v1922_v2  ;;  %v1940_v47 = vsub.f32 %v4415_v23, %v4449_v17  ;;  %v4462_v24 = vmul.f32 2.0, %v4449_v17 }
 0xb59   :  { %v1958_v52 = vmul.f32 4.0, %v4449_v17  ;;  %2930 = vrcp.f32 %v1973_v8  ;;  %v1969_v62 = vadd.f32 %v1967_v54, %v1957_v11  ;;  %v1979_v7 = vmul.f32 %v1977_v44, %v1977_v44 }
 0xb5a   :  { %v1914_v31 = vmul.f32 1.0833334, %v1912_v12  ;;  %v1926_v59 = vmul.f32 0.25, %v1924_v39  ;;  %v1942_v58 = vmul.f32 %v1940_v47, %v1940_v47  ;;  %v1950_v61 = vsub.f32 %v4384_v22, %v4462_v24 }
 0xb5b   :  { %v4467_v30 = vpop.permute.xlu0 %1902  ;;  %v4472_v29 = vadd.f32 %v1932_v9, %v4449_v17  ;;  %v1960_v36 = vsub.f32 %v1920_v45, %v1958_v52  ;;  %2932 = vrcp.f32 %v1979_v7  ;;  %v1983_v43 = vadd.f32 1e-13, %v1969_v62 }
 0xb5c   :  { %v1928_v49 = vadd.f32 %v1926_v59, %v1914_v31  ;;  %v1944_v10 = vmul.f32 0.25, %v1942_v58  ;;  %v4477_v55 = vadd.f32 %v1950_v61, %v4467_v30  ;;  %v2025_v31 = vmul.f32 2.0, %v4402_v51 }
 0xb5d   :  { %v1936_v28 = vmul.f32 %v4472_v29, %v4472_v29  ;;  %v1962_v46 = vadd.f32 %v1960_v36, %v4467_v30  ;;  %v1985_v6 = vmul.f32 %v1983_v43, %v1983_v43  ;;  %v2027_v11 = vmul.f32 7.0, %v4398_v21 }
 0xb5e   :  { %v1970_v57 = vadd.f32 1e-13, %v1928_v49  ;;  %v1954_v34 = vmul.f32 %v4477_v55, %v4477_v55  ;;  %v2037_v44 = vsub.f32 0.0, %v4398_v21  ;;  %v2047_v52 = vmul.f32 5.0, %v4410_v20 }
 0xb5f   :  { %v1938_v19 = vmul.f32 1.0833334, %v1936_v28  ;;  %v1964_v18 = vmul.f32 %v1962_v46, %v1962_v46  ;;  %2934 = vrcp.f32 %v1985_v6  ;;  %v2029_v49 = vsub.f32 %v2025_v31, %v2027_v11 }
 0xb60   :  { %v1972_v16 = vmul.f32 %v1970_v57, %v1970_v57  ;;  %v1956_v42 = vmul.f32 1.0833334, %v1954_v34  ;;  %v2039_v62 = vmul.f32 5.0, %v4372_v26  ;;  %v2031_v7 = vmul.f32 11.0, %v4372_v26 }
 0xb61   :  { %v1946_v15 = vadd.f32 %v1944_v10, %v1938_v19  ;;  %v1966_v41 = vmul.f32 0.25, %v1964_v18  ;;  %v2049_v46 = vadd.f32 %v2047_v52, %v4413_v53  ;;  %v2024_v18 = vmul.f32 2.0, %v4432_v13 }
 0xb62   :  { %2936 = vrcp.f32 %v1972_v16  ;;  %v2041_v10 = vadd.f32 %v2039_v62, %v2037_v44  ;;  %v2033_v28 = vadd.f32 %v2031_v7, %v2029_v49  ;;  %v2046_v53 = vmul.f32 5.0, %v4449_v17 }
 0xb63   :  { %v1976_v45 = vadd.f32 1e-13, %v1946_v15  ;;  %v2931_v27 = vpop.eup %2930  ;;  %v1968_v3 = vadd.f32 %v1966_v41, %v1956_v42  ;;  %v2036_v42 = vsub.f32 0.0, %v4415_v23  ;;  %v2026_v41 = vmul.f32 7.0, %v4415_v23 }
 0xb64   :  { %v1995_v25 = vmul.f32 0.25, %v2931_v27  ;;  %v1989_v39 = vmul.f32 0.1, %v2931_v27  ;;  %v2043_v6 = vadd.f32 %v2041_v10, %v4426_v33  ;;  %v2038_v23 = vmul.f32 5.0, %v4384_v22 }
 0xb65   :  { %v1978_v56 = vmul.f32 %v1976_v45, %v1976_v45  ;;  %v2933_v38 = vpop.eup %2932  ;;  %v1982_v0 = vadd.f32 1e-13, %v1968_v3  ;;  %v2051_v45 = vsub.f32 %v2049_v46, %v4434_v40  ;;  %v2035_v3 = vmul.f32 0.16666667, %v2033_v28 }
 0xb66   :  { %v1991_v2 = vmul.f32 0.6, %v2933_v38  ;;  %v1997_v37 = vmul.f32 0.5, %v2933_v38  ;;  %v2028_v13 = vsub.f32 %v2024_v18, %v2026_v41 }
 0xb67   :  { %2938 = vrcp.f32 %v1978_v56  ;;  %v1984_v12 = vmul.f32 %v1982_v0, %v1982_v0  ;;  %v2045_v56 = vmul.f32 0.16666667, %v2043_v6  ;;  %v2053_v31 = vmul.f32 0.16666667, %v2051_v45 }
 0xb68   :  { %v2007_v47 = vadd.f32 %v1997_v37, %v1995_v25  ;;  %v2001_v4 = vadd.f32 %v1991_v2, %v1989_v39 }
 0xb69   :  { %v2935_v8 = vpop.eup %2934  ;;  %2940 = vrcp.f32 %v1984_v12 }
 0xb6a   :  { %v1993_v63 = vmul.f32 0.3, %v2935_v8  ;;  %v1999_v35 = vmul.f32 0.25, %v2935_v8 }
 0xb6c   :  { %v2003_v59 = vadd.f32 %v2001_v4, %v1993_v63  ;;  %v2009_v58 = vadd.f32 %v2007_v47, %v1999_v35  ;;  %v2937_v54 = vpop.eup %2936 }
 0xb6d   :  { %v1994_v36 = vmul.f32 0.25, %v2937_v54  ;;  %v1988_v43 = vmul.f32 0.1, %v2937_v54 }
 0xb6e   :  { %2942 = vrcp.f32 %v2003_v59 }
 0xb6f   :  { %2944 = vrcp.f32 %v2009_v58  ;;  %v2030_v58 = vmul.f32 11.0, %v4384_v22 }
 0xb71   :  { %v2939_v9 = vpop.eup %2938 }
 0xb72   :  { %v1990_v61 = vmul.f32 0.6, %v2939_v9  ;;  %v1996_v51 = vmul.f32 0.5, %v2939_v9 }
 0xb73   :  { %v2941_v57 = vpop.eup %2940 }
 0xb74   :  { %v2006_v21 = vadd.f32 %v1996_v51, %v1994_v36  ;;  %v1992_v19 = vmul.f32 0.3, %v2941_v57  ;;  %v1998_v20 = vmul.f32 0.25, %v2941_v57  ;;  %v2000_v34 = vadd.f32 %v1990_v61, %v1988_v43 }
 0xb76   :  { %v2002_v16 = vadd.f32 %v2000_v34, %v1992_v19  ;;  %v2008_v15 = vadd.f32 %v2006_v21, %v1998_v20 }
 0xb78   :  { %v2943_v27 = vpop.eup %2942  ;;  %2946 = vrcp.f32 %v2002_v16 }
 0xb79   :  { %v2945_v33 = vpop.eup %2944  ;;  %v2017_v38 = vmul.f32 %v2943_v27, %v1993_v63  ;;  %2948 = vrcp.f32 %v2008_v15  ;;  %v2013_v0 = vmul.f32 %v2943_v27, %v1989_v39  ;;  %v2015_v12 = vmul.f32 %v2943_v27, %v1991_v2 }
 0xb7a   :  { %v2023_v47 = vmul.f32 %v2945_v33, %v1999_v35  ;;  %v2019_v8 = vmul.f32 %v2945_v33, %v1995_v25  ;;  %v2021_v4 = vmul.f32 %v2945_v33, %v1997_v37  ;;  %v2040_v39 = vadd.f32 %v2038_v23, %v2036_v42 }
 0xb7b   :  { %v2055_v59 = vmul.f32 %v2035_v3, %v2013_v0  ;;  %v2057_v40 = vmul.f32 %v2045_v56, %v2015_v12  ;;  %v2061_v54 = vmul.f32 %v2053_v31, %v2017_v38  ;;  %v2048_v2 = vadd.f32 %v2046_v53, %v4459_v60 }
 0xb7c   :  { %v2079_v11 = vmul.f32 %v2023_v47, %v4447_v32  ;;  %v2073_v17 = vmul.f32 %v2019_v8, %v4408_v1  ;;  %v2075_v63 = vmul.f32 %v2021_v4, %v4430_v5  ;;  %v2032_v25 = vadd.f32 %v2030_v58, %v2028_v13 }
 0xb7d   :  { %v2059_v35 = vadd.f32 %v2057_v40, %v2055_v59  ;;  %v2042_v44 = vadd.f32 %v2040_v39, %v4462_v24  ;;  %v2050_v9 = vsub.f32 %v2048_v2, %v4467_v30  ;;  %v2091_v27 = vmul.f32 0.1, %v4372_v26 }
 0xb7e   :  { %v2077_v37 = vadd.f32 %v2075_v63, %v2073_v17  ;;  %v2034_v62 = vmul.f32 0.16666667, %v2032_v25  ;;  %v2090_v8 = vmul.f32 0.1, %v4384_v22 }
 0xb7f   :  { %v2063_v49 = vadd.f32 %v2061_v54, %v2059_v35  ;;  %v2044_v5 = vmul.f32 0.16666667, %v2042_v44  ;;  %v2052_v21 = vmul.f32 0.16666667, %v2050_v9 }
 0xb80   :  { %v2081_v52 = vadd.f32 %v2079_v11, %v2077_v37 }
 0xb81   :  { %2066 = vrot.lane.b32.xlu1 %v2063_v49, %s3109_s21 }
 0xb82   :  { %v2947_v32 = vpop.eup %2946 }
 0xb83   :  { %v2949_v1 = vpop.eup %2948  ;;  %v2016_v7 = vmul.f32 %v2947_v32, %v1992_v19  ;;  %v2012_v10 = vmul.f32 %v2947_v32, %v1988_v43  ;;  %v2014_v57 = vmul.f32 %v2947_v32, %v1990_v61  ;;  %v2083_v43 = vmul.f32 113.77778, %v2081_v52 }
 0xb84   :  { %v2022_v28 = vmul.f32 %v2949_v1, %v1998_v20  ;;  %v2018_v60 = vmul.f32 %v2949_v1, %v1994_v36  ;;  %v2020_v46 = vmul.f32 %v2949_v1, %v1996_v51 }
 0xb85   :  { %v2054_v6 = vmul.f32 %v2034_v62, %v2012_v10  ;;  %v2056_v34 = vmul.f32 %v2044_v5, %v2014_v57  ;;  %v2060_v16 = vmul.f32 %v2052_v21, %v2016_v7  ;;  %v2085_v20 = vmul.f32 0.045, %v2083_v43 }
 0xb86   :  { %v2078_v24 = vmul.f32 %v2022_v28, %v4477_v55  ;;  %v2072_v18 = vmul.f32 %v2018_v60, %v4444_v14  ;;  %v2074_v30 = vmul.f32 %v2020_v46, %v4472_v29 }
 0xb87   :  { %v2058_v15 = vadd.f32 %v2056_v34, %v2054_v6 }
 0xb88   :  { %v2076_v42 = vadd.f32 %v2074_v30, %v2072_v18 }
 0xb89   :  { %v2062_v41 = vadd.f32 %v2060_v16, %v2058_v15 }
 0xb8a   :  { %v2080_v19 = vadd.f32 %v2078_v24, %v2076_v42 }
 0xb8b   :  { %2064 = vrot.lane.b32.xlu0 %v2062_v41, %s3109_s21 }
 0xb8c   :  { %v2082_v29 = vmul.f32 113.77778, %v2080_v19 }
 0xb8e   :  { %v2084_v12 = vmul.f32 0.045, %v2082_v29 }
 0xbf3   :  { %v2067_v61 = vpop.permute.xlu1 %2066 }
 0xbf4   :  { %v2069_v36 = vsub.f32 %v2063_v49, %v2067_v61 }
 0xbf6   :  { %v2071_v51 = vmul.f32 10.666667, %v2069_v36 }
 0xbf8   :  { %v2087_v45 = vmul.f32 0.055, %v2071_v51 }
 0xbfa   :  { %v2089_v55 = vadd.f32 %v2087_v45, %v2085_v20 }
 0xbfc   :  { %v2093_v3 = vsub.f32 %v2089_v55, %v2091_v27 }
 0xbfd   :  { %v2065_v14 = vpop.permute.xlu0 %2064 }
 0xbfe   :  { %v2095_v56 = vmul.f32 0.07692308, %v2093_v3  ;;  %v2068_v53 = vsub.f32 %v2062_v41, %v2065_v14 }
 0xc00   :  { %v2097_v33 = vadd.f32 %v2095_v56, %v4372_v26  ;;  %v2070_v38 = vmul.f32 10.666667, %v2068_v53 }
 0xc02   :  { %v2099_v0 = vsel %vm3220_vm4, 0.0, %v2097_v33  ;;  %v2086_v13 = vmul.f32 0.055, %v2070_v38 }
 0xc03   :  { %v4514_v47 = vsel %vm3224_vm5, 0.01851922, %v2099_v0 }
 0xc04   :  { %v2088_v4 = vadd.f32 %v2086_v13, %v2084_v12  ;;  %2108 = vrot.lane.b32.xlu1 %v4514_v47, %s3109_s21  ;;  %v2133_v39 = vmul.f32 3.0, %v4514_v47  ;;  %v4550_v2 = vmul.f32 2.0, %v4514_v47 }
 0xc06   :  { %v2092_v31 = vsub.f32 %v2088_v4, %v2090_v8 }
 0xc08   :  { %v2094_v23 = vmul.f32 0.07692308, %v2092_v31  ;;  %2104 = vrot.lane.b32.xlu1 %v4514_v47, %s3110_s22 }
 0xc0a   :  { %v2096_v26 = vadd.f32 %v2094_v23, %v4384_v22 }
 0xc0c   :  { %v2098_v59 = vsel %vm3220_vm4, 0.0, %v2096_v26  ;;  %2112 = vrot.lane.b32.xlu1 %v4514_v47, %s3111_s2 }
 0xc0d   :  { %v4528_v40 = vsel %vm3224_vm5, 0.01851922, %v2098_v59 }
 0xc0e   :  { %2106 = vrot.lane.b32.xlu0 %v4528_v40, %s3109_s21  ;;  %v2132_v41 = vmul.f32 3.0, %v4528_v40  ;;  %v4599_v29 = vmul.f32 2.0, %v4528_v40 }
 0xc10   :  { %2116 = vrot.lane.b32.xlu1 %v4514_v47, %s3112_s23 }
 0xc12   :  { %2102 = vrot.lane.b32.xlu0 %v4528_v40, %s3110_s22 }
 0xc16   :  { %2110 = vrot.lane.b32.xlu0 %v4528_v40, %s3111_s2 }
 0xc1a   :  { %2114 = vrot.lane.b32.xlu0 %v4528_v40, %s3112_s23 }
 0xc76   :  { %v4540_v22 = vpop.permute.xlu1 %2108 }
 0xc77   :  { %v2119_v58 = vmul.f32 2.0, %v4540_v22  ;;  %v2129_v11 = vmul.f32 4.0, %v4540_v22  ;;  %v2145_v44 = vsub.f32 %v4540_v22, %v4550_v2 }
 0xc7a   :  { %v4544_v17 = vpop.permute.xlu1 %2104 }
 0xc7b   :  { %v2121_v63 = vsub.f32 %v4544_v17, %v2119_v58  ;;  %v2131_v54 = vsub.f32 %v4544_v17, %v2129_v11 }
 0xc7d   :  { %v4553_v35 = vadd.f32 %v2121_v63, %v4514_v47  ;;  %v2135_v25 = vadd.f32 %v2133_v39, %v2131_v54 }
 0xc7e   :  { %v4555_v37 = vpop.permute.xlu1 %2112 }
 0xc7f   :  { %v2125_v49 = vmul.f32 %v4553_v35, %v4553_v35  ;;  %v2137_v52 = vmul.f32 %v2135_v25, %v2135_v25  ;;  %v2153_v9 = vsub.f32 %v4540_v22, %v4555_v37  ;;  %v4566_v62 = vmul.f32 2.0, %v4555_v37 }
 0xc80   :  { %v4563_v32 = vpop.permute.xlu0 %2106  ;;  %v2171_v1 = vmul.f32 4.0, %v4555_v37  ;;  %v4570_v7 = vadd.f32 %v2145_v44, %v4555_v37 }
 0xc81   :  { %v2127_v5 = vmul.f32 1.0833334, %v2125_v49  ;;  %v2139_v10 = vmul.f32 0.25, %v2137_v52  ;;  %v2118_v57 = vmul.f32 2.0, %v4563_v32  ;;  %v2128_v28 = vmul.f32 4.0, %v4563_v32 }
 0xc82   :  { %v2155_v60 = vmul.f32 %v2153_v9, %v2153_v9  ;;  %v2163_v21 = vsub.f32 %v4514_v47, %v4566_v62  ;;  %v4576_v6 = vpop.permute.xlu1 %2116  ;;  %v2149_v34 = vmul.f32 %v4570_v7, %v4570_v7  ;;  %v2173_v24 = vsub.f32 %v2133_v39, %v2171_v1 }
 0xc83   :  { %v2141_v46 = vadd.f32 %v2139_v10, %v2127_v5  ;;  %v2144_v4 = vsub.f32 %v4563_v32, %v4599_v29 }
 0xc84   :  { %v4580_v18 = vpop.permute.xlu0 %2102  ;;  %v2157_v30 = vmul.f32 0.25, %v2155_v60  ;;  %v2151_v19 = vmul.f32 1.0833334, %v2149_v34  ;;  %v4586_v61 = vadd.f32 %v2163_v21, %v4576_v6  ;;  %v2175_v43 = vadd.f32 %v2173_v24, %v4576_v6 }
 0xc85   :  { %v2183_v16 = vadd.f32 1e-13, %v2141_v46  ;;  %v2120_v15 = vsub.f32 %v4580_v18, %v2118_v57  ;;  %v2130_v42 = vsub.f32 %v4580_v18, %v2128_v28 }
 0xc86   :  { %v2159_v27 = vadd.f32 %v2157_v30, %v2151_v19  ;;  %v2167_v55 = vmul.f32 %v4586_v61, %v4586_v61  ;;  %v2177_v3 = vmul.f32 %v2175_v43, %v2175_v43 }
 0xc87   :  { %v4590_v36 = vadd.f32 %v2120_v15, %v4528_v40  ;;  %v2134_v51 = vadd.f32 %v2132_v41, %v2130_v42  ;;  %v2185_v20 = vmul.f32 %v2183_v16, %v2183_v16 }
 0xc88   :  { %v4592_v45 = vpop.permute.xlu0 %2110  ;;  %v2169_v33 = vmul.f32 1.0833334, %v2167_v55  ;;  %v2179_v38 = vmul.f32 0.25, %v2177_v3  ;;  %v2189_v0 = vadd.f32 1e-13, %v2159_v27 }
 0xc89   :  { %v2124_v14 = vmul.f32 %v4590_v36, %v4590_v36  ;;  %v2136_v56 = vmul.f32 %v2134_v51, %v2134_v51  ;;  %v2152_v53 = vsub.f32 %v4563_v32, %v4592_v45  ;;  %v4604_v8 = vmul.f32 2.0, %v4592_v45 }
 0xc8a   :  { %2950 = vrcp.f32 %v2185_v20  ;;  %v2181_v23 = vadd.f32 %v2179_v38, %v2169_v33  ;;  %v2191_v26 = vmul.f32 %v2189_v0, %v2189_v0  ;;  %v2170_v63 = vmul.f32 4.0, %v4592_v45 }
 0xc8b   :  { %v2126_v12 = vmul.f32 1.0833334, %v2124_v14  ;;  %v2138_v13 = vmul.f32 0.25, %v2136_v56  ;;  %v2154_v31 = vmul.f32 %v2152_v53, %v2152_v53  ;;  %v2162_v11 = vsub.f32 %v4528_v40, %v4604_v8 }
 0xc8c   :  { %v4608_v59 = vpop.permute.xlu0 %2114  ;;  %2952 = vrcp.f32 %v2191_v26  ;;  %v2195_v54 = vadd.f32 1e-13, %v2181_v23  ;;  %v4614_v39 = vadd.f32 %v2144_v4, %v4592_v45  ;;  %v2172_v44 = vsub.f32 %v2132_v41, %v2170_v63 }
 0xc8d   :  { %v2140_v58 = vadd.f32 %v2138_v13, %v2126_v12  ;;  %v4617_v25 = vadd.f32 %v2162_v11, %v4608_v59  ;;  %v2156_v52 = vmul.f32 0.25, %v2154_v31  ;;  %v2237_v33 = vmul.f32 2.0, %v4544_v17 }
 0xc8e   :  { %v2197_v9 = vmul.f32 %v2195_v54, %v2195_v54  ;;  %v2148_v1 = vmul.f32 %v4614_v39, %v4614_v39  ;;  %v2174_v10 = vadd.f32 %v2172_v44, %v4608_v59  ;;  %v2249_v12 = vsub.f32 0.0, %v4540_v22 }
 0xc8f   :  { %v2182_v49 = vadd.f32 1e-13, %v2140_v58  ;;  %v2166_v5 = vmul.f32 %v4617_v25, %v4617_v25  ;;  %v2239_v13 = vmul.f32 7.0, %v4540_v22  ;;  %v2259_v31 = vmul.f32 5.0, %v4555_v37 }
 0xc90   :  { %2954 = vrcp.f32 %v2197_v9  ;;  %v2150_v57 = vmul.f32 1.0833334, %v2148_v1  ;;  %v2176_v60 = vmul.f32 %v2174_v10, %v2174_v10  ;;  %v2251_v26 = vmul.f32 5.0, %v4514_v47 }
 0xc91   :  { %v2168_v28 = vmul.f32 1.0833334, %v2166_v5  ;;  %v2184_v46 = vmul.f32 %v2182_v49, %v2182_v49  ;;  %v2241_v23 = vsub.f32 %v2237_v33, %v2239_v13  ;;  %v2243_v11 = vmul.f32 11.0, %v4514_v47 }
 0xc92   :  { %v2158_v21 = vadd.f32 %v2156_v52, %v2150_v57  ;;  %v2178_v34 = vmul.f32 0.25, %v2176_v60  ;;  %v2253_v63 = vadd.f32 %v2251_v26, %v2249_v12  ;;  %v2261_v49 = vadd.f32 %v2259_v31, %v4550_v2 }
 0xc93   :  { %2956 = vrcp.f32 %v2184_v46  ;;  %v2245_v22 = vadd.f32 %v2243_v11, %v2241_v23  ;;  %v2236_v60 = vmul.f32 2.0, %v4580_v18  ;;  %v2238_v2 = vmul.f32 7.0, %v4563_v32 }
 0xc94   :  { %v2951_v24 = vpop.eup %2950  ;;  %v2188_v30 = vadd.f32 1e-13, %v2158_v21  ;;  %v2180_v16 = vadd.f32 %v2178_v34, %v2168_v28  ;;  %v2255_v1 = vadd.f32 %v2253_v63, %v4566_v62  ;;  %v2248_v28 = vsub.f32 0.0, %v4563_v32 }
 0xc95   :  { %v2207_v19 = vmul.f32 0.25, %v2951_v24  ;;  %v2201_v20 = vmul.f32 0.1, %v2951_v24  ;;  %v2263_v46 = vsub.f32 %v2261_v49, %v4576_v6  ;;  %v2250_v32 = vmul.f32 5.0, %v4528_v40 }
 0xc96   :  { %v2953_v15 = vpop.eup %2952  ;;  %v2190_v42 = vmul.f32 %v2188_v30, %v2188_v30  ;;  %v2194_v51 = vadd.f32 1e-13, %v2180_v16  ;;  %v2247_v30 = vmul.f32 0.16666667, %v2245_v22  ;;  %v2257_v16 = vmul.f32 0.16666667, %v2255_v1 }
 0xc97   :  { %v2203_v41 = vmul.f32 0.6, %v2953_v15  ;;  %v2209_v43 = vmul.f32 0.5, %v2953_v15  ;;  %v2258_v15 = vmul.f32 5.0, %v4592_v45  ;;  %v2265_v6 = vmul.f32 0.16666667, %v2263_v46 }
 0xc98   :  { %2958 = vrcp.f32 %v2190_v42  ;;  %v2196_v55 = vmul.f32 %v2194_v51, %v2194_v51 }
 0xc99   :  { %v2219_v27 = vadd.f32 %v2209_v43, %v2207_v19  ;;  %v2213_v53 = vadd.f32 %v2203_v41, %v2201_v20 }
 0xc9a   :  { %v2955_v3 = vpop.eup %2954  ;;  %2960 = vrcp.f32 %v2196_v55 }
 0xc9b   :  { %v2205_v14 = vmul.f32 0.3, %v2955_v3  ;;  %v2211_v56 = vmul.f32 0.25, %v2955_v3 }
 0xc9d   :  { %v2215_v38 = vadd.f32 %v2213_v53, %v2205_v14  ;;  %v2221_v0 = vadd.f32 %v2219_v27, %v2211_v56  ;;  %v2957_v4 = vpop.eup %2956  ;;  %v2240_v53 = vsub.f32 %v2236_v60, %v2238_v2 }
 0xc9e   :  { %v2206_v17 = vmul.f32 0.25, %v2957_v4  ;;  %v2200_v52 = vmul.f32 0.1, %v2957_v4 }
 0xc9f   :  { %2962 = vrcp.f32 %v2215_v38 }
 0xca0   :  { %2964 = vrcp.f32 %v2221_v0 }
 0xca2   :  { %v2959_v58 = vpop.eup %2958 }
 0xca3   :  { %v2202_v54 = vmul.f32 0.6, %v2959_v58  ;;  %v2208_v44 = vmul.f32 0.5, %v2959_v58 }
 0xca4   :  { %v2961_v9 = vpop.eup %2960 }
 0xca5   :  { %v2218_v5 = vadd.f32 %v2208_v44, %v2206_v17  ;;  %v2204_v37 = vmul.f32 0.3, %v2961_v9  ;;  %v2210_v10 = vmul.f32 0.25, %v2961_v9  ;;  %v2212_v57 = vadd.f32 %v2202_v54, %v2200_v52 }
 0xca7   :  { %v2214_v21 = vadd.f32 %v2212_v57, %v2204_v37  ;;  %v2220_v34 = vadd.f32 %v2218_v5, %v2210_v10 }
 0xca9   :  { %v2963_v24 = vpop.eup %2962  ;;  %2966 = vrcp.f32 %v2214_v21 }
 0xcaa   :  { %v2965_v62 = vpop.eup %2964  ;;  %v2229_v42 = vmul.f32 %v2963_v24, %v2205_v14  ;;  %v2225_v51 = vmul.f32 %v2963_v24, %v2201_v20  ;;  %v2227_v27 = vmul.f32 %v2963_v24, %v2203_v41  ;;  %2968 = vrcp.f32 %v2220_v34 }
 0xcab   :  { %v2235_v55 = vmul.f32 %v2965_v62, %v2211_v56  ;;  %v2231_v3 = vmul.f32 %v2965_v62, %v2207_v19  ;;  %v2233_v18 = vmul.f32 %v2965_v62, %v2209_v43  ;;  %v2242_v14 = vmul.f32 11.0, %v4528_v40 }
 0xcac   :  { %v2267_v33 = vmul.f32 %v2247_v30, %v2225_v51  ;;  %v2269_v38 = vmul.f32 %v2257_v16, %v2227_v27  ;;  %v2273_v20 = vmul.f32 %v2265_v6, %v2229_v42  ;;  %v2252_v56 = vadd.f32 %v2250_v32, %v2248_v28 }
 0xcad   :  { %v2291_v0 = vmul.f32 %v2235_v55, %v4586_v61  ;;  %v2285_v12 = vmul.f32 %v2231_v3, %v4553_v35  ;;  %v2287_v45 = vmul.f32 %v2233_v18, %v4570_v7  ;;  %v2260_v19 = vadd.f32 %v2258_v15, %v4599_v29 }
 0xcae   :  { %v2271_v41 = vadd.f32 %v2269_v38, %v2267_v33  ;;  %v2244_v13 = vadd.f32 %v2242_v14, %v2240_v53  ;;  %v2254_v31 = vadd.f32 %v2252_v56, %v4604_v8  ;;  %v2303_v30 = vmul.f32 0.1, %v4514_v47 }
 0xcaf   :  { %v2289_v43 = vadd.f32 %v2287_v45, %v2285_v12  ;;  %v2262_v61 = vsub.f32 %v2260_v19, %v4608_v59  ;;  %v2302_v18 = vmul.f32 0.1, %v4528_v40 }
 0xcb0   :  { %v2275_v4 = vadd.f32 %v2273_v20, %v2271_v41  ;;  %v2246_v26 = vmul.f32 0.16666667, %v2244_v13  ;;  %v2256_v11 = vmul.f32 0.16666667, %v2254_v31 }
 0xcb1   :  { %v2293_v23 = vadd.f32 %v2291_v0, %v2289_v43  ;;  %v2264_v1 = vmul.f32 0.16666667, %v2262_v61 }
 0xcb2   :  { %2278 = vrot.lane.b32.xlu1 %v2275_v4, %s3109_s21 }
 0xcb3   :  { %v2967_v35 = vpop.eup %2966 }
 0xcb4   :  { %v2969_v7 = vpop.eup %2968  ;;  %v2228_v58 = vmul.f32 %v2967_v35, %v2204_v37  ;;  %v2224_v63 = vmul.f32 %v2967_v35, %v2200_v52  ;;  %v2226_v49 = vmul.f32 %v2967_v35, %v2202_v54  ;;  %v2295_v52 = vmul.f32 113.77778, %v2293_v23 }
 0xcb5   :  { %v2234_v9 = vmul.f32 %v2969_v7, %v2210_v10  ;;  %v2230_v22 = vmul.f32 %v2969_v7, %v2206_v17  ;;  %v2232_v29 = vmul.f32 %v2969_v7, %v2208_v44 }
 0xcb6   :  { %v2266_v5 = vmul.f32 %v2246_v26, %v2224_v63  ;;  %v2268_v57 = vmul.f32 %v2256_v11, %v2226_v49  ;;  %v2272_v59 = vmul.f32 %v2264_v1, %v2228_v58  ;;  %v2297_v10 = vmul.f32 0.045, %v2295_v52 }
 0xcb7   :  { %v2290_v8 = vmul.f32 %v2234_v9, %v4617_v25  ;;  %v2284_v28 = vmul.f32 %v2230_v22, %v4590_v36  ;;  %v2286_v60 = vmul.f32 %v2232_v29, %v4614_v39 }
 0xcb8   :  { %v2270_v46 = vadd.f32 %v2268_v57, %v2266_v5 }
 0xcb9   :  { %v2288_v21 = vadd.f32 %v2286_v60, %v2284_v28 }
 0xcba   :  { %v2274_v34 = vadd.f32 %v2272_v59, %v2270_v46 }
 0xcbb   :  { %v2292_v37 = vadd.f32 %v2290_v8, %v2288_v21 }
 0xcbc   :  { %2276 = vrot.lane.b32.xlu0 %v2274_v34, %s3109_s21 }
 0xcbd   :  { %v2294_v39 = vmul.f32 113.77778, %v2292_v37 }
 0xcbf   :  { %v2296_v55 = vmul.f32 0.045, %v2294_v39 }
 0xd24   :  { %v2279_v54 = vpop.permute.xlu1 %2278 }
 0xd25   :  { %v2281_v17 = vsub.f32 %v2275_v4, %v2279_v54 }
 0xd27   :  { %v2283_v44 = vmul.f32 10.666667, %v2281_v17 }
 0xd29   :  { %v2299_v24 = vmul.f32 0.055, %v2283_v44 }
 0xd2b   :  { %v2301_v25 = vadd.f32 %v2299_v24, %v2297_v10 }
 0xd2d   :  { %v2305_v2 = vsub.f32 %v2301_v25, %v2303_v30 }
 0xd2e   :  { %v2277_v16 = vpop.permute.xlu0 %2276 }
 0xd2f   :  { %v2307_v36 = vmul.f32 0.07692308, %v2305_v2  ;;  %v2280_v15 = vsub.f32 %v2274_v34, %v2277_v16 }
 0xd31   :  { %v2309_v62 = vadd.f32 %v2307_v36, %v4514_v47  ;;  %v2282_v42 = vmul.f32 10.666667, %v2280_v15 }
 0xd33   :  { %v2311_v51 = vsel %vm3220_vm4, 0.0, %v2309_v62  ;;  %v2298_v3 = vmul.f32 0.055, %v2282_v42 }
 0xd34   :  { %v4656_v27 = vsel %vm3224_vm5, 0.018377313, %v2311_v51 }
 0xd35   :  { %2320 = vrot.lane.b32.xlu1 %v4656_v27, %s3109_s21  ;;  %v2300_v53 = vadd.f32 %v2298_v3, %v2296_v55  ;;  %v2345_v41 = vmul.f32 3.0, %v4656_v27  ;;  %v4692_v56 = vmul.f32 2.0, %v4656_v27 }
 0xd37   :  { %v2304_v6 = vsub.f32 %v2300_v53, %v2302_v18 }
 0xd39   :  { %2316 = vrot.lane.b32.xlu1 %v4656_v27, %s3110_s22  ;;  %v2306_v47 = vmul.f32 0.07692308, %v2304_v6 }
 0xd3b   :  { %v2308_v33 = vadd.f32 %v2306_v47, %v4528_v40 }
 0xd3d   :  { %2324 = vrot.lane.b32.xlu1 %v4656_v27, %s3111_s2  ;;  %v2310_v38 = vsel %vm3220_vm4, 0.0, %v2308_v33 }
 0xd3e   :  { %v4670_v0 = vsel %vm3224_vm5, 0.018377313, %v2310_v38 }
 0xd3f   :  { %2318 = vrot.lane.b32.xlu0 %v4670_v0, %s3109_s21  ;;  %v2344_v54 = vmul.f32 3.0, %v4670_v0  ;;  %v4743_v42 = vmul.f32 2.0, %v4670_v0 }
 0xd41   :  { %2328 = vrot.lane.b32.xlu1 %v4656_v27, %s3112_s23 }
 0xd43   :  { %2314 = vrot.lane.b32.xlu0 %v4670_v0, %s3110_s22 }
 0xd47   :  { %2322 = vrot.lane.b32.xlu0 %v4670_v0, %s3111_s2 }
 0xd4b   :  { %2326 = vrot.lane.b32.xlu0 %v4670_v0, %s3112_s23 }
 0xda7   :  { %v4682_v40 = vpop.permute.xlu1 %2320 }
 0xda8   :  { %v2331_v32 = vmul.f32 2.0, %v4682_v40  ;;  %v2341_v12 = vmul.f32 4.0, %v4682_v40  ;;  %v2357_v4 = vsub.f32 %v4682_v40, %v4692_v56 }
 0xdab   :  { %v4686_v45 = vpop.permute.xlu1 %2316 }
 0xdac   :  { %v2333_v14 = vsub.f32 %v4686_v45, %v2331_v32  ;;  %v2343_v20 = vsub.f32 %v4686_v45, %v2341_v12 }
 0xdae   :  { %v4695_v19 = vadd.f32 %v2333_v14, %v4656_v27  ;;  %v2347_v43 = vadd.f32 %v2345_v41, %v2343_v20 }
 0xdaf   :  { %v4697_v13 = vpop.permute.xlu1 %2324 }
 0xdb0   :  { %v2337_v31 = vmul.f32 %v4695_v19, %v4695_v19  ;;  %v2349_v23 = vmul.f32 %v2347_v43, %v2347_v43  ;;  %v2365_v61 = vsub.f32 %v4682_v40, %v4697_v13  ;;  %v4706_v35 = vmul.f32 2.0, %v4697_v13 }
 0xdb1   :  { %v2383_v26 = vmul.f32 4.0, %v4697_v13  ;;  %v4710_v7 = vadd.f32 %v2357_v4, %v4697_v13  ;;  %v4712_v58 = vpop.permute.xlu0 %2318 }
 0xdb2   :  { %v2339_v11 = vmul.f32 1.0833334, %v2337_v31  ;;  %v2351_v63 = vmul.f32 0.25, %v2349_v23  ;;  %v2367_v49 = vmul.f32 %v2365_v61, %v2365_v61  ;;  %v2375_v1 = vsub.f32 %v4656_v27, %v4706_v35 }
 0xdb3   :  { %v4714_v9 = vpop.permute.xlu1 %2328  ;;  %v2361_v5 = vmul.f32 %v4710_v7, %v4710_v7  ;;  %v2330_v57 = vmul.f32 2.0, %v4712_v58  ;;  %v2340_v8 = vmul.f32 4.0, %v4712_v58  ;;  %v2385_v28 = vsub.f32 %v2345_v41, %v2383_v26 }
 0xdb4   :  { %v2353_v22 = vadd.f32 %v2351_v63, %v2339_v11  ;;  %v2369_v29 = vmul.f32 0.25, %v2367_v49  ;;  %v4725_v21 = vadd.f32 %v2375_v1, %v4714_v9  ;;  %v2356_v47 = vsub.f32 %v4712_v58, %v4743_v42 }
 0xdb5   :  { %v4722_v59 = vpop.permute.xlu0 %2314  ;;  %v2363_v46 = vmul.f32 1.0833334, %v2361_v5  ;;  %v2387_v52 = vadd.f32 %v2385_v28, %v4714_v9 }
 0xdb6   :  { %v2395_v60 = vadd.f32 1e-13, %v2353_v22  ;;  %v2332_v34 = vsub.f32 %v4722_v59, %v2330_v57  ;;  %v2342_v37 = vsub.f32 %v4722_v59, %v2340_v8  ;;  %v2379_v10 = vmul.f32 %v4725_v21, %v4725_v21 }
 0xdb7   :  { %v2371_v44 = vadd.f32 %v2369_v29, %v2363_v46  ;;  %v2389_v25 = vmul.f32 %v2387_v52, %v2387_v52 }
 0xdb8   :  { %v2397_v17 = vmul.f32 %v2395_v60, %v2395_v60  ;;  %v4734_v24 = vadd.f32 %v2332_v34, %v4670_v0  ;;  %v2346_v30 = vadd.f32 %v2344_v54, %v2342_v37  ;;  %v2381_v36 = vmul.f32 1.0833334, %v2379_v10 }
 0xdb9   :  { %v4736_v2 = vpop.permute.xlu0 %2322  ;;  %v2401_v16 = vadd.f32 1e-13, %v2371_v44  ;;  %v2391_v51 = vmul.f32 0.25, %v2389_v25 }
 0xdba   :  { %v2336_v39 = vmul.f32 %v4734_v24, %v4734_v24  ;;  %v2348_v15 = vmul.f32 %v2346_v30, %v2346_v30  ;;  %v2364_v62 = vsub.f32 %v4712_v58, %v4736_v2  ;;  %2970 = vrcp.f32 %v2397_v17 }
 0xdbb   :  { %v2403_v55 = vmul.f32 %v2401_v16, %v2401_v16  ;;  %v4746_v3 = vmul.f32 2.0, %v4736_v2  ;;  %v2393_v33 = vadd.f32 %v2391_v51, %v2381_v36  ;;  %v2382_v32 = vmul.f32 4.0, %v4736_v2 }
 0xdbc   :  { %v2338_v18 = vmul.f32 1.0833334, %v2336_v39  ;;  %v2350_v53 = vmul.f32 0.25, %v2348_v15  ;;  %v2366_v6 = vmul.f32 %v2364_v62, %v2364_v62  ;;  %v4756_v20 = vadd.f32 %v2356_v47, %v4736_v2 }
 0xdbd   :  { %2972 = vrcp.f32 %v2403_v55  ;;  %v2374_v38 = vsub.f32 %v4670_v0, %v4746_v3  ;;  %v4753_v12 = vpop.permute.xlu0 %2326  ;;  %v2407_v41 = vadd.f32 1e-13, %v2393_v33  ;;  %v2384_v4 = vsub.f32 %v2344_v54, %v2382_v32 }
 0xdbe   :  { %v2352_v14 = vadd.f32 %v2350_v53, %v2338_v18  ;;  %v2368_v23 = vmul.f32 0.25, %v2366_v6  ;;  %v2360_v61 = vmul.f32 %v4756_v20, %v4756_v20  ;;  %v2449_v15 = vmul.f32 2.0, %v4686_v45 }
 0xdbf   :  { %v4759_v43 = vadd.f32 %v2374_v38, %v4753_v12  ;;  %v2409_v26 = vmul.f32 %v2407_v41, %v2407_v41  ;;  %v2386_v63 = vadd.f32 %v2384_v4, %v4753_v12  ;;  %v2451_v55 = vmul.f32 7.0, %v4682_v40 }
 0xdc0   :  { %v2394_v31 = vadd.f32 1e-13, %v2352_v14  ;;  %v2362_v49 = vmul.f32 1.0833334, %v2360_v61  ;;  %v2461_v53 = vsub.f32 0.0, %v4682_v40  ;;  %v2471_v47 = vmul.f32 5.0, %v4697_v13 }
 0xdc1   :  { %v2378_v11 = vmul.f32 %v4759_v43, %v4759_v43  ;;  %2974 = vrcp.f32 %v2409_v26  ;;  %v2388_v29 = vmul.f32 %v2386_v63, %v2386_v63  ;;  %v2453_v6 = vsub.f32 %v2449_v15, %v2451_v55 }
 0xdc2   :  { %v2396_v1 = vmul.f32 %v2394_v31, %v2394_v31  ;;  %v2370_v5 = vadd.f32 %v2368_v23, %v2362_v49  ;;  %v2463_v38 = vmul.f32 5.0, %v4656_v27  ;;  %v2455_v32 = vmul.f32 11.0, %v4656_v27 }
 0xdc3   :  { %v2380_v22 = vmul.f32 1.0833334, %v2378_v11  ;;  %v2390_v8 = vmul.f32 0.25, %v2388_v29  ;;  %v2473_v26 = vadd.f32 %v2471_v47, %v4692_v56  ;;  %v2470_v56 = vmul.f32 5.0, %v4736_v2 }
 0xdc4   :  { %v2971_v57 = vpop.eup %2970  ;;  %v2400_v28 = vadd.f32 1e-13, %v2370_v5  ;;  %2976 = vrcp.f32 %v2396_v1  ;;  %v2465_v4 = vadd.f32 %v2463_v38, %v2461_v53  ;;  %v2457_v61 = vadd.f32 %v2455_v32, %v2453_v6 }
 0xdc5   :  { %v2392_v46 = vadd.f32 %v2390_v8, %v2380_v22  ;;  %v2419_v34 = vmul.f32 0.25, %v2971_v57  ;;  %v2413_v30 = vmul.f32 0.1, %v2971_v57  ;;  %v2448_v22 = vmul.f32 2.0, %v4722_v59 }
 0xdc6   :  { %v2402_v54 = vmul.f32 %v2400_v28, %v2400_v28  ;;  %v2467_v11 = vadd.f32 %v2465_v4, %v4706_v35  ;;  %v2460_v5 = vsub.f32 0.0, %v4712_v58  ;;  %v2459_v57 = vmul.f32 0.16666667, %v2457_v61 }
 0xdc7   :  { %v2973_v60 = vpop.eup %2972  ;;  %v2406_v52 = vadd.f32 1e-13, %v2392_v46  ;;  %v2475_v8 = vsub.f32 %v2473_v26, %v4714_v9 }
 0xdc8   :  { %v2421_v37 = vmul.f32 0.5, %v2973_v60  ;;  %v2415_v17 = vmul.f32 0.6, %v2973_v60  ;;  %2978 = vrcp.f32 %v2402_v54  ;;  %v2450_v60 = vmul.f32 7.0, %v4712_v58 }
 0xdc9   :  { %v2408_v10 = vmul.f32 %v2406_v52, %v2406_v52  ;;  %v2469_v46 = vmul.f32 0.16666667, %v2467_v11  ;;  %v2477_v15 = vmul.f32 0.16666667, %v2475_v8  ;;  %v2454_v58 = vmul.f32 11.0, %v4670_v0 }
 0xdca   :  { %v2431_v44 = vadd.f32 %v2421_v37, %v2419_v34  ;;  %v2425_v39 = vadd.f32 %v2415_v17, %v2413_v30  ;;  %v2452_v59 = vsub.f32 %v2448_v22, %v2450_v60 }
 0xdcb   :  { %v2975_v25 = vpop.eup %2974  ;;  %2980 = vrcp.f32 %v2408_v10 }
 0xdcc   :  { %v2417_v36 = vmul.f32 0.3, %v2975_v25  ;;  %v2423_v16 = vmul.f32 0.25, %v2975_v25 }
 0xdce   :  { %v2427_v62 = vadd.f32 %v2425_v39, %v2417_v36  ;;  %v2433_v51 = vadd.f32 %v2431_v44, %v2423_v16  ;;  %v2977_v18 = vpop.eup %2976 }
 0xdcf   :  { %v2418_v41 = vmul.f32 0.25, %v2977_v18  ;;  %v2412_v31 = vmul.f32 0.1, %v2977_v18 }
 0xdd0   :  { %2982 = vrcp.f32 %v2427_v62  ;;  %v2462_v62 = vmul.f32 5.0, %v4670_v0 }
 0xdd1   :  { %2984 = vrcp.f32 %v2433_v51 }
 0xdd2   :  { %v2979_v33 = vpop.eup %2978 }
 0xdd3   :  { %v2414_v14 = vmul.f32 0.6, %v2979_v33  ;;  %v2420_v45 = vmul.f32 0.5, %v2979_v33 }
 0xdd5   :  { %v2981_v23 = vpop.eup %2980  ;;  %v2430_v40 = vadd.f32 %v2420_v45, %v2418_v41  ;;  %v2424_v49 = vadd.f32 %v2414_v14, %v2412_v31 }
 0xdd6   :  { %v2416_v63 = vmul.f32 0.3, %v2981_v23  ;;  %v2422_v13 = vmul.f32 0.25, %v2981_v23 }
 0xdd8   :  { %v2426_v29 = vadd.f32 %v2424_v49, %v2416_v63  ;;  %v2432_v1 = vadd.f32 %v2430_v40, %v2422_v13 }
 0xdda   :  { %v2983_v28 = vpop.eup %2982  ;;  %2986 = vrcp.f32 %v2426_v29 }
 0xddb   :  { %v2985_v35 = vpop.eup %2984  ;;  %v2441_v54 = vmul.f32 %v2983_v28, %v2417_v36  ;;  %2988 = vrcp.f32 %v2432_v1  ;;  %v2437_v52 = vmul.f32 %v2983_v28, %v2413_v30  ;;  %v2439_v44 = vmul.f32 %v2983_v28, %v2415_v17 }
 0xddc   :  { %v2447_v10 = vmul.f32 %v2985_v35, %v2423_v16  ;;  %v2443_v25 = vmul.f32 %v2985_v35, %v2419_v34  ;;  %v2445_v39 = vmul.f32 %v2985_v35, %v2421_v37  ;;  %v2464_v30 = vadd.f32 %v2462_v62, %v2460_v5 }
 0xddd   :  { %v2479_v9 = vmul.f32 %v2459_v57, %v2437_v52  ;;  %v2481_v51 = vmul.f32 %v2469_v46, %v2439_v44  ;;  %v2485_v18 = vmul.f32 %v2477_v15, %v2441_v54  ;;  %v2472_v17 = vadd.f32 %v2470_v56, %v4743_v42 }
 0xdde   :  { %v2503_v55 = vmul.f32 %v2447_v10, %v4725_v21  ;;  %v2497_v2 = vmul.f32 %v2443_v25, %v4695_v19  ;;  %v2499_v36 = vmul.f32 %v2445_v39, %v4710_v7  ;;  %v2456_v34 = vadd.f32 %v2454_v58, %v2452_v59 }
 0xddf   :  { %v2483_v16 = vadd.f32 %v2481_v51, %v2479_v9  ;;  %v2466_v53 = vadd.f32 %v2464_v30, %v4746_v3  ;;  %v2474_v33 = vsub.f32 %v2472_v17, %v4753_v12  ;;  %v2515_v28 = vmul.f32 0.1, %v4656_v27 }
 0xde0   :  { %v2501_v37 = vadd.f32 %v2499_v36, %v2497_v2  ;;  %v2458_v38 = vmul.f32 0.16666667, %v2456_v34  ;;  %v2514_v25 = vmul.f32 0.1, %v4670_v0 }
 0xde1   :  { %v2487_v6 = vadd.f32 %v2485_v18, %v2483_v16  ;;  %v2468_v7 = vmul.f32 0.16666667, %v2466_v53  ;;  %v2476_v40 = vmul.f32 0.16666667, %v2474_v33 }
 0xde2   :  { %v2505_v47 = vadd.f32 %v2503_v55, %v2501_v37 }
 0xde3   :  { %2490 = vrot.lane.b32.xlu1 %v2487_v6, %s3109_s21 }
 0xde4   :  { %v2987_v21 = vpop.eup %2986 }
 0xde5   :  { %v2989_v19 = vpop.eup %2988  ;;  %v2440_v32 = vmul.f32 %v2987_v21, %v2416_v63  ;;  %v2436_v4 = vmul.f32 %v2987_v21, %v2412_v31  ;;  %v2438_v23 = vmul.f32 %v2987_v21, %v2414_v14  ;;  %v2507_v31 = vmul.f32 113.77778, %v2505_v47 }
 0xde6   :  { %v2446_v61 = vmul.f32 %v2989_v19, %v2422_v13  ;;  %v2442_v42 = vmul.f32 %v2989_v19, %v2418_v41  ;;  %v2444_v26 = vmul.f32 %v2989_v19, %v2420_v45 }
 0xde7   :  { %v2478_v11 = vmul.f32 %v2458_v38, %v2436_v4  ;;  %v2480_v49 = vmul.f32 %v2468_v7, %v2438_v23  ;;  %v2484_v29 = vmul.f32 %v2476_v40, %v2440_v32  ;;  %v2509_v13 = vmul.f32 0.045, %v2507_v31 }
 0xde8   :  { %v2502_v3 = vmul.f32 %v2446_v61, %v4759_v43  ;;  %v2496_v22 = vmul.f32 %v2442_v42, %v4734_v24  ;;  %v2498_v12 = vmul.f32 %v2444_v26, %v4756_v20 }
 0xde9   :  { %v2482_v1 = vadd.f32 %v2480_v49, %v2478_v11 }
 0xdea   :  { %v2500_v5 = vadd.f32 %v2498_v12, %v2496_v22 }
 0xdeb   :  { %v2486_v57 = vadd.f32 %v2484_v29, %v2482_v1 }
 0xdec   :  { %v2504_v63 = vadd.f32 %v2502_v3, %v2500_v5 }
 0xded   :  { %2488 = vrot.lane.b32.xlu0 %v2486_v57, %s3109_s21 }
 0xdee   :  { %v2506_v20 = vmul.f32 113.77778, %v2504_v63 }
 0xdf0   :  { %v2508_v44 = vmul.f32 0.045, %v2506_v20 }
 0xe55   :  { %v2491_v14 = vpop.permute.xlu1 %2490 }
 0xe56   :  { %v2493_v41 = vsub.f32 %v2487_v6, %v2491_v14 }
 0xe58   :  { %v2495_v45 = vmul.f32 10.666667, %v2493_v41 }
 0xe5a   :  { %v2511_v8 = vmul.f32 0.055, %v2495_v45 }
 0xe5c   :  { %v2513_v43 = vadd.f32 %v2511_v8, %v2509_v13 }
 0xe5e   :  { %v2517_v60 = vsub.f32 %v2513_v43, %v2515_v28 }
 0xe5f   :  { %v2489_v24 = vpop.permute.xlu0 %2488 }
 0xe60   :  { %v2519_v46 = vmul.f32 0.07692308, %v2517_v60  ;;  %v2492_v56 = vsub.f32 %v2486_v57, %v2489_v24 }
 0xe62   :  { %v2521_v35 = vadd.f32 %v2519_v46, %v4656_v27  ;;  %v2494_v54 = vmul.f32 10.666667, %v2492_v56 }
 0xe64   :  { %v2523_v52 = vsel %vm3220_vm4, 0.0, %v2521_v35  ;;  %v2510_v59 = vmul.f32 0.055, %v2494_v54 }
 0xe65   :  { %v4798_v10 = vsel %vm3224_vm5, 0.018236492, %v2523_v52 }
 0xe66   :  { %v2512_v39 = vadd.f32 %v2510_v59, %v2508_v44  ;;  %2532 = vrot.lane.b32.xlu1 %v4798_v10, %s3109_s21  ;;  %v2557_v30 = vmul.f32 3.0, %v4798_v10  ;;  %v4834_v17 = vmul.f32 2.0, %v4798_v10 }
 0xe68   :  { %v2516_v15 = vsub.f32 %v2512_v39, %v2514_v25 }
 0xe6a   :  { %v2518_v62 = vmul.f32 0.07692308, %v2516_v15  ;;  %2528 = vrot.lane.b32.xlu1 %v4798_v10, %s3110_s22 }
 0xe6c   :  { %v2520_v27 = vadd.f32 %v2518_v62, %v4670_v0 }
 0xe6e   :  { %v2522_v9 = vsel %vm3220_vm4, 0.0, %v2520_v27  ;;  %2536 = vrot.lane.b32.xlu1 %v4798_v10, %s3111_s2 }
 0xe6f   :  { %v4812_v51 = vsel %vm3224_vm5, 0.018236492, %v2522_v9 }
 0xe70   :  { %2530 = vrot.lane.b32.xlu0 %v4812_v51, %s3109_s21  ;;  %v2556_v57 = vmul.f32 3.0, %v4812_v51  ;;  %v4883_v20 = vmul.f32 2.0, %v4812_v51 }
 0xe72   :  { %2540 = vrot.lane.b32.xlu1 %v4798_v10, %s3112_s23 }
 0xe74   :  { %2526 = vrot.lane.b32.xlu0 %v4812_v51, %s3110_s22 }
 0xe78   :  { %2534 = vrot.lane.b32.xlu0 %v4812_v51, %s3111_s2 }
 0xe7c   :  { %2538 = vrot.lane.b32.xlu0 %v4812_v51, %s3112_s23 }
 0xed8   :  { %v4824_v0 = vpop.permute.xlu1 %2532 }
 0xed9   :  { %v2543_v58 = vmul.f32 2.0, %v4824_v0  ;;  %v2553_v55 = vmul.f32 4.0, %v4824_v0  ;;  %v2569_v53 = vsub.f32 %v4824_v0, %v4834_v17 }
 0xedc   :  { %v4828_v2 = vpop.permute.xlu1 %2528 }
 0xedd   :  { %v2545_v36 = vsub.f32 %v4828_v2, %v2543_v58  ;;  %v2555_v18 = vsub.f32 %v4828_v2, %v2553_v55 }
 0xedf   :  { %v4837_v16 = vadd.f32 %v2545_v36, %v4798_v10  ;;  %v2559_v34 = vadd.f32 %v2557_v30, %v2555_v18 }
 0xee0   :  { %v4839_v37 = vpop.permute.xlu1 %2536 }
 0xee1   :  { %v2549_v6 = vmul.f32 %v4837_v16, %v4837_v16  ;;  %v2561_v47 = vmul.f32 %v2559_v34, %v2559_v34  ;;  %v2577_v33 = vsub.f32 %v4824_v0, %v4839_v37  ;;  %v4850_v38 = vmul.f32 2.0, %v4839_v37 }
 0xee2   :  { %v4847_v21 = vpop.permute.xlu0 %2530  ;;  %v2595_v19 = vmul.f32 4.0, %v4839_v37  ;;  %v4854_v32 = vadd.f32 %v2569_v53, %v4839_v37 }
 0xee3   :  { %v2551_v7 = vmul.f32 1.0833334, %v2549_v6  ;;  %v2563_v4 = vmul.f32 0.25, %v2561_v47  ;;  %v2542_v23 = vmul.f32 2.0, %v4847_v21  ;;  %v2552_v61 = vmul.f32 4.0, %v4847_v21 }
 0xee4   :  { %v2579_v42 = vmul.f32 %v2577_v33, %v2577_v33  ;;  %v2587_v40 = vsub.f32 %v4798_v10, %v4850_v38  ;;  %v4860_v11 = vpop.permute.xlu1 %2540  ;;  %v2573_v49 = vmul.f32 %v4854_v32, %v4854_v32  ;;  %v2597_v3 = vsub.f32 %v2557_v30, %v2595_v19 }
 0xee5   :  { %v2565_v26 = vadd.f32 %v2563_v4, %v2551_v7  ;;  %v2568_v39 = vsub.f32 %v4847_v21, %v4883_v20 }
 0xee6   :  { %v4864_v22 = vpop.permute.xlu0 %2526  ;;  %v2581_v12 = vmul.f32 0.25, %v2579_v42  ;;  %v2575_v63 = vmul.f32 1.0833334, %v2573_v49  ;;  %v4870_v14 = vadd.f32 %v2587_v40, %v4860_v11  ;;  %v2599_v31 = vadd.f32 %v2597_v3, %v4860_v11 }
 0xee7   :  { %v2607_v29 = vadd.f32 1e-13, %v2565_v26  ;;  %v2544_v1 = vsub.f32 %v4864_v22, %v2542_v23  ;;  %v2554_v5 = vsub.f32 %v4864_v22, %v2552_v61 }
 0xee8   :  { %v2583_v28 = vadd.f32 %v2581_v12, %v2575_v63  ;;  %v2591_v43 = vmul.f32 %v4870_v14, %v4870_v14  ;;  %v2601_v60 = vmul.f32 %v2599_v31, %v2599_v31 }
 0xee9   :  { %v4874_v41 = vadd.f32 %v2544_v1, %v4812_v51  ;;  %v2558_v45 = vadd.f32 %v2556_v57, %v2554_v5  ;;  %v2609_v13 = vmul.f32 %v2607_v29, %v2607_v29 }
 0xeea   :  { %v4876_v8 = vpop.permute.xlu0 %2534  ;;  %v2593_v35 = vmul.f32 1.0833334, %v2591_v43  ;;  %v2603_v54 = vmul.f32 0.25, %v2601_v60  ;;  %v2613_v52 = vadd.f32 1e-13, %v2583_v28 }
 0xeeb   :  { %v2548_v24 = vmul.f32 %v4874_v41, %v4874_v41  ;;  %v2560_v46 = vmul.f32 %v2558_v45, %v2558_v45  ;;  %v2576_v56 = vsub.f32 %v4847_v21, %v4876_v8  ;;  %v4888_v25 = vmul.f32 2.0, %v4876_v8 }
 0xeec   :  { %2990 = vrcp.f32 %v2609_v13  ;;  %v2605_v62 = vadd.f32 %v2603_v54, %v2593_v35  ;;  %v2615_v27 = vmul.f32 %v2613_v52, %v2613_v52  ;;  %v2594_v36 = vmul.f32 4.0, %v4876_v8 }
 0xeed   :  { %v2550_v44 = vmul.f32 1.0833334, %v2548_v24  ;;  %v2562_v59 = vmul.f32 0.25, %v2560_v46  ;;  %v2578_v15 = vmul.f32 %v2576_v56, %v2576_v56  ;;  %v2586_v55 = vsub.f32 %v4812_v51, %v4888_v25 }
 0xeee   :  { %v4892_v9 = vpop.permute.xlu0 %2538  ;;  %2992 = vrcp.f32 %v2615_v27  ;;  %v2619_v18 = vadd.f32 1e-13, %v2605_v62  ;;  %v4898_v30 = vadd.f32 %v2568_v39, %v4876_v8  ;;  %v2596_v53 = vsub.f32 %v2556_v57, %v2594_v36 }
 0xeef   :  { %v2564_v58 = vadd.f32 %v2562_v59, %v2550_v44  ;;  %v4901_v34 = vadd.f32 %v2586_v55, %v4892_v9  ;;  %v2580_v47 = vmul.f32 0.25, %v2578_v15  ;;  %v2661_v35 = vmul.f32 2.0, %v4828_v2 }
 0xef0   :  { %v2621_v33 = vmul.f32 %v2619_v18, %v2619_v18  ;;  %v2572_v19 = vmul.f32 %v4898_v30, %v4898_v30  ;;  %v2598_v4 = vadd.f32 %v2596_v53, %v4892_v9  ;;  %v2673_v44 = vsub.f32 0.0, %v4824_v0 }
 0xef1   :  { %v2606_v6 = vadd.f32 1e-13, %v2564_v58  ;;  %v2590_v7 = vmul.f32 %v4901_v34, %v4901_v34  ;;  %v2663_v59 = vmul.f32 7.0, %v4824_v0  ;;  %v2683_v15 = vmul.f32 5.0, %v4839_v37 }
 0xef2   :  { %2994 = vrcp.f32 %v2621_v33  ;;  %v2574_v23 = vmul.f32 1.0833334, %v2572_v19  ;;  %v2600_v42 = vmul.f32 %v2598_v4, %v2598_v4  ;;  %v2675_v27 = vmul.f32 5.0, %v4798_v10 }
 0xef3   :  { %v2592_v61 = vmul.f32 1.0833334, %v2590_v7  ;;  %v2608_v26 = vmul.f32 %v2606_v6, %v2606_v6  ;;  %v2665_v62 = vsub.f32 %v2661_v35, %v2663_v59  ;;  %v2667_v55 = vmul.f32 11.0, %v4798_v10 }
 0xef4   :  { %v2582_v40 = vadd.f32 %v2580_v47, %v2574_v23  ;;  %v2602_v49 = vmul.f32 0.25, %v2600_v42  ;;  %v2677_v36 = vadd.f32 %v2675_v27, %v2673_v44  ;;  %v2685_v6 = vadd.f32 %v2683_v15, %v4834_v17 }
 0xef5   :  { %2996 = vrcp.f32 %v2608_v26  ;;  %v2669_v0 = vadd.f32 %v2667_v55, %v2665_v62  ;;  %v2660_v42 = vmul.f32 2.0, %v4864_v22  ;;  %v2662_v17 = vmul.f32 7.0, %v4847_v21 }
 0xef6   :  { %v2991_v3 = vpop.eup %2990  ;;  %v2612_v12 = vadd.f32 1e-13, %v2582_v40  ;;  %v2604_v29 = vadd.f32 %v2602_v49, %v2592_v61  ;;  %v2679_v19 = vadd.f32 %v2677_v36, %v4850_v38  ;;  %v2672_v61 = vsub.f32 0.0, %v4847_v21 }
 0xef7   :  { %v2631_v63 = vmul.f32 0.25, %v2991_v3  ;;  %v2625_v13 = vmul.f32 0.1, %v2991_v3  ;;  %v2687_v26 = vsub.f32 %v2685_v6, %v4860_v11  ;;  %v2674_v21 = vmul.f32 5.0, %v4812_v51 }
 0xef8   :  { %v2993_v1 = vpop.eup %2992  ;;  %v2614_v5 = vmul.f32 %v2612_v12, %v2612_v12  ;;  %v2618_v45 = vadd.f32 1e-13, %v2604_v29  ;;  %v2671_v12 = vmul.f32 0.16666667, %v2669_v0  ;;  %v2681_v29 = vmul.f32 0.16666667, %v2679_v19 }
 0xef9   :  { %v2627_v57 = vmul.f32 0.6, %v2993_v1  ;;  %v2633_v31 = vmul.f32 0.5, %v2993_v1  ;;  %v2682_v1 = vmul.f32 5.0, %v4876_v8  ;;  %v2689_v11 = vmul.f32 0.16666667, %v2687_v26 }
 0xefa   :  { %2998 = vrcp.f32 %v2614_v5  ;;  %v2620_v43 = vmul.f32 %v2618_v45, %v2618_v45 }
 0xefb   :  { %v2643_v28 = vadd.f32 %v2633_v31, %v2631_v63  ;;  %v2637_v56 = vadd.f32 %v2627_v57, %v2625_v13 }
 0xefc   :  { %v2995_v60 = vpop.eup %2994  ;;  %3000 = vrcp.f32 %v2620_v43 }
 0xefd   :  { %v2629_v24 = vmul.f32 0.3, %v2995_v60  ;;  %v2635_v46 = vmul.f32 0.25, %v2995_v60 }
 0xeff   :  { %v2639_v54 = vadd.f32 %v2637_v56, %v2629_v24  ;;  %v2645_v52 = vadd.f32 %v2643_v28, %v2635_v46  ;;  %v2997_v39 = vpop.eup %2996  ;;  %v2664_v56 = vsub.f32 %v2660_v42, %v2662_v17 }
 0xf00   :  { %v2630_v2 = vmul.f32 0.25, %v2997_v39  ;;  %v2624_v47 = vmul.f32 0.1, %v2997_v39 }
 0xf01   :  { %3002 = vrcp.f32 %v2639_v54 }
 0xf02   :  { %3004 = vrcp.f32 %v2645_v52 }
 0xf04   :  { %v2999_v58 = vpop.eup %2998 }
 0xf05   :  { %v2626_v18 = vmul.f32 0.6, %v2999_v58  ;;  %v2632_v53 = vmul.f32 0.5, %v2999_v58 }
 0xf06   :  { %v3001_v33 = vpop.eup %3000 }
 0xf07   :  { %v2642_v7 = vadd.f32 %v2632_v53, %v2630_v2  ;;  %v2628_v37 = vmul.f32 0.3, %v3001_v33  ;;  %v2634_v4 = vmul.f32 0.25, %v3001_v33  ;;  %v2636_v23 = vadd.f32 %v2626_v18, %v2624_v47 }
 0xf09   :  { %v2638_v40 = vadd.f32 %v2636_v23, %v2628_v37  ;;  %v2644_v49 = vadd.f32 %v2642_v7, %v2634_v4 }
 0xf0b   :  { %v3003_v3 = vpop.eup %3002  ;;  %3006 = vrcp.f32 %v2638_v40 }
 0xf0c   :  { %v3005_v38 = vpop.eup %3004  ;;  %v2653_v5 = vmul.f32 %v3003_v3, %v2629_v24  ;;  %v2649_v45 = vmul.f32 %v3003_v3, %v2625_v13  ;;  %v2651_v28 = vmul.f32 %v3003_v3, %v2627_v57  ;;  %3008 = vrcp.f32 %v2644_v49 }
 0xf0d   :  { %v2659_v43 = vmul.f32 %v3005_v38, %v2635_v46  ;;  %v2655_v60 = vmul.f32 %v3005_v38, %v2631_v63  ;;  %v2657_v22 = vmul.f32 %v3005_v38, %v2633_v31  ;;  %v2666_v24 = vmul.f32 11.0, %v4812_v51 }
 0xf0e   :  { %v2691_v35 = vmul.f32 %v2671_v12, %v2649_v45  ;;  %v2693_v54 = vmul.f32 %v2681_v29, %v2651_v28  ;;  %v2697_v13 = vmul.f32 %v2689_v11, %v2653_v5  ;;  %v2676_v46 = vadd.f32 %v2674_v21, %v2672_v61 }
 0xf0f   :  { %v2715_v52 = vmul.f32 %v2659_v43, %v4870_v14  ;;  %v2709_v44 = vmul.f32 %v2655_v60, %v4837_v16  ;;  %v2711_v8 = vmul.f32 %v2657_v22, %v4854_v32  ;;  %v2684_v63 = vadd.f32 %v2682_v1, %v4883_v20 }
 0xf10   :  { %v2695_v57 = vadd.f32 %v2693_v54, %v2691_v35  ;;  %v2668_v59 = vadd.f32 %v2666_v24, %v2664_v56  ;;  %v2678_v15 = vadd.f32 %v2676_v46, %v4888_v25  ;;  %v2727_v12 = vmul.f32 0.1, %v4798_v10 }
 0xf11   :  { %v2713_v31 = vadd.f32 %v2711_v8, %v2709_v44  ;;  %v2686_v14 = vsub.f32 %v2684_v63, %v4892_v9  ;;  %v2726_v56 = vmul.f32 0.1, %v4812_v51 }
 0xf12   :  { %v2699_v39 = vadd.f32 %v2697_v13, %v2695_v57  ;;  %v2670_v27 = vmul.f32 0.16666667, %v2668_v59  ;;  %v2680_v55 = vmul.f32 0.16666667, %v2678_v15 }
 0xf13   :  { %v2717_v62 = vadd.f32 %v2715_v52, %v2713_v31  ;;  %v2688_v19 = vmul.f32 0.16666667, %v2686_v14 }
 0xf14   :  { %2702 = vrot.lane.b32.xlu1 %v2699_v39, %s3109_s21 }
 0xf15   :  { %v3007_v16 = vpop.eup %3006 }
 0xf16   :  { %v3009_v32 = vpop.eup %3008  ;;  %v2652_v58 = vmul.f32 %v3007_v16, %v2628_v37  ;;  %v2648_v36 = vmul.f32 %v3007_v16, %v2624_v47  ;;  %v2650_v6 = vmul.f32 %v3007_v16, %v2626_v18  ;;  %v2719_v47 = vmul.f32 113.77778, %v2717_v62 }
 0xf17   :  { %v2658_v33 = vmul.f32 %v3009_v32, %v2634_v4  ;;  %v2654_v0 = vmul.f32 %v3009_v32, %v2630_v2  ;;  %v2656_v20 = vmul.f32 %v3009_v32, %v2632_v53 }
 0xf18   :  { %v2690_v7 = vmul.f32 %v2670_v27, %v2648_v36  ;;  %v2692_v23 = vmul.f32 %v2680_v55, %v2650_v6  ;;  %v2696_v9 = vmul.f32 %v2688_v19, %v2652_v58  ;;  %v2721_v4 = vmul.f32 0.045, %v2719_v47 }
 0xf19   :  { %v2714_v25 = vmul.f32 %v2658_v33, %v4901_v34  ;;  %v2708_v61 = vmul.f32 %v2654_v0, %v4874_v41  ;;  %v2710_v42 = vmul.f32 %v2656_v20, %v4898_v30 }
 0xf1a   :  { %v2694_v26 = vadd.f32 %v2692_v23, %v2690_v7 }
 0xf1b   :  { %v2712_v40 = vadd.f32 %v2710_v42, %v2708_v61 }
 0xf1c   :  { %v2698_v49 = vadd.f32 %v2696_v9, %v2694_v26 }
 0xf1d   :  { %v2716_v37 = vadd.f32 %v2714_v25, %v2712_v40 }
 0xf1e   :  { %2700 = vrot.lane.b32.xlu0 %v2698_v49, %s3109_s21 }
 0xf1f   :  { %v2718_v30 = vmul.f32 113.77778, %v2716_v37 }
 0xf21   :  { %v2720_v28 = vmul.f32 0.045, %v2718_v30 }
 0xf86   :  { %v2703_v18 = vpop.permute.xlu1 %2702 }
 0xf87   :  { %v2705_v2 = vsub.f32 %v2699_v39, %v2703_v18 }
 0xf89   :  { %v2707_v53 = vmul.f32 10.666667, %v2705_v2 }
 0xf8b   :  { %v2723_v3 = vmul.f32 0.055, %v2707_v53 }
 0xf8d   :  { %v2725_v34 = vadd.f32 %v2723_v3, %v2721_v4 }
 0xf8f   :  { %v2729_v17 = vsub.f32 %v2725_v34, %v2727_v12 }
 0xf90   :  { %v2701_v29 = vpop.permute.xlu0 %2700 }
 0xf91   :  { %v2731_v41 = vmul.f32 0.07692308, %v2729_v17  ;;  %v2704_v1 = vsub.f32 %v2698_v49, %v2701_v29 }
 0xf93   :  { %v2733_v38 = vadd.f32 %v2731_v41, %v4798_v10  ;;  %v2706_v5 = vmul.f32 10.666667, %v2704_v1 }
 0xf95   :  { %v2735_v45 = vsel %vm3220_vm4, 0.0, %v2733_v38  ;;  %v2722_v43 = vmul.f32 0.055, %v2706_v5 }
 0xf96   :  { %v2737_v60 = vsel %vm3224_vm5, 0.018096749, %v2735_v45 }
 0xf97   :  { %v2739_v22 = vmul.f32 50.0, %v2737_v60  ;;  %v2724_v11 = vadd.f32 %v2722_v43, %v2720_v28 }
 0xf99   :  { %2741 = vst [vmem:[#allocation8 + $0x8] sm:$0xff] %v2739_v22  ;;  %v2728_v35 = vsub.f32 %v2724_v11, %v2726_v56 }
 0xf9b   :  { %v2730_v54 = vmul.f32 0.07692308, %v2728_v35 }
 0xf9d   :  { %v2732_v52 = vadd.f32 %v2730_v54, %v4812_v51 }
 0xf9f   :  { %v2734_v10 = vsel %vm3220_vm4, 0.0, %v2732_v52 }
 0xfa0   :  { %v2736_v21 = vsel %vm3224_vm5, 0.018096749, %v2734_v10 }
 0xfa1   :  { %v2738_v44 = vmul.f32 50.0, %v2736_v21 }
 0xfa3   :  { %2740 = vst [vmem:[#allocation8] sm:$0xff] %v2738_v44 }
 0xfa4   :  { %3087 = shalt.err (!%p3084_p0)
}
 0xfa5   :  { %s3088_s4 = scalar_lea.hbm %s4964_s3, 256 }
 0xfa6   :  { %p3089_p1 = scmp.ne.s32.totalorder %s4964_s3, %s3088_s4  ;;  %p3092_p2 = scmp.lt.u32.totalorder %s3088_s4, %s4964_s3 }
 0xfa8   :  { %p3094_p3 = pnand %p3092_p2, %p3089_p1 }
 0xfaa   :  { %3097 = shalt.err (!%p3094_p3)
}
 0xfab   :  { %2753 = dma.vmem_to_hbm [thread:$0]  %s2748_s27, 256, %s4964_s3, [#allocation4], %s3106_s24, %s3106_s24, %s3107_s25  }
 0xfac   :  { %3102 = dma.done.wait [#allocation4], 256  }
 0xfad   :  { %3103 = vsyncadd [#allocation4], 4294967040 }
 0xfae   :  { %2757 = vsyncpa [#allocation3], 1 }
 0xfaf   :  { %2758 = vsyncpa [#allocation6], 1 }
 0xfb0   :  { %2759 = vsyncpa [#allocation4], 1 }

</bundles_post_ra>
